<compile_context>
chip_gen: v7x
topology: tpu7x:2x2x1
jax: 0.10.0
libtpu: 0.0.40
codegen_flags: <defaults>
</compile_context>

<pallas_src>
import functools

import jax
import jax.numpy as jnp
from jax.experimental import pallas as pl
from jax.experimental.pallas import tpu as pltpu

BN_EPS = 1e-5
LRELU_SLOPE = 0.2
COMPUTE_DTYPE = jnp.bfloat16          # MXU operand dtype (f32 accumulation)
VMEM_LIMIT = 32 * 1024 * 1024         # safe on v5e / v6e / v7x
FUSED_BN_Y_BUDGET = 24 * 1024 * 1024  # resident Y (f32) + output (bf16) budget


# ---------------------------------------------------------------------------
# Kernels
# ---------------------------------------------------------------------------
def _accumulate_taps(p_ref, w_ref, ho, wo):
    """Sum of 4 height-tap matmuls: (Ho*Wo, 4*Cin) @ (4*Cin, Cout) in f32."""
    m = ho * wo
    row0 = (ho + 1) * wo                      # rows per height phase
    acc = None
    for i in range(4):                        # static unroll over height taps
        r, a = i % 2, i // 2
        s = r * row0 + a * wo                 # static start of this tap's rows
        op = p_ref[0, s:s + m, :]             # (m, 4*Cin) bf16, contiguous slice
        d = jnp.dot(op, w_ref[i], preferred_element_type=jnp.float32)
        acc = d if acc is None else acc + d
    return acc                                # (m, Cout) f32


def _conv_lrelu_kernel(p_ref, w_ref, o_ref, *, ho, wo):
    """conv (4x4/s2/p1) + LeakyReLU; one image per grid step, unpadded Cout."""
    acc = _accumulate_taps(p_ref, w_ref, ho, wo)
    o_ref[...] = jnp.maximum(acc, LRELU_SLOPE * acc).astype(o_ref.dtype)


def _conv_bn_lrelu_kernel(p_ref, w_ref, g_ref, b_ref, o_ref, y_ref, *,
                          ho, wo, inv_rows):
    """Fused conv + BatchNorm(batch stats) + LeakyReLU.

    Y stays resident in a f32 VMEM scratch across the batch grid axis; the
    fully-resident output block is written once at the last step, so Y never
    round-trips through HBM.
    """
    n = pl.program_id(0)
    m = ho * wo
    acc = _accumulate_taps(p_ref, w_ref, ho, wo)
    start = pl.multiple_of(n * m, m)
    y_ref[pl.ds(start, m), :] = acc            # f32, stays in VMEM

    @pl.when(n == pl.num_programs(0) - 1)
    def _():
        y = y_ref[...]                                            # (N*m, Cout)
        mean = jnp.sum(y, axis=0, keepdims=True) * inv_rows
        d0 = y - mean                                             # two-pass var
        var = jnp.sum(d0 * d0, axis=0, keepdims=True) * inv_rows  # biased (torch train BN)
        scale = g_ref[...] * jax.lax.rsqrt(var + BN_EPS)
        yn = d0 * scale + b_ref[...]
        o_ref[...] = jnp.maximum(yn, LRELU_SLOPE * yn).astype(o_ref.dtype)


def _matmul_sigmoid_kernel(p_ref, w_ref, o_ref):
    """conv5 (4x4/s1/p0 on a 4x4 map) == matmul, then sigmoid."""
    y = jnp.dot(p_ref[...], w_ref[...], preferred_element_type=jnp.float32)
    s = pl.reciprocal(1.0 + jnp.exp(-y), approx=True)    # EUP reciprocal
    o_ref[...] = jnp.clip(s, 0.0, 1.0).astype(o_ref.dtype)


# ---------------------------------------------------------------------------
# Wrapper-side layout helpers (cheap XLA permutations / small gathers)
# ---------------------------------------------------------------------------
def _phase_split_width_patches(x, ho, wo):
    """NHWC (N,H,W,C) -> (N, 2*(Ho+1)*Wo, 4*C) for a 4x4 / stride-2 / pad-1 conv.

    Row index  r*(Ho+1)*Wo + (y + a)*Wo + x0  holds input element
    x_padded[2y+i, 2x0+j] with i = 2a + r; column index = j*C + c.
    Only the width taps are materialized (~2x input), height taps are
    resolved in-kernel via overlapping row slices of the two phases.
    """
    n, h, w, c = x.shape
    xp = jnp.pad(x, ((0, 0), (1, 1), (1, 1), (0, 0)))
    # width taps: wp[n, hrow, x0, j, c] = xp[n, hrow, 2*x0 + j, c]
    wp = jnp.stack([xp[:, :, j:j + 2 * wo:2, :] for j in range(4)], axis=3)
    wp = wp.reshape(n, 2 * (ho + 1), wo, 4 * c)
    # height phase split: hrow -> (phase r = hrow % 2, phase-row = hrow // 2)
    wp = wp.reshape(n, ho + 1, 2, wo, 4 * c).transpose(0, 2, 1, 3, 4)
    return wp.reshape(n, 2 * (ho + 1) * wo, 4 * c)


def _w_to_tap_mats(w):
    """torch (Cout, Cin, 4, 4) -> (4, 4*Cin, Cout); index [i] is height tap i,
    row index j*Cin + c matches the patch column order above."""
    cout, cin, kh, kw = w.shape
    return jnp.transpose(w, (2, 3, 1, 0)).reshape(kh, kw * cin, cout)


# ---------------------------------------------------------------------------
# Layer wrappers (pallas_call)
# ---------------------------------------------------------------------------
def _conv_lrelu(x, w):
    n, h, wdt, _ = x.shape
    cout = w.shape[0]
    ho, wo = h // 2, wdt // 2
    m = ho * wo
    p = _phase_split_width_patches(x, ho, wo).astype(COMPUTE_DTYPE)
    wm = _w_to_tap_mats(w).astype(COMPUTE_DTYPE)
    out = pl.pallas_call(
        functools.partial(_conv_lrelu_kernel, ho=ho, wo=wo),
        out_shape=jax.ShapeDtypeStruct((n * m, cout), COMPUTE_DTYPE),
        grid=(n,),
        in_specs=[
            pl.BlockSpec((1, p.shape[1], p.shape[2]), lambda i: (i, 0, 0)),
            pl.BlockSpec(wm.shape, lambda i: (0, 0, 0)),        # weights resident
        ],
        out_specs=pl.BlockSpec((m, cout), lambda i: (i, 0)),    # unpadded Cout
        compiler_params=pltpu.CompilerParams(
            dimension_semantics=("parallel",),
            vmem_limit_bytes=VMEM_LIMIT,
        ),
    )(p, wm)
    return out.reshape(n, ho, wo, cout)


def _conv_bn_lrelu(x, w, gamma, beta):
    n, h, wdt, _ = x.shape
    cout = w.shape[0]
    ho, wo = h // 2, wdt // 2
    m = ho * wo
    rows = n * m
    # Gate the fully fused (VMEM-resident Y) variant on size.
    # TODO(synk): tiled two-pass (bf16 Y) fallback for very large N*H*W.
    assert rows * cout * 6 <= FUSED_BN_Y_BUDGET, "fused BN exceeds VMEM budget"

    p = _phase_split_width_patches(x, ho, wo).astype(COMPUTE_DTYPE)
    wm = _w_to_tap_mats(w).astype(COMPUTE_DTYPE)
    g = gamma.astype(jnp.float32).reshape(1, cout)
    b = beta.astype(jnp.float32).reshape(1, cout)

    out = pl.pallas_call(
        functools.partial(_conv_bn_lrelu_kernel, ho=ho, wo=wo, inv_rows=1.0 / rows),
        out_shape=jax.ShapeDtypeStruct((rows, cout), COMPUTE_DTYPE),
        grid=(n,),
        in_specs=[
            pl.BlockSpec((1, p.shape[1], p.shape[2]), lambda i: (i, 0, 0)),
            pl.BlockSpec(wm.shape, lambda i: (0, 0, 0)),
            pl.BlockSpec((1, cout), lambda i: (0, 0)),
            pl.BlockSpec((1, cout), lambda i: (0, 0)),
        ],
        # Full output resident across the batch axis; written only at the
        # last step (normalized) -> no Y HBM round trip.
        out_specs=pl.BlockSpec((rows, cout), lambda i: (0, 0)),
        scratch_shapes=[pltpu.VMEM((rows, cout), jnp.float32)],
        compiler_params=pltpu.CompilerParams(
            # TODO(synk): per-core partial stats to use both v7x TensorCores.
            dimension_semantics=("arbitrary",),
            vmem_limit_bytes=VMEM_LIMIT,
        ),
    )(p, wm, g, b)
    return out.reshape(n, ho, wo, cout)


def _conv_valid_sigmoid(x, w):
    """conv5: kernel 4, stride 1, pad 0 on a 4x4 map -> one matmul per image."""
    n, h, wdt, cin = x.shape
    cout = w.shape[0]
    p = x.reshape(n, h * wdt * cin).astype(COMPUTE_DTYPE)            # (h,w,c) order
    wm = jnp.transpose(w, (2, 3, 1, 0)).reshape(h * wdt * cin, cout).astype(COMPUTE_DTYPE)
    return pl.pallas_call(
        _matmul_sigmoid_kernel,
        out_shape=jax.ShapeDtypeStruct((n, cout), jnp.float32),
        grid=(1,),
        in_specs=[
            pl.BlockSpec(p.shape, lambda i: (0, 0)),
            pl.BlockSpec(wm.shape, lambda i: (0, 0)),
        ],
        out_specs=pl.BlockSpec((n, cout), lambda i: (0, 0)),
        compiler_params=pltpu.CompilerParams(
            dimension_semantics=("arbitrary",),
            vmem_limit_bytes=VMEM_LIMIT,
        ),
    )(p, wm)


# ---------------------------------------------------------------------------
# Discriminator forward
# ---------------------------------------------------------------------------
def discriminator_forward(x_nchw, params):
    """x_nchw: (N, Cin, H, W) float32. Returns (N, output_dim, 1, 1) float32."""
    x = jnp.transpose(x_nchw, (0, 2, 3, 1)).astype(COMPUTE_DTYPE)   # NHWC bf16
    x = _conv_lrelu(x, params["w1"])
    for li in (2, 3, 4):
        x = _conv_bn_lrelu(x, params[f"w{li}"],
                           params[f"gamma{li}"], params[f"beta{li}"])
    y = _conv_valid_sigmoid(x, params["w5"])                        # (N, out)
    return y.reshape(y.shape[0], y.shape[1], 1, 1)                  # (N, out, 1, 1)


def init_params(key, input_dim, output_dim, num_filters, std=0.02):
    ks = jax.random.split(key, 5)
    chans = [input_dim] + list(num_filters)
    params = {}
    for i in range(4):
        params[f"w{i+1}"] = (
            jax.random.normal(ks[i], (chans[i + 1], chans[i], 4, 4), jnp.float32) * std
        )
    params["w5"] = (
        jax.random.normal(ks[4], (output_dim, num_filters[3], 4, 4), jnp.float32) * std
    )
    for li, c in zip((2, 3, 4), num_filters[1:4]):
        params[f"gamma{li}"] = jnp.ones((c,), jnp.float32)
        params[f"beta{li}"] = jnp.zeros((c,), jnp.float32)
    return params


if __name__ == "__main__":
    key = jax.random.PRNGKey(0)
    k_in, k_par = jax.random.split(key)

    batch = 2
    input_dim = 3
    output_dim = 1
    num_filters = [8, 16, 32, 64]
    spatial = 64  # 64 -> 32 -> 16 -> 8 -> 4 -> 1 (required by the 4x4/s1/p0 final conv)

    x = jax.random.normal(k_in, (batch, input_dim, spatial, spatial), jnp.float32)
    params = init_params(k_par, input_dim, output_dim, num_filters)

    fwd = jax.jit(discriminator_forward)
    out = fwd(x, params)
    out = jax.block_until_ready(out)

    assert out.shape == (batch, output_dim, 1, 1), out.shape
    assert bool(jnp.all(jnp.isfinite(out)))
    assert bool(jnp.all((out >= 0.0) & (out <= 1.0)))
    print("KERNEL_OK")
</pallas_src>

<mosaic_0001>
module attributes {stable_mosaic.version = 11 : i64} {
  func.func @_conv_lrelu_kernel(%arg0: i32, %arg1: memref<1x2112x12xbf16, #tpu.memory_space<vmem>>, %arg2: memref<4x12x8xbf16, #tpu.memory_space<vmem>>, %arg3: memref<1024x8xbf16, #tpu.memory_space<vmem>>) attributes {dimension_semantics = [#tpu.dimension_semantics<parallel>], iteration_bounds = array<i64: 2>, scalar_prefetch = 0 : i64, scratch_operands = 0 : i64, tpu.core_type = #tpu.core_type<tc>, window_params = [{transform_indices = @transform_0, window_bounds = array<i64: 1, 2112, 12>}, {pipeline_mode = #tpu.pipeline_mode<synchronous>, transform_indices = @transform_1, window_bounds = array<i64: 4, 12, 8>}, {transform_indices = @transform_2, window_bounds = array<i64: 1024, 8>}]} {
    %c0 = arith.constant 0 : index
    %c0_0 = arith.constant 0 : index
    %c0_1 = arith.constant 0 : index
    %0 = vector.load %arg1[%c0, %c0_0, %c0_1] : memref<1x2112x12xbf16, #tpu.memory_space<vmem>>, vector<1x1024x12xbf16>
    %1 = vector.shape_cast %0 : vector<1x1024x12xbf16> to vector<1024x12xbf16>
    %c0_2 = arith.constant 0 : index
    %c0_3 = arith.constant 0 : index
    %c0_4 = arith.constant 0 : index
    %2 = vector.load %arg2[%c0_2, %c0_3, %c0_4] : memref<4x12x8xbf16, #tpu.memory_space<vmem>>, vector<1x12x8xbf16>
    %3 = vector.shape_cast %2 : vector<1x12x8xbf16> to vector<12x8xbf16>
    %cst = arith.constant dense<0.000000e+00> : vector<1024x8xf32>
    %4 = tpu.matmul %1, %3, %cst {dimension_numbers = #tpu.dot_dimension_numbers<[1], [0], [0], [1], [0, 0, 1, 1], [], []>} : vector<1024x12xbf16>, vector<12x8xbf16>, vector<1024x8xf32> -> vector<1024x8xf32>
    %c0_5 = arith.constant 0 : index
    %c1056 = arith.constant 1056 : index
    %c0_6 = arith.constant 0 : index
    %5 = vector.load %arg1[%c0_5, %c1056, %c0_6] : memref<1x2112x12xbf16, #tpu.memory_space<vmem>>, vector<1x1024x12xbf16>
    %6 = vector.shape_cast %5 : vector<1x1024x12xbf16> to vector<1024x12xbf16>
    %c1 = arith.constant 1 : index
    %c0_7 = arith.constant 0 : index
    %c0_8 = arith.constant 0 : index
    %7 = vector.load %arg2[%c1, %c0_7, %c0_8] : memref<4x12x8xbf16, #tpu.memory_space<vmem>>, vector<1x12x8xbf16>
    %8 = vector.shape_cast %7 : vector<1x12x8xbf16> to vector<12x8xbf16>
    %cst_9 = arith.constant dense<0.000000e+00> : vector<1024x8xf32>
    %9 = tpu.matmul %6, %8, %cst_9 {dimension_numbers = #tpu.dot_dimension_numbers<[1], [0], [0], [1], [0, 0, 1, 1], [], []>} : vector<1024x12xbf16>, vector<12x8xbf16>, vector<1024x8xf32> -> vector<1024x8xf32>
    %10 = arith.addf %4, %9 : vector<1024x8xf32>
    %c0_10 = arith.constant 0 : index
    %c32 = arith.constant 32 : index
    %c0_11 = arith.constant 0 : index
    %11 = vector.load %arg1[%c0_10, %c32, %c0_11] : memref<1x2112x12xbf16, #tpu.memory_space<vmem>>, vector<1x1024x12xbf16>
    %12 = vector.shape_cast %11 : vector<1x1024x12xbf16> to vector<1024x12xbf16>
    %c2 = arith.constant 2 : index
    %c0_12 = arith.constant 0 : index
    %c0_13 = arith.constant 0 : index
    %13 = vector.load %arg2[%c2, %c0_12, %c0_13] : memref<4x12x8xbf16, #tpu.memory_space<vmem>>, vector<1x12x8xbf16>
    %14 = vector.shape_cast %13 : vector<1x12x8xbf16> to vector<12x8xbf16>
    %cst_14 = arith.constant dense<0.000000e+00> : vector<1024x8xf32>
    %15 = tpu.matmul %12, %14, %cst_14 {dimension_numbers = #tpu.dot_dimension_numbers<[1], [0], [0], [1], [0, 0, 1, 1], [], []>} : vector<1024x12xbf16>, vector<12x8xbf16>, vector<1024x8xf32> -> vector<1024x8xf32>
    %16 = arith.addf %10, %15 : vector<1024x8xf32>
    %c0_15 = arith.constant 0 : index
    %c1088 = arith.constant 1088 : index
    %c0_16 = arith.constant 0 : index
    %17 = vector.load %arg1[%c0_15, %c1088, %c0_16] : memref<1x2112x12xbf16, #tpu.memory_space<vmem>>, vector<1x1024x12xbf16>
    %18 = vector.shape_cast %17 : vector<1x1024x12xbf16> to vector<1024x12xbf16>
    %c3 = arith.constant 3 : index
    %c0_17 = arith.constant 0 : index
    %c0_18 = arith.constant 0 : index
    %19 = vector.load %arg2[%c3, %c0_17, %c0_18] : memref<4x12x8xbf16, #tpu.memory_space<vmem>>, vector<1x12x8xbf16>
    %20 = vector.shape_cast %19 : vector<1x12x8xbf16> to vector<12x8xbf16>
    %cst_19 = arith.constant dense<0.000000e+00> : vector<1024x8xf32>
    %21 = tpu.matmul %18, %20, %cst_19 {dimension_numbers = #tpu.dot_dimension_numbers<[1], [0], [0], [1], [0, 0, 1, 1], [], []>} : vector<1024x12xbf16>, vector<12x8xbf16>, vector<1024x8xf32> -> vector<1024x8xf32>
    %22 = arith.addf %16, %21 : vector<1024x8xf32>
    %cst_20 = arith.constant 2.000000e-01 : f32
    %23 = vector.broadcast %cst_20 : f32 to vector<1024x8xf32>
    %24 = arith.mulf %23, %22 : vector<1024x8xf32>
    %25 = arith.maximumf %22, %24 : vector<1024x8xf32>
    %26 = arith.truncf %25 : vector<1024x8xf32> to vector<1024x8xbf16>
    %c0_21 = arith.constant 0 : index
    %c0_22 = arith.constant 0 : index
    %27 = vector.load %arg3[%c0_21, %c0_22] : memref<1024x8xbf16, #tpu.memory_space<vmem>>, vector<1024x8xbf16>
    tpu.vector_store %arg3[%c0_21, %c0_22], %26 {strides = array<i32>} : memref<1024x8xbf16, #tpu.memory_space<vmem>>, vector<1024x8xbf16>,
    return
  }
  func.func @transform_0(%arg0: i32) -> (i32, i32, i32) {
    %c0_i32 = arith.constant 0 : i32
    %c0_i32_0 = arith.constant 0 : i32
    %c0_i32_1 = arith.constant 0 : i32
    return %arg0, %c0_i32, %c0_i32_0 : i32, i32, i32
  }
  func.func @transform_1(%arg0: i32) -> (i32, i32, i32) {
    %c0_i32 = arith.constant 0 : i32
    %c0_i32_0 = arith.constant 0 : i32
    %c0_i32_1 = arith.constant 0 : i32
    %c0_i32_2 = arith.constant 0 : i32
    return %c0_i32, %c0_i32_0, %c0_i32_1 : i32, i32, i32
  }
  func.func @transform_2(%arg0: i32) -> (i32, i32) {
    %c0_i32 = arith.constant 0 : i32
    %c0_i32_0 = arith.constant 0 : i32
    return %arg0, %c0_i32 : i32, i32
  }
}

module attributes {stable_mosaic.version = 11 : i64} {
  func.func @_conv_bn_lrelu_kernel(%arg0: i32, %arg1: memref<1x544x32xbf16, #tpu.memory_space<vmem>>, %arg2: memref<4x32x16xbf16, #tpu.memory_space<vmem>>, %arg3: memref<1x16xf32, #tpu.memory_space<vmem>>, %arg4: memref<1x16xf32, #tpu.memory_space<vmem>>, %arg5: memref<512x16xbf16, #tpu.memory_space<vmem>>, %arg6: memref<512x16xf32, #tpu.memory_space<vmem>>) attributes {dimension_semantics = [#tpu.dimension_semantics<arbitrary>], iteration_bounds = array<i64: 2>, scalar_prefetch = 0 : i64, scratch_operands = 1 : i64, tpu.core_type = #tpu.core_type<tc>, window_params = [{transform_indices = @transform_0, window_bounds = array<i64: 1, 544, 32>}, {pipeline_mode = #tpu.pipeline_mode<synchronous>, transform_indices = @transform_1, window_bounds = array<i64: 4, 32, 16>}, {pipeline_mode = #tpu.pipeline_mode<synchronous>, transform_indices = @transform_2, window_bounds = array<i64: 1, 16>}, {pipeline_mode = #tpu.pipeline_mode<synchronous>, transform_indices = @transform_3, window_bounds = array<i64: 1, 16>}, {pipeline_mode = #tpu.pipeline_mode<synchronous>, transform_indices = @transform_4, window_bounds = array<i64: 512, 16>}]} {
    %c0 = arith.constant 0 : index
    %c0_0 = arith.constant 0 : index
    %c0_1 = arith.constant 0 : index
    %0 = vector.load %arg1[%c0, %c0_0, %c0_1] : memref<1x544x32xbf16, #tpu.memory_space<vmem>>, vector<1x256x32xbf16>
    %1 = vector.shape_cast %0 : vector<1x256x32xbf16> to vector<256x32xbf16>
    %c0_2 = arith.constant 0 : index
    %c0_3 = arith.constant 0 : index
    %c0_4 = arith.constant 0 : index
    %2 = vector.load %arg2[%c0_2, %c0_3, %c0_4] : memref<4x32x16xbf16, #tpu.memory_space<vmem>>, vector<1x32x16xbf16>
    %3 = vector.shape_cast %2 : vector<1x32x16xbf16> to vector<32x16xbf16>
    %cst = arith.constant dense<0.000000e+00> : vector<256x16xf32>
    %4 = tpu.matmul %1, %3, %cst {dimension_numbers = #tpu.dot_dimension_numbers<[1], [0], [0], [1], [0, 0, 1, 1], [], []>} : vector<256x32xbf16>, vector<32x16xbf16>, vector<256x16xf32> -> vector<256x16xf32>
    %c0_5 = arith.constant 0 : index
    %c272 = arith.constant 272 : index
    %c0_6 = arith.constant 0 : index
    %5 = vector.load %arg1[%c0_5, %c272, %c0_6] : memref<1x544x32xbf16, #tpu.memory_space<vmem>>, vector<1x256x32xbf16>
    %6 = vector.shape_cast %5 : vector<1x256x32xbf16> to vector<256x32xbf16>
    %c1 = arith.constant 1 : index
    %c0_7 = arith.constant 0 : index
    %c0_8 = arith.constant 0 : index
    %7 = vector.load %arg2[%c1, %c0_7, %c0_8] : memref<4x32x16xbf16, #tpu.memory_space<vmem>>, vector<1x32x16xbf16>
    %8 = vector.shape_cast %7 : vector<1x32x16xbf16> to vector<32x16xbf16>
    %cst_9 = arith.constant dense<0.000000e+00> : vector<256x16xf32>
    %9 = tpu.matmul %6, %8, %cst_9 {dimension_numbers = #tpu.dot_dimension_numbers<[1], [0], [0], [1], [0, 0, 1, 1], [], []>} : vector<256x32xbf16>, vector<32x16xbf16>, vector<256x16xf32> -> vector<256x16xf32>
    %10 = arith.addf %4, %9 : vector<256x16xf32>
    %c0_10 = arith.constant 0 : index
    %c16 = arith.constant 16 : index
    %c0_11 = arith.constant 0 : index
    %11 = vector.load %arg1[%c0_10, %c16, %c0_11] : memref<1x544x32xbf16, #tpu.memory_space<vmem>>, vector<1x256x32xbf16>
    %12 = vector.shape_cast %11 : vector<1x256x32xbf16> to vector<256x32xbf16>
    %c2 = arith.constant 2 : index
    %c0_12 = arith.constant 0 : index
    %c0_13 = arith.constant 0 : index
    %13 = vector.load %arg2[%c2, %c0_12, %c0_13] : memref<4x32x16xbf16, #tpu.memory_space<vmem>>, vector<1x32x16xbf16>
    %14 = vector.shape_cast %13 : vector<1x32x16xbf16> to vector<32x16xbf16>
    %cst_14 = arith.constant dense<0.000000e+00> : vector<256x16xf32>
    %15 = tpu.matmul %12, %14, %cst_14 {dimension_numbers = #tpu.dot_dimension_numbers<[1], [0], [0], [1], [0, 0, 1, 1], [], []>} : vector<256x32xbf16>, vector<32x16xbf16>, vector<256x16xf32> -> vector<256x16xf32>
    %16 = arith.addf %10, %15 : vector<256x16xf32>
    %c0_15 = arith.constant 0 : index
    %c288 = arith.constant 288 : index
    %c0_16 = arith.constant 0 : index
    %17 = vector.load %arg1[%c0_15, %c288, %c0_16] : memref<1x544x32xbf16, #tpu.memory_space<vmem>>, vector<1x256x32xbf16>
    %18 = vector.shape_cast %17 : vector<1x256x32xbf16> to vector<256x32xbf16>
    %c3 = arith.constant 3 : index
    %c0_17 = arith.constant 0 : index
    %c0_18 = arith.constant 0 : index
    %19 = vector.load %arg2[%c3, %c0_17, %c0_18] : memref<4x32x16xbf16, #tpu.memory_space<vmem>>, vector<1x32x16xbf16>
    %20 = vector.shape_cast %19 : vector<1x32x16xbf16> to vector<32x16xbf16>
    %cst_19 = arith.constant dense<0.000000e+00> : vector<256x16xf32>
    %21 = tpu.matmul %18, %20, %cst_19 {dimension_numbers = #tpu.dot_dimension_numbers<[1], [0], [0], [1], [0, 0, 1, 1], [], []>} : vector<256x32xbf16>, vector<32x16xbf16>, vector<256x16xf32> -> vector<256x16xf32>
    %22 = arith.addf %16, %21 : vector<256x16xf32>
    %c256_i32 = arith.constant 256 : i32
    %23 = arith.muli %arg0, %c256_i32 : i32
    %24 = tpu.assume_multiple %23, 256 : i32
    %25 = arith.index_cast %24 : i32 to index
    %c0_20 = arith.constant 0 : index
    %26 = vector.load %arg6[%25, %c0_20] : memref<512x16xf32, #tpu.memory_space<vmem>>, vector<256x16xf32>
    tpu.vector_store %arg6[%25, %c0_20], %22 {strides = array<i32>} : memref<512x16xf32, #tpu.memory_space<vmem>>, vector<256x16xf32>,
    %c1_i32 = arith.constant 1 : i32
    %27 = arith.cmpi eq, %arg0, %c1_i32 : i32
    %28 = arith.extui %27 : i1 to i32
    %c0_i32 = arith.constant 0 : i32
    %29 = arith.cmpi ne, %28, %c0_i32 : i32
    scf.if %29 {
      %c0_21 = arith.constant 0 : index
      %c0_22 = arith.constant 0 : index
      %30 = vector.load %arg6[%c0_21, %c0_22] : memref<512x16xf32, #tpu.memory_space<vmem>>, vector<512x16xf32>
      %cst_23 = arith.constant dense<0.000000e+00> : vector<16xf32>
      %31 = vector.multi_reduction <add>, %30, %cst_23 [0] : vector<512x16xf32> to vector<16xf32>
      %32 = vector.shape_cast %31 : vector<16xf32> to vector<1x16xf32>
      %cst_24 = arith.constant 0.001953125 : f32
      %33 = vector.broadcast %cst_24 : f32 to vector<1x16xf32>
      %34 = arith.mulf %32, %33 : vector<1x16xf32>
      %35 = vector.broadcast %34 : vector<1x16xf32> to vector<512x16xf32>
      %36 = arith.subf %30, %35 : vector<512x16xf32>
      %37 = arith.mulf %36, %36 : vector<512x16xf32>
      %cst_25 = arith.constant dense<0.000000e+00> : vector<16xf32>
      %38 = vector.multi_reduction <add>, %37, %cst_25 [0] : vector<512x16xf32> to vector<16xf32>
      %39 = vector.shape_cast %38 : vector<16xf32> to vector<1x16xf32>
      %cst_26 = arith.constant 0.001953125 : f32
      %40 = vector.broadcast %cst_26 : f32 to vector<1x16xf32>
      %41 = arith.mulf %39, %40 : vector<1x16xf32>
      %c0_27 = arith.constant 0 : index
      %c0_28 = arith.constant 0 : index
      %42 = vector.load %arg3[%c0_27, %c0_28] : memref<1x16xf32, #tpu.memory_space<vmem>>, vector<1x16xf32>
      %cst_29 = arith.constant 9.99999974E-6 : f32
      %43 = vector.broadcast %cst_29 : f32 to vector<1x16xf32>
      %44 = arith.addf %41, %43 : vector<1x16xf32>
      %45 = math.rsqrt %44 : vector<1x16xf32>
      %46 = arith.mulf %42, %45 : vector<1x16xf32>
      %47 = vector.broadcast %46 : vector<1x16xf32> to vector<512x16xf32>
      %48 = arith.mulf %36, %47 : vector<512x16xf32>
      %c0_30 = arith.constant 0 : index
      %c0_31 = arith.constant 0 : index
      %49 = vector.load %arg4[%c0_30, %c0_31] : memref<1x16xf32, #tpu.memory_space<vmem>>, vector<1x16xf32>
      %50 = vector.broadcast %49 : vector<1x16xf32> to vector<512x16xf32>
      %51 = arith.addf %48, %50 : vector<512x16xf32>
      %cst_32 = arith.constant 2.000000e-01 : f32
      %52 = vector.broadcast %cst_32 : f32 to vector<512x16xf32>
      %53 = arith.mulf %52, %51 : vector<512x16xf32>
      %54 = arith.maximumf %51, %53 : vector<512x16xf32>
      %55 = arith.truncf %54 : vector<512x16xf32> to vector<512x16xbf16>
      %c0_33 = arith.constant 0 : index
      %c0_34 = arith.constant 0 : index
      %56 = vector.load %arg5[%c0_33, %c0_34] : memref<512x16xbf16, #tpu.memory_space<vmem>>, vector<512x16xbf16>
      tpu.vector_store %arg5[%c0_33, %c0_34], %55 {strides = array<i32>} : memref<512x16xbf16, #tpu.memory_space<vmem>>, vector<512x16xbf16>,
    } else {
    }
    return
  }
  func.func @transform_0(%arg0: i32) -> (i32, i32, i32) {
    %c0_i32 = arith.constant 0 : i32
    %c0_i32_0 = arith.constant 0 : i32
    %c0_i32_1 = arith.constant 0 : i32
    return %arg0, %c0_i32, %c0_i32_0 : i32, i32, i32
  }
  func.func @transform_1(%arg0: i32) -> (i32, i32, i32) {
    %c0_i32 = arith.constant 0 : i32
    %c0_i32_0 = arith.constant 0 : i32
    %c0_i32_1 = arith.constant 0 : i32
    %c0_i32_2 = arith.constant 0 : i32
    return %c0_i32, %c0_i32_0, %c0_i32_1 : i32, i32, i32
  }
  func.func @transform_2(%arg0: i32) -> (i32, i32) {
    %c0_i32 = arith.constant 0 : i32
    %c0_i32_0 = arith.constant 0 : i32
    %c0_i32_1 = arith.constant 0 : i32
    return %c0_i32, %c0_i32_0 : i32, i32
  }
  func.func @transform_3(%arg0: i32) -> (i32, i32) {
    %c0_i32 = arith.constant 0 : i32
    %c0_i32_0 = arith.constant 0 : i32
    %c0_i32_1 = arith.constant 0 : i32
    return %c0_i32, %c0_i32_0 : i32, i32
  }
  func.func @transform_4(%arg0: i32) -> (i32, i32) {
    %c0_i32 = arith.constant 0 : i32
    %c0_i32_0 = arith.constant 0 : i32
    %c0_i32_1 = arith.constant 0 : i32
    return %c0_i32, %c0_i32_0 : i32, i32
  }
}

module attributes {stable_mosaic.version = 11 : i64} {
  func.func @_conv_bn_lrelu_kernel(%arg0: i32, %arg1: memref<1x144x64xbf16, #tpu.memory_space<vmem>>, %arg2: memref<4x64x32xbf16, #tpu.memory_space<vmem>>, %arg3: memref<1x32xf32, #tpu.memory_space<vmem>>, %arg4: memref<1x32xf32, #tpu.memory_space<vmem>>, %arg5: memref<128x32xbf16, #tpu.memory_space<vmem>>, %arg6: memref<128x32xf32, #tpu.memory_space<vmem>>) attributes {dimension_semantics = [#tpu.dimension_semantics<arbitrary>], iteration_bounds = array<i64: 2>, scalar_prefetch = 0 : i64, scratch_operands = 1 : i64, tpu.core_type = #tpu.core_type<tc>, window_params = [{transform_indices = @transform_0, window_bounds = array<i64: 1, 144, 64>}, {pipeline_mode = #tpu.pipeline_mode<synchronous>, transform_indices = @transform_1, window_bounds = array<i64: 4, 64, 32>}, {pipeline_mode = #tpu.pipeline_mode<synchronous>, transform_indices = @transform_2, window_bounds = array<i64: 1, 32>}, {pipeline_mode = #tpu.pipeline_mode<synchronous>, transform_indices = @transform_3, window_bounds = array<i64: 1, 32>}, {pipeline_mode = #tpu.pipeline_mode<synchronous>, transform_indices = @transform_4, window_bounds = array<i64: 128, 32>}]} {
    %c0 = arith.constant 0 : index
    %c0_0 = arith.constant 0 : index
    %c0_1 = arith.constant 0 : index
    %0 = vector.load %arg1[%c0, %c0_0, %c0_1] : memref<1x144x64xbf16, #tpu.memory_space<vmem>>, vector<1x64x64xbf16>
    %1 = vector.shape_cast %0 : vector<1x64x64xbf16> to vector<64x64xbf16>
    %c0_2 = arith.constant 0 : index
    %c0_3 = arith.constant 0 : index
    %c0_4 = arith.constant 0 : index
    %2 = vector.load %arg2[%c0_2, %c0_3, %c0_4] : memref<4x64x32xbf16, #tpu.memory_space<vmem>>, vector<1x64x32xbf16>
    %3 = vector.shape_cast %2 : vector<1x64x32xbf16> to vector<64x32xbf16>
    %cst = arith.constant dense<0.000000e+00> : vector<64x32xf32>
    %4 = tpu.matmul %1, %3, %cst {dimension_numbers = #tpu.dot_dimension_numbers<[1], [0], [0], [1], [0, 0, 1, 1], [], []>} : vector<64x64xbf16>, vector<64x32xbf16>, vector<64x32xf32> -> vector<64x32xf32>
    %c0_5 = arith.constant 0 : index
    %c72 = arith.constant 72 : index
    %c0_6 = arith.constant 0 : index
    %5 = vector.load %arg1[%c0_5, %c72, %c0_6] : memref<1x144x64xbf16, #tpu.memory_space<vmem>>, vector<1x64x64xbf16>
    %6 = vector.shape_cast %5 : vector<1x64x64xbf16> to vector<64x64xbf16>
    %c1 = arith.constant 1 : index
    %c0_7 = arith.constant 0 : index
    %c0_8 = arith.constant 0 : index
    %7 = vector.load %arg2[%c1, %c0_7, %c0_8] : memref<4x64x32xbf16, #tpu.memory_space<vmem>>, vector<1x64x32xbf16>
    %8 = vector.shape_cast %7 : vector<1x64x32xbf16> to vector<64x32xbf16>
    %cst_9 = arith.constant dense<0.000000e+00> : vector<64x32xf32>
    %9 = tpu.matmul %6, %8, %cst_9 {dimension_numbers = #tpu.dot_dimension_numbers<[1], [0], [0], [1], [0, 0, 1, 1], [], []>} : vector<64x64xbf16>, vector<64x32xbf16>, vector<64x32xf32> -> vector<64x32xf32>
    %10 = arith.addf %4, %9 : vector<64x32xf32>
    %c0_10 = arith.constant 0 : index
    %c8 = arith.constant 8 : index
    %c0_11 = arith.constant 0 : index
    %11 = vector.load %arg1[%c0_10, %c8, %c0_11] : memref<1x144x64xbf16, #tpu.memory_space<vmem>>, vector<1x64x64xbf16>
    %12 = vector.shape_cast %11 : vector<1x64x64xbf16> to vector<64x64xbf16>
    %c2 = arith.constant 2 : index
    %c0_12 = arith.constant 0 : index
    %c0_13 = arith.constant 0 : index
    %13 = vector.load %arg2[%c2, %c0_12, %c0_13] : memref<4x64x32xbf16, #tpu.memory_space<vmem>>, vector<1x64x32xbf16>
    %14 = vector.shape_cast %13 : vector<1x64x32xbf16> to vector<64x32xbf16>
    %cst_14 = arith.constant dense<0.000000e+00> : vector<64x32xf32>
    %15 = tpu.matmul %12, %14, %cst_14 {dimension_numbers = #tpu.dot_dimension_numbers<[1], [0], [0], [1], [0, 0, 1, 1], [], []>} : vector<64x64xbf16>, vector<64x32xbf16>, vector<64x32xf32> -> vector<64x32xf32>
    %16 = arith.addf %10, %15 : vector<64x32xf32>
    %c0_15 = arith.constant 0 : index
    %c80 = arith.constant 80 : index
    %c0_16 = arith.constant 0 : index
    %17 = vector.load %arg1[%c0_15, %c80, %c0_16] : memref<1x144x64xbf16, #tpu.memory_space<vmem>>, vector<1x64x64xbf16>
    %18 = vector.shape_cast %17 : vector<1x64x64xbf16> to vector<64x64xbf16>
    %c3 = arith.constant 3 : index
    %c0_17 = arith.constant 0 : index
    %c0_18 = arith.constant 0 : index
    %19 = vector.load %arg2[%c3, %c0_17, %c0_18] : memref<4x64x32xbf16, #tpu.memory_space<vmem>>, vector<1x64x32xbf16>
    %20 = vector.shape_cast %19 : vector<1x64x32xbf16> to vector<64x32xbf16>
    %cst_19 = arith.constant dense<0.000000e+00> : vector<64x32xf32>
    %21 = tpu.matmul %18, %20, %cst_19 {dimension_numbers = #tpu.dot_dimension_numbers<[1], [0], [0], [1], [0, 0, 1, 1], [], []>} : vector<64x64xbf16>, vector<64x32xbf16>, vector<64x32xf32> -> vector<64x32xf32>
    %22 = arith.addf %16, %21 : vector<64x32xf32>
    %c64_i32 = arith.constant 64 : i32
    %23 = arith.muli %arg0, %c64_i32 : i32
    %24 = tpu.assume_multiple %23, 64 : i32
    %25 = arith.index_cast %24 : i32 to index
    %c0_20 = arith.constant 0 : index
    %26 = vector.load %arg6[%25, %c0_20] : memref<128x32xf32, #tpu.memory_space<vmem>>, vector<64x32xf32>
    tpu.vector_store %arg6[%25, %c0_20], %22 {strides = array<i32>} : memref<128x32xf32, #tpu.memory_space<vmem>>, vector<64x32xf32>,
    %c1_i32 = arith.constant 1 : i32
    %27 = arith.cmpi eq, %arg0, %c1_i32 : i32
    %28 = arith.extui %27 : i1 to i32
    %c0_i32 = arith.constant 0 : i32
    %29 = arith.cmpi ne, %28, %c0_i32 : i32
    scf.if %29 {
      %c0_21 = arith.constant 0 : index
      %c0_22 = arith.constant 0 : index
      %30 = vector.load %arg6[%c0_21, %c0_22] : memref<128x32xf32, #tpu.memory_space<vmem>>, vector<128x32xf32>
      %cst_23 = arith.constant dense<0.000000e+00> : vector<32xf32>
      %31 = vector.multi_reduction <add>, %30, %cst_23 [0] : vector<128x32xf32> to vector<32xf32>
      %32 = vector.shape_cast %31 : vector<32xf32> to vector<1x32xf32>
      %cst_24 = arith.constant 7.812500e-03 : f32
      %33 = vector.broadcast %cst_24 : f32 to vector<1x32xf32>
      %34 = arith.mulf %32, %33 : vector<1x32xf32>
      %35 = vector.broadcast %34 : vector<1x32xf32> to vector<128x32xf32>
      %36 = arith.subf %30, %35 : vector<128x32xf32>
      %37 = arith.mulf %36, %36 : vector<128x32xf32>
      %cst_25 = arith.constant dense<0.000000e+00> : vector<32xf32>
      %38 = vector.multi_reduction <add>, %37, %cst_25 [0] : vector<128x32xf32> to vector<32xf32>
      %39 = vector.shape_cast %38 : vector<32xf32> to vector<1x32xf32>
      %cst_26 = arith.constant 7.812500e-03 : f32
      %40 = vector.broadcast %cst_26 : f32 to vector<1x32xf32>
      %41 = arith.mulf %39, %40 : vector<1x32xf32>
      %c0_27 = arith.constant 0 : index
      %c0_28 = arith.constant 0 : index
      %42 = vector.load %arg3[%c0_27, %c0_28] : memref<1x32xf32, #tpu.memory_space<vmem>>, vector<1x32xf32>
      %cst_29 = arith.constant 9.99999974E-6 : f32
      %43 = vector.broadcast %cst_29 : f32 to vector<1x32xf32>
      %44 = arith.addf %41, %43 : vector<1x32xf32>
      %45 = math.rsqrt %44 : vector<1x32xf32>
      %46 = arith.mulf %42, %45 : vector<1x32xf32>
      %47 = vector.broadcast %46 : vector<1x32xf32> to vector<128x32xf32>
      %48 = arith.mulf %36, %47 : vector<128x32xf32>
      %c0_30 = arith.constant 0 : index
      %c0_31 = arith.constant 0 : index
      %49 = vector.load %arg4[%c0_30, %c0_31] : memref<1x32xf32, #tpu.memory_space<vmem>>, vector<1x32xf32>
      %50 = vector.broadcast %49 : vector<1x32xf32> to vector<128x32xf32>
      %51 = arith.addf %48, %50 : vector<128x32xf32>
      %cst_32 = arith.constant 2.000000e-01 : f32
      %52 = vector.broadcast %cst_32 : f32 to vector<128x32xf32>
      %53 = arith.mulf %52, %51 : vector<128x32xf32>
      %54 = arith.maximumf %51, %53 : vector<128x32xf32>
      %55 = arith.truncf %54 : vector<128x32xf32> to vector<128x32xbf16>
      %c0_33 = arith.constant 0 : index
      %c0_34 = arith.constant 0 : index
      %56 = vector.load %arg5[%c0_33, %c0_34] : memref<128x32xbf16, #tpu.memory_space<vmem>>, vector<128x32xbf16>
      tpu.vector_store %arg5[%c0_33, %c0_34], %55 {strides = array<i32>} : memref<128x32xbf16, #tpu.memory_space<vmem>>, vector<128x32xbf16>,
    } else {
    }
    return
  }
  func.func @transform_0(%arg0: i32) -> (i32, i32, i32) {
    %c0_i32 = arith.constant 0 : i32
    %c0_i32_0 = arith.constant 0 : i32
    %c0_i32_1 = arith.constant 0 : i32
    return %arg0, %c0_i32, %c0_i32_0 : i32, i32, i32
  }
  func.func @transform_1(%arg0: i32) -> (i32, i32, i32) {
    %c0_i32 = arith.constant 0 : i32
    %c0_i32_0 = arith.constant 0 : i32
    %c0_i32_1 = arith.constant 0 : i32
    %c0_i32_2 = arith.constant 0 : i32
    return %c0_i32, %c0_i32_0, %c0_i32_1 : i32, i32, i32
  }
  func.func @transform_2(%arg0: i32) -> (i32, i32) {
    %c0_i32 = arith.constant 0 : i32
    %c0_i32_0 = arith.constant 0 : i32
    %c0_i32_1 = arith.constant 0 : i32
    return %c0_i32, %c0_i32_0 : i32, i32
  }
  func.func @transform_3(%arg0: i32) -> (i32, i32) {
    %c0_i32 = arith.constant 0 : i32
    %c0_i32_0 = arith.constant 0 : i32
    %c0_i32_1 = arith.constant 0 : i32
    return %c0_i32, %c0_i32_0 : i32, i32
  }
  func.func @transform_4(%arg0: i32) -> (i32, i32) {
    %c0_i32 = arith.constant 0 : i32
    %c0_i32_0 = arith.constant 0 : i32
    %c0_i32_1 = arith.constant 0 : i32
    return %c0_i32, %c0_i32_0 : i32, i32
  }
}

module attributes {stable_mosaic.version = 11 : i64} {
  func.func @_conv_bn_lrelu_kernel(%arg0: i32, %arg1: memref<1x40x128xbf16, #tpu.memory_space<vmem>>, %arg2: memref<4x128x64xbf16, #tpu.memory_space<vmem>>, %arg3: memref<1x64xf32, #tpu.memory_space<vmem>>, %arg4: memref<1x64xf32, #tpu.memory_space<vmem>>, %arg5: memref<32x64xbf16, #tpu.memory_space<vmem>>, %arg6: memref<32x64xf32, #tpu.memory_space<vmem>>) attributes {dimension_semantics = [#tpu.dimension_semantics<arbitrary>], iteration_bounds = array<i64: 2>, scalar_prefetch = 0 : i64, scratch_operands = 1 : i64, tpu.core_type = #tpu.core_type<tc>, window_params = [{transform_indices = @transform_0, window_bounds = array<i64: 1, 40, 128>}, {pipeline_mode = #tpu.pipeline_mode<synchronous>, transform_indices = @transform_1, window_bounds = array<i64: 4, 128, 64>}, {pipeline_mode = #tpu.pipeline_mode<synchronous>, transform_indices = @transform_2, window_bounds = array<i64: 1, 64>}, {pipeline_mode = #tpu.pipeline_mode<synchronous>, transform_indices = @transform_3, window_bounds = array<i64: 1, 64>}, {pipeline_mode = #tpu.pipeline_mode<synchronous>, transform_indices = @transform_4, window_bounds = array<i64: 32, 64>}]} {
    %c0 = arith.constant 0 : index
    %c0_0 = arith.constant 0 : index
    %c0_1 = arith.constant 0 : index
    %0 = vector.load %arg1[%c0, %c0_0, %c0_1] : memref<1x40x128xbf16, #tpu.memory_space<vmem>>, vector<1x16x128xbf16>
    %1 = vector.shape_cast %0 : vector<1x16x128xbf16> to vector<16x128xbf16>
    %c0_2 = arith.constant 0 : index
    %c0_3 = arith.constant 0 : index
    %c0_4 = arith.constant 0 : index
    %2 = vector.load %arg2[%c0_2, %c0_3, %c0_4] : memref<4x128x64xbf16, #tpu.memory_space<vmem>>, vector<1x128x64xbf16>
    %3 = vector.shape_cast %2 : vector<1x128x64xbf16> to vector<128x64xbf16>
    %cst = arith.constant dense<0.000000e+00> : vector<16x64xf32>
    %4 = tpu.matmul %1, %3, %cst {dimension_numbers = #tpu.dot_dimension_numbers<[1], [0], [0], [1], [0, 0, 1, 1], [], []>} : vector<16x128xbf16>, vector<128x64xbf16>, vector<16x64xf32> -> vector<16x64xf32>
    %c0_5 = arith.constant 0 : index
    %c20 = arith.constant 20 : index
    %c0_6 = arith.constant 0 : index
    %5 = vector.load %arg1[%c0_5, %c20, %c0_6] : memref<1x40x128xbf16, #tpu.memory_space<vmem>>, vector<1x16x128xbf16>
    %6 = vector.shape_cast %5 : vector<1x16x128xbf16> to vector<16x128xbf16>
    %c1 = arith.constant 1 : index
    %c0_7 = arith.constant 0 : index
    %c0_8 = arith.constant 0 : index
    %7 = vector.load %arg2[%c1, %c0_7, %c0_8] : memref<4x128x64xbf16, #tpu.memory_space<vmem>>, vector<1x128x64xbf16>
    %8 = vector.shape_cast %7 : vector<1x128x64xbf16> to vector<128x64xbf16>
    %cst_9 = arith.constant dense<0.000000e+00> : vector<16x64xf32>
    %9 = tpu.matmul %6, %8, %cst_9 {dimension_numbers = #tpu.dot_dimension_numbers<[1], [0], [0], [1], [0, 0, 1, 1], [], []>} : vector<16x128xbf16>, vector<128x64xbf16>, vector<16x64xf32> -> vector<16x64xf32>
    %10 = arith.addf %4, %9 : vector<16x64xf32>
    %c0_10 = arith.constant 0 : index
    %c4 = arith.constant 4 : index
    %c0_11 = arith.constant 0 : index
    %11 = vector.load %arg1[%c0_10, %c4, %c0_11] : memref<1x40x128xbf16, #tpu.memory_space<vmem>>, vector<1x16x128xbf16>
    %12 = vector.shape_cast %11 : vector<1x16x128xbf16> to vector<16x128xbf16>
    %c2 = arith.constant 2 : index
    %c0_12 = arith.constant 0 : index
    %c0_13 = arith.constant 0 : index
    %13 = vector.load %arg2[%c2, %c0_12, %c0_13] : memref<4x128x64xbf16, #tpu.memory_space<vmem>>, vector<1x128x64xbf16>
    %14 = vector.shape_cast %13 : vector<1x128x64xbf16> to vector<128x64xbf16>
    %cst_14 = arith.constant dense<0.000000e+00> : vector<16x64xf32>
    %15 = tpu.matmul %12, %14, %cst_14 {dimension_numbers = #tpu.dot_dimension_numbers<[1], [0], [0], [1], [0, 0, 1, 1], [], []>} : vector<16x128xbf16>, vector<128x64xbf16>, vector<16x64xf32> -> vector<16x64xf32>
    %16 = arith.addf %10, %15 : vector<16x64xf32>
    %c0_15 = arith.constant 0 : index
    %c24 = arith.constant 24 : index
    %c0_16 = arith.constant 0 : index
    %17 = vector.load %arg1[%c0_15, %c24, %c0_16] : memref<1x40x128xbf16, #tpu.memory_space<vmem>>, vector<1x16x128xbf16>
    %18 = vector.shape_cast %17 : vector<1x16x128xbf16> to vector<16x128xbf16>
    %c3 = arith.constant 3 : index
    %c0_17 = arith.constant 0 : index
    %c0_18 = arith.constant 0 : index
    %19 = vector.load %arg2[%c3, %c0_17, %c0_18] : memref<4x128x64xbf16, #tpu.memory_space<vmem>>, vector<1x128x64xbf16>
    %20 = vector.shape_cast %19 : vector<1x128x64xbf16> to vector<128x64xbf16>
    %cst_19 = arith.constant dense<0.000000e+00> : vector<16x64xf32>
    %21 = tpu.matmul %18, %20, %cst_19 {dimension_numbers = #tpu.dot_dimension_numbers<[1], [0], [0], [1], [0, 0, 1, 1], [], []>} : vector<16x128xbf16>, vector<128x64xbf16>, vector<16x64xf32> -> vector<16x64xf32>
    %22 = arith.addf %16, %21 : vector<16x64xf32>
    %c16_i32 = arith.constant 16 : i32
    %23 = arith.muli %arg0, %c16_i32 : i32
    %24 = tpu.assume_multiple %23, 16 : i32
    %25 = arith.index_cast %24 : i32 to index
    %c0_20 = arith.constant 0 : index
    %26 = vector.load %arg6[%25, %c0_20] : memref<32x64xf32, #tpu.memory_space<vmem>>, vector<16x64xf32>
    tpu.vector_store %arg6[%25, %c0_20], %22 {strides = array<i32>} : memref<32x64xf32, #tpu.memory_space<vmem>>, vector<16x64xf32>,
    %c1_i32 = arith.constant 1 : i32
    %27 = arith.cmpi eq, %arg0, %c1_i32 : i32
    %28 = arith.extui %27 : i1 to i32
    %c0_i32 = arith.constant 0 : i32
    %29 = arith.cmpi ne, %28, %c0_i32 : i32
    scf.if %29 {
      %c0_21 = arith.constant 0 : index
      %c0_22 = arith.constant 0 : index
      %30 = vector.load %arg6[%c0_21, %c0_22] : memref<32x64xf32, #tpu.memory_space<vmem>>, vector<32x64xf32>
      %cst_23 = arith.constant dense<0.000000e+00> : vector<64xf32>
      %31 = vector.multi_reduction <add>, %30, %cst_23 [0] : vector<32x64xf32> to vector<64xf32>
      %32 = vector.shape_cast %31 : vector<64xf32> to vector<1x64xf32>
      %cst_24 = arith.constant 3.125000e-02 : f32
      %33 = vector.broadcast %cst_24 : f32 to vector<1x64xf32>
      %34 = arith.mulf %32, %33 : vector<1x64xf32>
      %35 = vector.broadcast %34 : vector<1x64xf32> to vector<32x64xf32>
      %36 = arith.subf %30, %35 : vector<32x64xf32>
      %37 = arith.mulf %36, %36 : vector<32x64xf32>
      %cst_25 = arith.constant dense<0.000000e+00> : vector<64xf32>
      %38 = vector.multi_reduction <add>, %37, %cst_25 [0] : vector<32x64xf32> to vector<64xf32>
      %39 = vector.shape_cast %38 : vector<64xf32> to vector<1x64xf32>
      %cst_26 = arith.constant 3.125000e-02 : f32
      %40 = vector.broadcast %cst_26 : f32 to vector<1x64xf32>
      %41 = arith.mulf %39, %40 : vector<1x64xf32>
      %c0_27 = arith.constant 0 : index
      %c0_28 = arith.constant 0 : index
      %42 = vector.load %arg3[%c0_27, %c0_28] : memref<1x64xf32, #tpu.memory_space<vmem>>, vector<1x64xf32>
      %cst_29 = arith.constant 9.99999974E-6 : f32
      %43 = vector.broadcast %cst_29 : f32 to vector<1x64xf32>
      %44 = arith.addf %41, %43 : vector<1x64xf32>
      %45 = math.rsqrt %44 : vector<1x64xf32>
      %46 = arith.mulf %42, %45 : vector<1x64xf32>
      %47 = vector.broadcast %46 : vector<1x64xf32> to vector<32x64xf32>
      %48 = arith.mulf %36, %47 : vector<32x64xf32>
      %c0_30 = arith.constant 0 : index
      %c0_31 = arith.constant 0 : index
      %49 = vector.load %arg4[%c0_30, %c0_31] : memref<1x64xf32, #tpu.memory_space<vmem>>, vector<1x64xf32>
      %50 = vector.broadcast %49 : vector<1x64xf32> to vector<32x64xf32>
      %51 = arith.addf %48, %50 : vector<32x64xf32>
      %cst_32 = arith.constant 2.000000e-01 : f32
      %52 = vector.broadcast %cst_32 : f32 to vector<32x64xf32>
      %53 = arith.mulf %52, %51 : vector<32x64xf32>
      %54 = arith.maximumf %51, %53 : vector<32x64xf32>
      %55 = arith.truncf %54 : vector<32x64xf32> to vector<32x64xbf16>
      %c0_33 = arith.constant 0 : index
      %c0_34 = arith.constant 0 : index
      %56 = vector.load %arg5[%c0_33, %c0_34] : memref<32x64xbf16, #tpu.memory_space<vmem>>, vector<32x64xbf16>
      tpu.vector_store %arg5[%c0_33, %c0_34], %55 {strides = array<i32>} : memref<32x64xbf16, #tpu.memory_space<vmem>>, vector<32x64xbf16>,
    } else {
    }
    return
  }
  func.func @transform_0(%arg0: i32) -> (i32, i32, i32) {
    %c0_i32 = arith.constant 0 : i32
    %c0_i32_0 = arith.constant 0 : i32
    %c0_i32_1 = arith.constant 0 : i32
    return %arg0, %c0_i32, %c0_i32_0 : i32, i32, i32
  }
  func.func @transform_1(%arg0: i32) -> (i32, i32, i32) {
    %c0_i32 = arith.constant 0 : i32
    %c0_i32_0 = arith.constant 0 : i32
    %c0_i32_1 = arith.constant 0 : i32
    %c0_i32_2 = arith.constant 0 : i32
    return %c0_i32, %c0_i32_0, %c0_i32_1 : i32, i32, i32
  }
  func.func @transform_2(%arg0: i32) -> (i32, i32) {
    %c0_i32 = arith.constant 0 : i32
    %c0_i32_0 = arith.constant 0 : i32
    %c0_i32_1 = arith.constant 0 : i32
    return %c0_i32, %c0_i32_0 : i32, i32
  }
  func.func @transform_3(%arg0: i32) -> (i32, i32) {
    %c0_i32 = arith.constant 0 : i32
    %c0_i32_0 = arith.constant 0 : i32
    %c0_i32_1 = arith.constant 0 : i32
    return %c0_i32, %c0_i32_0 : i32, i32
  }
  func.func @transform_4(%arg0: i32) -> (i32, i32) {
    %c0_i32 = arith.constant 0 : i32
    %c0_i32_0 = arith.constant 0 : i32
    %c0_i32_1 = arith.constant 0 : i32
    return %c0_i32, %c0_i32_0 : i32, i32
  }
}

module attributes {stable_mosaic.version = 11 : i64} {
  func.func @_matmul_sigmoid_kernel(%arg0: i32, %arg1: memref<2x1024xbf16, #tpu.memory_space<vmem>>, %arg2: memref<1024x1xbf16, #tpu.memory_space<vmem>>, %arg3: memref<2x1xf32, #tpu.memory_space<vmem>>) attributes {dimension_semantics = [#tpu.dimension_semantics<arbitrary>], iteration_bounds = array<i64: 1>, scalar_prefetch = 0 : i64, scratch_operands = 0 : i64, tpu.core_type = #tpu.core_type<tc>, window_params = [{pipeline_mode = #tpu.pipeline_mode<synchronous>, transform_indices = @transform_0, window_bounds = array<i64: 2, 1024>}, {pipeline_mode = #tpu.pipeline_mode<synchronous>, transform_indices = @transform_1, window_bounds = array<i64: 1024, 1>}, {pipeline_mode = #tpu.pipeline_mode<synchronous>, transform_indices = @transform_2, window_bounds = array<i64: 2, 1>}]} {
    %c0 = arith.constant 0 : index
    %c0_0 = arith.constant 0 : index
    %0 = vector.load %arg1[%c0, %c0_0] : memref<2x1024xbf16, #tpu.memory_space<vmem>>, vector<2x1024xbf16>
    %c0_1 = arith.constant 0 : index
    %c0_2 = arith.constant 0 : index
    %1 = vector.load %arg2[%c0_1, %c0_2] : memref<1024x1xbf16, #tpu.memory_space<vmem>>, vector<1024x1xbf16>
    %cst = arith.constant dense<0.000000e+00> : vector<2x1xf32>
    %2 = tpu.matmul %0, %1, %cst {dimension_numbers = #tpu.dot_dimension_numbers<[1], [0], [0], [1], [0, 0, 1, 1], [], []>} : vector<2x1024xbf16>, vector<1024x1xbf16>, vector<2x1xf32> -> vector<2x1xf32>
    %cst_3 = arith.constant 0.000000e+00 : f32
    %3 = vector.broadcast %cst_3 : f32 to vector<2x1xf32>
    %4 = arith.subf %3, %2 : vector<2x1xf32>
    %5 = math.exp %4 : vector<2x1xf32>
    %cst_4 = arith.constant 1.000000e+00 : f32
    %6 = vector.broadcast %cst_4 : f32 to vector<2x1xf32>
    %7 = arith.addf %6, %5 : vector<2x1xf32>
    %8 = tpu.reciprocal %7 {approx = true} : vector<2x1xf32> -> vector<2x1xf32>
    %cst_5 = arith.constant 0.000000e+00 : f32
    %cst_6 = arith.constant 1.000000e+00 : f32
    %9 = vector.broadcast %cst_5 : f32 to vector<2x1xf32>
    %10 = arith.maximumf %9, %8 : vector<2x1xf32>
    %11 = vector.broadcast %cst_6 : f32 to vector<2x1xf32>
    %12 = arith.minimumf %11, %10 : vector<2x1xf32>
    %c0_7 = arith.constant 0 : index
    %c0_8 = arith.constant 0 : index
    %13 = vector.load %arg3[%c0_7, %c0_8] : memref<2x1xf32, #tpu.memory_space<vmem>>, vector<2x1xf32>
    tpu.vector_store %arg3[%c0_7, %c0_8], %12 {strides = array<i32>} : memref<2x1xf32, #tpu.memory_space<vmem>>, vector<2x1xf32>,
    return
  }
  func.func @transform_0(%arg0: i32) -> (i32, i32) {
    %c0_i32 = arith.constant 0 : i32
    %c0_i32_0 = arith.constant 0 : i32
    %c0_i32_1 = arith.constant 0 : i32
    return %c0_i32, %c0_i32_0 : i32, i32
  }
  func.func @transform_1(%arg0: i32) -> (i32, i32) {
    %c0_i32 = arith.constant 0 : i32
    %c0_i32_0 = arith.constant 0 : i32
    %c0_i32_1 = arith.constant 0 : i32
    return %c0_i32, %c0_i32_0 : i32, i32
  }
  func.func @transform_2(%arg0: i32) -> (i32, i32) {
    %c0_i32 = arith.constant 0 : i32
    %c0_i32_0 = arith.constant 0 : i32
    %c0_i32_1 = arith.constant 0 : i32
    return %c0_i32, %c0_i32_0 : i32, i32
  }
}

</mosaic_0001>

<bundles_post_ra>
// kernel: discriminator_forward.5
= control target key start
LH: loop header
LB: loop body
LE: loop exit
PB: predicated region body
PF: predicated region fallthrough
CT: control target
= control target key end

     0   :  { %s8388_s9 = smov 0   ;;  %s9202_s0 = inlined_call_operand.vmem [shape: bf16[2,2112,12], index: 0, kind: input, shape index: {}]   ;;  %s9203_s1 = inlined_call_operand.vmem [shape: bf16[4,12,8], index: 1, kind: input, shape index: {}]   ;;  %s9204_s2 = inlined_call_operand.vmem [shape: bf16[2048,8], index: 2, kind: output, shape index: {}]  }
   0x1 LB: > { %s8394_s10 = sadd.s32 4294967295, %s8371_s9   ;;  %p6144_p0 = scmp.ge.s32.totalorder %s8371_s9, 1  ;;  %s8371_s9 = sphi %s8388_s9, %s12_s9  }
   0x2   : > { %p112_p1 = scmp.lt.s32.totalorder %s8371_s9, 3 }
   0x4   : > { %p113_p2 = pnand %p6144_p0, %p112_p1 }
   0x5   : > { %v8105_v0 = vld [vmem:[%s9203_s1 + $0x8] sm:$0x3f] (!%p113_p2)   ;;  %vm925_vm0 = vcmask (!%p113_p2), 1045504   ;;  %p134_p3 = scmp.lt.s32.totalorder (!%p113_p2), %s8394_s10, 1  ;;  %v8106_v1 = vld [vmem:[%s9203_s1 + $0x10] sm:$0x3f] (!%p113_p2)  }
   0x6   : > { %116 = sbr.rel (%p113_p2) target bundleno = 749 (0x2ed), region = 28  ;;  %8092 = vmatprep.subr.msk.bf16.mxu1 (!%p113_p2), %vm925_vm0, %v8105_v0  ;;  %v927_v2 = vsel (!%p113_p2), %vm925_vm0, %v8105_v0, 0  ;;  %v8108_v3 = vld [vmem:[%s9203_s1] sm:$0x3f] (!%p113_p2)   ;;  %8094 = vmatprep.subr.msk.bf16.mxu0 (!%p113_p2), %vm925_vm0, %v8106_v1  ;;  %v3188_v4 = vsel (!%p113_p2), %vm925_vm0, %v8106_v1, 0  ;;  %vm732_vm1 = vcmask (!%p113_p2), 97280  }
   0x7   : > { %7189 = vmatpush3.bf16.msra.mxu1 (!%p113_p2), %v927_v2  ;;  %7449 = vmatpush3.bf16.msra.mxu0 (!%p113_p2), %v3188_v4  ;;  %v8110_v5 = vld [vmem:[%s9203_s1 + $0x18] sm:$0x3f] (!%p113_p2)   ;;  %v1992_v9 = vsel (!%p113_p2), %vm925_vm0, %v8108_v3, 0  ;;  %s6146_s24 = sshll.u32 (!%p113_p2), %s8394_s10, 7  ;;  %vm5955_vm2 = vcmask (!%p113_p2), 60416  }
   0x8   : > { %8093 = vmatprep.subr.msk.bf16.mxu1 (!%p113_p2), %vm925_vm0, %v8108_v3  ;;  %8095 = vmatprep.subr.msk.bf16.mxu0 (!%p113_p2), %vm925_vm0, %v8110_v5  ;;  %v4512_v11 = vsel (!%p113_p2), %vm925_vm0, %v8110_v5, 0  ;;  %p140_p4 = scmp.lt.s32.totalorder (!%p113_p2), %s6146_s24, 255 }
   0xd   : > { %s135_s15 = scalar_select %p134_p3, %s8394_s10, 1 }
   0xe   : > { %s9206_s24 = smov (!%p140_p4, %s6146_s24), 255 }
   0xf   : > { %s8096_s18 = smul.u32 1056, %s135_s15  ;;  %s6147_s25 = sshll.u32 %s9206_s24, 2 }
  0x10   : > { %s8912_s28 = scalar_lea.vmem %s9204_s2, %s6147_s25 }
  0x11   : > { %s8420_s23 = scalar_lea.vmem %s9202_s0, %s8096_s18 }
  0x12   : > { %v8107_v6 = vld [vmem:[%s8420_s23 + $0x210] sm:$0xff]   ;;  %v8111_v8 = vld [vmem:[%s8420_s23 + $0x218] sm:$0xff]   ;;  %v8113_v12 = vld [vmem:[%s8420_s23 + $0x220] sm:$0xff]  }
  0x13   : > { %v8109_v7 = vld [vmem:[%s8420_s23 + $0x10] sm:$0xff]   ;;  %7190 = vmatprep.mubr.msk.bf16.mxu1 %vm732_vm1, %v8107_v6  ;;  %v8112_v10 = vld [vmem:[%s8420_s23 + $0x18] sm:$0xff]   ;;  %v8114_v13 = vld [vmem:[%s8420_s23 + $0x20] sm:$0xff]  }
  0x14   : > { %7450 = vmatprep.mubr.msk.bf16.mxu0 %vm732_vm1, %v8109_v7  ;;  %7191 = vmatmul.mubr.msk.bf16.vlgmr.msra.gmra.mrb[0].mxu1 %vm732_vm1, %v8111_v8  ;;  %v8115_v14 = vld [vmem:[%s8420_s23 + $0x228] sm:$0xff]   ;;  %v8117_v16 = vld [vmem:[%s8420_s23 + $0x230] sm:$0xff]   ;;  %v8119_v18 = vld [vmem:[%s8420_s23 + $0x238] sm:$0xff]  }
  0x15   : > { %7319 = vmatpush3.bf16.msra.mxu1 %v1992_v9  ;;  %7451 = vmatmul.mubr.msk.bf16.vlgmr.msra.gmra.mrb[0].mxu0 %vm732_vm1, %v8112_v10  ;;  %v8116_v15 = vld [vmem:[%s8420_s23 + $0x28] sm:$0xff]   ;;  %v8118_v17 = vld [vmem:[%s8420_s23 + $0x30] sm:$0xff]   ;;  %v8120_v19 = vld [vmem:[%s8420_s23 + $0x38] sm:$0xff]  }
  0x16   : > { %7579 = vmatpush3.bf16.msra.mxu0 %v4512_v11  ;;  %7194 = vmatprep.mubr.msk.bf16.mxu1 %vm732_vm1, %v8113_v12  ;;  %v8121_v20 = vld [vmem:[%s8420_s23 + $0x240] sm:$0xff]   ;;  %v8123_v22 = vld [vmem:[%s8420_s23 + $0x248] sm:$0xff]   ;;  %v8125_v24 = vld [vmem:[%s8420_s23 + $0x250] sm:$0xff]  }
  0x17   : > { %7454 = vmatprep.mubr.msk.bf16.mxu0 %vm732_vm1, %v8114_v13  ;;  %v8122_v21 = vld [vmem:[%s8420_s23 + $0x40] sm:$0xff]   ;;  %v8124_v23 = vld [vmem:[%s8420_s23 + $0x48] sm:$0xff]   ;;  %v8126_v25 = vld [vmem:[%s8420_s23 + $0x50] sm:$0xff]  }
  0x18   : > { %v8127_v26 = vld [vmem:[%s8420_s23 + $0x258] sm:$0xff]   ;;  %v8129_v28 = vld [vmem:[%s8420_s23 + $0x260] sm:$0xff]   ;;  %v8131_v30 = vld [vmem:[%s8420_s23 + $0x268] sm:$0xff]  }
  0x19   : > { %v8128_v27 = vld [vmem:[%s8420_s23 + $0x58] sm:$0xff]   ;;  %v8130_v29 = vld [vmem:[%s8420_s23 + $0x60] sm:$0xff]   ;;  %v8132_v31 = vld [vmem:[%s8420_s23 + $0x68] sm:$0xff]  }
  0x1a   : > { %v8133_v32 = vld [vmem:[%s8420_s23 + $0x270] sm:$0xff]   ;;  %v8135_v34 = vld [vmem:[%s8420_s23 + $0x278] sm:$0xff]   ;;  %v8137_v36 = vld [vmem:[%s8420_s23 + $0x280] sm:$0xff]  }
  0x1b   : > { %v8134_v33 = vld [vmem:[%s8420_s23 + $0x70] sm:$0xff]   ;;  %v8136_v35 = vld [vmem:[%s8420_s23 + $0x78] sm:$0xff]   ;;  %v8138_v37 = vld [vmem:[%s8420_s23 + $0x80] sm:$0xff]  }
  0x1c   : > { %7195 = vmatmul.mubr.msk.bf16.gmra.mrb[4].mxu1 %vm732_vm1, %v8115_v14  ;;  %v8139_v38 = vld [vmem:[%s8420_s23 + $0x288] sm:$0xff]   ;;  %v8141_v40 = vld [vmem:[%s8420_s23 + $0x290] sm:$0xff]   ;;  %v8143_v42 = vld [vmem:[%s8420_s23 + $0x298] sm:$0xff]  }
  0x1d   : > { %7455 = vmatmul.mubr.msk.bf16.gmra.mrb[4].mxu0 %vm732_vm1, %v8116_v15  ;;  %7198 = vmatprep.mubr.msk.bf16.mxu1 %vm732_vm1, %v8117_v16  ;;  %v8140_v39 = vld [vmem:[%s8420_s23 + $0x88] sm:$0xff]   ;;  %v8142_v41 = vld [vmem:[%s8420_s23 + $0x90] sm:$0xff]   ;;  %v8144_v43 = vld [vmem:[%s8420_s23 + $0x98] sm:$0xff]  }
  0x1e   : > { %7458 = vmatprep.mubr.msk.bf16.mxu0 %vm732_vm1, %v8118_v17  ;;  %v8145_v44 = vld [vmem:[%s8420_s23 + $0x2a0] sm:$0xff]   ;;  %v8147_v46 = vld [vmem:[%s8420_s23 + $0x2a8] sm:$0xff]   ;;  %v8149_v48 = vld [vmem:[%s8420_s23 + $0x2b0] sm:$0xff]  }
  0x1f   : > { %v8146_v45 = vld [vmem:[%s8420_s23 + $0xa0] sm:$0xff]   ;;  %v8148_v47 = vld [vmem:[%s8420_s23 + $0xa8] sm:$0xff]   ;;  %v8150_v49 = vld [vmem:[%s8420_s23 + $0xb0] sm:$0xff]  }
  0x20   : > { %v8151_v50 = vld [vmem:[%s8420_s23 + $0x2b8] sm:$0xff]   ;;  %v8153_v52 = vld [vmem:[%s8420_s23 + $0x2c0] sm:$0xff]   ;;  %v8155_v54 = vld [vmem:[%s8420_s23 + $0x2c8] sm:$0xff]  }
  0x21   : > { %v8152_v51 = vld [vmem:[%s8420_s23 + $0xb8] sm:$0xff]   ;;  %v8154_v53 = vld [vmem:[%s8420_s23 + $0xc0] sm:$0xff]   ;;  %v8156_v55 = vld [vmem:[%s8420_s23 + $0xc8] sm:$0xff]  }
  0x22   : > { %v8157_v56 = vld [vmem:[%s8420_s23 + $0x2d0] sm:$0xff]   ;;  %v8159_v58 = vld [vmem:[%s8420_s23 + $0x2d8] sm:$0xff]   ;;  %v8161_v60 = vld [vmem:[%s8420_s23 + $0x2e0] sm:$0xff]  }
  0x23   : > { %v8158_v57 = vld [vmem:[%s8420_s23 + $0xd0] sm:$0xff]   ;;  %v8160_v59 = vld [vmem:[%s8420_s23 + $0xd8] sm:$0xff]   ;;  %v8162_v61 = vld [vmem:[%s8420_s23 + $0xe0] sm:$0xff]  }
  0x24   : > { %7199 = vmatmul.mubr.msk.bf16.gmra.mrb[8].mxu1 %vm732_vm1, %v8119_v18  ;;  %v8163_v62 = vld [vmem:[%s8420_s23 + $0x2e8] sm:$0xff]   ;;  %v8165_v0 = vld [vmem:[%s8420_s23 + $0x2f0] sm:$0xff]   ;;  %v8167_v2 = vld [vmem:[%s8420_s23 + $0x2f8] sm:$0xff]  }
  0x25   : > { %7459 = vmatmul.mubr.msk.bf16.gmra.mrb[8].mxu0 %vm732_vm1, %v8120_v19  ;;  %7202 = vmatprep.mubr.msk.bf16.mxu1 %vm732_vm1, %v8121_v20  ;;  %v8164_v63 = vld [vmem:[%s8420_s23 + $0xe8] sm:$0xff]   ;;  %v8166_v1 = vld [vmem:[%s8420_s23 + $0xf0] sm:$0xff]   ;;  %v8168_v3 = vld [vmem:[%s8420_s23 + $0xf8] sm:$0xff]  }
  0x26   : > { %7462 = vmatprep.mubr.msk.bf16.mxu0 %vm732_vm1, %v8122_v21  ;;  %v8169_v4 = vld [vmem:[%s8420_s23 + $0x300] sm:$0xff]   ;;  %v8171_v6 = vld [vmem:[%s8420_s23 + $0x308] sm:$0xff]   ;;  %v8173_v8 = vld [vmem:[%s8420_s23 + $0x310] sm:$0xff]  }
  0x27   : > { %v8170_v5 = vld [vmem:[%s8420_s23 + $0x100] sm:$0xff]   ;;  %v8172_v7 = vld [vmem:[%s8420_s23 + $0x108] sm:$0xff]   ;;  %v8174_v9 = vld [vmem:[%s8420_s23 + $0x110] sm:$0xff]  }
  0x28   : > { %v8175_v10 = vld [vmem:[%s8420_s23 + $0x318] sm:$0xff]   ;;  %v8177_v12 = vld [vmem:[%s8420_s23 + $0x320] sm:$0xff]   ;;  %v8179_v14 = vld [vmem:[%s8420_s23 + $0x328] sm:$0xff]  }
  0x29   : > { %v8176_v11 = vld [vmem:[%s8420_s23 + $0x118] sm:$0xff]   ;;  %v8178_v13 = vld [vmem:[%s8420_s23 + $0x120] sm:$0xff]   ;;  %v8180_v15 = vld [vmem:[%s8420_s23 + $0x128] sm:$0xff]  }
  0x2a   : > { %v8181_v16 = vld [vmem:[%s8420_s23 + $0x330] sm:$0xff]   ;;  %v8183_v18 = vld [vmem:[%s8420_s23 + $0x338] sm:$0xff]   ;;  %v8185_v20 = vld [vmem:[%s8420_s23 + $0x340] sm:$0xff]  }
  0x2b   : > { %v8182_v17 = vld [vmem:[%s8420_s23 + $0x130] sm:$0xff]   ;;  %v8184_v19 = vld [vmem:[%s8420_s23 + $0x138] sm:$0xff]   ;;  %v8186_v21 = vld [vmem:[%s8420_s23 + $0x140] sm:$0xff]  }
  0x2c   : > { %7203 = vmatmul.mubr.msk.bf16.gmra.mrb[12].mxu1 %vm732_vm1, %v8123_v22  ;;  %v8187_v22 = vld [vmem:[%s8420_s23 + $0x348] sm:$0xff]  }
  0x2d   : > { %7463 = vmatmul.mubr.msk.bf16.gmra.mrb[12].mxu0 %vm732_vm1, %v8124_v23  ;;  %7206 = vmatprep.mubr.msk.bf16.mxu1 %vm732_vm1, %v8125_v24  ;;  %v8188_v23 = vld [vmem:[%s8420_s23 + $0x148] sm:$0xff]   ;;  %v8189_v24 = vld [vmem:[%s8420_s23 + $0x350] sm:$0xff]  }
  0x2e   : > { %7466 = vmatprep.mubr.msk.bf16.mxu0 %vm732_vm1, %v8126_v25  ;;  %v8190_v25 = vld [vmem:[%s8420_s23 + $0x150] sm:$0xff]  }
  0x34   : > { %7207 = vmatmul.mubr.msk.bf16.gmra.mrb[16].mxu1 %vm732_vm1, %v8127_v26  ;;  %v8191_v26 = vld [vmem:[%s8420_s23 + $0x358] sm:$0xff]  }
  0x35   : > { %7467 = vmatmul.mubr.msk.bf16.gmra.mrb[16].mxu0 %vm732_vm1, %v8128_v27  ;;  %7210 = vmatprep.mubr.msk.bf16.mxu1 %vm732_vm1, %v8129_v28  ;;  %v8192_v27 = vld [vmem:[%s8420_s23 + $0x158] sm:$0xff]   ;;  %v8193_v28 = vld [vmem:[%s8420_s23 + $0x360] sm:$0xff]  }
  0x36   : > { %7470 = vmatprep.mubr.msk.bf16.mxu0 %vm732_vm1, %v8130_v29  ;;  %v8194_v29 = vld [vmem:[%s8420_s23 + $0x160] sm:$0xff]  }
  0x3c   : > { %7211 = vmatmul.mubr.msk.bf16.gmra.mrb[20].mxu1 %vm732_vm1, %v8131_v30  ;;  %v8195_v30 = vld [vmem:[%s8420_s23 + $0x368] sm:$0xff]  }
  0x3d   : > { %7471 = vmatmul.mubr.msk.bf16.gmra.mrb[20].mxu0 %vm732_vm1, %v8132_v31  ;;  %7214 = vmatprep.mubr.msk.bf16.mxu1 %vm732_vm1, %v8133_v32  ;;  %v8196_v31 = vld [vmem:[%s8420_s23 + $0x168] sm:$0xff]   ;;  %v8197_v32 = vld [vmem:[%s8420_s23 + $0x370] sm:$0xff]  }
  0x3e   : > { %7474 = vmatprep.mubr.msk.bf16.mxu0 %vm732_vm1, %v8134_v33  ;;  %v8198_v33 = vld [vmem:[%s8420_s23 + $0x170] sm:$0xff]  }
  0x44   : > { %7215 = vmatmul.mubr.msk.bf16.gmra.mrb[24].mxu1 %vm732_vm1, %v8135_v34  ;;  %v8199_v34 = vld [vmem:[%s8420_s23 + $0x378] sm:$0xff]  }
  0x45   : > { %7475 = vmatmul.mubr.msk.bf16.gmra.mrb[24].mxu0 %vm732_vm1, %v8136_v35  ;;  %7218 = vmatprep.mubr.msk.bf16.mxu1 %vm732_vm1, %v8137_v36  ;;  %v8200_v35 = vld [vmem:[%s8420_s23 + $0x178] sm:$0xff]   ;;  %v8201_v36 = vld [vmem:[%s8420_s23 + $0x380] sm:$0xff]  }
  0x46   : > { %7478 = vmatprep.mubr.msk.bf16.mxu0 %vm732_vm1, %v8138_v37  ;;  %v8202_v37 = vld [vmem:[%s8420_s23 + $0x180] sm:$0xff]  }
  0x4c   : > { %7219 = vmatmul.mubr.msk.bf16.gmra.mrb[28].mxu1 %vm732_vm1, %v8139_v38  ;;  %v8203_v38 = vld [vmem:[%s8420_s23 + $0x388] sm:$0xff]  }
  0x4d   : > { %7479 = vmatmul.mubr.msk.bf16.gmra.mrb[28].mxu0 %vm732_vm1, %v8140_v39  ;;  %7222 = vmatprep.mubr.msk.bf16.mxu1 %vm732_vm1, %v8141_v40  ;;  %v8204_v39 = vld [vmem:[%s8420_s23 + $0x188] sm:$0xff]   ;;  %v8205_v40 = vld [vmem:[%s8420_s23 + $0x390] sm:$0xff]  }
  0x4e   : > { %7482 = vmatprep.mubr.msk.bf16.mxu0 %vm732_vm1, %v8142_v41  ;;  %v8206_v41 = vld [vmem:[%s8420_s23 + $0x190] sm:$0xff]  }
  0x54   : > { %7223 = vmatmul.mubr.msk.bf16.gmra.mrb[32].mxu1 %vm732_vm1, %v8143_v42  ;;  %v8207_v42 = vld [vmem:[%s8420_s23 + $0x398] sm:$0xff]  }
  0x55   : > { %7483 = vmatmul.mubr.msk.bf16.gmra.mrb[32].mxu0 %vm732_vm1, %v8144_v43  ;;  %7226 = vmatprep.mubr.msk.bf16.mxu1 %vm732_vm1, %v8145_v44  ;;  %v8208_v43 = vld [vmem:[%s8420_s23 + $0x198] sm:$0xff]   ;;  %v8209_v44 = vld [vmem:[%s8420_s23 + $0x3a0] sm:$0xff]  }
  0x56   : > { %7486 = vmatprep.mubr.msk.bf16.mxu0 %vm732_vm1, %v8146_v45  ;;  %v8210_v45 = vld [vmem:[%s8420_s23 + $0x1a0] sm:$0xff]  }
  0x5c   : > { %7227 = vmatmul.mubr.msk.bf16.gmra.mrb[36].mxu1 %vm732_vm1, %v8147_v46  ;;  %v8211_v46 = vld [vmem:[%s8420_s23 + $0x3a8] sm:$0xff]  }
  0x5d   : > { %7487 = vmatmul.mubr.msk.bf16.gmra.mrb[36].mxu0 %vm732_vm1, %v8148_v47  ;;  %7230 = vmatprep.mubr.msk.bf16.mxu1 %vm732_vm1, %v8149_v48  ;;  %v8212_v47 = vld [vmem:[%s8420_s23 + $0x1a8] sm:$0xff]   ;;  %v8213_v48 = vld [vmem:[%s8420_s23 + $0x3b0] sm:$0xff]  }
  0x5e   : > { %7490 = vmatprep.mubr.msk.bf16.mxu0 %vm732_vm1, %v8150_v49  ;;  %v8214_v49 = vld [vmem:[%s8420_s23 + $0x1b0] sm:$0xff]  }
  0x64   : > { %7231 = vmatmul.mubr.msk.bf16.gmra.mrb[40].mxu1 %vm732_vm1, %v8151_v50  ;;  %v8215_v50 = vld [vmem:[%s8420_s23 + $0x3b8] sm:$0xff]  }
  0x65   : > { %7491 = vmatmul.mubr.msk.bf16.gmra.mrb[40].mxu0 %vm732_vm1, %v8152_v51  ;;  %7234 = vmatprep.mubr.msk.bf16.mxu1 %vm732_vm1, %v8153_v52  ;;  %v8216_v51 = vld [vmem:[%s8420_s23 + $0x1b8] sm:$0xff]   ;;  %v8217_v52 = vld [vmem:[%s8420_s23 + $0x3c0] sm:$0xff]  }
  0x66   : > { %7494 = vmatprep.mubr.msk.bf16.mxu0 %vm732_vm1, %v8154_v53  ;;  %v8218_v53 = vld [vmem:[%s8420_s23 + $0x1c0] sm:$0xff]  }
  0x6c   : > { %7235 = vmatmul.mubr.msk.bf16.gmra.mrb[44].mxu1 %vm732_vm1, %v8155_v54  ;;  %v8219_v54 = vld [vmem:[%s8420_s23 + $0x3c8] sm:$0xff]  }
  0x6d   : > { %7495 = vmatmul.mubr.msk.bf16.gmra.mrb[44].mxu0 %vm732_vm1, %v8156_v55  ;;  %7238 = vmatprep.mubr.msk.bf16.mxu1 %vm732_vm1, %v8157_v56  ;;  %v8220_v55 = vld [vmem:[%s8420_s23 + $0x1c8] sm:$0xff]   ;;  %v8221_v56 = vld [vmem:[%s8420_s23 + $0x3d0] sm:$0xff]  }
  0x6e   : > { %7498 = vmatprep.mubr.msk.bf16.mxu0 %vm732_vm1, %v8158_v57  ;;  %v8222_v57 = vld [vmem:[%s8420_s23 + $0x1d0] sm:$0xff]  }
  0x74   : > { %7239 = vmatmul.mubr.msk.bf16.gmra.mrb[48].mxu1 %vm732_vm1, %v8159_v58  ;;  %v8223_v58 = vld [vmem:[%s8420_s23 + $0x3d8] sm:$0xff]  }
  0x75   : > { %7499 = vmatmul.mubr.msk.bf16.gmra.mrb[48].mxu0 %vm732_vm1, %v8160_v59  ;;  %7242 = vmatprep.mubr.msk.bf16.mxu1 %vm732_vm1, %v8161_v60  ;;  %v8224_v59 = vld [vmem:[%s8420_s23 + $0x1d8] sm:$0xff]   ;;  %v8225_v60 = vld [vmem:[%s8420_s23 + $0x3e0] sm:$0xff]  }
  0x76   : > { %7502 = vmatprep.mubr.msk.bf16.mxu0 %vm732_vm1, %v8162_v61  ;;  %v8226_v61 = vld [vmem:[%s8420_s23 + $0x1e0] sm:$0xff]  }
  0x7c   : > { %7243 = vmatmul.mubr.msk.bf16.gmra.mrb[52].mxu1 %vm732_vm1, %v8163_v62  ;;  %v8227_v62 = vld [vmem:[%s8420_s23 + $0x3e8] sm:$0xff]  }
  0x7d   : > { %7503 = vmatmul.mubr.msk.bf16.gmra.mrb[52].mxu0 %vm732_vm1, %v8164_v63  ;;  %7246 = vmatprep.mubr.msk.bf16.mxu1 %vm732_vm1, %v8165_v0  ;;  %v8228_v63 = vld [vmem:[%s8420_s23 + $0x1e8] sm:$0xff]   ;;  %v8229_v0 = vld [vmem:[%s8420_s23 + $0x3f0] sm:$0xff]  }
  0x7e   : > { %7506 = vmatprep.mubr.msk.bf16.mxu0 %vm732_vm1, %v8166_v1  ;;  %v8230_v1 = vld [vmem:[%s8420_s23 + $0x1f0] sm:$0xff]  }
  0x84   : > { %7247 = vmatmul.mubr.msk.bf16.gmra.mrb[56].mxu1 %vm732_vm1, %v8167_v2  ;;  %v8231_v2 = vld [vmem:[%s8420_s23 + $0x3f8] sm:$0xff]  }
  0x85   : > { %7507 = vmatmul.mubr.msk.bf16.gmra.mrb[56].mxu0 %vm732_vm1, %v8168_v3  ;;  %7250 = vmatprep.mubr.msk.bf16.mxu1 %vm732_vm1, %v8169_v4  ;;  %v8232_v3 = vld [vmem:[%s8420_s23 + $0x1f8] sm:$0xff]   ;;  %v8233_v4 = vld [vmem:[%s8420_s23 + $0x400] sm:$0xff]  }
  0x86   : > { %7510 = vmatprep.mubr.msk.bf16.mxu0 %vm732_vm1, %v8170_v5  ;;  %v8234_v5 = vld [vmem:[%s8420_s23 + $0x200] sm:$0xff]  }
  0x8c   : > { %7251 = vmatmul.mubr.msk.bf16.gmra.mrb[60].mxu1 %vm732_vm1, %v8171_v6  ;;  %v8235_v6 = vld [vmem:[%s8420_s23 + $0x408] sm:$0xff]  }
  0x8d   : > { %7511 = vmatmul.mubr.msk.bf16.gmra.mrb[60].mxu0 %vm732_vm1, %v8172_v7  ;;  %7254 = vmatprep.mubr.msk.bf16.mxu1 %vm732_vm1, %v8173_v8  ;;  %v8236_v7 = vld [vmem:[%s8420_s23 + $0x208] sm:$0xff]   ;;  %v8237_v8 = vld [vmem:[%s8420_s23] sm:$0xff]  }
  0x8e   : > { %7514 = vmatprep.mubr.msk.bf16.mxu0 %vm732_vm1, %v8174_v9  ;;  %v8238_v9 = vld [vmem:[%s8420_s23 + $0x220] sm:$0xff]  }
  0x94   : > { %7255 = vmatmul.mubr.msk.bf16.gmra.mrb[64].mxu1 %vm732_vm1, %v8175_v10  ;;  %v8239_v10 = vld [vmem:[%s8420_s23 + $0x8] sm:$0xff]  }
  0x95   : > { %7515 = vmatmul.mubr.msk.bf16.gmra.mrb[64].mxu0 %vm732_vm1, %v8176_v11  ;;  %7258 = vmatprep.mubr.msk.bf16.mxu1 %vm732_vm1, %v8177_v12  ;;  %v8240_v11 = vld [vmem:[%s8420_s23 + $0x228] sm:$0xff]   ;;  %v8241_v12 = vld [vmem:[%s8420_s23 + $0x10] sm:$0xff]  }
  0x96   : > { %7518 = vmatprep.mubr.msk.bf16.mxu0 %vm732_vm1, %v8178_v13  ;;  %v8242_v13 = vld [vmem:[%s8420_s23 + $0x230] sm:$0xff]  }
  0x9c   : > { %7259 = vmatmul.mubr.msk.bf16.gmra.mrb[68].mxu1 %vm732_vm1, %v8179_v14  ;;  %v8243_v14 = vld [vmem:[%s8420_s23 + $0x18] sm:$0xff]  }
  0x9d   : > { %7519 = vmatmul.mubr.msk.bf16.gmra.mrb[68].mxu0 %vm732_vm1, %v8180_v15  ;;  %7262 = vmatprep.mubr.msk.bf16.mxu1 %vm732_vm1, %v8181_v16  ;;  %v8244_v15 = vld [vmem:[%s8420_s23 + $0x238] sm:$0xff]   ;;  %v8245_v16 = vld [vmem:[%s8420_s23 + $0x20] sm:$0xff]  }
  0x9e   : > { %7522 = vmatprep.mubr.msk.bf16.mxu0 %vm732_vm1, %v8182_v17  ;;  %v8246_v17 = vld [vmem:[%s8420_s23 + $0x240] sm:$0xff]  }
  0xa4   : > { %7263 = vmatmul.mubr.msk.bf16.gmra.mrb[72].mxu1 %vm732_vm1, %v8183_v18  ;;  %v8247_v18 = vld [vmem:[%s8420_s23 + $0x28] sm:$0xff]  }
  0xa5   : > { %7523 = vmatmul.mubr.msk.bf16.gmra.mrb[72].mxu0 %vm732_vm1, %v8184_v19  ;;  %7266 = vmatprep.mubr.msk.bf16.mxu1 %vm732_vm1, %v8185_v20  ;;  %v8248_v19 = vld [vmem:[%s8420_s23 + $0x248] sm:$0xff]   ;;  %v8249_v20 = vld [vmem:[%s8420_s23 + $0x30] sm:$0xff]  }
  0xa6   : > { %7526 = vmatprep.mubr.msk.bf16.mxu0 %vm732_vm1, %v8186_v21  ;;  %v8250_v21 = vld [vmem:[%s8420_s23 + $0x250] sm:$0xff]  }
  0xac   : > { %7267 = vmatmul.mubr.msk.bf16.gmra.mrb[76].mxu1 %vm732_vm1, %v8187_v22  ;;  %v8251_v22 = vld [vmem:[%s8420_s23 + $0x38] sm:$0xff]  }
  0xad   : > { %7527 = vmatmul.mubr.msk.bf16.gmra.mrb[76].mxu0 %vm732_vm1, %v8188_v23  ;;  %7270 = vmatprep.mubr.msk.bf16.mxu1 %vm732_vm1, %v8189_v24  ;;  %v8252_v23 = vld [vmem:[%s8420_s23 + $0x258] sm:$0xff]   ;;  %v8253_v24 = vld [vmem:[%s8420_s23 + $0x40] sm:$0xff]  }
  0xae   : > { %7530 = vmatprep.mubr.msk.bf16.mxu0 %vm732_vm1, %v8190_v25  ;;  %v8254_v25 = vld [vmem:[%s8420_s23 + $0x260] sm:$0xff]  }
  0xb4   : > { %7271 = vmatmul.mubr.msk.bf16.gmra.mrb[80].mxu1 %vm732_vm1, %v8191_v26  ;;  %v8255_v26 = vld [vmem:[%s8420_s23 + $0x48] sm:$0xff]  }
  0xb5   : > { %7531 = vmatmul.mubr.msk.bf16.gmra.mrb[80].mxu0 %vm732_vm1, %v8192_v27  ;;  %7274 = vmatprep.mubr.msk.bf16.mxu1 %vm732_vm1, %v8193_v28  ;;  %v8256_v27 = vld [vmem:[%s8420_s23 + $0x268] sm:$0xff]   ;;  %v8257_v28 = vld [vmem:[%s8420_s23 + $0x50] sm:$0xff]  }
  0xb6   : > { %7534 = vmatprep.mubr.msk.bf16.mxu0 %vm732_vm1, %v8194_v29  ;;  %v8258_v29 = vld [vmem:[%s8420_s23 + $0x270] sm:$0xff]  }
  0xbc   : > { %7275 = vmatmul.mubr.msk.bf16.gmra.mrb[84].mxu1 %vm732_vm1, %v8195_v30  ;;  %v8259_v30 = vld [vmem:[%s8420_s23 + $0x58] sm:$0xff]  }
  0xbd   : > { %7535 = vmatmul.mubr.msk.bf16.gmra.mrb[84].mxu0 %vm732_vm1, %v8196_v31  ;;  %7278 = vmatprep.mubr.msk.bf16.mxu1 %vm732_vm1, %v8197_v32  ;;  %v8260_v31 = vld [vmem:[%s8420_s23 + $0x278] sm:$0xff]   ;;  %v8261_v32 = vld [vmem:[%s8420_s23 + $0x60] sm:$0xff]  }
  0xbe   : > { %7538 = vmatprep.mubr.msk.bf16.mxu0 %vm732_vm1, %v8198_v33  ;;  %v8262_v33 = vld [vmem:[%s8420_s23 + $0x280] sm:$0xff]  }
  0xc4   : > { %7279 = vmatmul.mubr.msk.bf16.gmra.mrb[88].mxu1 %vm732_vm1, %v8199_v34  ;;  %v8263_v34 = vld [vmem:[%s8420_s23 + $0x68] sm:$0xff]  }
  0xc5   : > { %7539 = vmatmul.mubr.msk.bf16.gmra.mrb[88].mxu0 %vm732_vm1, %v8200_v35  ;;  %7282 = vmatprep.mubr.msk.bf16.mxu1 %vm732_vm1, %v8201_v36  ;;  %v8264_v35 = vld [vmem:[%s8420_s23 + $0x288] sm:$0xff]   ;;  %v8265_v36 = vld [vmem:[%s8420_s23 + $0x70] sm:$0xff]  }
  0xc6   : > { %7542 = vmatprep.mubr.msk.bf16.mxu0 %vm732_vm1, %v8202_v37  ;;  %v8266_v37 = vld [vmem:[%s8420_s23 + $0x290] sm:$0xff]  }
  0xcc   : > { %7283 = vmatmul.mubr.msk.bf16.gmra.mrb[92].mxu1 %vm732_vm1, %v8203_v38  ;;  %v8267_v38 = vld [vmem:[%s8420_s23 + $0x78] sm:$0xff]  }
  0xcd   : > { %7543 = vmatmul.mubr.msk.bf16.gmra.mrb[92].mxu0 %vm732_vm1, %v8204_v39  ;;  %7286 = vmatprep.mubr.msk.bf16.mxu1 %vm732_vm1, %v8205_v40  ;;  %v8268_v39 = vld [vmem:[%s8420_s23 + $0x298] sm:$0xff]   ;;  %v8269_v40 = vld [vmem:[%s8420_s23 + $0x80] sm:$0xff]  }
  0xce   : > { %7546 = vmatprep.mubr.msk.bf16.mxu0 %vm732_vm1, %v8206_v41  ;;  %v8270_v41 = vld [vmem:[%s8420_s23 + $0x2a0] sm:$0xff]  }
  0xd4   : > { %7287 = vmatmul.mubr.msk.bf16.gmra.mrb[96].mxu1 %vm732_vm1, %v8207_v42  ;;  %v8271_v42 = vld [vmem:[%s8420_s23 + $0x88] sm:$0xff]  }
  0xd5   : > { %7547 = vmatmul.mubr.msk.bf16.gmra.mrb[96].mxu0 %vm732_vm1, %v8208_v43  ;;  %7290 = vmatprep.mubr.msk.bf16.mxu1 %vm732_vm1, %v8209_v44  ;;  %v8272_v43 = vld [vmem:[%s8420_s23 + $0x2a8] sm:$0xff]   ;;  %v8273_v44 = vld [vmem:[%s8420_s23 + $0x90] sm:$0xff]  }
  0xd6   : > { %7550 = vmatprep.mubr.msk.bf16.mxu0 %vm732_vm1, %v8210_v45  ;;  %v8274_v45 = vld [vmem:[%s8420_s23 + $0x2b0] sm:$0xff]  }
  0xdc   : > { %7291 = vmatmul.mubr.msk.bf16.gmra.mrb[100].mxu1 %vm732_vm1, %v8211_v46  ;;  %v8275_v46 = vld [vmem:[%s8420_s23 + $0x98] sm:$0xff]  }
  0xdd   : > { %7551 = vmatmul.mubr.msk.bf16.gmra.mrb[100].mxu0 %vm732_vm1, %v8212_v47  ;;  %7294 = vmatprep.mubr.msk.bf16.mxu1 %vm732_vm1, %v8213_v48  ;;  %v8276_v47 = vld [vmem:[%s8420_s23 + $0x2b8] sm:$0xff]   ;;  %v8277_v48 = vld [vmem:[%s8420_s23 + $0xa0] sm:$0xff]  }
  0xde   : > { %7554 = vmatprep.mubr.msk.bf16.mxu0 %vm732_vm1, %v8214_v49  ;;  %v8278_v49 = vld [vmem:[%s8420_s23 + $0x2c0] sm:$0xff]  }
  0xe4   : > { %7295 = vmatmul.mubr.msk.bf16.gmra.mrb[104].mxu1 %vm732_vm1, %v8215_v50  ;;  %v8279_v50 = vld [vmem:[%s8420_s23 + $0xa8] sm:$0xff]  }
  0xe5   : > { %7555 = vmatmul.mubr.msk.bf16.gmra.mrb[104].mxu0 %vm732_vm1, %v8216_v51  ;;  %7298 = vmatprep.mubr.msk.bf16.mxu1 %vm732_vm1, %v8217_v52  ;;  %v8280_v51 = vld [vmem:[%s8420_s23 + $0x2c8] sm:$0xff]   ;;  %v8281_v52 = vld [vmem:[%s8420_s23 + $0xb0] sm:$0xff]  }
  0xe6   : > { %7558 = vmatprep.mubr.msk.bf16.mxu0 %vm732_vm1, %v8218_v53  ;;  %v8282_v53 = vld [vmem:[%s8420_s23 + $0x2d0] sm:$0xff]  }
  0xec   : > { %7299 = vmatmul.mubr.msk.bf16.gmra.mrb[108].mxu1 %vm732_vm1, %v8219_v54  ;;  %v8283_v54 = vld [vmem:[%s8420_s23 + $0xb8] sm:$0xff]  }
  0xed   : > { %7559 = vmatmul.mubr.msk.bf16.gmra.mrb[108].mxu0 %vm732_vm1, %v8220_v55  ;;  %7302 = vmatprep.mubr.msk.bf16.mxu1 %vm732_vm1, %v8221_v56  ;;  %v8284_v55 = vld [vmem:[%s8420_s23 + $0x2d8] sm:$0xff]   ;;  %v8285_v56 = vld [vmem:[%s8420_s23 + $0xc0] sm:$0xff]  }
  0xee   : > { %7562 = vmatprep.mubr.msk.bf16.mxu0 %vm732_vm1, %v8222_v57  ;;  %v8286_v57 = vld [vmem:[%s8420_s23 + $0x2e0] sm:$0xff]  }
  0xf4   : > { %7303 = vmatmul.mubr.msk.bf16.gmra.mrb[112].mxu1 %vm732_vm1, %v8223_v58  ;;  %v8287_v58 = vld [vmem:[%s8420_s23 + $0xc8] sm:$0xff]  }
  0xf5   : > { %7563 = vmatmul.mubr.msk.bf16.gmra.mrb[112].mxu0 %vm732_vm1, %v8224_v59  ;;  %7306 = vmatprep.mubr.msk.bf16.mxu1 %vm732_vm1, %v8225_v60  ;;  %v8288_v59 = vld [vmem:[%s8420_s23 + $0x2e8] sm:$0xff]   ;;  %v8289_v60 = vld [vmem:[%s8420_s23 + $0xd0] sm:$0xff]  }
  0xf6   : > { %7566 = vmatprep.mubr.msk.bf16.mxu0 %vm732_vm1, %v8226_v61  ;;  %v8290_v61 = vld [vmem:[%s8420_s23 + $0x2f0] sm:$0xff]  }
  0xfc   : > { %7307 = vmatmul.mubr.msk.bf16.gmra.mrb[116].mxu1 %vm732_vm1, %v8227_v62  ;;  %v8291_v62 = vld [vmem:[%s8420_s23 + $0xd8] sm:$0xff]  }
  0xfd   : > { %7567 = vmatmul.mubr.msk.bf16.gmra.mrb[116].mxu0 %vm732_vm1, %v8228_v63  ;;  %7310 = vmatprep.mubr.msk.bf16.mxu1 %vm732_vm1, %v8229_v0  ;;  %v8292_v63 = vld [vmem:[%s8420_s23 + $0x2f8] sm:$0xff]   ;;  %v8293_v0 = vld [vmem:[%s8420_s23 + $0xe0] sm:$0xff]  }
  0xfe   : > { %7570 = vmatprep.mubr.msk.bf16.mxu0 %vm732_vm1, %v8230_v1  ;;  %v8294_v1 = vld [vmem:[%s8420_s23 + $0x300] sm:$0xff]  }
 0x104   : > { %7311 = vmatmul.mubr.msk.bf16.gmra.mrb[120].mxu1 %vm732_vm1, %v8231_v2  ;;  %v8295_v2 = vld [vmem:[%s8420_s23 + $0xe8] sm:$0xff]  }
 0x105   : > { %7571 = vmatmul.mubr.msk.bf16.gmra.mrb[120].mxu0 %vm732_vm1, %v8232_v3  ;;  %7314 = vmatprep.mubr.msk.bf16.mxu1 %vm732_vm1, %v8233_v4  ;;  %v8296_v3 = vld [vmem:[%s8420_s23 + $0x308] sm:$0xff]   ;;  %v8297_v4 = vld [vmem:[%s8420_s23 + $0xf0] sm:$0xff]  }
 0x106   : > { %7574 = vmatprep.mubr.msk.bf16.mxu0 %vm732_vm1, %v8234_v5  ;;  %v8298_v5 = vld [vmem:[%s8420_s23 + $0x310] sm:$0xff]  }
 0x10c   : > { %7315 = vmatmul.mubr.msk.bf16.gmra.mrb[124].mxu1 %vm732_vm1, %v8235_v6  ;;  %v8299_v6 = vld [vmem:[%s8420_s23 + $0xf8] sm:$0xff]  }
 0x10d   : > { %7575 = vmatmul.mubr.msk.bf16.gmra.mrb[124].mxu0 %vm732_vm1, %v8236_v7  ;;  %7320 = vmatprep.mubr.msk.bf16.mxu1 %vm732_vm1, %v8237_v8  ;;  %v8300_v7 = vld [vmem:[%s8420_s23 + $0x318] sm:$0xff]   ;;  %v8301_v8 = vld [vmem:[%s8420_s23 + $0x100] sm:$0xff]  }
 0x10e   : > { %7580 = vmatprep.mubr.msk.bf16.mxu0 %vm732_vm1, %v8238_v9  ;;  %v8302_v9 = vld [vmem:[%s8420_s23 + $0x320] sm:$0xff]  }
 0x114   : > { %7321 = vmatmul.mubr.msk.bf16.vlgmr.msra.gmra.mrb[0].mxu1 %vm732_vm1, %v8239_v10  ;;  %v8303_v10 = vld [vmem:[%s8420_s23 + $0x108] sm:$0xff]  }
 0x115   : > { %7581 = vmatmul.mubr.msk.bf16.vlgmr.msra.gmra.mrb[0].mxu0 %vm732_vm1, %v8240_v11  ;;  %7324 = vmatprep.mubr.msk.bf16.mxu1 %vm732_vm1, %v8241_v12  ;;  %v8304_v11 = vld [vmem:[%s8420_s23 + $0x328] sm:$0xff]   ;;  %v8305_v12 = vld [vmem:[%s8420_s23 + $0x110] sm:$0xff]  }
 0x116   : > { %7584 = vmatprep.mubr.msk.bf16.mxu0 %vm732_vm1, %v8242_v13  ;;  %v8306_v13 = vld [vmem:[%s8420_s23 + $0x330] sm:$0xff]  }
 0x11c   : > { %7325 = vmatmul.mubr.msk.bf16.gmra.mrb[4].mxu1 %vm732_vm1, %v8243_v14  ;;  %v8307_v14 = vld [vmem:[%s8420_s23 + $0x118] sm:$0xff]  }
 0x11d   : > { %7585 = vmatmul.mubr.msk.bf16.gmra.mrb[4].mxu0 %vm732_vm1, %v8244_v15  ;;  %7328 = vmatprep.mubr.msk.bf16.mxu1 %vm732_vm1, %v8245_v16  ;;  %v8308_v15 = vld [vmem:[%s8420_s23 + $0x338] sm:$0xff]   ;;  %v8309_v16 = vld [vmem:[%s8420_s23 + $0x120] sm:$0xff]  }
 0x11e   : > { %7588 = vmatprep.mubr.msk.bf16.mxu0 %vm732_vm1, %v8246_v17  ;;  %v8310_v17 = vld [vmem:[%s8420_s23 + $0x340] sm:$0xff]  }
 0x124   : > { %7329 = vmatmul.mubr.msk.bf16.gmra.mrb[8].mxu1 %vm732_vm1, %v8247_v18  ;;  %v8311_v18 = vld [vmem:[%s8420_s23 + $0x128] sm:$0xff]  }
 0x125   : > { %7589 = vmatmul.mubr.msk.bf16.gmra.mrb[8].mxu0 %vm732_vm1, %v8248_v19  ;;  %7332 = vmatprep.mubr.msk.bf16.mxu1 %vm732_vm1, %v8249_v20  ;;  %v8312_v19 = vld [vmem:[%s8420_s23 + $0x348] sm:$0xff]   ;;  %v8313_v20 = vld [vmem:[%s8420_s23 + $0x130] sm:$0xff]  }
 0x126   : > { %7592 = vmatprep.mubr.msk.bf16.mxu0 %vm732_vm1, %v8250_v21  ;;  %v8314_v21 = vld [vmem:[%s8420_s23 + $0x350] sm:$0xff]  }
 0x12c   : > { %7333 = vmatmul.mubr.msk.bf16.gmra.mrb[12].mxu1 %vm732_vm1, %v8251_v22  ;;  %v8315_v22 = vld [vmem:[%s8420_s23 + $0x138] sm:$0xff]  }
 0x12d   : > { %7593 = vmatmul.mubr.msk.bf16.gmra.mrb[12].mxu0 %vm732_vm1, %v8252_v23  ;;  %7336 = vmatprep.mubr.msk.bf16.mxu1 %vm732_vm1, %v8253_v24  ;;  %v8316_v23 = vld [vmem:[%s8420_s23 + $0x358] sm:$0xff]   ;;  %v8317_v24 = vld [vmem:[%s8420_s23 + $0x140] sm:$0xff]  }
 0x12e   : > { %7596 = vmatprep.mubr.msk.bf16.mxu0 %vm732_vm1, %v8254_v25  ;;  %v8318_v25 = vld [vmem:[%s8420_s23 + $0x360] sm:$0xff]  }
 0x134   : > { %7337 = vmatmul.mubr.msk.bf16.gmra.mrb[16].mxu1 %vm732_vm1, %v8255_v26  ;;  %v8319_v26 = vld [vmem:[%s8420_s23 + $0x148] sm:$0xff]  }
 0x135   : > { %7597 = vmatmul.mubr.msk.bf16.gmra.mrb[16].mxu0 %vm732_vm1, %v8256_v27  ;;  %7340 = vmatprep.mubr.msk.bf16.mxu1 %vm732_vm1, %v8257_v28  ;;  %v8320_v27 = vld [vmem:[%s8420_s23 + $0x368] sm:$0xff]   ;;  %v8321_v28 = vld [vmem:[%s8420_s23 + $0x150] sm:$0xff]  }
 0x136   : > { %7600 = vmatprep.mubr.msk.bf16.mxu0 %vm732_vm1, %v8258_v29  ;;  %v8322_v29 = vld [vmem:[%s8420_s23 + $0x370] sm:$0xff]  }
 0x13c   : > { %7341 = vmatmul.mubr.msk.bf16.gmra.mrb[20].mxu1 %vm732_vm1, %v8259_v30  ;;  %v8323_v30 = vld [vmem:[%s8420_s23 + $0x158] sm:$0xff]  }
 0x13d   : > { %7601 = vmatmul.mubr.msk.bf16.gmra.mrb[20].mxu0 %vm732_vm1, %v8260_v31  ;;  %7344 = vmatprep.mubr.msk.bf16.mxu1 %vm732_vm1, %v8261_v32  ;;  %v8324_v31 = vld [vmem:[%s8420_s23 + $0x378] sm:$0xff]   ;;  %v8325_v32 = vld [vmem:[%s8420_s23 + $0x160] sm:$0xff]  }
 0x13e   : > { %7604 = vmatprep.mubr.msk.bf16.mxu0 %vm732_vm1, %v8262_v33  ;;  %v8326_v33 = vld [vmem:[%s8420_s23 + $0x380] sm:$0xff]  }
 0x144   : > { %7345 = vmatmul.mubr.msk.bf16.gmra.mrb[24].mxu1 %vm732_vm1, %v8263_v34  ;;  %v8327_v34 = vld [vmem:[%s8420_s23 + $0x168] sm:$0xff]  }
 0x145   : > { %7605 = vmatmul.mubr.msk.bf16.gmra.mrb[24].mxu0 %vm732_vm1, %v8264_v35  ;;  %7348 = vmatprep.mubr.msk.bf16.mxu1 %vm732_vm1, %v8265_v36  ;;  %v8328_v35 = vld [vmem:[%s8420_s23 + $0x388] sm:$0xff]   ;;  %v8329_v36 = vld [vmem:[%s8420_s23 + $0x170] sm:$0xff]  }
 0x146   : > { %7608 = vmatprep.mubr.msk.bf16.mxu0 %vm732_vm1, %v8266_v37  ;;  %v8330_v37 = vld [vmem:[%s8420_s23 + $0x390] sm:$0xff]  }
 0x14c   : > { %7349 = vmatmul.mubr.msk.bf16.gmra.mrb[28].mxu1 %vm732_vm1, %v8267_v38  ;;  %v8331_v38 = vld [vmem:[%s8420_s23 + $0x178] sm:$0xff]  }
 0x14d   : > { %7609 = vmatmul.mubr.msk.bf16.gmra.mrb[28].mxu0 %vm732_vm1, %v8268_v39  ;;  %7352 = vmatprep.mubr.msk.bf16.mxu1 %vm732_vm1, %v8269_v40  ;;  %v8332_v39 = vld [vmem:[%s8420_s23 + $0x398] sm:$0xff]   ;;  %v8333_v40 = vld [vmem:[%s8420_s23 + $0x180] sm:$0xff]  }
 0x14e   : > { %7612 = vmatprep.mubr.msk.bf16.mxu0 %vm732_vm1, %v8270_v41  ;;  %v8334_v41 = vld [vmem:[%s8420_s23 + $0x3a0] sm:$0xff]  }
 0x154   : > { %7353 = vmatmul.mubr.msk.bf16.gmra.mrb[32].mxu1 %vm732_vm1, %v8271_v42  ;;  %v8335_v42 = vld [vmem:[%s8420_s23 + $0x188] sm:$0xff]  }
 0x155   : > { %7613 = vmatmul.mubr.msk.bf16.gmra.mrb[32].mxu0 %vm732_vm1, %v8272_v43  ;;  %7356 = vmatprep.mubr.msk.bf16.mxu1 %vm732_vm1, %v8273_v44  ;;  %v8336_v43 = vld [vmem:[%s8420_s23 + $0x3a8] sm:$0xff]   ;;  %v8337_v44 = vld [vmem:[%s8420_s23 + $0x190] sm:$0xff]  }
 0x156   : > { %7616 = vmatprep.mubr.msk.bf16.mxu0 %vm732_vm1, %v8274_v45  ;;  %v8338_v45 = vld [vmem:[%s8420_s23 + $0x3b0] sm:$0xff]  }
 0x15c   : > { %7357 = vmatmul.mubr.msk.bf16.gmra.mrb[36].mxu1 %vm732_vm1, %v8275_v46  ;;  %v8339_v46 = vld [vmem:[%s8420_s23 + $0x198] sm:$0xff]  }
 0x15d   : > { %7617 = vmatmul.mubr.msk.bf16.gmra.mrb[36].mxu0 %vm732_vm1, %v8276_v47  ;;  %7360 = vmatprep.mubr.msk.bf16.mxu1 %vm732_vm1, %v8277_v48  ;;  %v8340_v47 = vld [vmem:[%s8420_s23 + $0x3b8] sm:$0xff]   ;;  %v8341_v48 = vld [vmem:[%s8420_s23 + $0x1a0] sm:$0xff]  }
 0x15e   : > { %7620 = vmatprep.mubr.msk.bf16.mxu0 %vm732_vm1, %v8278_v49  ;;  %v8342_v49 = vld [vmem:[%s8420_s23 + $0x3c0] sm:$0xff]  }
 0x164   : > { %7361 = vmatmul.mubr.msk.bf16.gmra.mrb[40].mxu1 %vm732_vm1, %v8279_v50  ;;  %v8343_v50 = vld [vmem:[%s8420_s23 + $0x1a8] sm:$0xff]  }
 0x165   : > { %7621 = vmatmul.mubr.msk.bf16.gmra.mrb[40].mxu0 %vm732_vm1, %v8280_v51  ;;  %7364 = vmatprep.mubr.msk.bf16.mxu1 %vm732_vm1, %v8281_v52  ;;  %v8344_v51 = vld [vmem:[%s8420_s23 + $0x3c8] sm:$0xff]   ;;  %v8345_v52 = vld [vmem:[%s8420_s23 + $0x1b0] sm:$0xff]  }
 0x166   : > { %7624 = vmatprep.mubr.msk.bf16.mxu0 %vm732_vm1, %v8282_v53  ;;  %v8346_v53 = vld [vmem:[%s8420_s23 + $0x3d0] sm:$0xff]  }
 0x16c   : > { %7365 = vmatmul.mubr.msk.bf16.gmra.mrb[44].mxu1 %vm732_vm1, %v8283_v54 }
 0x16d   : > { %7625 = vmatmul.mubr.msk.bf16.gmra.mrb[44].mxu0 %vm732_vm1, %v8284_v55  ;;  %7368 = vmatprep.mubr.msk.bf16.mxu1 %vm732_vm1, %v8285_v56 }
 0x16e   : > { %7628 = vmatprep.mubr.msk.bf16.mxu0 %vm732_vm1, %v8286_v57  ;;  %v8347_v57 = vld [vmem:[%s8420_s23 + $0x1b8] sm:$0xff]  }
 0x174   : > { %7369 = vmatmul.mubr.msk.bf16.gmra.mrb[48].mxu1 %vm732_vm1, %v8287_v58 }
 0x175   : > { %7629 = vmatmul.mubr.msk.bf16.gmra.mrb[48].mxu0 %vm732_vm1, %v8288_v59  ;;  %7372 = vmatprep.mubr.msk.bf16.mxu1 %vm732_vm1, %v8289_v60 }
 0x176   : > { %7632 = vmatprep.mubr.msk.bf16.mxu0 %vm732_vm1, %v8290_v61  ;;  %v8348_v61 = vld [vmem:[%s8420_s23 + $0x3d8] sm:$0xff]  }
 0x17c   : > { %7373 = vmatmul.mubr.msk.bf16.gmra.mrb[52].mxu1 %vm732_vm1, %v8291_v62  ;;  %v8349_v62 = vld [vmem:[%s8420_s23 + $0x1c0] sm:$0xff]  }
 0x17d   : > { %7633 = vmatmul.mubr.msk.bf16.gmra.mrb[52].mxu0 %vm732_vm1, %v8292_v63  ;;  %7376 = vmatprep.mubr.msk.bf16.mxu1 %vm732_vm1, %v8293_v0 }
 0x17e   : > { %7636 = vmatprep.mubr.msk.bf16.mxu0 %vm732_vm1, %v8294_v1 }
 0x184   : > { %7377 = vmatmul.mubr.msk.bf16.gmra.mrb[56].mxu1 %vm732_vm1, %v8295_v2  ;;  %v8350_v2 = vld [vmem:[%s8420_s23 + $0x3e0] sm:$0xff]  }
 0x185   : > { %7637 = vmatmul.mubr.msk.bf16.gmra.mrb[56].mxu0 %vm732_vm1, %v8296_v3  ;;  %7380 = vmatprep.mubr.msk.bf16.mxu1 %vm732_vm1, %v8297_v4 }
 0x186   : > { %7640 = vmatprep.mubr.msk.bf16.mxu0 %vm732_vm1, %v8298_v5 }
 0x18c   : > { %7381 = vmatmul.mubr.msk.bf16.gmra.mrb[60].mxu1 %vm732_vm1, %v8299_v6 }
 0x18d   : > { %7641 = vmatmul.mubr.msk.bf16.gmra.mrb[60].mxu0 %vm732_vm1, %v8300_v7  ;;  %7384 = vmatprep.mubr.msk.bf16.mxu1 %vm732_vm1, %v8301_v8 }
 0x18e   : > { %7644 = vmatprep.mubr.msk.bf16.mxu0 %vm732_vm1, %v8302_v9 }
 0x194   : > { %7385 = vmatmul.mubr.msk.bf16.gmra.mrb[64].mxu1 %vm732_vm1, %v8303_v10 }
 0x195   : > { %7645 = vmatmul.mubr.msk.bf16.gmra.mrb[64].mxu0 %vm732_vm1, %v8304_v11  ;;  %7388 = vmatprep.mubr.msk.bf16.mxu1 %vm732_vm1, %v8305_v12 }
 0x196   : > { %7648 = vmatprep.mubr.msk.bf16.mxu0 %vm732_vm1, %v8306_v13 }
 0x19c   : > { %7389 = vmatmul.mubr.msk.bf16.gmra.mrb[68].mxu1 %vm732_vm1, %v8307_v14 }
 0x19d   : > { %7649 = vmatmul.mubr.msk.bf16.gmra.mrb[68].mxu0 %vm732_vm1, %v8308_v15  ;;  %7392 = vmatprep.mubr.msk.bf16.mxu1 %vm732_vm1, %v8309_v16 }
 0x19e   : > { %7652 = vmatprep.mubr.msk.bf16.mxu0 %vm732_vm1, %v8310_v17 }
 0x1a4   : > { %7393 = vmatmul.mubr.msk.bf16.gmra.mrb[72].mxu1 %vm732_vm1, %v8311_v18 }
 0x1a5   : > { %7653 = vmatmul.mubr.msk.bf16.gmra.mrb[72].mxu0 %vm732_vm1, %v8312_v19  ;;  %7396 = vmatprep.mubr.msk.bf16.mxu1 %vm732_vm1, %v8313_v20  ;;  %v8351_v19 = vld [vmem:[%s8420_s23 + $0x1c8] sm:$0xff]  }
 0x1a6   : > { %7656 = vmatprep.mubr.msk.bf16.mxu0 %vm732_vm1, %v8314_v21 }
 0x1ac   : > { %7397 = vmatmul.mubr.msk.bf16.gmra.mrb[76].mxu1 %vm732_vm1, %v8315_v22 }
 0x1ad   : > { %7657 = vmatmul.mubr.msk.bf16.gmra.mrb[76].mxu0 %vm732_vm1, %v8316_v23  ;;  %7400 = vmatprep.mubr.msk.bf16.mxu1 %vm732_vm1, %v8317_v24  ;;  %v8352_v24 = vld [vmem:[%s8420_s23 + $0x3e8] sm:$0xff]  }
 0x1ae   : > { %7660 = vmatprep.mubr.msk.bf16.mxu0 %vm732_vm1, %v8318_v25  ;;  %v8353_v25 = vld [vmem:[%s8420_s23 + $0x1d0] sm:$0xff]  }
 0x1b4   : > { %7401 = vmatmul.mubr.msk.bf16.gmra.mrb[80].mxu1 %vm732_vm1, %v8319_v26 }
 0x1b5   : > { %7661 = vmatmul.mubr.msk.bf16.gmra.mrb[80].mxu0 %vm732_vm1, %v8320_v27  ;;  %7404 = vmatprep.mubr.msk.bf16.mxu1 %vm732_vm1, %v8321_v28 }
 0x1b6   : > { %7664 = vmatprep.mubr.msk.bf16.mxu0 %vm732_vm1, %v8322_v29 }
 0x1bc   : > { %7405 = vmatmul.mubr.msk.bf16.gmra.mrb[84].mxu1 %vm732_vm1, %v8323_v30  ;;  %v8354_v30 = vld [vmem:[%s8420_s23 + $0x3f0] sm:$0xff]  }
 0x1bd   : > { %7665 = vmatmul.mubr.msk.bf16.gmra.mrb[84].mxu0 %vm732_vm1, %v8324_v31  ;;  %7408 = vmatprep.mubr.msk.bf16.mxu1 %vm732_vm1, %v8325_v32 }
 0x1be   : > { %7668 = vmatprep.mubr.msk.bf16.mxu0 %vm732_vm1, %v8326_v33 }
 0x1c4   : > { %7409 = vmatmul.mubr.msk.bf16.gmra.mrb[88].mxu1 %vm732_vm1, %v8327_v34 }
 0x1c5   : > { %7669 = vmatmul.mubr.msk.bf16.gmra.mrb[88].mxu0 %vm732_vm1, %v8328_v35  ;;  %7412 = vmatprep.mubr.msk.bf16.mxu1 %vm732_vm1, %v8329_v36 }
 0x1c6   : > { %7672 = vmatprep.mubr.msk.bf16.mxu0 %vm732_vm1, %v8330_v37 }
 0x1cc   : > { %7413 = vmatmul.mubr.msk.bf16.gmra.mrb[92].mxu1 %vm732_vm1, %v8331_v38 }
 0x1cd   : > { %7673 = vmatmul.mubr.msk.bf16.gmra.mrb[92].mxu0 %vm732_vm1, %v8332_v39  ;;  %7416 = vmatprep.mubr.msk.bf16.mxu1 %vm732_vm1, %v8333_v40 }
 0x1ce   : > { %7676 = vmatprep.mubr.msk.bf16.mxu0 %vm732_vm1, %v8334_v41 }
 0x1d4   : > { %7417 = vmatmul.mubr.msk.bf16.gmra.mrb[96].mxu1 %vm732_vm1, %v8335_v42 }
 0x1d5   : > { %7677 = vmatmul.mubr.msk.bf16.gmra.mrb[96].mxu0 %vm732_vm1, %v8336_v43  ;;  %7420 = vmatprep.mubr.msk.bf16.mxu1 %vm732_vm1, %v8337_v44 }
 0x1d6   : > { %7680 = vmatprep.mubr.msk.bf16.mxu0 %vm732_vm1, %v8338_v45 }
 0x1dc   : > { %7421 = vmatmul.mubr.msk.bf16.gmra.mrb[100].mxu1 %vm732_vm1, %v8339_v46 }
 0x1dd   : > { %7681 = vmatmul.mubr.msk.bf16.gmra.mrb[100].mxu0 %vm732_vm1, %v8340_v47  ;;  %7424 = vmatprep.mubr.msk.bf16.mxu1 %vm732_vm1, %v8341_v48  ;;  %v8355_v47 = vld [vmem:[%s8420_s23 + $0x1d8] sm:$0xff]  }
 0x1de   : > { %7684 = vmatprep.mubr.msk.bf16.mxu0 %vm732_vm1, %v8342_v49 }
 0x1e4   : > { %7425 = vmatmul.mubr.msk.bf16.gmra.mrb[104].mxu1 %vm732_vm1, %v8343_v50 }
 0x1e5   : > { %7685 = vmatmul.mubr.msk.bf16.gmra.mrb[104].mxu0 %vm732_vm1, %v8344_v51  ;;  %7428 = vmatprep.mubr.msk.bf16.mxu1 %vm732_vm1, %v8345_v52  ;;  %v8356_v52 = vld [vmem:[%s8420_s23 + $0x3f8] sm:$0xff]  }
 0x1e6   : > { %7688 = vmatprep.mubr.msk.bf16.mxu0 %vm732_vm1, %v8346_v53  ;;  %v8357_v53 = vld [vmem:[%s8420_s23 + $0x1e0] sm:$0xff]  }
 0x1e7   : > { %v7322_v54 = vpop.f32.mrb[0].mxu1 }
 0x1e8   : > { %v7582_v55 = vpop.f32.mrb[0].mxu0  ;;  %v2028_v56 = vpop.f32.mrb[1].mxu1 }
 0x1e9   : > { %v7708_v58 = vadd.f32 %v7582_v55, %v7322_v54  ;;  %v4548_v59 = vpop.f32.mrb[1].mxu0  ;;  %v7323_v60 = vpop.f32.mrb[2].mxu1 }
 0x1ea   : > { %v7709_v63 = vadd.f32 %v4548_v59, %v2028_v56  ;;  %v7583_v0 = vpop.f32.mrb[2].mxu0  ;;  %v2031_v1 = vpop.f32.mrb[3].mxu1 }
 0x1eb   : > { %v5189_v3 = vmul.f32 0.2, %v7708_v58  ;;  %v7710_v4 = vadd.f32 %v7583_v0, %v7323_v60  ;;  %v4551_v5 = vpop.f32.mrb[3].mxu0 }
 0x1ec   : > { %v5187_v6 = vmul.f32 0.2, %v7709_v63  ;;  %v7711_v7 = vadd.f32 %v4551_v5, %v2031_v1  ;;  %7429 = vmatmul.mubr.msk.bf16.gmra.mrb[108].mxu1 %vm732_vm1, %v8347_v57 }
 0x1ed   : > { %v5317_v8 = vmax.f32 %v7708_v58, %v5189_v3  ;;  %v5190_v9 = vmul.f32 0.2, %v7710_v4  ;;  %7689 = vmatmul.mubr.msk.bf16.gmra.mrb[108].mxu0 %vm732_vm1, %v8348_v61  ;;  %7432 = vmatprep.mubr.msk.bf16.mxu1 %vm732_vm1, %v8349_v62  ;;  %v8358_v58 = vld [vmem:[%s8420_s23 + $0x400] sm:$0xff]  }
 0x1ee   : > { %v5315_v10 = vmax.f32 %v7709_v63, %v5187_v6  ;;  %v5188_v11 = vmul.f32 0.2, %v7711_v7  ;;  %7692 = vmatprep.mubr.msk.bf16.mxu0 %vm732_vm1, %v8350_v2 }
 0x1ef   : > { %v6802_v12 = vpack.c.bf16 %v5317_v8, %v5317_v8  ;;  %v5318_v13 = vmax.f32 %v7710_v4, %v5190_v9  ;;  %v7326_v14 = vpop.f32.mrb[4].mxu1 }
 0x1f0   : > { %v6800_v15 = vpack.c.bf16 %v5315_v10, %v5315_v10  ;;  %v5316_v16 = vmax.f32 %v7711_v7, %v5188_v11  ;;  %v7586_v17 = vpop.f32.mrb[4].mxu0  ;;  %v2044_v18 = vpop.f32.mrb[5].mxu1  ;;  %v8359_v11 = vld [vmem:[%s8420_s23 + $0x1e8] sm:$0xff]  }
 0x1f1   : > { %5958 = vst.msk [vmem:[%s8912_s28 + $0x8] sm:$0xf] %vm5955_vm2, %v6802_v12  ;;  %v6803_v20 = vpack.c.bf16 %v5318_v13, %v5318_v13  ;;  %v7712_v21 = vadd.f32 %v7586_v17, %v7326_v14  ;;  %v4564_v22 = vpop.f32.mrb[5].mxu0  ;;  %v7327_v23 = vpop.f32.mrb[6].mxu1  ;;  %v8361_v17 = vld [vmem:[%s8420_s23 + $0x1f0] sm:$0xff]  }
 0x1f2   : > { %5956 = vst.msk [vmem:[%s8912_s28] sm:$0xf] %vm5955_vm2, %v6800_v15  ;;  %v6801_v26 = vpack.c.bf16 %v5316_v16, %v5316_v16  ;;  %v7713_v27 = vadd.f32 %v4564_v22, %v2044_v18  ;;  %v7587_v28 = vpop.f32.mrb[6].mxu0  ;;  %v2047_v29 = vpop.f32.mrb[7].mxu1  ;;  %v8360_v16 = vld [vmem:[%s8420_s23 + $0x408] sm:$0xff]   ;;  %v8362_v22 = vld [vmem:[%s8420_s23 + $0x410] sm:$0xff]  }
 0x1f3   : > { %5959 = vst.msk [vmem:[%s8912_s28 + $0xc] sm:$0xf] %vm5955_vm2, %v6803_v20  ;;  %v5193_v31 = vmul.f32 0.2, %v7712_v21  ;;  %v7714_v32 = vadd.f32 %v7587_v28, %v7327_v23  ;;  %v4567_v33 = vpop.f32.mrb[7].mxu0 }
 0x1f4   : > { %5957 = vst.msk [vmem:[%s8912_s28 + $0x4] sm:$0xf] %vm5955_vm2, %v6801_v26  ;;  %v5191_v34 = vmul.f32 0.2, %v7713_v27  ;;  %v7715_v35 = vadd.f32 %v4567_v33, %v2047_v29  ;;  %7433 = vmatmul.mubr.msk.bf16.gmra.mrb[112].mxu1 %vm732_vm1, %v8351_v19 }
 0x1f5   : > { %v5321_v36 = vmax.f32 %v7712_v21, %v5193_v31  ;;  %v5194_v37 = vmul.f32 0.2, %v7714_v32  ;;  %7693 = vmatmul.mubr.msk.bf16.gmra.mrb[112].mxu0 %vm732_vm1, %v8352_v24  ;;  %7436 = vmatprep.mubr.msk.bf16.mxu1 %vm732_vm1, %v8353_v25 }
 0x1f6   : > { %v5319_v38 = vmax.f32 %v7713_v27, %v5191_v34  ;;  %v5192_v39 = vmul.f32 0.2, %v7715_v35  ;;  %7696 = vmatprep.mubr.msk.bf16.mxu0 %vm732_vm1, %v8354_v30 }
 0x1f7   : > { %v6806_v40 = vpack.c.bf16 %v5321_v36, %v5321_v36  ;;  %v5322_v41 = vmax.f32 %v7714_v32, %v5194_v37  ;;  %v7330_v42 = vpop.f32.mrb[8].mxu1 }
 0x1f8   : > { %v6804_v43 = vpack.c.bf16 %v5319_v38, %v5319_v38  ;;  %v5320_v44 = vmax.f32 %v7715_v35, %v5192_v39  ;;  %v7590_v45 = vpop.f32.mrb[8].mxu0  ;;  %v2060_v46 = vpop.f32.mrb[9].mxu1  ;;  %v8363_v39 = vld [vmem:[%s8420_s23 + $0x1f8] sm:$0xff]  }
 0x1f9   : > { %5962 = vst.msk [vmem:[%s8912_s28 + $0x18] sm:$0xf] %vm5955_vm2, %v6806_v40  ;;  %v6807_v48 = vpack.c.bf16 %v5322_v41, %v5322_v41  ;;  %v7716_v49 = vadd.f32 %v7590_v45, %v7330_v42  ;;  %v4580_v50 = vpop.f32.mrb[9].mxu0  ;;  %v7331_v51 = vpop.f32.mrb[10].mxu1 }
 0x1fa   : > { %5960 = vst.msk [vmem:[%s8912_s28 + $0x10] sm:$0xf] %vm5955_vm2, %v6804_v43  ;;  %v6805_v54 = vpack.c.bf16 %v5320_v44, %v5320_v44  ;;  %v7717_v55 = vadd.f32 %v4580_v50, %v2060_v46  ;;  %v7591_v56 = vpop.f32.mrb[10].mxu0  ;;  %v2063_v57 = vpop.f32.mrb[11].mxu1  ;;  %v8364_v44 = vld [vmem:[%s8420_s23 + $0x418] sm:$0xff]  }
 0x1fb   : > { %5963 = vst.msk [vmem:[%s8912_s28 + $0x1c] sm:$0xf] %vm5955_vm2, %v6807_v48  ;;  %v5197_v59 = vmul.f32 0.2, %v7716_v49  ;;  %v7718_v60 = vadd.f32 %v7591_v56, %v7331_v51  ;;  %v4583_v61 = vpop.f32.mrb[11].mxu0 }
 0x1fc   : > { %5961 = vst.msk [vmem:[%s8912_s28 + $0x14] sm:$0xf] %vm5955_vm2, %v6805_v54  ;;  %v5195_v62 = vmul.f32 0.2, %v7717_v55  ;;  %v7719_v63 = vadd.f32 %v4583_v61, %v2063_v57  ;;  %7437 = vmatmul.mubr.msk.bf16.gmra.mrb[116].mxu1 %vm732_vm1, %v8355_v47 }
 0x1fd   : > { %v5325_v0 = vmax.f32 %v7716_v49, %v5197_v59  ;;  %v5198_v1 = vmul.f32 0.2, %v7718_v60  ;;  %7697 = vmatmul.mubr.msk.bf16.gmra.mrb[116].mxu0 %vm732_vm1, %v8356_v52  ;;  %7440 = vmatprep.mubr.msk.bf16.mxu1 %vm732_vm1, %v8357_v53 }
 0x1fe   : > { %v5323_v2 = vmax.f32 %v7717_v55, %v5195_v62  ;;  %v5196_v3 = vmul.f32 0.2, %v7719_v63  ;;  %7700 = vmatprep.mubr.msk.bf16.mxu0 %vm732_vm1, %v8358_v58 }
 0x1ff   : > { %v6810_v4 = vpack.c.bf16 %v5325_v0, %v5325_v0  ;;  %v5326_v5 = vmax.f32 %v7718_v60, %v5198_v1  ;;  %v7334_v6 = vpop.f32.mrb[12].mxu1 }
 0x200   : > { %v6808_v7 = vpack.c.bf16 %v5323_v2, %v5323_v2  ;;  %v5324_v8 = vmax.f32 %v7719_v63, %v5196_v3  ;;  %v7594_v9 = vpop.f32.mrb[12].mxu0  ;;  %v2076_v10 = vpop.f32.mrb[13].mxu1 }
 0x201   : > { %5966 = vst.msk [vmem:[%s8912_s28 + $0x28] sm:$0xf] %vm5955_vm2, %v6810_v4  ;;  %v6811_v12 = vpack.c.bf16 %v5326_v5, %v5326_v5  ;;  %v7720_v13 = vadd.f32 %v7594_v9, %v7334_v6  ;;  %v4596_v14 = vpop.f32.mrb[13].mxu0  ;;  %v7335_v15 = vpop.f32.mrb[14].mxu1 }
 0x202   : > { %5964 = vst.msk [vmem:[%s8912_s28 + $0x20] sm:$0xf] %vm5955_vm2, %v6808_v7  ;;  %v6809_v18 = vpack.c.bf16 %v5324_v8, %v5324_v8  ;;  %v7721_v19 = vadd.f32 %v4596_v14, %v2076_v10  ;;  %v7595_v20 = vpop.f32.mrb[14].mxu0  ;;  %v2079_v21 = vpop.f32.mrb[15].mxu1 }
 0x203   : > { %5967 = vst.msk [vmem:[%s8912_s28 + $0x2c] sm:$0xf] %vm5955_vm2, %v6811_v12  ;;  %v5201_v23 = vmul.f32 0.2, %v7720_v13  ;;  %v7722_v24 = vadd.f32 %v7595_v20, %v7335_v15  ;;  %v4599_v25 = vpop.f32.mrb[15].mxu0 }
 0x204   : > { %5965 = vst.msk [vmem:[%s8912_s28 + $0x24] sm:$0xf] %vm5955_vm2, %v6809_v18  ;;  %v5199_v26 = vmul.f32 0.2, %v7721_v19  ;;  %v7723_v27 = vadd.f32 %v4599_v25, %v2079_v21  ;;  %7441 = vmatmul.mubr.msk.bf16.gmra.mrb[120].mxu1 %vm732_vm1, %v8359_v11 }
 0x205   : > { %v5329_v28 = vmax.f32 %v7720_v13, %v5201_v23  ;;  %v5202_v29 = vmul.f32 0.2, %v7722_v24  ;;  %7701 = vmatmul.mubr.msk.bf16.gmra.mrb[120].mxu0 %vm732_vm1, %v8360_v16  ;;  %7444 = vmatprep.mubr.msk.bf16.mxu1 %vm732_vm1, %v8361_v17 }
 0x206   : > { %v5327_v30 = vmax.f32 %v7721_v19, %v5199_v26  ;;  %v5200_v31 = vmul.f32 0.2, %v7723_v27  ;;  %7704 = vmatprep.mubr.msk.bf16.mxu0 %vm732_vm1, %v8362_v22 }
 0x207   : > { %v6814_v32 = vpack.c.bf16 %v5329_v28, %v5329_v28  ;;  %v5330_v33 = vmax.f32 %v7722_v24, %v5202_v29  ;;  %v7338_v34 = vpop.f32.mrb[16].mxu1 }
 0x208   : > { %v6812_v35 = vpack.c.bf16 %v5327_v30, %v5327_v30  ;;  %v5328_v36 = vmax.f32 %v7723_v27, %v5200_v31  ;;  %v7598_v37 = vpop.f32.mrb[16].mxu0  ;;  %v2092_v38 = vpop.f32.mrb[17].mxu1 }
 0x209   : > { %5970 = vst.msk [vmem:[%s8912_s28 + $0x38] sm:$0xf] %vm5955_vm2, %v6814_v32  ;;  %v6815_v40 = vpack.c.bf16 %v5330_v33, %v5330_v33  ;;  %v7724_v41 = vadd.f32 %v7598_v37, %v7338_v34  ;;  %v4612_v42 = vpop.f32.mrb[17].mxu0  ;;  %v7339_v43 = vpop.f32.mrb[18].mxu1 }
 0x20a   : > { %5968 = vst.msk [vmem:[%s8912_s28 + $0x30] sm:$0xf] %vm5955_vm2, %v6812_v35  ;;  %v6813_v45 = vpack.c.bf16 %v5328_v36, %v5328_v36  ;;  %v7725_v46 = vadd.f32 %v4612_v42, %v2092_v38  ;;  %v7599_v47 = vpop.f32.mrb[18].mxu0  ;;  %v2095_v48 = vpop.f32.mrb[19].mxu1 }
 0x20b   : > { %5971 = vst.msk [vmem:[%s8912_s28 + $0x3c] sm:$0xf] %vm5955_vm2, %v6815_v40  ;;  %v5205_v49 = vmul.f32 0.2, %v7724_v41  ;;  %v7726_v50 = vadd.f32 %v7599_v47, %v7339_v43  ;;  %v4615_v51 = vpop.f32.mrb[19].mxu0 }
 0x20c   : > { %5969 = vst.msk [vmem:[%s8912_s28 + $0x34] sm:$0xf] %vm5955_vm2, %v6813_v45  ;;  %v5203_v52 = vmul.f32 0.2, %v7725_v46  ;;  %v7727_v53 = vadd.f32 %v4615_v51, %v2095_v48  ;;  %7445 = vmatmul.mubr.msk.bf16.gmra.mrb[124].mxu1 %vm732_vm1, %v8363_v39 }
 0x20d   : > { %v5333_v54 = vmax.f32 %v7724_v41, %v5205_v49  ;;  %v5206_v55 = vmul.f32 0.2, %v7726_v50  ;;  %7705 = vmatmul.mubr.msk.bf16.gmra.mrb[124].mxu0 %vm732_vm1, %v8364_v44 }
 0x20e   : > { %v5331_v56 = vmax.f32 %v7725_v46, %v5203_v52  ;;  %v5204_v57 = vmul.f32 0.2, %v7727_v53 }
 0x20f   : > { %v6818_v58 = vpack.c.bf16 %v5333_v54, %v5333_v54  ;;  %v5334_v59 = vmax.f32 %v7726_v50, %v5206_v55  ;;  %v7342_v60 = vpop.f32.mrb[20].mxu1 }
 0x210   : > { %v6816_v61 = vpack.c.bf16 %v5331_v56, %v5331_v56  ;;  %v5332_v62 = vmax.f32 %v7727_v53, %v5204_v57  ;;  %v7602_v63 = vpop.f32.mrb[20].mxu0  ;;  %v2108_v0 = vpop.f32.mrb[21].mxu1 }
 0x211   : > { %5974 = vst.msk [vmem:[%s8912_s28 + $0x48] sm:$0xf] %vm5955_vm2, %v6818_v58  ;;  %v6819_v1 = vpack.c.bf16 %v5334_v59, %v5334_v59  ;;  %v7728_v2 = vadd.f32 %v7602_v63, %v7342_v60  ;;  %v4628_v3 = vpop.f32.mrb[21].mxu0  ;;  %v7343_v4 = vpop.f32.mrb[22].mxu1 }
 0x212   : > { %5972 = vst.msk [vmem:[%s8912_s28 + $0x40] sm:$0xf] %vm5955_vm2, %v6816_v61  ;;  %v6817_v5 = vpack.c.bf16 %v5332_v62, %v5332_v62  ;;  %v7729_v6 = vadd.f32 %v4628_v3, %v2108_v0  ;;  %v7603_v7 = vpop.f32.mrb[22].mxu0  ;;  %v2111_v8 = vpop.f32.mrb[23].mxu1 }
 0x213   : > { %5975 = vst.msk [vmem:[%s8912_s28 + $0x4c] sm:$0xf] %vm5955_vm2, %v6819_v1  ;;  %v5209_v9 = vmul.f32 0.2, %v7728_v2  ;;  %v7730_v10 = vadd.f32 %v7603_v7, %v7343_v4  ;;  %v4631_v11 = vpop.f32.mrb[23].mxu0 }
 0x214   : > { %5973 = vst.msk [vmem:[%s8912_s28 + $0x44] sm:$0xf] %vm5955_vm2, %v6817_v5  ;;  %v5207_v12 = vmul.f32 0.2, %v7729_v6  ;;  %v7731_v13 = vadd.f32 %v4631_v11, %v2111_v8 }
 0x215   : > { %v5337_v14 = vmax.f32 %v7728_v2, %v5209_v9  ;;  %v5210_v15 = vmul.f32 0.2, %v7730_v10 }
 0x216   : > { %v5335_v16 = vmax.f32 %v7729_v6, %v5207_v12  ;;  %v5208_v17 = vmul.f32 0.2, %v7731_v13 }
 0x217   : > { %v6822_v18 = vpack.c.bf16 %v5337_v14, %v5337_v14  ;;  %v5338_v19 = vmax.f32 %v7730_v10, %v5210_v15  ;;  %v7346_v20 = vpop.f32.mrb[24].mxu1 }
 0x218   : > { %v6820_v21 = vpack.c.bf16 %v5335_v16, %v5335_v16  ;;  %v5336_v22 = vmax.f32 %v7731_v13, %v5208_v17  ;;  %v7606_v23 = vpop.f32.mrb[24].mxu0  ;;  %v2124_v24 = vpop.f32.mrb[25].mxu1 }
 0x219   : > { %5978 = vst.msk [vmem:[%s8912_s28 + $0x58] sm:$0xf] %vm5955_vm2, %v6822_v18  ;;  %v6823_v25 = vpack.c.bf16 %v5338_v19, %v5338_v19  ;;  %v7732_v26 = vadd.f32 %v7606_v23, %v7346_v20  ;;  %v4644_v27 = vpop.f32.mrb[25].mxu0  ;;  %v7347_v28 = vpop.f32.mrb[26].mxu1 }
 0x21a   : > { %5976 = vst.msk [vmem:[%s8912_s28 + $0x50] sm:$0xf] %vm5955_vm2, %v6820_v21  ;;  %v6821_v29 = vpack.c.bf16 %v5336_v22, %v5336_v22  ;;  %v7733_v30 = vadd.f32 %v4644_v27, %v2124_v24  ;;  %v7607_v31 = vpop.f32.mrb[26].mxu0  ;;  %v2127_v32 = vpop.f32.mrb[27].mxu1 }
 0x21b   : > { %5979 = vst.msk [vmem:[%s8912_s28 + $0x5c] sm:$0xf] %vm5955_vm2, %v6823_v25  ;;  %v5213_v33 = vmul.f32 0.2, %v7732_v26  ;;  %v7734_v34 = vadd.f32 %v7607_v31, %v7347_v28  ;;  %v4647_v35 = vpop.f32.mrb[27].mxu0 }
 0x21c   : > { %5977 = vst.msk [vmem:[%s8912_s28 + $0x54] sm:$0xf] %vm5955_vm2, %v6821_v29  ;;  %v5211_v36 = vmul.f32 0.2, %v7733_v30  ;;  %v7735_v37 = vadd.f32 %v4647_v35, %v2127_v32 }
 0x21d   : > { %v5341_v38 = vmax.f32 %v7732_v26, %v5213_v33  ;;  %v5214_v39 = vmul.f32 0.2, %v7734_v34 }
 0x21e   : > { %v5339_v40 = vmax.f32 %v7733_v30, %v5211_v36  ;;  %v5212_v41 = vmul.f32 0.2, %v7735_v37 }
 0x21f   : > { %v6826_v42 = vpack.c.bf16 %v5341_v38, %v5341_v38  ;;  %v5342_v43 = vmax.f32 %v7734_v34, %v5214_v39  ;;  %v7350_v44 = vpop.f32.mrb[28].mxu1 }
 0x220   : > { %v6824_v45 = vpack.c.bf16 %v5339_v40, %v5339_v40  ;;  %v5340_v46 = vmax.f32 %v7735_v37, %v5212_v41  ;;  %v7610_v47 = vpop.f32.mrb[28].mxu0  ;;  %v2140_v48 = vpop.f32.mrb[29].mxu1 }
 0x221   : > { %5982 = vst.msk [vmem:[%s8912_s28 + $0x68] sm:$0xf] %vm5955_vm2, %v6826_v42  ;;  %v6827_v49 = vpack.c.bf16 %v5342_v43, %v5342_v43  ;;  %v7736_v50 = vadd.f32 %v7610_v47, %v7350_v44  ;;  %v4660_v51 = vpop.f32.mrb[29].mxu0  ;;  %v7351_v52 = vpop.f32.mrb[30].mxu1 }
 0x222   : > { %5980 = vst.msk [vmem:[%s8912_s28 + $0x60] sm:$0xf] %vm5955_vm2, %v6824_v45  ;;  %v6825_v53 = vpack.c.bf16 %v5340_v46, %v5340_v46  ;;  %v7737_v54 = vadd.f32 %v4660_v51, %v2140_v48  ;;  %v7611_v55 = vpop.f32.mrb[30].mxu0  ;;  %v2143_v56 = vpop.f32.mrb[31].mxu1 }
 0x223   : > { %5983 = vst.msk [vmem:[%s8912_s28 + $0x6c] sm:$0xf] %vm5955_vm2, %v6827_v49  ;;  %v5217_v57 = vmul.f32 0.2, %v7736_v50  ;;  %v7738_v58 = vadd.f32 %v7611_v55, %v7351_v52  ;;  %v4663_v59 = vpop.f32.mrb[31].mxu0 }
 0x224   : > { %5981 = vst.msk [vmem:[%s8912_s28 + $0x64] sm:$0xf] %vm5955_vm2, %v6825_v53  ;;  %v5215_v60 = vmul.f32 0.2, %v7737_v54  ;;  %v7739_v61 = vadd.f32 %v4663_v59, %v2143_v56 }
 0x225   : > { %v5345_v62 = vmax.f32 %v7736_v50, %v5217_v57  ;;  %v5218_v63 = vmul.f32 0.2, %v7738_v58 }
 0x226   : > { %v5343_v0 = vmax.f32 %v7737_v54, %v5215_v60  ;;  %v5216_v1 = vmul.f32 0.2, %v7739_v61 }
 0x227   : > { %v6830_v2 = vpack.c.bf16 %v5345_v62, %v5345_v62  ;;  %v5346_v3 = vmax.f32 %v7738_v58, %v5218_v63  ;;  %v7354_v4 = vpop.f32.mrb[32].mxu1 }
 0x228   : > { %v6828_v5 = vpack.c.bf16 %v5343_v0, %v5343_v0  ;;  %v5344_v6 = vmax.f32 %v7739_v61, %v5216_v1  ;;  %v7614_v7 = vpop.f32.mrb[32].mxu0  ;;  %v2156_v8 = vpop.f32.mrb[33].mxu1 }
 0x229   : > { %5986 = vst.msk [vmem:[%s8912_s28 + $0x78] sm:$0xf] %vm5955_vm2, %v6830_v2  ;;  %v6831_v9 = vpack.c.bf16 %v5346_v3, %v5346_v3  ;;  %v7740_v10 = vadd.f32 %v7614_v7, %v7354_v4  ;;  %v4676_v11 = vpop.f32.mrb[33].mxu0  ;;  %v7355_v12 = vpop.f32.mrb[34].mxu1 }
 0x22a   : > { %5984 = vst.msk [vmem:[%s8912_s28 + $0x70] sm:$0xf] %vm5955_vm2, %v6828_v5  ;;  %v6829_v13 = vpack.c.bf16 %v5344_v6, %v5344_v6  ;;  %v7741_v14 = vadd.f32 %v4676_v11, %v2156_v8  ;;  %v7615_v15 = vpop.f32.mrb[34].mxu0  ;;  %v2159_v16 = vpop.f32.mrb[35].mxu1 }
 0x22b   : > { %5987 = vst.msk [vmem:[%s8912_s28 + $0x7c] sm:$0xf] %vm5955_vm2, %v6831_v9  ;;  %v5221_v17 = vmul.f32 0.2, %v7740_v10  ;;  %v7742_v18 = vadd.f32 %v7615_v15, %v7355_v12  ;;  %v4679_v19 = vpop.f32.mrb[35].mxu0 }
 0x22c   : > { %5985 = vst.msk [vmem:[%s8912_s28 + $0x74] sm:$0xf] %vm5955_vm2, %v6829_v13  ;;  %v5219_v20 = vmul.f32 0.2, %v7741_v14  ;;  %v7743_v21 = vadd.f32 %v4679_v19, %v2159_v16 }
 0x22d   : > { %v5349_v22 = vmax.f32 %v7740_v10, %v5221_v17  ;;  %v5222_v23 = vmul.f32 0.2, %v7742_v18 }
 0x22e   : > { %v5347_v24 = vmax.f32 %v7741_v14, %v5219_v20  ;;  %v5220_v25 = vmul.f32 0.2, %v7743_v21 }
 0x22f   : > { %v6834_v26 = vpack.c.bf16 %v5349_v22, %v5349_v22  ;;  %v5350_v27 = vmax.f32 %v7742_v18, %v5222_v23  ;;  %v7358_v28 = vpop.f32.mrb[36].mxu1 }
 0x230   : > { %v6832_v29 = vpack.c.bf16 %v5347_v24, %v5347_v24  ;;  %v5348_v30 = vmax.f32 %v7743_v21, %v5220_v25  ;;  %v7618_v31 = vpop.f32.mrb[36].mxu0  ;;  %v2172_v32 = vpop.f32.mrb[37].mxu1 }
 0x231   : > { %5990 = vst.msk [vmem:[%s8912_s28 + $0x88] sm:$0xf] %vm5955_vm2, %v6834_v26  ;;  %v6835_v33 = vpack.c.bf16 %v5350_v27, %v5350_v27  ;;  %v7744_v34 = vadd.f32 %v7618_v31, %v7358_v28  ;;  %v4692_v35 = vpop.f32.mrb[37].mxu0  ;;  %v7359_v36 = vpop.f32.mrb[38].mxu1 }
 0x232   : > { %5988 = vst.msk [vmem:[%s8912_s28 + $0x80] sm:$0xf] %vm5955_vm2, %v6832_v29  ;;  %v6833_v37 = vpack.c.bf16 %v5348_v30, %v5348_v30  ;;  %v7745_v38 = vadd.f32 %v4692_v35, %v2172_v32  ;;  %v7619_v39 = vpop.f32.mrb[38].mxu0  ;;  %v2175_v40 = vpop.f32.mrb[39].mxu1 }
 0x233   : > { %5991 = vst.msk [vmem:[%s8912_s28 + $0x8c] sm:$0xf] %vm5955_vm2, %v6835_v33  ;;  %v5225_v41 = vmul.f32 0.2, %v7744_v34  ;;  %v7746_v42 = vadd.f32 %v7619_v39, %v7359_v36  ;;  %v4695_v43 = vpop.f32.mrb[39].mxu0 }
 0x234   : > { %5989 = vst.msk [vmem:[%s8912_s28 + $0x84] sm:$0xf] %vm5955_vm2, %v6833_v37  ;;  %v5223_v44 = vmul.f32 0.2, %v7745_v38  ;;  %v7747_v45 = vadd.f32 %v4695_v43, %v2175_v40 }
 0x235   : > { %v5353_v46 = vmax.f32 %v7744_v34, %v5225_v41  ;;  %v5226_v47 = vmul.f32 0.2, %v7746_v42 }
 0x236   : > { %v5351_v48 = vmax.f32 %v7745_v38, %v5223_v44  ;;  %v5224_v49 = vmul.f32 0.2, %v7747_v45 }
 0x237   : > { %v6838_v50 = vpack.c.bf16 %v5353_v46, %v5353_v46  ;;  %v5354_v51 = vmax.f32 %v7746_v42, %v5226_v47  ;;  %v7362_v52 = vpop.f32.mrb[40].mxu1 }
 0x238   : > { %v6836_v53 = vpack.c.bf16 %v5351_v48, %v5351_v48  ;;  %v5352_v54 = vmax.f32 %v7747_v45, %v5224_v49  ;;  %v7622_v55 = vpop.f32.mrb[40].mxu0  ;;  %v2188_v56 = vpop.f32.mrb[41].mxu1 }
 0x239   : > { %5994 = vst.msk [vmem:[%s8912_s28 + $0x98] sm:$0xf] %vm5955_vm2, %v6838_v50  ;;  %v6839_v57 = vpack.c.bf16 %v5354_v51, %v5354_v51  ;;  %v7748_v58 = vadd.f32 %v7622_v55, %v7362_v52  ;;  %v4708_v59 = vpop.f32.mrb[41].mxu0  ;;  %v7363_v60 = vpop.f32.mrb[42].mxu1 }
 0x23a   : > { %5992 = vst.msk [vmem:[%s8912_s28 + $0x90] sm:$0xf] %vm5955_vm2, %v6836_v53  ;;  %v6837_v61 = vpack.c.bf16 %v5352_v54, %v5352_v54  ;;  %v7749_v62 = vadd.f32 %v4708_v59, %v2188_v56  ;;  %v7623_v63 = vpop.f32.mrb[42].mxu0  ;;  %v2191_v0 = vpop.f32.mrb[43].mxu1 }
 0x23b   : > { %5995 = vst.msk [vmem:[%s8912_s28 + $0x9c] sm:$0xf] %vm5955_vm2, %v6839_v57  ;;  %v5229_v1 = vmul.f32 0.2, %v7748_v58  ;;  %v7750_v2 = vadd.f32 %v7623_v63, %v7363_v60  ;;  %v4711_v3 = vpop.f32.mrb[43].mxu0 }
 0x23c   : > { %5993 = vst.msk [vmem:[%s8912_s28 + $0x94] sm:$0xf] %vm5955_vm2, %v6837_v61  ;;  %v5227_v4 = vmul.f32 0.2, %v7749_v62  ;;  %v7751_v5 = vadd.f32 %v4711_v3, %v2191_v0 }
 0x23d   : > { %v5357_v6 = vmax.f32 %v7748_v58, %v5229_v1  ;;  %v5230_v7 = vmul.f32 0.2, %v7750_v2 }
 0x23e   : > { %v5355_v8 = vmax.f32 %v7749_v62, %v5227_v4  ;;  %v5228_v9 = vmul.f32 0.2, %v7751_v5 }
 0x23f   : > { %v6842_v10 = vpack.c.bf16 %v5357_v6, %v5357_v6  ;;  %v5358_v11 = vmax.f32 %v7750_v2, %v5230_v7  ;;  %v7366_v12 = vpop.f32.mrb[44].mxu1 }
 0x240   : > { %v6840_v13 = vpack.c.bf16 %v5355_v8, %v5355_v8  ;;  %v5356_v14 = vmax.f32 %v7751_v5, %v5228_v9  ;;  %v7626_v15 = vpop.f32.mrb[44].mxu0  ;;  %v2204_v16 = vpop.f32.mrb[45].mxu1 }
 0x241   : > { %5998 = vst.msk [vmem:[%s8912_s28 + $0xa8] sm:$0xf] %vm5955_vm2, %v6842_v10  ;;  %v6843_v17 = vpack.c.bf16 %v5358_v11, %v5358_v11  ;;  %v7752_v18 = vadd.f32 %v7626_v15, %v7366_v12  ;;  %v4724_v19 = vpop.f32.mrb[45].mxu0  ;;  %v7367_v20 = vpop.f32.mrb[46].mxu1 }
 0x242   : > { %5996 = vst.msk [vmem:[%s8912_s28 + $0xa0] sm:$0xf] %vm5955_vm2, %v6840_v13  ;;  %v6841_v21 = vpack.c.bf16 %v5356_v14, %v5356_v14  ;;  %v7753_v22 = vadd.f32 %v4724_v19, %v2204_v16  ;;  %v7627_v23 = vpop.f32.mrb[46].mxu0  ;;  %v2207_v24 = vpop.f32.mrb[47].mxu1 }
 0x243   : > { %5999 = vst.msk [vmem:[%s8912_s28 + $0xac] sm:$0xf] %vm5955_vm2, %v6843_v17  ;;  %v5233_v25 = vmul.f32 0.2, %v7752_v18  ;;  %v7754_v26 = vadd.f32 %v7627_v23, %v7367_v20  ;;  %v4727_v27 = vpop.f32.mrb[47].mxu0 }
 0x244   : > { %5997 = vst.msk [vmem:[%s8912_s28 + $0xa4] sm:$0xf] %vm5955_vm2, %v6841_v21  ;;  %v5231_v28 = vmul.f32 0.2, %v7753_v22  ;;  %v7755_v29 = vadd.f32 %v4727_v27, %v2207_v24 }
 0x245   : > { %v5361_v30 = vmax.f32 %v7752_v18, %v5233_v25  ;;  %v5234_v31 = vmul.f32 0.2, %v7754_v26 }
 0x246   : > { %v5359_v32 = vmax.f32 %v7753_v22, %v5231_v28  ;;  %v5232_v33 = vmul.f32 0.2, %v7755_v29 }
 0x247   : > { %v6846_v34 = vpack.c.bf16 %v5361_v30, %v5361_v30  ;;  %v5362_v35 = vmax.f32 %v7754_v26, %v5234_v31  ;;  %v7370_v36 = vpop.f32.mrb[48].mxu1 }
 0x248   : > { %v6844_v37 = vpack.c.bf16 %v5359_v32, %v5359_v32  ;;  %v5360_v38 = vmax.f32 %v7755_v29, %v5232_v33  ;;  %v7630_v39 = vpop.f32.mrb[48].mxu0  ;;  %v2220_v40 = vpop.f32.mrb[49].mxu1 }
 0x249   : > { %6002 = vst.msk [vmem:[%s8912_s28 + $0xb8] sm:$0xf] %vm5955_vm2, %v6846_v34  ;;  %v6847_v41 = vpack.c.bf16 %v5362_v35, %v5362_v35  ;;  %v7756_v42 = vadd.f32 %v7630_v39, %v7370_v36  ;;  %v4740_v43 = vpop.f32.mrb[49].mxu0  ;;  %v7371_v44 = vpop.f32.mrb[50].mxu1 }
 0x24a   : > { %6000 = vst.msk [vmem:[%s8912_s28 + $0xb0] sm:$0xf] %vm5955_vm2, %v6844_v37  ;;  %v6845_v45 = vpack.c.bf16 %v5360_v38, %v5360_v38  ;;  %v7757_v46 = vadd.f32 %v4740_v43, %v2220_v40  ;;  %v7631_v47 = vpop.f32.mrb[50].mxu0  ;;  %v2223_v48 = vpop.f32.mrb[51].mxu1 }
 0x24b   : > { %6003 = vst.msk [vmem:[%s8912_s28 + $0xbc] sm:$0xf] %vm5955_vm2, %v6847_v41  ;;  %v5237_v49 = vmul.f32 0.2, %v7756_v42  ;;  %v7758_v50 = vadd.f32 %v7631_v47, %v7371_v44  ;;  %v4743_v51 = vpop.f32.mrb[51].mxu0 }
 0x24c   : > { %6001 = vst.msk [vmem:[%s8912_s28 + $0xb4] sm:$0xf] %vm5955_vm2, %v6845_v45  ;;  %v5235_v52 = vmul.f32 0.2, %v7757_v46  ;;  %v7759_v53 = vadd.f32 %v4743_v51, %v2223_v48 }
 0x24d   : > { %v5365_v54 = vmax.f32 %v7756_v42, %v5237_v49  ;;  %v5238_v55 = vmul.f32 0.2, %v7758_v50 }
 0x24e   : > { %v5363_v56 = vmax.f32 %v7757_v46, %v5235_v52  ;;  %v5236_v57 = vmul.f32 0.2, %v7759_v53 }
 0x24f   : > { %v6850_v58 = vpack.c.bf16 %v5365_v54, %v5365_v54  ;;  %v5366_v59 = vmax.f32 %v7758_v50, %v5238_v55  ;;  %v7374_v60 = vpop.f32.mrb[52].mxu1 }
 0x250   : > { %v6848_v61 = vpack.c.bf16 %v5363_v56, %v5363_v56  ;;  %v5364_v62 = vmax.f32 %v7759_v53, %v5236_v57  ;;  %v7634_v63 = vpop.f32.mrb[52].mxu0  ;;  %v2236_v0 = vpop.f32.mrb[53].mxu1 }
 0x251   : > { %6006 = vst.msk [vmem:[%s8912_s28 + $0xc8] sm:$0xf] %vm5955_vm2, %v6850_v58  ;;  %v6851_v1 = vpack.c.bf16 %v5366_v59, %v5366_v59  ;;  %v7760_v2 = vadd.f32 %v7634_v63, %v7374_v60  ;;  %v4756_v3 = vpop.f32.mrb[53].mxu0  ;;  %v7375_v4 = vpop.f32.mrb[54].mxu1 }
 0x252   : > { %6004 = vst.msk [vmem:[%s8912_s28 + $0xc0] sm:$0xf] %vm5955_vm2, %v6848_v61  ;;  %v6849_v5 = vpack.c.bf16 %v5364_v62, %v5364_v62  ;;  %v7761_v6 = vadd.f32 %v4756_v3, %v2236_v0  ;;  %v7635_v7 = vpop.f32.mrb[54].mxu0  ;;  %v2239_v8 = vpop.f32.mrb[55].mxu1 }
 0x253   : > { %6007 = vst.msk [vmem:[%s8912_s28 + $0xcc] sm:$0xf] %vm5955_vm2, %v6851_v1  ;;  %v5241_v9 = vmul.f32 0.2, %v7760_v2  ;;  %v7762_v10 = vadd.f32 %v7635_v7, %v7375_v4  ;;  %v4759_v11 = vpop.f32.mrb[55].mxu0 }
 0x254   : > { %6005 = vst.msk [vmem:[%s8912_s28 + $0xc4] sm:$0xf] %vm5955_vm2, %v6849_v5  ;;  %v5239_v12 = vmul.f32 0.2, %v7761_v6  ;;  %v7763_v13 = vadd.f32 %v4759_v11, %v2239_v8 }
 0x255   : > { %v5369_v14 = vmax.f32 %v7760_v2, %v5241_v9  ;;  %v5242_v15 = vmul.f32 0.2, %v7762_v10 }
 0x256   : > { %v5367_v16 = vmax.f32 %v7761_v6, %v5239_v12  ;;  %v5240_v17 = vmul.f32 0.2, %v7763_v13 }
 0x257   : > { %v6854_v18 = vpack.c.bf16 %v5369_v14, %v5369_v14  ;;  %v5370_v19 = vmax.f32 %v7762_v10, %v5242_v15  ;;  %v7378_v20 = vpop.f32.mrb[56].mxu1 }
 0x258   : > { %v6852_v21 = vpack.c.bf16 %v5367_v16, %v5367_v16  ;;  %v5368_v22 = vmax.f32 %v7763_v13, %v5240_v17  ;;  %v7638_v23 = vpop.f32.mrb[56].mxu0  ;;  %v2252_v24 = vpop.f32.mrb[57].mxu1 }
 0x259   : > { %6010 = vst.msk [vmem:[%s8912_s28 + $0xd8] sm:$0xf] %vm5955_vm2, %v6854_v18  ;;  %v6855_v25 = vpack.c.bf16 %v5370_v19, %v5370_v19  ;;  %v7764_v26 = vadd.f32 %v7638_v23, %v7378_v20  ;;  %v4772_v27 = vpop.f32.mrb[57].mxu0  ;;  %v7379_v28 = vpop.f32.mrb[58].mxu1 }
 0x25a   : > { %6008 = vst.msk [vmem:[%s8912_s28 + $0xd0] sm:$0xf] %vm5955_vm2, %v6852_v21  ;;  %v6853_v29 = vpack.c.bf16 %v5368_v22, %v5368_v22  ;;  %v7765_v30 = vadd.f32 %v4772_v27, %v2252_v24  ;;  %v7639_v31 = vpop.f32.mrb[58].mxu0  ;;  %v2255_v32 = vpop.f32.mrb[59].mxu1 }
 0x25b   : > { %6011 = vst.msk [vmem:[%s8912_s28 + $0xdc] sm:$0xf] %vm5955_vm2, %v6855_v25  ;;  %v5245_v33 = vmul.f32 0.2, %v7764_v26  ;;  %v7766_v34 = vadd.f32 %v7639_v31, %v7379_v28  ;;  %v4775_v35 = vpop.f32.mrb[59].mxu0 }
 0x25c   : > { %6009 = vst.msk [vmem:[%s8912_s28 + $0xd4] sm:$0xf] %vm5955_vm2, %v6853_v29  ;;  %v5243_v36 = vmul.f32 0.2, %v7765_v30  ;;  %v7767_v37 = vadd.f32 %v4775_v35, %v2255_v32 }
 0x25d   : > { %v5373_v38 = vmax.f32 %v7764_v26, %v5245_v33  ;;  %v5246_v39 = vmul.f32 0.2, %v7766_v34 }
 0x25e   : > { %v5371_v40 = vmax.f32 %v7765_v30, %v5243_v36  ;;  %v5244_v41 = vmul.f32 0.2, %v7767_v37 }
 0x25f   : > { %v6858_v42 = vpack.c.bf16 %v5373_v38, %v5373_v38  ;;  %v5374_v43 = vmax.f32 %v7766_v34, %v5246_v39  ;;  %v7382_v44 = vpop.f32.mrb[60].mxu1 }
 0x260   : > { %v6856_v45 = vpack.c.bf16 %v5371_v40, %v5371_v40  ;;  %v5372_v46 = vmax.f32 %v7767_v37, %v5244_v41  ;;  %v7642_v47 = vpop.f32.mrb[60].mxu0  ;;  %v2268_v48 = vpop.f32.mrb[61].mxu1 }
 0x261   : > { %6014 = vst.msk [vmem:[%s8912_s28 + $0xe8] sm:$0xf] %vm5955_vm2, %v6858_v42  ;;  %v6859_v49 = vpack.c.bf16 %v5374_v43, %v5374_v43  ;;  %v7768_v50 = vadd.f32 %v7642_v47, %v7382_v44  ;;  %v4788_v51 = vpop.f32.mrb[61].mxu0  ;;  %v7383_v52 = vpop.f32.mrb[62].mxu1 }
 0x262   : > { %6012 = vst.msk [vmem:[%s8912_s28 + $0xe0] sm:$0xf] %vm5955_vm2, %v6856_v45  ;;  %v6857_v53 = vpack.c.bf16 %v5372_v46, %v5372_v46  ;;  %v7769_v54 = vadd.f32 %v4788_v51, %v2268_v48  ;;  %v7643_v55 = vpop.f32.mrb[62].mxu0  ;;  %v2271_v56 = vpop.f32.mrb[63].mxu1 }
 0x263   : > { %6015 = vst.msk [vmem:[%s8912_s28 + $0xec] sm:$0xf] %vm5955_vm2, %v6859_v49  ;;  %v5249_v57 = vmul.f32 0.2, %v7768_v50  ;;  %v7770_v58 = vadd.f32 %v7643_v55, %v7383_v52  ;;  %v4791_v59 = vpop.f32.mrb[63].mxu0 }
 0x264   : > { %6013 = vst.msk [vmem:[%s8912_s28 + $0xe4] sm:$0xf] %vm5955_vm2, %v6857_v53  ;;  %v5247_v60 = vmul.f32 0.2, %v7769_v54  ;;  %v7771_v61 = vadd.f32 %v4791_v59, %v2271_v56 }
 0x265   : > { %v5377_v62 = vmax.f32 %v7768_v50, %v5249_v57  ;;  %v5250_v63 = vmul.f32 0.2, %v7770_v58 }
 0x266   : > { %v5375_v0 = vmax.f32 %v7769_v54, %v5247_v60  ;;  %v5248_v1 = vmul.f32 0.2, %v7771_v61 }
 0x267   : > { %v6862_v2 = vpack.c.bf16 %v5377_v62, %v5377_v62  ;;  %v5378_v3 = vmax.f32 %v7770_v58, %v5250_v63  ;;  %v7386_v4 = vpop.f32.mrb[64].mxu1 }
 0x268   : > { %v6860_v5 = vpack.c.bf16 %v5375_v0, %v5375_v0  ;;  %v5376_v6 = vmax.f32 %v7771_v61, %v5248_v1  ;;  %v7646_v7 = vpop.f32.mrb[64].mxu0  ;;  %v2284_v8 = vpop.f32.mrb[65].mxu1 }
 0x269   : > { %6018 = vst.msk [vmem:[%s8912_s28 + $0xf8] sm:$0xf] %vm5955_vm2, %v6862_v2  ;;  %v6863_v9 = vpack.c.bf16 %v5378_v3, %v5378_v3  ;;  %v7772_v10 = vadd.f32 %v7646_v7, %v7386_v4  ;;  %v4804_v11 = vpop.f32.mrb[65].mxu0  ;;  %v7387_v12 = vpop.f32.mrb[66].mxu1 }
 0x26a   : > { %6016 = vst.msk [vmem:[%s8912_s28 + $0xf0] sm:$0xf] %vm5955_vm2, %v6860_v5  ;;  %v6861_v13 = vpack.c.bf16 %v5376_v6, %v5376_v6  ;;  %v7773_v14 = vadd.f32 %v4804_v11, %v2284_v8  ;;  %v7647_v15 = vpop.f32.mrb[66].mxu0  ;;  %v2287_v16 = vpop.f32.mrb[67].mxu1 }
 0x26b   : > { %6019 = vst.msk [vmem:[%s8912_s28 + $0xfc] sm:$0xf] %vm5955_vm2, %v6863_v9  ;;  %v5253_v17 = vmul.f32 0.2, %v7772_v10  ;;  %v7774_v18 = vadd.f32 %v7647_v15, %v7387_v12  ;;  %v4807_v19 = vpop.f32.mrb[67].mxu0 }
 0x26c   : > { %6017 = vst.msk [vmem:[%s8912_s28 + $0xf4] sm:$0xf] %vm5955_vm2, %v6861_v13  ;;  %v5251_v20 = vmul.f32 0.2, %v7773_v14  ;;  %v7775_v21 = vadd.f32 %v4807_v19, %v2287_v16 }
 0x26d   : > { %v5381_v22 = vmax.f32 %v7772_v10, %v5253_v17  ;;  %v5254_v23 = vmul.f32 0.2, %v7774_v18 }
 0x26e   : > { %v5379_v24 = vmax.f32 %v7773_v14, %v5251_v20  ;;  %v5252_v25 = vmul.f32 0.2, %v7775_v21 }
 0x26f   : > { %v6866_v26 = vpack.c.bf16 %v5381_v22, %v5381_v22  ;;  %v5382_v27 = vmax.f32 %v7774_v18, %v5254_v23  ;;  %v7390_v28 = vpop.f32.mrb[68].mxu1 }
 0x270   : > { %v6864_v29 = vpack.c.bf16 %v5379_v24, %v5379_v24  ;;  %v5380_v30 = vmax.f32 %v7775_v21, %v5252_v25  ;;  %v7650_v31 = vpop.f32.mrb[68].mxu0  ;;  %v2300_v32 = vpop.f32.mrb[69].mxu1 }
 0x271   : > { %6022 = vst.msk [vmem:[%s8912_s28 + $0x108] sm:$0xf] %vm5955_vm2, %v6866_v26  ;;  %v6867_v33 = vpack.c.bf16 %v5382_v27, %v5382_v27  ;;  %v7776_v34 = vadd.f32 %v7650_v31, %v7390_v28  ;;  %v4820_v35 = vpop.f32.mrb[69].mxu0  ;;  %v7391_v36 = vpop.f32.mrb[70].mxu1 }
 0x272   : > { %6020 = vst.msk [vmem:[%s8912_s28 + $0x100] sm:$0xf] %vm5955_vm2, %v6864_v29  ;;  %v6865_v37 = vpack.c.bf16 %v5380_v30, %v5380_v30  ;;  %v7777_v38 = vadd.f32 %v4820_v35, %v2300_v32  ;;  %v7651_v39 = vpop.f32.mrb[70].mxu0  ;;  %v2303_v40 = vpop.f32.mrb[71].mxu1 }
 0x273   : > { %6023 = vst.msk [vmem:[%s8912_s28 + $0x10c] sm:$0xf] %vm5955_vm2, %v6867_v33  ;;  %v5257_v41 = vmul.f32 0.2, %v7776_v34  ;;  %v7778_v42 = vadd.f32 %v7651_v39, %v7391_v36  ;;  %v4823_v43 = vpop.f32.mrb[71].mxu0 }
 0x274   : > { %6021 = vst.msk [vmem:[%s8912_s28 + $0x104] sm:$0xf] %vm5955_vm2, %v6865_v37  ;;  %v5255_v44 = vmul.f32 0.2, %v7777_v38  ;;  %v7779_v45 = vadd.f32 %v4823_v43, %v2303_v40 }
 0x275   : > { %v5385_v46 = vmax.f32 %v7776_v34, %v5257_v41  ;;  %v5258_v47 = vmul.f32 0.2, %v7778_v42 }
 0x276   : > { %v5383_v48 = vmax.f32 %v7777_v38, %v5255_v44  ;;  %v5256_v49 = vmul.f32 0.2, %v7779_v45 }
 0x277   : > { %v6870_v50 = vpack.c.bf16 %v5385_v46, %v5385_v46  ;;  %v5386_v51 = vmax.f32 %v7778_v42, %v5258_v47  ;;  %v7394_v52 = vpop.f32.mrb[72].mxu1 }
 0x278   : > { %v6868_v53 = vpack.c.bf16 %v5383_v48, %v5383_v48  ;;  %v5384_v54 = vmax.f32 %v7779_v45, %v5256_v49  ;;  %v7654_v55 = vpop.f32.mrb[72].mxu0  ;;  %v2316_v56 = vpop.f32.mrb[73].mxu1 }
 0x279   : > { %6026 = vst.msk [vmem:[%s8912_s28 + $0x118] sm:$0xf] %vm5955_vm2, %v6870_v50  ;;  %v6871_v57 = vpack.c.bf16 %v5386_v51, %v5386_v51  ;;  %v7780_v58 = vadd.f32 %v7654_v55, %v7394_v52  ;;  %v4836_v59 = vpop.f32.mrb[73].mxu0  ;;  %v7395_v60 = vpop.f32.mrb[74].mxu1 }
 0x27a   : > { %6024 = vst.msk [vmem:[%s8912_s28 + $0x110] sm:$0xf] %vm5955_vm2, %v6868_v53  ;;  %v6869_v61 = vpack.c.bf16 %v5384_v54, %v5384_v54  ;;  %v7781_v62 = vadd.f32 %v4836_v59, %v2316_v56  ;;  %v7655_v63 = vpop.f32.mrb[74].mxu0  ;;  %v2319_v0 = vpop.f32.mrb[75].mxu1 }
 0x27b   : > { %6027 = vst.msk [vmem:[%s8912_s28 + $0x11c] sm:$0xf] %vm5955_vm2, %v6871_v57  ;;  %v5261_v1 = vmul.f32 0.2, %v7780_v58  ;;  %v7782_v2 = vadd.f32 %v7655_v63, %v7395_v60  ;;  %v4839_v3 = vpop.f32.mrb[75].mxu0 }
 0x27c   : > { %6025 = vst.msk [vmem:[%s8912_s28 + $0x114] sm:$0xf] %vm5955_vm2, %v6869_v61  ;;  %v5259_v4 = vmul.f32 0.2, %v7781_v62  ;;  %v7783_v5 = vadd.f32 %v4839_v3, %v2319_v0 }
 0x27d   : > { %v5389_v6 = vmax.f32 %v7780_v58, %v5261_v1  ;;  %v5262_v7 = vmul.f32 0.2, %v7782_v2 }
 0x27e   : > { %v5387_v8 = vmax.f32 %v7781_v62, %v5259_v4  ;;  %v5260_v9 = vmul.f32 0.2, %v7783_v5 }
 0x27f   : > { %v6874_v10 = vpack.c.bf16 %v5389_v6, %v5389_v6  ;;  %v5390_v11 = vmax.f32 %v7782_v2, %v5262_v7  ;;  %v7398_v12 = vpop.f32.mrb[76].mxu1 }
 0x280   : > { %v6872_v13 = vpack.c.bf16 %v5387_v8, %v5387_v8  ;;  %v5388_v14 = vmax.f32 %v7783_v5, %v5260_v9  ;;  %v7658_v15 = vpop.f32.mrb[76].mxu0  ;;  %v2332_v16 = vpop.f32.mrb[77].mxu1 }
 0x281   : > { %6030 = vst.msk [vmem:[%s8912_s28 + $0x128] sm:$0xf] %vm5955_vm2, %v6874_v10  ;;  %v6875_v17 = vpack.c.bf16 %v5390_v11, %v5390_v11  ;;  %v7784_v18 = vadd.f32 %v7658_v15, %v7398_v12  ;;  %v4852_v19 = vpop.f32.mrb[77].mxu0  ;;  %v7399_v20 = vpop.f32.mrb[78].mxu1 }
 0x282   : > { %6028 = vst.msk [vmem:[%s8912_s28 + $0x120] sm:$0xf] %vm5955_vm2, %v6872_v13  ;;  %v6873_v21 = vpack.c.bf16 %v5388_v14, %v5388_v14  ;;  %v7785_v22 = vadd.f32 %v4852_v19, %v2332_v16  ;;  %v7659_v23 = vpop.f32.mrb[78].mxu0  ;;  %v2335_v24 = vpop.f32.mrb[79].mxu1 }
 0x283   : > { %6031 = vst.msk [vmem:[%s8912_s28 + $0x12c] sm:$0xf] %vm5955_vm2, %v6875_v17  ;;  %v5265_v25 = vmul.f32 0.2, %v7784_v18  ;;  %v7786_v26 = vadd.f32 %v7659_v23, %v7399_v20  ;;  %v4855_v27 = vpop.f32.mrb[79].mxu0 }
 0x284   : > { %6029 = vst.msk [vmem:[%s8912_s28 + $0x124] sm:$0xf] %vm5955_vm2, %v6873_v21  ;;  %v5263_v28 = vmul.f32 0.2, %v7785_v22  ;;  %v7787_v29 = vadd.f32 %v4855_v27, %v2335_v24 }
 0x285   : > { %v5393_v30 = vmax.f32 %v7784_v18, %v5265_v25  ;;  %v5266_v31 = vmul.f32 0.2, %v7786_v26 }
 0x286   : > { %v5391_v32 = vmax.f32 %v7785_v22, %v5263_v28  ;;  %v5264_v33 = vmul.f32 0.2, %v7787_v29 }
 0x287   : > { %v6878_v34 = vpack.c.bf16 %v5393_v30, %v5393_v30  ;;  %v5394_v35 = vmax.f32 %v7786_v26, %v5266_v31  ;;  %v7402_v36 = vpop.f32.mrb[80].mxu1 }
 0x288   : > { %v6876_v37 = vpack.c.bf16 %v5391_v32, %v5391_v32  ;;  %v5392_v38 = vmax.f32 %v7787_v29, %v5264_v33  ;;  %v7662_v39 = vpop.f32.mrb[80].mxu0  ;;  %v2348_v40 = vpop.f32.mrb[81].mxu1 }
 0x289   : > { %6034 = vst.msk [vmem:[%s8912_s28 + $0x138] sm:$0xf] %vm5955_vm2, %v6878_v34  ;;  %v6879_v41 = vpack.c.bf16 %v5394_v35, %v5394_v35  ;;  %v7788_v42 = vadd.f32 %v7662_v39, %v7402_v36  ;;  %v4868_v43 = vpop.f32.mrb[81].mxu0  ;;  %v7403_v44 = vpop.f32.mrb[82].mxu1 }
 0x28a   : > { %6032 = vst.msk [vmem:[%s8912_s28 + $0x130] sm:$0xf] %vm5955_vm2, %v6876_v37  ;;  %v6877_v45 = vpack.c.bf16 %v5392_v38, %v5392_v38  ;;  %v7789_v46 = vadd.f32 %v4868_v43, %v2348_v40  ;;  %v7663_v47 = vpop.f32.mrb[82].mxu0  ;;  %v2351_v48 = vpop.f32.mrb[83].mxu1 }
 0x28b   : > { %6035 = vst.msk [vmem:[%s8912_s28 + $0x13c] sm:$0xf] %vm5955_vm2, %v6879_v41  ;;  %v5269_v49 = vmul.f32 0.2, %v7788_v42  ;;  %v7790_v50 = vadd.f32 %v7663_v47, %v7403_v44  ;;  %v4871_v51 = vpop.f32.mrb[83].mxu0 }
 0x28c   : > { %6033 = vst.msk [vmem:[%s8912_s28 + $0x134] sm:$0xf] %vm5955_vm2, %v6877_v45  ;;  %v5267_v52 = vmul.f32 0.2, %v7789_v46  ;;  %v7791_v53 = vadd.f32 %v4871_v51, %v2351_v48 }
 0x28d   : > { %v5397_v54 = vmax.f32 %v7788_v42, %v5269_v49  ;;  %v5270_v55 = vmul.f32 0.2, %v7790_v50 }
 0x28e   : > { %v5395_v56 = vmax.f32 %v7789_v46, %v5267_v52  ;;  %v5268_v57 = vmul.f32 0.2, %v7791_v53 }
 0x28f   : > { %v6882_v58 = vpack.c.bf16 %v5397_v54, %v5397_v54  ;;  %v5398_v59 = vmax.f32 %v7790_v50, %v5270_v55  ;;  %v7406_v60 = vpop.f32.mrb[84].mxu1 }
 0x290   : > { %v6880_v61 = vpack.c.bf16 %v5395_v56, %v5395_v56  ;;  %v5396_v62 = vmax.f32 %v7791_v53, %v5268_v57  ;;  %v7666_v63 = vpop.f32.mrb[84].mxu0  ;;  %v2364_v0 = vpop.f32.mrb[85].mxu1 }
 0x291   : > { %6038 = vst.msk [vmem:[%s8912_s28 + $0x148] sm:$0xf] %vm5955_vm2, %v6882_v58  ;;  %v6883_v1 = vpack.c.bf16 %v5398_v59, %v5398_v59  ;;  %v7792_v2 = vadd.f32 %v7666_v63, %v7406_v60  ;;  %v4884_v3 = vpop.f32.mrb[85].mxu0  ;;  %v7407_v4 = vpop.f32.mrb[86].mxu1 }
 0x292   : > { %6036 = vst.msk [vmem:[%s8912_s28 + $0x140] sm:$0xf] %vm5955_vm2, %v6880_v61  ;;  %v6881_v5 = vpack.c.bf16 %v5396_v62, %v5396_v62  ;;  %v7793_v6 = vadd.f32 %v4884_v3, %v2364_v0  ;;  %v7667_v7 = vpop.f32.mrb[86].mxu0  ;;  %v2367_v8 = vpop.f32.mrb[87].mxu1 }
 0x293   : > { %6039 = vst.msk [vmem:[%s8912_s28 + $0x14c] sm:$0xf] %vm5955_vm2, %v6883_v1  ;;  %v5273_v9 = vmul.f32 0.2, %v7792_v2  ;;  %v7794_v10 = vadd.f32 %v7667_v7, %v7407_v4  ;;  %v4887_v11 = vpop.f32.mrb[87].mxu0 }
 0x294   : > { %6037 = vst.msk [vmem:[%s8912_s28 + $0x144] sm:$0xf] %vm5955_vm2, %v6881_v5  ;;  %v5271_v12 = vmul.f32 0.2, %v7793_v6  ;;  %v7795_v13 = vadd.f32 %v4887_v11, %v2367_v8 }
 0x295   : > { %v5401_v14 = vmax.f32 %v7792_v2, %v5273_v9  ;;  %v5274_v15 = vmul.f32 0.2, %v7794_v10 }
 0x296   : > { %v5399_v16 = vmax.f32 %v7793_v6, %v5271_v12  ;;  %v5272_v17 = vmul.f32 0.2, %v7795_v13 }
 0x297   : > { %v6886_v18 = vpack.c.bf16 %v5401_v14, %v5401_v14  ;;  %v5402_v19 = vmax.f32 %v7794_v10, %v5274_v15  ;;  %v7410_v20 = vpop.f32.mrb[88].mxu1 }
 0x298   : > { %v6884_v21 = vpack.c.bf16 %v5399_v16, %v5399_v16  ;;  %v5400_v22 = vmax.f32 %v7795_v13, %v5272_v17  ;;  %v7670_v23 = vpop.f32.mrb[88].mxu0  ;;  %v2380_v24 = vpop.f32.mrb[89].mxu1 }
 0x299   : > { %6042 = vst.msk [vmem:[%s8912_s28 + $0x158] sm:$0xf] %vm5955_vm2, %v6886_v18  ;;  %v6887_v25 = vpack.c.bf16 %v5402_v19, %v5402_v19  ;;  %v7796_v26 = vadd.f32 %v7670_v23, %v7410_v20  ;;  %v4900_v27 = vpop.f32.mrb[89].mxu0  ;;  %v7411_v28 = vpop.f32.mrb[90].mxu1 }
 0x29a   : > { %6040 = vst.msk [vmem:[%s8912_s28 + $0x150] sm:$0xf] %vm5955_vm2, %v6884_v21  ;;  %v6885_v29 = vpack.c.bf16 %v5400_v22, %v5400_v22  ;;  %v7797_v30 = vadd.f32 %v4900_v27, %v2380_v24  ;;  %v7671_v31 = vpop.f32.mrb[90].mxu0  ;;  %v2383_v32 = vpop.f32.mrb[91].mxu1 }
 0x29b   : > { %6043 = vst.msk [vmem:[%s8912_s28 + $0x15c] sm:$0xf] %vm5955_vm2, %v6887_v25  ;;  %v5277_v33 = vmul.f32 0.2, %v7796_v26  ;;  %v7798_v34 = vadd.f32 %v7671_v31, %v7411_v28  ;;  %v4903_v35 = vpop.f32.mrb[91].mxu0 }
 0x29c   : > { %6041 = vst.msk [vmem:[%s8912_s28 + $0x154] sm:$0xf] %vm5955_vm2, %v6885_v29  ;;  %v5275_v36 = vmul.f32 0.2, %v7797_v30  ;;  %v7799_v37 = vadd.f32 %v4903_v35, %v2383_v32 }
 0x29d   : > { %v5405_v38 = vmax.f32 %v7796_v26, %v5277_v33  ;;  %v5278_v39 = vmul.f32 0.2, %v7798_v34 }
 0x29e   : > { %v5403_v40 = vmax.f32 %v7797_v30, %v5275_v36  ;;  %v5276_v41 = vmul.f32 0.2, %v7799_v37 }
 0x29f   : > { %v6890_v42 = vpack.c.bf16 %v5405_v38, %v5405_v38  ;;  %v5406_v43 = vmax.f32 %v7798_v34, %v5278_v39  ;;  %v7414_v44 = vpop.f32.mrb[92].mxu1 }
 0x2a0   : > { %v6888_v45 = vpack.c.bf16 %v5403_v40, %v5403_v40  ;;  %v5404_v46 = vmax.f32 %v7799_v37, %v5276_v41  ;;  %v7674_v47 = vpop.f32.mrb[92].mxu0  ;;  %v2396_v48 = vpop.f32.mrb[93].mxu1 }
 0x2a1   : > { %6046 = vst.msk [vmem:[%s8912_s28 + $0x168] sm:$0xf] %vm5955_vm2, %v6890_v42  ;;  %v6891_v49 = vpack.c.bf16 %v5406_v43, %v5406_v43  ;;  %v7800_v50 = vadd.f32 %v7674_v47, %v7414_v44  ;;  %v4916_v51 = vpop.f32.mrb[93].mxu0  ;;  %v7415_v52 = vpop.f32.mrb[94].mxu1 }
 0x2a2   : > { %6044 = vst.msk [vmem:[%s8912_s28 + $0x160] sm:$0xf] %vm5955_vm2, %v6888_v45  ;;  %v6889_v53 = vpack.c.bf16 %v5404_v46, %v5404_v46  ;;  %v7801_v54 = vadd.f32 %v4916_v51, %v2396_v48  ;;  %v7675_v55 = vpop.f32.mrb[94].mxu0  ;;  %v2399_v56 = vpop.f32.mrb[95].mxu1 }
 0x2a3   : > { %6047 = vst.msk [vmem:[%s8912_s28 + $0x16c] sm:$0xf] %vm5955_vm2, %v6891_v49  ;;  %v5281_v57 = vmul.f32 0.2, %v7800_v50  ;;  %v7802_v58 = vadd.f32 %v7675_v55, %v7415_v52  ;;  %v4919_v59 = vpop.f32.mrb[95].mxu0 }
 0x2a4   : > { %6045 = vst.msk [vmem:[%s8912_s28 + $0x164] sm:$0xf] %vm5955_vm2, %v6889_v53  ;;  %v5279_v60 = vmul.f32 0.2, %v7801_v54  ;;  %v7803_v61 = vadd.f32 %v4919_v59, %v2399_v56 }
 0x2a5   : > { %v5409_v62 = vmax.f32 %v7800_v50, %v5281_v57  ;;  %v5282_v63 = vmul.f32 0.2, %v7802_v58 }
 0x2a6   : > { %v5407_v0 = vmax.f32 %v7801_v54, %v5279_v60  ;;  %v5280_v1 = vmul.f32 0.2, %v7803_v61 }
 0x2a7   : > { %v6894_v2 = vpack.c.bf16 %v5409_v62, %v5409_v62  ;;  %v5410_v3 = vmax.f32 %v7802_v58, %v5282_v63  ;;  %v7418_v4 = vpop.f32.mrb[96].mxu1 }
 0x2a8   : > { %v6892_v5 = vpack.c.bf16 %v5407_v0, %v5407_v0  ;;  %v5408_v6 = vmax.f32 %v7803_v61, %v5280_v1  ;;  %v7678_v7 = vpop.f32.mrb[96].mxu0  ;;  %v2412_v8 = vpop.f32.mrb[97].mxu1 }
 0x2a9   : > { %6050 = vst.msk [vmem:[%s8912_s28 + $0x178] sm:$0xf] %vm5955_vm2, %v6894_v2  ;;  %v6895_v9 = vpack.c.bf16 %v5410_v3, %v5410_v3  ;;  %v7804_v10 = vadd.f32 %v7678_v7, %v7418_v4  ;;  %v4932_v11 = vpop.f32.mrb[97].mxu0  ;;  %v7419_v12 = vpop.f32.mrb[98].mxu1 }
 0x2aa   : > { %6048 = vst.msk [vmem:[%s8912_s28 + $0x170] sm:$0xf] %vm5955_vm2, %v6892_v5  ;;  %v6893_v13 = vpack.c.bf16 %v5408_v6, %v5408_v6  ;;  %v7805_v14 = vadd.f32 %v4932_v11, %v2412_v8  ;;  %v7679_v15 = vpop.f32.mrb[98].mxu0  ;;  %v2415_v16 = vpop.f32.mrb[99].mxu1 }
 0x2ab   : > { %6051 = vst.msk [vmem:[%s8912_s28 + $0x17c] sm:$0xf] %vm5955_vm2, %v6895_v9  ;;  %v5285_v17 = vmul.f32 0.2, %v7804_v10  ;;  %v7806_v18 = vadd.f32 %v7679_v15, %v7419_v12  ;;  %v4935_v19 = vpop.f32.mrb[99].mxu0 }
 0x2ac   : > { %6049 = vst.msk [vmem:[%s8912_s28 + $0x174] sm:$0xf] %vm5955_vm2, %v6893_v13  ;;  %v5283_v20 = vmul.f32 0.2, %v7805_v14  ;;  %v7807_v21 = vadd.f32 %v4935_v19, %v2415_v16 }
 0x2ad   : > { %v5413_v22 = vmax.f32 %v7804_v10, %v5285_v17  ;;  %v5286_v23 = vmul.f32 0.2, %v7806_v18 }
 0x2ae   : > { %v5411_v24 = vmax.f32 %v7805_v14, %v5283_v20  ;;  %v5284_v25 = vmul.f32 0.2, %v7807_v21 }
 0x2af   : > { %v6898_v26 = vpack.c.bf16 %v5413_v22, %v5413_v22  ;;  %v5414_v27 = vmax.f32 %v7806_v18, %v5286_v23  ;;  %v7422_v28 = vpop.f32.mrb[100].mxu1 }
 0x2b0   : > { %v6896_v29 = vpack.c.bf16 %v5411_v24, %v5411_v24  ;;  %v5412_v30 = vmax.f32 %v7807_v21, %v5284_v25  ;;  %v7682_v31 = vpop.f32.mrb[100].mxu0  ;;  %v2428_v32 = vpop.f32.mrb[101].mxu1 }
 0x2b1   : > { %6054 = vst.msk [vmem:[%s8912_s28 + $0x188] sm:$0xf] %vm5955_vm2, %v6898_v26  ;;  %v6899_v33 = vpack.c.bf16 %v5414_v27, %v5414_v27  ;;  %v7808_v34 = vadd.f32 %v7682_v31, %v7422_v28  ;;  %v4948_v35 = vpop.f32.mrb[101].mxu0  ;;  %v7423_v36 = vpop.f32.mrb[102].mxu1 }
 0x2b2   : > { %6052 = vst.msk [vmem:[%s8912_s28 + $0x180] sm:$0xf] %vm5955_vm2, %v6896_v29  ;;  %v6897_v37 = vpack.c.bf16 %v5412_v30, %v5412_v30  ;;  %v7809_v38 = vadd.f32 %v4948_v35, %v2428_v32  ;;  %v7683_v39 = vpop.f32.mrb[102].mxu0  ;;  %v2431_v40 = vpop.f32.mrb[103].mxu1 }
 0x2b3   : > { %6055 = vst.msk [vmem:[%s8912_s28 + $0x18c] sm:$0xf] %vm5955_vm2, %v6899_v33  ;;  %v5289_v41 = vmul.f32 0.2, %v7808_v34  ;;  %v7810_v42 = vadd.f32 %v7683_v39, %v7423_v36  ;;  %v4951_v43 = vpop.f32.mrb[103].mxu0 }
 0x2b4   : > { %6053 = vst.msk [vmem:[%s8912_s28 + $0x184] sm:$0xf] %vm5955_vm2, %v6897_v37  ;;  %v5287_v44 = vmul.f32 0.2, %v7809_v38  ;;  %v7811_v45 = vadd.f32 %v4951_v43, %v2431_v40 }
 0x2b5   : > { %v5417_v46 = vmax.f32 %v7808_v34, %v5289_v41  ;;  %v5290_v47 = vmul.f32 0.2, %v7810_v42 }
 0x2b6   : > { %v5415_v48 = vmax.f32 %v7809_v38, %v5287_v44  ;;  %v5288_v49 = vmul.f32 0.2, %v7811_v45 }
 0x2b7   : > { %v6902_v50 = vpack.c.bf16 %v5417_v46, %v5417_v46  ;;  %v5418_v51 = vmax.f32 %v7810_v42, %v5290_v47  ;;  %v7426_v52 = vpop.f32.mrb[104].mxu1 }
 0x2b8   : > { %v6900_v53 = vpack.c.bf16 %v5415_v48, %v5415_v48  ;;  %v5416_v54 = vmax.f32 %v7811_v45, %v5288_v49  ;;  %v7686_v55 = vpop.f32.mrb[104].mxu0  ;;  %v2444_v56 = vpop.f32.mrb[105].mxu1 }
 0x2b9   : > { %6058 = vst.msk [vmem:[%s8912_s28 + $0x198] sm:$0xf] %vm5955_vm2, %v6902_v50  ;;  %v6903_v57 = vpack.c.bf16 %v5418_v51, %v5418_v51  ;;  %v7812_v58 = vadd.f32 %v7686_v55, %v7426_v52  ;;  %v4964_v59 = vpop.f32.mrb[105].mxu0  ;;  %v7427_v60 = vpop.f32.mrb[106].mxu1 }
 0x2ba   : > { %6056 = vst.msk [vmem:[%s8912_s28 + $0x190] sm:$0xf] %vm5955_vm2, %v6900_v53  ;;  %v6901_v61 = vpack.c.bf16 %v5416_v54, %v5416_v54  ;;  %v7813_v62 = vadd.f32 %v4964_v59, %v2444_v56  ;;  %v7687_v63 = vpop.f32.mrb[106].mxu0  ;;  %v2447_v0 = vpop.f32.mrb[107].mxu1 }
 0x2bb   : > { %6059 = vst.msk [vmem:[%s8912_s28 + $0x19c] sm:$0xf] %vm5955_vm2, %v6903_v57  ;;  %v5293_v1 = vmul.f32 0.2, %v7812_v58  ;;  %v7814_v2 = vadd.f32 %v7687_v63, %v7427_v60  ;;  %v4967_v3 = vpop.f32.mrb[107].mxu0 }
 0x2bc   : > { %6057 = vst.msk [vmem:[%s8912_s28 + $0x194] sm:$0xf] %vm5955_vm2, %v6901_v61  ;;  %v5291_v4 = vmul.f32 0.2, %v7813_v62  ;;  %v7815_v5 = vadd.f32 %v4967_v3, %v2447_v0 }
 0x2bd   : > { %v5421_v6 = vmax.f32 %v7812_v58, %v5293_v1  ;;  %v5294_v7 = vmul.f32 0.2, %v7814_v2 }
 0x2be   : > { %v5419_v8 = vmax.f32 %v7813_v62, %v5291_v4  ;;  %v5292_v9 = vmul.f32 0.2, %v7815_v5 }
 0x2bf   : > { %v6906_v10 = vpack.c.bf16 %v5421_v6, %v5421_v6  ;;  %v5422_v11 = vmax.f32 %v7814_v2, %v5294_v7  ;;  %v7430_v12 = vpop.f32.mrb[108].mxu1 }
 0x2c0   : > { %v6904_v13 = vpack.c.bf16 %v5419_v8, %v5419_v8  ;;  %v5420_v14 = vmax.f32 %v7815_v5, %v5292_v9  ;;  %v7690_v15 = vpop.f32.mrb[108].mxu0  ;;  %v2460_v16 = vpop.f32.mrb[109].mxu1 }
 0x2c1   : > { %6062 = vst.msk [vmem:[%s8912_s28 + $0x1a8] sm:$0xf] %vm5955_vm2, %v6906_v10  ;;  %v6907_v17 = vpack.c.bf16 %v5422_v11, %v5422_v11  ;;  %v7816_v18 = vadd.f32 %v7690_v15, %v7430_v12  ;;  %v4980_v19 = vpop.f32.mrb[109].mxu0  ;;  %v7431_v20 = vpop.f32.mrb[110].mxu1 }
 0x2c2   : > { %6060 = vst.msk [vmem:[%s8912_s28 + $0x1a0] sm:$0xf] %vm5955_vm2, %v6904_v13  ;;  %v6905_v21 = vpack.c.bf16 %v5420_v14, %v5420_v14  ;;  %v7817_v22 = vadd.f32 %v4980_v19, %v2460_v16  ;;  %v7691_v23 = vpop.f32.mrb[110].mxu0  ;;  %v2463_v24 = vpop.f32.mrb[111].mxu1 }
 0x2c3   : > { %6063 = vst.msk [vmem:[%s8912_s28 + $0x1ac] sm:$0xf] %vm5955_vm2, %v6907_v17  ;;  %v5297_v25 = vmul.f32 0.2, %v7816_v18  ;;  %v7818_v26 = vadd.f32 %v7691_v23, %v7431_v20  ;;  %v4983_v27 = vpop.f32.mrb[111].mxu0 }
 0x2c4   : > { %6061 = vst.msk [vmem:[%s8912_s28 + $0x1a4] sm:$0xf] %vm5955_vm2, %v6905_v21  ;;  %v5295_v28 = vmul.f32 0.2, %v7817_v22  ;;  %v7819_v29 = vadd.f32 %v4983_v27, %v2463_v24 }
 0x2c5   : > { %v5425_v30 = vmax.f32 %v7816_v18, %v5297_v25  ;;  %v5298_v31 = vmul.f32 0.2, %v7818_v26 }
 0x2c6   : > { %v5423_v32 = vmax.f32 %v7817_v22, %v5295_v28  ;;  %v5296_v33 = vmul.f32 0.2, %v7819_v29 }
 0x2c7   : > { %v6910_v34 = vpack.c.bf16 %v5425_v30, %v5425_v30  ;;  %v5426_v35 = vmax.f32 %v7818_v26, %v5298_v31  ;;  %v7434_v36 = vpop.f32.mrb[112].mxu1 }
 0x2c8   : > { %v6908_v37 = vpack.c.bf16 %v5423_v32, %v5423_v32  ;;  %v5424_v38 = vmax.f32 %v7819_v29, %v5296_v33  ;;  %v7694_v39 = vpop.f32.mrb[112].mxu0  ;;  %v2476_v40 = vpop.f32.mrb[113].mxu1 }
 0x2c9   : > { %6066 = vst.msk [vmem:[%s8912_s28 + $0x1b8] sm:$0xf] %vm5955_vm2, %v6910_v34  ;;  %v6911_v41 = vpack.c.bf16 %v5426_v35, %v5426_v35  ;;  %v7820_v42 = vadd.f32 %v7694_v39, %v7434_v36  ;;  %v4996_v43 = vpop.f32.mrb[113].mxu0  ;;  %v7435_v44 = vpop.f32.mrb[114].mxu1 }
 0x2ca   : > { %6064 = vst.msk [vmem:[%s8912_s28 + $0x1b0] sm:$0xf] %vm5955_vm2, %v6908_v37  ;;  %v6909_v45 = vpack.c.bf16 %v5424_v38, %v5424_v38  ;;  %v7821_v46 = vadd.f32 %v4996_v43, %v2476_v40  ;;  %v7695_v47 = vpop.f32.mrb[114].mxu0  ;;  %v2479_v48 = vpop.f32.mrb[115].mxu1 }
 0x2cb   : > { %6067 = vst.msk [vmem:[%s8912_s28 + $0x1bc] sm:$0xf] %vm5955_vm2, %v6911_v41  ;;  %v5301_v49 = vmul.f32 0.2, %v7820_v42  ;;  %v7822_v50 = vadd.f32 %v7695_v47, %v7435_v44  ;;  %v4999_v51 = vpop.f32.mrb[115].mxu0 }
 0x2cc   : > { %6065 = vst.msk [vmem:[%s8912_s28 + $0x1b4] sm:$0xf] %vm5955_vm2, %v6909_v45  ;;  %v5299_v52 = vmul.f32 0.2, %v7821_v46  ;;  %v7823_v53 = vadd.f32 %v4999_v51, %v2479_v48 }
 0x2cd   : > { %v5429_v54 = vmax.f32 %v7820_v42, %v5301_v49  ;;  %v5302_v55 = vmul.f32 0.2, %v7822_v50 }
 0x2ce   : > { %v5427_v56 = vmax.f32 %v7821_v46, %v5299_v52  ;;  %v5300_v57 = vmul.f32 0.2, %v7823_v53 }
 0x2cf   : > { %v6914_v58 = vpack.c.bf16 %v5429_v54, %v5429_v54  ;;  %v5430_v59 = vmax.f32 %v7822_v50, %v5302_v55  ;;  %v7438_v60 = vpop.f32.mrb[116].mxu1 }
 0x2d0   : > { %v6912_v61 = vpack.c.bf16 %v5427_v56, %v5427_v56  ;;  %v5428_v62 = vmax.f32 %v7823_v53, %v5300_v57  ;;  %v7698_v63 = vpop.f32.mrb[116].mxu0  ;;  %v2492_v0 = vpop.f32.mrb[117].mxu1 }
 0x2d1   : > { %6070 = vst.msk [vmem:[%s8912_s28 + $0x1c8] sm:$0xf] %vm5955_vm2, %v6914_v58  ;;  %v6915_v1 = vpack.c.bf16 %v5430_v59, %v5430_v59  ;;  %v7824_v2 = vadd.f32 %v7698_v63, %v7438_v60  ;;  %v5012_v3 = vpop.f32.mrb[117].mxu0  ;;  %v7439_v4 = vpop.f32.mrb[118].mxu1 }
 0x2d2   : > { %6068 = vst.msk [vmem:[%s8912_s28 + $0x1c0] sm:$0xf] %vm5955_vm2, %v6912_v61  ;;  %v6913_v5 = vpack.c.bf16 %v5428_v62, %v5428_v62  ;;  %v7825_v6 = vadd.f32 %v5012_v3, %v2492_v0  ;;  %v7699_v7 = vpop.f32.mrb[118].mxu0  ;;  %v2495_v8 = vpop.f32.mrb[119].mxu1 }
 0x2d3   : > { %6071 = vst.msk [vmem:[%s8912_s28 + $0x1cc] sm:$0xf] %vm5955_vm2, %v6915_v1  ;;  %v5305_v9 = vmul.f32 0.2, %v7824_v2  ;;  %v7826_v10 = vadd.f32 %v7699_v7, %v7439_v4  ;;  %v5015_v11 = vpop.f32.mrb[119].mxu0 }
 0x2d4   : > { %6069 = vst.msk [vmem:[%s8912_s28 + $0x1c4] sm:$0xf] %vm5955_vm2, %v6913_v5  ;;  %v5303_v12 = vmul.f32 0.2, %v7825_v6  ;;  %v7827_v13 = vadd.f32 %v5015_v11, %v2495_v8 }
 0x2d5   : > { %v5433_v14 = vmax.f32 %v7824_v2, %v5305_v9  ;;  %v5306_v15 = vmul.f32 0.2, %v7826_v10 }
 0x2d6   : > { %v5431_v16 = vmax.f32 %v7825_v6, %v5303_v12  ;;  %v5304_v17 = vmul.f32 0.2, %v7827_v13 }
 0x2d7   : > { %v6918_v18 = vpack.c.bf16 %v5433_v14, %v5433_v14  ;;  %v5434_v19 = vmax.f32 %v7826_v10, %v5306_v15  ;;  %v7442_v20 = vpop.f32.mrb[120].mxu1 }
 0x2d8   : > { %v6916_v21 = vpack.c.bf16 %v5431_v16, %v5431_v16  ;;  %v5432_v22 = vmax.f32 %v7827_v13, %v5304_v17  ;;  %v7702_v23 = vpop.f32.mrb[120].mxu0  ;;  %v2508_v24 = vpop.f32.mrb[121].mxu1 }
 0x2d9   : > { %6074 = vst.msk [vmem:[%s8912_s28 + $0x1d8] sm:$0xf] %vm5955_vm2, %v6918_v18  ;;  %v6919_v25 = vpack.c.bf16 %v5434_v19, %v5434_v19  ;;  %v7828_v26 = vadd.f32 %v7702_v23, %v7442_v20  ;;  %v5028_v27 = vpop.f32.mrb[121].mxu0  ;;  %v7443_v28 = vpop.f32.mrb[122].mxu1 }
 0x2da   : > { %6072 = vst.msk [vmem:[%s8912_s28 + $0x1d0] sm:$0xf] %vm5955_vm2, %v6916_v21  ;;  %v6917_v29 = vpack.c.bf16 %v5432_v22, %v5432_v22  ;;  %v7829_v30 = vadd.f32 %v5028_v27, %v2508_v24  ;;  %v7703_v31 = vpop.f32.mrb[122].mxu0  ;;  %v2511_v32 = vpop.f32.mrb[123].mxu1 }
 0x2db   : > { %6075 = vst.msk [vmem:[%s8912_s28 + $0x1dc] sm:$0xf] %vm5955_vm2, %v6919_v25  ;;  %v5309_v33 = vmul.f32 0.2, %v7828_v26  ;;  %v7830_v34 = vadd.f32 %v7703_v31, %v7443_v28  ;;  %v5031_v35 = vpop.f32.mrb[123].mxu0 }
 0x2dc   : > { %6073 = vst.msk [vmem:[%s8912_s28 + $0x1d4] sm:$0xf] %vm5955_vm2, %v6917_v29  ;;  %v5307_v36 = vmul.f32 0.2, %v7829_v30  ;;  %v7831_v37 = vadd.f32 %v5031_v35, %v2511_v32 }
 0x2dd   : > { %v5437_v38 = vmax.f32 %v7828_v26, %v5309_v33  ;;  %v5310_v39 = vmul.f32 0.2, %v7830_v34 }
 0x2de   : > { %v5435_v40 = vmax.f32 %v7829_v30, %v5307_v36  ;;  %v5308_v41 = vmul.f32 0.2, %v7831_v37 }
 0x2df   : > { %v6922_v42 = vpack.c.bf16 %v5437_v38, %v5437_v38  ;;  %v5438_v43 = vmax.f32 %v7830_v34, %v5310_v39  ;;  %v7446_v44 = vpop.f32.mrb[124].mxu1 }
 0x2e0   : > { %v6920_v45 = vpack.c.bf16 %v5435_v40, %v5435_v40  ;;  %v5436_v46 = vmax.f32 %v7831_v37, %v5308_v41  ;;  %v7706_v47 = vpop.f32.mrb[124].mxu0  ;;  %v2524_v48 = vpop.f32.mrb[125].mxu1 }
 0x2e1   : > { %6078 = vst.msk [vmem:[%s8912_s28 + $0x1e8] sm:$0xf] %vm5955_vm2, %v6922_v42  ;;  %v6923_v49 = vpack.c.bf16 %v5438_v43, %v5438_v43  ;;  %v7832_v50 = vadd.f32 %v7706_v47, %v7446_v44  ;;  %v5044_v51 = vpop.f32.mrb[125].mxu0  ;;  %v7447_v52 = vpop.f32.mrb[126].mxu1 }
 0x2e2   : > { %6076 = vst.msk [vmem:[%s8912_s28 + $0x1e0] sm:$0xf] %vm5955_vm2, %v6920_v45  ;;  %v6921_v53 = vpack.c.bf16 %v5436_v46, %v5436_v46  ;;  %v7833_v54 = vadd.f32 %v5044_v51, %v2524_v48  ;;  %v7707_v55 = vpop.f32.mrb[126].mxu0  ;;  %v2527_v56 = vpop.f32.mrb[127].mxu1 }
 0x2e3   : > { %6079 = vst.msk [vmem:[%s8912_s28 + $0x1ec] sm:$0xf] %vm5955_vm2, %v6923_v49  ;;  %v5313_v57 = vmul.f32 0.2, %v7832_v50  ;;  %v7834_v58 = vadd.f32 %v7707_v55, %v7447_v52  ;;  %v5047_v59 = vpop.f32.mrb[127].mxu0 }
 0x2e4   : > { %6077 = vst.msk [vmem:[%s8912_s28 + $0x1e4] sm:$0xf] %vm5955_vm2, %v6921_v53  ;;  %v5311_v60 = vmul.f32 0.2, %v7833_v54  ;;  %v7835_v61 = vadd.f32 %v5047_v59, %v2527_v56 }
 0x2e5   : > { %v5441_v62 = vmax.f32 %v7832_v50, %v5313_v57  ;;  %v5314_v63 = vmul.f32 0.2, %v7834_v58 }
 0x2e6   : > { %v5439_v0 = vmax.f32 %v7833_v54, %v5311_v60  ;;  %v5312_v1 = vmul.f32 0.2, %v7835_v61 }
 0x2e7   : > { %v6926_v2 = vpack.c.bf16 %v5441_v62, %v5441_v62  ;;  %v5442_v3 = vmax.f32 %v7834_v58, %v5314_v63 }
 0x2e8   : > { %v6924_v4 = vpack.c.bf16 %v5439_v0, %v5439_v0  ;;  %v5440_v5 = vmax.f32 %v7835_v61, %v5312_v1 }
 0x2e9   : > { %6082 = vst.msk [vmem:[%s8912_s28 + $0x1f8] sm:$0xf] %vm5955_vm2, %v6926_v2  ;;  %v6927_v6 = vpack.c.bf16 %v5442_v3, %v5442_v3 }
 0x2ea   : > { %6080 = vst.msk [vmem:[%s8912_s28 + $0x1f0] sm:$0xf] %vm5955_vm2, %v6924_v4  ;;  %v6925_v7 = vpack.c.bf16 %v5440_v5, %v5440_v5 }
 0x2eb   : > { %6083 = vst.msk [vmem:[%s8912_s28 + $0x1fc] sm:$0xf] %vm5955_vm2, %v6927_v6 }
 0x2ec   : > { %6081 = vst.msk [vmem:[%s8912_s28 + $0x1f4] sm:$0xf] %vm5955_vm2, %v6925_v7 }
 0x2ed PF: > { %s12_s9 = sadd.s32 1, %s8371_s9  }
 0x2ee   : > { %p9_p5 = scmp.ge.s32.totalorder %s12_s9, 4  }
 0x2f0   :  { %11 = sbr.rel (!%p9_p5) target bundleno = 1 (0x1), region = 61 }

// kernel: discriminator_forward.6
= control target key start
LH: loop header
LB: loop body
LE: loop exit
PB: predicated region body
PF: predicated region fallthrough
CT: control target
= control target key end

     0   :  { %s3437_s15 = smov 0   ;;  %s4841_s0 = inlined_call_operand.vmem [shape: bf16[2,544,32], index: 0, kind: input, shape index: {}]   ;;  %s4842_s1 = inlined_call_operand.vmem [shape: bf16[4,32,16], index: 1, kind: input, shape index: {}]   ;;  %s4843_s2 = inlined_call_operand.vmem [shape: f32[1,16], index: 2, kind: input, shape index: {}]   ;;  %s4844_s3 = inlined_call_operand.vmem [shape: f32[1,16], index: 3, kind: input, shape index: {}]   ;;  %s4845_s4 = inlined_call_operand.vmem [shape: bf16[512,16], index: 4, kind: output, shape index: {}]  }
   0x1 LB: > { %s3443_s16 = sadd.s32 4294967295, %s3410_s15   ;;  %p2726_p0 = scmp.ge.s32.totalorder %s3410_s15, 1  ;;  %s3410_s15 = sphi %s3437_s15, %s14_s15  }
   0x2   : > { %p157_p1 = scmp.lt.s32.totalorder %s3410_s15, 3 }
   0x4   : > { %p158_p2 = pnand %p2726_p0, %p157_p1 }
   0x5   : > { %v3330_v0 = vld [vmem:[%s4842_s1 + $0x10] sm:$0xff] (!%p158_p2)   ;;  %p178_p3 = scmp.lt.s32.totalorder (!%p158_p2), %s3443_s16, 1  ;;  %v3331_v1 = vld [vmem:[%s4842_s1 + $0x20] sm:$0xff] (!%p158_p2)   ;;  %v3332_v2 = vld [vmem:[%s4842_s1 + $0x18] sm:$0xff] (!%p158_p2)   ;;  %vm349_vm0 = vcmask (!%p158_p2), 261120   ;;  %s2876_s12 = sshll.u32 (!%p158_p2), %s3443_s16, 8 }
   0x6   : > { %161 = sbr.rel (%p158_p2) target bundleno = 754 (0x2f2), region = 36  ;;  %3081 = vmatprep.subr.bf16.mxu1 (!%p158_p2), %v3330_v0  ;;  %3153 = vmatprep.subr.bf16.mxu0 (!%p158_p2), %v3331_v1  ;;  %v3333_v3 = vld [vmem:[%s4842_s1 + $0x28] sm:$0xff] (!%p158_p2)   ;;  %v3337_v4 = vld [vmem:[%s4842_s1] sm:$0xff] (!%p158_p2)   ;;  %v3339_v5 = vld [vmem:[%s4842_s1 + $0x30] sm:$0xff] (!%p158_p2)   ;;  %vm1602_vm1 = vcmask (!%p158_p2), 130048   ;;  %s3607_s13 = scalar_lea.vmem (!%p158_p2), [#allocation2], %s2876_s12 }
   0x7   : > { %3082 = vmatpush3.bf16.msra.mxu1 (!%p158_p2), %v3330_v0  ;;  %3154 = vmatpush3.bf16.msra.mxu0 (!%p158_p2), %v3331_v1  ;;  %v3355_v8 = vld [vmem:[%s4842_s1 + $0x8] sm:$0xff] (!%p158_p2)   ;;  %v3357_v21 = vld [vmem:[%s4842_s1 + $0x38] sm:$0xff] (!%p158_p2)   ;;  %p2877_p4 = scmp.ne.s32.totalorder (!%p158_p2), %s3443_s16, 1 }
   0x8   : > { %3083 = vmatprep.subr.bf16.mxu1 (!%p158_p2), %v3332_v2  ;;  %3155 = vmatprep.subr.bf16.mxu0 (!%p158_p2), %v3333_v3 }
   0xb   : > { %3084 = vmatpush3.bf16.msra.mxu1 (!%p158_p2), %v3332_v2  ;;  %3156 = vmatpush3.bf16.msra.mxu0 (!%p158_p2), %v3333_v3 }
   0xc   : > { %3117 = vmatprep.subr.bf16.mxu1 (!%p158_p2), %v3337_v4  ;;  %3189 = vmatprep.subr.bf16.mxu0 (!%p158_p2), %v3339_v5 }
   0xd   : > { %s179_s23 = scalar_select %p178_p3, %s3443_s16, 1 }
   0xf   : > { %s3321_s26 = smul.u32 272, %s179_s23 }
  0x11   : > { %s3470_s7 = scalar_lea.vmem %s4841_s0, %s3321_s26 }
  0x12   : > { %v3334_v6 = vld [vmem:[%s3470_s7 + $0x88] sm:$0xff]   ;;  %v3336_v9 = vld [vmem:[%s3470_s7 + $0x90] sm:$0xff]   ;;  %v3340_v11 = vld [vmem:[%s3470_s7 + $0x98] sm:$0xff]  }
  0x13   : > { %v3335_v7 = vld [vmem:[%s3470_s7 + $0x8] sm:$0xff]   ;;  %3085 = vmatprep.mubr.msk.bf16.mxu1 %vm349_vm0, %v3334_v6  ;;  %v3338_v10 = vld [vmem:[%s3470_s7 + $0x10] sm:$0xff]   ;;  %v3341_v12 = vld [vmem:[%s3470_s7 + $0x18] sm:$0xff]  }
  0x14   : > { %3157 = vmatprep.mubr.msk.bf16.mxu0 %vm349_vm0, %v3335_v7  ;;  %3086 = vmatmul.mubr.msk.bf16.vlgmr.msra.gmra.mrb[0].mxu1 %vm349_vm0, %v3336_v9  ;;  %v3342_v13 = vld [vmem:[%s3470_s7 + $0xa0] sm:$0xff]   ;;  %v3344_v15 = vld [vmem:[%s3470_s7 + $0xa8] sm:$0xff]   ;;  %v3346_v17 = vld [vmem:[%s3470_s7 + $0xb0] sm:$0xff]  }
  0x15   : > { %3158 = vmatmul.mubr.msk.bf16.vlgmr.msra.gmra.mrb[0].mxu0 %vm349_vm0, %v3338_v10  ;;  %3118 = vmatpush3.bf16.msra.mxu1 %v3337_v4  ;;  %v3343_v14 = vld [vmem:[%s3470_s7 + $0x20] sm:$0xff]   ;;  %v3345_v16 = vld [vmem:[%s3470_s7 + $0x28] sm:$0xff]   ;;  %v3347_v18 = vld [vmem:[%s3470_s7 + $0x30] sm:$0xff]  }
  0x16   : > { %3190 = vmatpush3.bf16.msra.mxu0 %v3339_v5  ;;  %3089 = vmatprep.mubr.msk.bf16.mxu1 %vm349_vm0, %v3340_v11  ;;  %v3348_v19 = vld [vmem:[%s3470_s7 + $0xb8] sm:$0xff]   ;;  %v3350_v22 = vld [vmem:[%s3470_s7 + $0xc0] sm:$0xff]   ;;  %v3352_v24 = vld [vmem:[%s3470_s7 + $0xc8] sm:$0xff]  }
  0x17   : > { %3161 = vmatprep.mubr.msk.bf16.mxu0 %vm349_vm0, %v3341_v12  ;;  %3119 = vmatprep.subr.bf16.mxu1 %v3355_v8  ;;  %v3349_v20 = vld [vmem:[%s3470_s7 + $0x38] sm:$0xff]   ;;  %v3351_v23 = vld [vmem:[%s3470_s7 + $0x40] sm:$0xff]   ;;  %v3353_v25 = vld [vmem:[%s3470_s7 + $0x48] sm:$0xff]  }
  0x18   : > { %3191 = vmatprep.subr.bf16.mxu0 %v3357_v21  ;;  %v3354_v26 = vld [vmem:[%s3470_s7 + $0xd0] sm:$0xff]   ;;  %v3358_v28 = vld [vmem:[%s3470_s7 + $0xd8] sm:$0xff]   ;;  %v3360_v30 = vld [vmem:[%s3470_s7 + $0xe0] sm:$0xff]  }
  0x19   : > { %3120 = vmatpush3.bf16.msra.mxu1 %v3355_v8  ;;  %v3356_v27 = vld [vmem:[%s3470_s7 + $0x50] sm:$0xff]   ;;  %v3359_v29 = vld [vmem:[%s3470_s7 + $0x58] sm:$0xff]   ;;  %v3361_v31 = vld [vmem:[%s3470_s7 + $0x60] sm:$0xff]  }
  0x1a   : > { %3192 = vmatpush3.bf16.msra.mxu0 %v3357_v21  ;;  %v3362_v32 = vld [vmem:[%s3470_s7 + $0xe8] sm:$0xff]   ;;  %v3364_v34 = vld [vmem:[%s3470_s7 + $0xf0] sm:$0xff]   ;;  %v3366_v36 = vld [vmem:[%s3470_s7 + $0xf8] sm:$0xff]  }
  0x1b   : > { %v3363_v33 = vld [vmem:[%s3470_s7 + $0x68] sm:$0xff]   ;;  %v3365_v35 = vld [vmem:[%s3470_s7 + $0x70] sm:$0xff]   ;;  %v3367_v37 = vld [vmem:[%s3470_s7 + $0x78] sm:$0xff]  }
  0x1c   : > { %3090 = vmatmul.mubr.msk.bf16.gmra.mrb[4].mxu1 %vm349_vm0, %v3342_v13  ;;  %v3368_v38 = vld [vmem:[%s3470_s7 + $0x100] sm:$0xff]   ;;  %v3371_v41 = vld [vmem:[%s3470_s7 + $0x90] sm:$0xff]   ;;  %v3372_v42 = vld [vmem:[%s3470_s7 + $0x8] sm:$0xff]  }
  0x1d   : > { %3162 = vmatmul.mubr.msk.bf16.gmra.mrb[4].mxu0 %vm349_vm0, %v3343_v14  ;;  %3093 = vmatprep.mubr.msk.bf16.mxu1 %vm349_vm0, %v3344_v15  ;;  %v3369_v39 = vld [vmem:[%s3470_s7 + $0x80] sm:$0xff]   ;;  %v3373_v43 = vld [vmem:[%s3470_s7 + $0x98] sm:$0xff]   ;;  %v3374_v44 = vld [vmem:[%s3470_s7 + $0x10] sm:$0xff]  }
  0x1e   : > { %3165 = vmatprep.mubr.msk.bf16.mxu0 %vm349_vm0, %v3345_v16  ;;  %v3370_v40 = vld [vmem:[%s3470_s7] sm:$0xff]   ;;  %v3376_v46 = vld [vmem:[%s3470_s7 + $0x18] sm:$0xff]   ;;  %v3377_v47 = vld [vmem:[%s3470_s7 + $0xa8] sm:$0xff]  }
  0x1f   : > { %v3375_v45 = vld [vmem:[%s3470_s7 + $0xa0] sm:$0xff]   ;;  %v3379_v49 = vld [vmem:[%s3470_s7 + $0xb0] sm:$0xff]   ;;  %v3380_v50 = vld [vmem:[%s3470_s7 + $0x28] sm:$0xff]  }
  0x20   : > { %v3378_v48 = vld [vmem:[%s3470_s7 + $0x20] sm:$0xff]   ;;  %v3381_v51 = vld [vmem:[%s3470_s7 + $0xb8] sm:$0xff]   ;;  %v3382_v52 = vld [vmem:[%s3470_s7 + $0x30] sm:$0xff]  }
  0x21   : > { %v3383_v53 = vld [vmem:[%s3470_s7 + $0xc0] sm:$0xff]   ;;  %v3384_v54 = vld [vmem:[%s3470_s7 + $0x38] sm:$0xff]   ;;  %v3385_v55 = vld [vmem:[%s3470_s7 + $0xc8] sm:$0xff]  }
  0x22   : > { %v3386_v56 = vld [vmem:[%s3470_s7 + $0x40] sm:$0xff]   ;;  %v3387_v57 = vld [vmem:[%s3470_s7 + $0xd0] sm:$0xff]   ;;  %v3388_v58 = vld [vmem:[%s3470_s7 + $0x48] sm:$0xff]  }
  0x23   : > { %v3389_v59 = vld [vmem:[%s3470_s7 + $0xd8] sm:$0xff]   ;;  %v3390_v60 = vld [vmem:[%s3470_s7 + $0x50] sm:$0xff]   ;;  %v3391_v61 = vld [vmem:[%s3470_s7 + $0xe0] sm:$0xff]  }
  0x24   : > { %3094 = vmatmul.mubr.msk.bf16.gmra.mrb[8].mxu1 %vm349_vm0, %v3346_v17  ;;  %v3392_v62 = vld [vmem:[%s3470_s7 + $0x58] sm:$0xff]   ;;  %v3393_v63 = vld [vmem:[%s3470_s7 + $0xe8] sm:$0xff]   ;;  %v3394_v0 = vld [vmem:[%s3470_s7 + $0x60] sm:$0xff]  }
  0x25   : > { %3166 = vmatmul.mubr.msk.bf16.gmra.mrb[8].mxu0 %vm349_vm0, %v3347_v18  ;;  %3097 = vmatprep.mubr.msk.bf16.mxu1 %vm349_vm0, %v3348_v19  ;;  %v3395_v1 = vld [vmem:[%s3470_s7 + $0xf0] sm:$0xff]   ;;  %v3396_v2 = vld [vmem:[%s3470_s7 + $0x68] sm:$0xff]   ;;  %v3397_v3 = vld [vmem:[%s3470_s7 + $0xf8] sm:$0xff]  }
  0x26   : > { %3169 = vmatprep.mubr.msk.bf16.mxu0 %vm349_vm0, %v3349_v20  ;;  %v3398_v4 = vld [vmem:[%s3470_s7 + $0x70] sm:$0xff]   ;;  %v3399_v5 = vld [vmem:[%s3470_s7 + $0x100] sm:$0xff]   ;;  %v3400_v6 = vld [vmem:[%s3470_s7 + $0x78] sm:$0xff]  }
  0x27   : > { %v3401_v7 = vld [vmem:[%s3470_s7 + $0x108] sm:$0xff]  }
  0x2c   : > { %3098 = vmatmul.mubr.msk.bf16.gmra.mrb[12].mxu1 %vm349_vm0, %v3350_v22 }
  0x2d   : > { %3170 = vmatmul.mubr.msk.bf16.gmra.mrb[12].mxu0 %vm349_vm0, %v3351_v23  ;;  %3101 = vmatprep.mubr.msk.bf16.mxu1 %vm349_vm0, %v3352_v24 }
  0x2e   : > { %3173 = vmatprep.mubr.msk.bf16.mxu0 %vm349_vm0, %v3353_v25 }
  0x34   : > { %3102 = vmatmul.mubr.msk.bf16.gmra.mrb[16].mxu1 %vm349_vm0, %v3354_v26 }
  0x35   : > { %3174 = vmatmul.mubr.msk.bf16.gmra.mrb[16].mxu0 %vm349_vm0, %v3356_v27  ;;  %3105 = vmatprep.mubr.msk.bf16.mxu1 %vm349_vm0, %v3358_v28 }
  0x36   : > { %3177 = vmatprep.mubr.msk.bf16.mxu0 %vm349_vm0, %v3359_v29 }
  0x3c   : > { %3106 = vmatmul.mubr.msk.bf16.gmra.mrb[20].mxu1 %vm349_vm0, %v3360_v30 }
  0x3d   : > { %3178 = vmatmul.mubr.msk.bf16.gmra.mrb[20].mxu0 %vm349_vm0, %v3361_v31  ;;  %3109 = vmatprep.mubr.msk.bf16.mxu1 %vm349_vm0, %v3362_v32 }
  0x3e   : > { %3181 = vmatprep.mubr.msk.bf16.mxu0 %vm349_vm0, %v3363_v33 }
  0x44   : > { %3110 = vmatmul.mubr.msk.bf16.gmra.mrb[24].mxu1 %vm349_vm0, %v3364_v34 }
  0x45   : > { %3182 = vmatmul.mubr.msk.bf16.gmra.mrb[24].mxu0 %vm349_vm0, %v3365_v35  ;;  %3113 = vmatprep.mubr.msk.bf16.mxu1 %vm349_vm0, %v3366_v36 }
  0x46   : > { %3185 = vmatprep.mubr.msk.bf16.mxu0 %vm349_vm0, %v3367_v37 }
  0x4c   : > { %3114 = vmatmul.mubr.msk.bf16.gmra.mrb[28].mxu1 %vm349_vm0, %v3368_v38 }
  0x4d   : > { %3186 = vmatmul.mubr.msk.bf16.gmra.mrb[28].mxu0 %vm349_vm0, %v3369_v39  ;;  %3121 = vmatprep.mubr.msk.bf16.mxu1 %vm349_vm0, %v3370_v40 }
  0x4e   : > { %3193 = vmatprep.mubr.msk.bf16.mxu0 %vm349_vm0, %v3371_v41 }
  0x54   : > { %3122 = vmatmul.mubr.msk.bf16.vlgmr.msra.gmra.mrb[0].mxu1 %vm349_vm0, %v3372_v42 }
  0x55   : > { %3194 = vmatmul.mubr.msk.bf16.vlgmr.msra.gmra.mrb[0].mxu0 %vm349_vm0, %v3373_v43  ;;  %3125 = vmatprep.mubr.msk.bf16.mxu1 %vm349_vm0, %v3374_v44 }
  0x56   : > { %3197 = vmatprep.mubr.msk.bf16.mxu0 %vm349_vm0, %v3375_v45 }
  0x5c   : > { %3126 = vmatmul.mubr.msk.bf16.gmra.mrb[4].mxu1 %vm349_vm0, %v3376_v46 }
  0x5d   : > { %3198 = vmatmul.mubr.msk.bf16.gmra.mrb[4].mxu0 %vm349_vm0, %v3377_v47  ;;  %3129 = vmatprep.mubr.msk.bf16.mxu1 %vm349_vm0, %v3378_v48 }
  0x5e   : > { %3201 = vmatprep.mubr.msk.bf16.mxu0 %vm349_vm0, %v3379_v49 }
  0x64   : > { %3130 = vmatmul.mubr.msk.bf16.gmra.mrb[8].mxu1 %vm349_vm0, %v3380_v50 }
  0x65   : > { %3202 = vmatmul.mubr.msk.bf16.gmra.mrb[8].mxu0 %vm349_vm0, %v3381_v51  ;;  %3133 = vmatprep.mubr.msk.bf16.mxu1 %vm349_vm0, %v3382_v52 }
  0x66   : > { %3205 = vmatprep.mubr.msk.bf16.mxu0 %vm349_vm0, %v3383_v53 }
  0x6c   : > { %3134 = vmatmul.mubr.msk.bf16.gmra.mrb[12].mxu1 %vm349_vm0, %v3384_v54 }
  0x6d   : > { %3206 = vmatmul.mubr.msk.bf16.gmra.mrb[12].mxu0 %vm349_vm0, %v3385_v55  ;;  %3137 = vmatprep.mubr.msk.bf16.mxu1 %vm349_vm0, %v3386_v56 }
  0x6e   : > { %3209 = vmatprep.mubr.msk.bf16.mxu0 %vm349_vm0, %v3387_v57 }
  0x74   : > { %3138 = vmatmul.mubr.msk.bf16.gmra.mrb[16].mxu1 %vm349_vm0, %v3388_v58 }
  0x75   : > { %3210 = vmatmul.mubr.msk.bf16.gmra.mrb[16].mxu0 %vm349_vm0, %v3389_v59  ;;  %3141 = vmatprep.mubr.msk.bf16.mxu1 %vm349_vm0, %v3390_v60 }
  0x76   : > { %3213 = vmatprep.mubr.msk.bf16.mxu0 %vm349_vm0, %v3391_v61 }
  0x7c   : > { %3142 = vmatmul.mubr.msk.bf16.gmra.mrb[20].mxu1 %vm349_vm0, %v3392_v62 }
  0x7d   : > { %3214 = vmatmul.mubr.msk.bf16.gmra.mrb[20].mxu0 %vm349_vm0, %v3393_v63  ;;  %3145 = vmatprep.mubr.msk.bf16.mxu1 %vm349_vm0, %v3394_v0 }
  0x7e   : > { %3217 = vmatprep.mubr.msk.bf16.mxu0 %vm349_vm0, %v3395_v1 }
  0x84   : > { %3146 = vmatmul.mubr.msk.bf16.gmra.mrb[24].mxu1 %vm349_vm0, %v3396_v2 }
  0x85   : > { %3218 = vmatmul.mubr.msk.bf16.gmra.mrb[24].mxu0 %vm349_vm0, %v3397_v3  ;;  %3149 = vmatprep.mubr.msk.bf16.mxu1 %vm349_vm0, %v3398_v4 }
  0x86   : > { %3221 = vmatprep.mubr.msk.bf16.mxu0 %vm349_vm0, %v3399_v5 }
  0x8c   : > { %3150 = vmatmul.mubr.msk.bf16.gmra.mrb[28].mxu1 %vm349_vm0, %v3400_v6 }
  0x8d   : > { %3222 = vmatmul.mubr.msk.bf16.gmra.mrb[28].mxu0 %vm349_vm0, %v3401_v7 }
 0x127   : > { %v3123_v8 = vpop.f32.mrb[0].mxu1 }
 0x128   : > { %v3195_v9 = vpop.f32.mrb[0].mxu0  ;;  %v733_v10 = vpop.f32.mrb[1].mxu1 }
 0x129   : > { %v3225_v11 = vadd.f32 %v3195_v9, %v3123_v8  ;;  %v1441_v12 = vpop.f32.mrb[1].mxu0  ;;  %v3124_v13 = vpop.f32.mrb[2].mxu1 }
 0x12a   : > { %v3226_v14 = vadd.f32 %v1441_v12, %v733_v10  ;;  %v3196_v15 = vpop.f32.mrb[2].mxu0  ;;  %v736_v16 = vpop.f32.mrb[3].mxu1 }
 0x12b   : > { %1605 = vst.msk [vmem:[%s3607_s13 + $0x10] sm:$0xff] %vm1602_vm1, %v3225_v11  ;;  %v3227_v17 = vadd.f32 %v3196_v15, %v3124_v13  ;;  %v1444_v18 = vpop.f32.mrb[3].mxu0 }
 0x12c   : > { %1603 = vst.msk [vmem:[%s3607_s13] sm:$0xff] %vm1602_vm1, %v3226_v14  ;;  %v3228_v19 = vadd.f32 %v1444_v18, %v736_v16 }
 0x12d   : > { %1606 = vst.msk [vmem:[%s3607_s13 + $0x18] sm:$0xff] %vm1602_vm1, %v3227_v17 }
 0x12e   : > { %1604 = vst.msk [vmem:[%s3607_s13 + $0x8] sm:$0xff] %vm1602_vm1, %v3228_v19 }
 0x12f   : > { %v3127_v20 = vpop.f32.mrb[4].mxu1 }
 0x130   : > { %v3199_v21 = vpop.f32.mrb[4].mxu0  ;;  %v749_v22 = vpop.f32.mrb[5].mxu1 }
 0x131   : > { %v3229_v23 = vadd.f32 %v3199_v21, %v3127_v20  ;;  %v1457_v24 = vpop.f32.mrb[5].mxu0  ;;  %v3128_v25 = vpop.f32.mrb[6].mxu1 }
 0x132   : > { %v3230_v26 = vadd.f32 %v1457_v24, %v749_v22  ;;  %v3200_v27 = vpop.f32.mrb[6].mxu0  ;;  %v752_v28 = vpop.f32.mrb[7].mxu1 }
 0x133   : > { %1609 = vst.msk [vmem:[%s3607_s13 + $0x30] sm:$0xff] %vm1602_vm1, %v3229_v23  ;;  %v3231_v29 = vadd.f32 %v3200_v27, %v3128_v25  ;;  %v1460_v30 = vpop.f32.mrb[7].mxu0 }
 0x134   : > { %1607 = vst.msk [vmem:[%s3607_s13 + $0x20] sm:$0xff] %vm1602_vm1, %v3230_v26  ;;  %v3232_v31 = vadd.f32 %v1460_v30, %v752_v28 }
 0x135   : > { %1610 = vst.msk [vmem:[%s3607_s13 + $0x38] sm:$0xff] %vm1602_vm1, %v3231_v29 }
 0x136   : > { %1608 = vst.msk [vmem:[%s3607_s13 + $0x28] sm:$0xff] %vm1602_vm1, %v3232_v31 }
 0x137   : > { %v3131_v32 = vpop.f32.mrb[8].mxu1 }
 0x138   : > { %v3203_v33 = vpop.f32.mrb[8].mxu0  ;;  %v765_v34 = vpop.f32.mrb[9].mxu1 }
 0x139   : > { %v3233_v35 = vadd.f32 %v3203_v33, %v3131_v32  ;;  %v1473_v36 = vpop.f32.mrb[9].mxu0  ;;  %v3132_v37 = vpop.f32.mrb[10].mxu1 }
 0x13a   : > { %v3234_v38 = vadd.f32 %v1473_v36, %v765_v34  ;;  %v3204_v39 = vpop.f32.mrb[10].mxu0  ;;  %v768_v40 = vpop.f32.mrb[11].mxu1 }
 0x13b   : > { %1613 = vst.msk [vmem:[%s3607_s13 + $0x50] sm:$0xff] %vm1602_vm1, %v3233_v35  ;;  %v3235_v41 = vadd.f32 %v3204_v39, %v3132_v37  ;;  %v1476_v42 = vpop.f32.mrb[11].mxu0 }
 0x13c   : > { %1611 = vst.msk [vmem:[%s3607_s13 + $0x40] sm:$0xff] %vm1602_vm1, %v3234_v38  ;;  %v3236_v43 = vadd.f32 %v1476_v42, %v768_v40 }
 0x13d   : > { %1614 = vst.msk [vmem:[%s3607_s13 + $0x58] sm:$0xff] %vm1602_vm1, %v3235_v41 }
 0x13e   : > { %1612 = vst.msk [vmem:[%s3607_s13 + $0x48] sm:$0xff] %vm1602_vm1, %v3236_v43 }
 0x13f   : > { %v3135_v44 = vpop.f32.mrb[12].mxu1 }
 0x140   : > { %v3207_v45 = vpop.f32.mrb[12].mxu0  ;;  %v781_v46 = vpop.f32.mrb[13].mxu1 }
 0x141   : > { %v3237_v47 = vadd.f32 %v3207_v45, %v3135_v44  ;;  %v1489_v48 = vpop.f32.mrb[13].mxu0  ;;  %v3136_v49 = vpop.f32.mrb[14].mxu1 }
 0x142   : > { %v3238_v50 = vadd.f32 %v1489_v48, %v781_v46  ;;  %v3208_v51 = vpop.f32.mrb[14].mxu0  ;;  %v784_v52 = vpop.f32.mrb[15].mxu1 }
 0x143   : > { %1617 = vst.msk [vmem:[%s3607_s13 + $0x70] sm:$0xff] %vm1602_vm1, %v3237_v47  ;;  %v3239_v53 = vadd.f32 %v3208_v51, %v3136_v49  ;;  %v1492_v54 = vpop.f32.mrb[15].mxu0 }
 0x144   : > { %1615 = vst.msk [vmem:[%s3607_s13 + $0x60] sm:$0xff] %vm1602_vm1, %v3238_v50  ;;  %v3240_v55 = vadd.f32 %v1492_v54, %v784_v52 }
 0x145   : > { %1618 = vst.msk [vmem:[%s3607_s13 + $0x78] sm:$0xff] %vm1602_vm1, %v3239_v53 }
 0x146   : > { %1616 = vst.msk [vmem:[%s3607_s13 + $0x68] sm:$0xff] %vm1602_vm1, %v3240_v55 }
 0x147   : > { %v3139_v56 = vpop.f32.mrb[16].mxu1 }
 0x148   : > { %v3211_v57 = vpop.f32.mrb[16].mxu0  ;;  %v797_v58 = vpop.f32.mrb[17].mxu1 }
 0x149   : > { %v3241_v59 = vadd.f32 %v3211_v57, %v3139_v56  ;;  %v1505_v60 = vpop.f32.mrb[17].mxu0  ;;  %v3140_v61 = vpop.f32.mrb[18].mxu1 }
 0x14a   : > { %v3242_v62 = vadd.f32 %v1505_v60, %v797_v58  ;;  %v3212_v63 = vpop.f32.mrb[18].mxu0  ;;  %v800_v0 = vpop.f32.mrb[19].mxu1 }
 0x14b   : > { %1621 = vst.msk [vmem:[%s3607_s13 + $0x90] sm:$0xff] %vm1602_vm1, %v3241_v59  ;;  %v3243_v1 = vadd.f32 %v3212_v63, %v3140_v61  ;;  %v1508_v2 = vpop.f32.mrb[19].mxu0 }
 0x14c   : > { %1619 = vst.msk [vmem:[%s3607_s13 + $0x80] sm:$0xff] %vm1602_vm1, %v3242_v62  ;;  %v3244_v3 = vadd.f32 %v1508_v2, %v800_v0 }
 0x14d   : > { %1622 = vst.msk [vmem:[%s3607_s13 + $0x98] sm:$0xff] %vm1602_vm1, %v3243_v1 }
 0x14e   : > { %1620 = vst.msk [vmem:[%s3607_s13 + $0x88] sm:$0xff] %vm1602_vm1, %v3244_v3 }
 0x14f   : > { %v3143_v4 = vpop.f32.mrb[20].mxu1 }
 0x150   : > { %v3215_v5 = vpop.f32.mrb[20].mxu0  ;;  %v813_v6 = vpop.f32.mrb[21].mxu1 }
 0x151   : > { %v3245_v7 = vadd.f32 %v3215_v5, %v3143_v4  ;;  %v1521_v8 = vpop.f32.mrb[21].mxu0  ;;  %v3144_v9 = vpop.f32.mrb[22].mxu1 }
 0x152   : > { %v3246_v10 = vadd.f32 %v1521_v8, %v813_v6  ;;  %v3216_v11 = vpop.f32.mrb[22].mxu0  ;;  %v816_v12 = vpop.f32.mrb[23].mxu1 }
 0x153   : > { %1625 = vst.msk [vmem:[%s3607_s13 + $0xb0] sm:$0xff] %vm1602_vm1, %v3245_v7  ;;  %v3247_v13 = vadd.f32 %v3216_v11, %v3144_v9  ;;  %v1524_v14 = vpop.f32.mrb[23].mxu0 }
 0x154   : > { %1623 = vst.msk [vmem:[%s3607_s13 + $0xa0] sm:$0xff] %vm1602_vm1, %v3246_v10  ;;  %v3248_v15 = vadd.f32 %v1524_v14, %v816_v12 }
 0x155   : > { %1626 = vst.msk [vmem:[%s3607_s13 + $0xb8] sm:$0xff] %vm1602_vm1, %v3247_v13 }
 0x156   : > { %1624 = vst.msk [vmem:[%s3607_s13 + $0xa8] sm:$0xff] %vm1602_vm1, %v3248_v15 }
 0x157   : > { %v3147_v16 = vpop.f32.mrb[24].mxu1 }
 0x158   : > { %v3219_v17 = vpop.f32.mrb[24].mxu0  ;;  %v829_v18 = vpop.f32.mrb[25].mxu1 }
 0x159   : > { %v3249_v19 = vadd.f32 %v3219_v17, %v3147_v16  ;;  %v1537_v20 = vpop.f32.mrb[25].mxu0  ;;  %v3148_v21 = vpop.f32.mrb[26].mxu1 }
 0x15a   : > { %v3250_v22 = vadd.f32 %v1537_v20, %v829_v18  ;;  %v3220_v23 = vpop.f32.mrb[26].mxu0  ;;  %v832_v24 = vpop.f32.mrb[27].mxu1 }
 0x15b   : > { %1629 = vst.msk [vmem:[%s3607_s13 + $0xd0] sm:$0xff] %vm1602_vm1, %v3249_v19  ;;  %v3251_v25 = vadd.f32 %v3220_v23, %v3148_v21  ;;  %v1540_v26 = vpop.f32.mrb[27].mxu0 }
 0x15c   : > { %1627 = vst.msk [vmem:[%s3607_s13 + $0xc0] sm:$0xff] %vm1602_vm1, %v3250_v22  ;;  %v3252_v27 = vadd.f32 %v1540_v26, %v832_v24 }
 0x15d   : > { %1630 = vst.msk [vmem:[%s3607_s13 + $0xd8] sm:$0xff] %vm1602_vm1, %v3251_v25 }
 0x15e   : > { %1628 = vst.msk [vmem:[%s3607_s13 + $0xc8] sm:$0xff] %vm1602_vm1, %v3252_v27 }
 0x15f   : > { %v3151_v28 = vpop.f32.mrb[28].mxu1 }
 0x160   : > { %v3223_v29 = vpop.f32.mrb[28].mxu0  ;;  %v845_v30 = vpop.f32.mrb[29].mxu1  ;;  %1638 = sbr.rel (%p2877_p4) target bundleno = 754 (0x2f2), region = 40 }
 0x161   : > { %v3253_v31 = vadd.f32 %v3223_v29, %v3151_v28  ;;  %v1553_v32 = vpop.f32.mrb[29].mxu0  ;;  %v3152_v33 = vpop.f32.mrb[30].mxu1 }
 0x162   : > { %v3254_v34 = vadd.f32 %v1553_v32, %v845_v30  ;;  %v3224_v35 = vpop.f32.mrb[30].mxu0  ;;  %v848_v36 = vpop.f32.mrb[31].mxu1 }
 0x163   : > { %1633 = vst.msk [vmem:[%s3607_s13 + $0xf0] sm:$0xff] %vm1602_vm1, %v3253_v31  ;;  %v3255_v37 = vadd.f32 %v3224_v35, %v3152_v33  ;;  %v1556_v38 = vpop.f32.mrb[31].mxu0 }
 0x164   : > { %1631 = vst.msk [vmem:[%s3607_s13 + $0xe0] sm:$0xff] %vm1602_vm1, %v3254_v34  ;;  %v3256_v39 = vadd.f32 %v1556_v38, %v848_v36 }
 0x165   : > { %1634 = vst.msk [vmem:[%s3607_s13 + $0xf8] sm:$0xff] %vm1602_vm1, %v3255_v37 }
 0x166   : > { %1632 = vst.msk [vmem:[%s3607_s13 + $0xe8] sm:$0xff] %vm1602_vm1, %v3256_v39 }
 0x167   : > { %vm2628_vm2 = vcmask 125952  }
 0x16d   : > { %v3674_v40 = vld [vmem:[#allocation2] sm:$0xff]  ;;  %v3676_v41 = vld [vmem:[#allocation2 + $0x8] sm:$0xff]  ;;  %v3678_v42 = vld [vmem:[#allocation2 + $0x10] sm:$0xff] }
 0x16e   : > { %v3680_v43 = vld [vmem:[#allocation2 + $0x18] sm:$0xff]  ;;  %v1703_v44 = vsel %vm1602_vm1, %v3674_v40, 0.0  ;;  %v1704_v45 = vsel %vm1602_vm1, %v3676_v41, 0.0  ;;  %v1706_v46 = vsel %vm1602_vm1, %v3678_v42, 0.0  ;;  %v3688_v47 = vld [vmem:[#allocation2 + $0x20] sm:$0xff]  ;;  %v3692_v50 = vld [vmem:[#allocation2 + $0x28] sm:$0xff] }
 0x16f   : > { %v1705_v48 = vadd.f32 %v1704_v45, %v1703_v44  ;;  %v1708_v49 = vsel %vm1602_vm1, %v3680_v43, 0.0  ;;  %v1710_v52 = vsel %vm1602_vm1, %v3688_v47, 0.0  ;;  %v3696_v53 = vld [vmem:[#allocation2 + $0x30] sm:$0xff]  ;;  %v1712_v55 = vsel %vm1602_vm1, %v3692_v50, 0.0  ;;  %v3700_v56 = vld [vmem:[#allocation2 + $0x38] sm:$0xff]  ;;  %v3704_v59 = vld [vmem:[#allocation2 + $0x40] sm:$0xff] }
 0x170   : > { %v1714_v58 = vsel %vm1602_vm1, %v3696_v53, 0.0  ;;  %v1716_v61 = vsel %vm1602_vm1, %v3700_v56, 0.0  ;;  %v3708_v62 = vld [vmem:[#allocation2 + $0x48] sm:$0xff]  ;;  %v1718_v0 = vsel %vm1602_vm1, %v3704_v59, 0.0  ;;  %v3712_v1 = vld [vmem:[#allocation2 + $0x50] sm:$0xff]  ;;  %v3716_v4 = vld [vmem:[#allocation2 + $0x58] sm:$0xff] }
 0x171   : > { %v1707_v51 = vadd.f32 %v1706_v46, %v1705_v48  ;;  %v1720_v3 = vsel %vm1602_vm1, %v3708_v62, 0.0  ;;  %v1722_v6 = vsel %vm1602_vm1, %v3712_v1, 0.0  ;;  %v3720_v7 = vld [vmem:[#allocation2 + $0x60] sm:$0xff]  ;;  %v1724_v9 = vsel %vm1602_vm1, %v3716_v4, 0.0  ;;  %v3724_v10 = vld [vmem:[#allocation2 + $0x68] sm:$0xff]  ;;  %v3728_v13 = vld [vmem:[#allocation2 + $0x70] sm:$0xff] }
 0x172   : > { %v1726_v12 = vsel %vm1602_vm1, %v3720_v7, 0.0  ;;  %v1728_v15 = vsel %vm1602_vm1, %v3724_v10, 0.0  ;;  %v3732_v16 = vld [vmem:[#allocation2 + $0x78] sm:$0xff]  ;;  %v1730_v18 = vsel %vm1602_vm1, %v3728_v13, 0.0  ;;  %v3736_v19 = vld [vmem:[#allocation2 + $0x80] sm:$0xff]  ;;  %v3740_v22 = vld [vmem:[#allocation2 + $0x88] sm:$0xff] }
 0x173   : > { %v1709_v54 = vadd.f32 %v1708_v49, %v1707_v51  ;;  %v1732_v21 = vsel %vm1602_vm1, %v3732_v16, 0.0  ;;  %v1734_v24 = vsel %vm1602_vm1, %v3736_v19, 0.0  ;;  %v3744_v25 = vld [vmem:[#allocation2 + $0x90] sm:$0xff]  ;;  %v1736_v27 = vsel %vm1602_vm1, %v3740_v22, 0.0  ;;  %v3748_v28 = vld [vmem:[#allocation2 + $0x98] sm:$0xff]  ;;  %v3752_v31 = vld [vmem:[#allocation2 + $0xa0] sm:$0xff] }
 0x174   : > { %v1738_v30 = vsel %vm1602_vm1, %v3744_v25, 0.0  ;;  %v1740_v33 = vsel %vm1602_vm1, %v3748_v28, 0.0  ;;  %v3756_v34 = vld [vmem:[#allocation2 + $0xa8] sm:$0xff]  ;;  %v1742_v36 = vsel %vm1602_vm1, %v3752_v31, 0.0  ;;  %v3760_v37 = vld [vmem:[#allocation2 + $0xb0] sm:$0xff]  ;;  %v3764_v44 = vld [vmem:[#allocation2 + $0xb8] sm:$0xff] }
 0x175   : > { %v1711_v57 = vadd.f32 %v1710_v52, %v1709_v54  ;;  %v1744_v39 = vsel %vm1602_vm1, %v3756_v34, 0.0  ;;  %v1746_v46 = vsel %vm1602_vm1, %v3760_v37, 0.0  ;;  %v3768_v48 = vld [vmem:[#allocation2 + $0xc0] sm:$0xff]  ;;  %v1748_v51 = vsel %vm1602_vm1, %v3764_v44, 0.0  ;;  %v3772_v52 = vld [vmem:[#allocation2 + $0xc8] sm:$0xff] }
 0x177   : > { %v1713_v60 = vadd.f32 %v1712_v55, %v1711_v57  ;;  %v1750_v55 = vsel %vm1602_vm1, %v3768_v48, 0.0  ;;  %v3776_v57 = vld [vmem:[#allocation2 + $0xd0] sm:$0xff] }
 0x179   : > { %v1715_v63 = vadd.f32 %v1714_v58, %v1713_v60  ;;  %v1752_v60 = vsel %vm1602_vm1, %v3772_v52, 0.0 }
 0x17b   : > { %v1717_v2 = vadd.f32 %v1716_v61, %v1715_v63  ;;  %v3780_v61 = vld [vmem:[#allocation2 + $0xd8] sm:$0xff] }
 0x17d   : > { %v1719_v5 = vadd.f32 %v1718_v0, %v1717_v2  ;;  %v1754_v0 = vsel %vm1602_vm1, %v3776_v57, 0.0  ;;  %v3784_v2 = vld [vmem:[#allocation2 + $0xe0] sm:$0xff] }
 0x17f   : > { %v1721_v8 = vadd.f32 %v1720_v3, %v1719_v5  ;;  %v1756_v5 = vsel %vm1602_vm1, %v3780_v61, 0.0 }
 0x181   : > { %v1723_v11 = vadd.f32 %v1722_v6, %v1721_v8  ;;  %v3788_v6 = vld [vmem:[#allocation2 + $0xe8] sm:$0xff] }
 0x183   : > { %v1725_v14 = vadd.f32 %v1724_v9, %v1723_v11  ;;  %v1758_v9 = vsel %vm1602_vm1, %v3784_v2, 0.0  ;;  %v3792_v11 = vld [vmem:[#allocation2 + $0xf0] sm:$0xff] }
 0x185   : > { %v1727_v17 = vadd.f32 %v1726_v12, %v1725_v14  ;;  %v1760_v14 = vsel %vm1602_vm1, %v3788_v6, 0.0 }
 0x187   : > { %v1729_v20 = vadd.f32 %v1728_v15, %v1727_v17  ;;  %v3796_v15 = vld [vmem:[#allocation2 + $0xf8] sm:$0xff] }
 0x189   : > { %v1731_v23 = vadd.f32 %v1730_v18, %v1729_v20  ;;  %v1762_v18 = vsel %vm1602_vm1, %v3792_v11, 0.0  ;;  %v3800_v20 = vld [vmem:[#allocation2 + $0x100] sm:$0xff] }
 0x18b   : > { %v1733_v26 = vadd.f32 %v1732_v21, %v1731_v23  ;;  %v1764_v23 = vsel %vm1602_vm1, %v3796_v15, 0.0 }
 0x18d   : > { %v1735_v29 = vadd.f32 %v1734_v24, %v1733_v26  ;;  %v3804_v24 = vld [vmem:[#allocation2 + $0x108] sm:$0xff] }
 0x18f   : > { %v1737_v32 = vadd.f32 %v1736_v27, %v1735_v29  ;;  %v1766_v27 = vsel %vm1602_vm1, %v3800_v20, 0.0  ;;  %v3808_v29 = vld [vmem:[#allocation2 + $0x110] sm:$0xff] }
 0x191   : > { %v1739_v35 = vadd.f32 %v1738_v30, %v1737_v32  ;;  %v1768_v32 = vsel %vm1602_vm1, %v3804_v24, 0.0 }
 0x193   : > { %v1741_v38 = vadd.f32 %v1740_v33, %v1739_v35  ;;  %v3812_v33 = vld [vmem:[#allocation2 + $0x118] sm:$0xff] }
 0x195   : > { %v1743_v45 = vadd.f32 %v1742_v36, %v1741_v38  ;;  %v1770_v36 = vsel %vm1602_vm1, %v3808_v29, 0.0  ;;  %v3816_v38 = vld [vmem:[#allocation2 + $0x120] sm:$0xff] }
 0x197   : > { %v1745_v49 = vadd.f32 %v1744_v39, %v1743_v45  ;;  %v1772_v45 = vsel %vm1602_vm1, %v3812_v33, 0.0 }
 0x199   : > { %v1747_v54 = vadd.f32 %v1746_v46, %v1745_v49  ;;  %v3820_v46 = vld [vmem:[#allocation2 + $0x128] sm:$0xff] }
 0x19b   : > { %v1749_v58 = vadd.f32 %v1748_v51, %v1747_v54  ;;  %v1774_v51 = vsel %vm1602_vm1, %v3816_v38, 0.0  ;;  %v3824_v54 = vld [vmem:[#allocation2 + $0x130] sm:$0xff] }
 0x19d   : > { %v1751_v63 = vadd.f32 %v1750_v55, %v1749_v58  ;;  %v1776_v58 = vsel %vm1602_vm1, %v3820_v46, 0.0 }
 0x19f   : > { %v1753_v3 = vadd.f32 %v1752_v60, %v1751_v63  ;;  %v3828_v60 = vld [vmem:[#allocation2 + $0x138] sm:$0xff] }
 0x1a1   : > { %v1755_v8 = vadd.f32 %v1754_v0, %v1753_v3  ;;  %v1778_v0 = vsel %vm1602_vm1, %v3824_v54, 0.0  ;;  %v3832_v3 = vld [vmem:[#allocation2 + $0x140] sm:$0xff] }
 0x1a3   : > { %v1757_v12 = vadd.f32 %v1756_v5, %v1755_v8  ;;  %v1780_v8 = vsel %vm1602_vm1, %v3828_v60, 0.0 }
 0x1a5   : > { %v1759_v17 = vadd.f32 %v1758_v9, %v1757_v12  ;;  %v3836_v9 = vld [vmem:[#allocation2 + $0x148] sm:$0xff] }
 0x1a7   : > { %v1761_v21 = vadd.f32 %v1760_v14, %v1759_v17  ;;  %v1782_v14 = vsel %vm1602_vm1, %v3832_v3, 0.0  ;;  %v3840_v17 = vld [vmem:[#allocation2 + $0x150] sm:$0xff] }
 0x1a9   : > { %v1763_v26 = vadd.f32 %v1762_v18, %v1761_v21  ;;  %v1784_v21 = vsel %vm1602_vm1, %v3836_v9, 0.0 }
 0x1ab   : > { %v1765_v30 = vadd.f32 %v1764_v23, %v1763_v26  ;;  %v3844_v23 = vld [vmem:[#allocation2 + $0x158] sm:$0xff] }
 0x1ad   : > { %v1767_v35 = vadd.f32 %v1766_v27, %v1765_v30  ;;  %v1786_v27 = vsel %vm1602_vm1, %v3840_v17, 0.0  ;;  %v3848_v30 = vld [vmem:[#allocation2 + $0x160] sm:$0xff] }
 0x1af   : > { %v1769_v39 = vadd.f32 %v1768_v32, %v1767_v35  ;;  %v1788_v35 = vsel %vm1602_vm1, %v3844_v23, 0.0 }
 0x1b1   : > { %v1771_v49 = vadd.f32 %v1770_v36, %v1769_v39  ;;  %v3852_v36 = vld [vmem:[#allocation2 + $0x168] sm:$0xff] }
 0x1b3   : > { %v1773_v55 = vadd.f32 %v1772_v45, %v1771_v49  ;;  %v1790_v45 = vsel %vm1602_vm1, %v3848_v30, 0.0  ;;  %v3856_v49 = vld [vmem:[#allocation2 + $0x170] sm:$0xff] }
 0x1b5   : > { %v1775_v63 = vadd.f32 %v1774_v51, %v1773_v55  ;;  %v1792_v55 = vsel %vm1602_vm1, %v3852_v36, 0.0 }
 0x1b7   : > { %v1777_v5 = vadd.f32 %v1776_v58, %v1775_v63  ;;  %v3860_v58 = vld [vmem:[#allocation2 + $0x178] sm:$0xff] }
 0x1b9   : > { %v1779_v12 = vadd.f32 %v1778_v0, %v1777_v5  ;;  %v1794_v0 = vsel %vm1602_vm1, %v3856_v49, 0.0  ;;  %v3864_v5 = vld [vmem:[#allocation2 + $0x180] sm:$0xff] }
 0x1ba   : > { %4886 = vst [vmem:[#allocation3_spill] sm:$0xff] %v3864_v5 }
 0x1bb   : > { %v1781_v18 = vadd.f32 %v1780_v8, %v1779_v12  ;;  %v1796_v12 = vsel %vm1602_vm1, %v3860_v58, 0.0 }
 0x1bd   : > { %v1783_v26 = vadd.f32 %v1782_v14, %v1781_v18  ;;  %v3868_v14 = vld [vmem:[#allocation2 + $0x188] sm:$0xff] }
 0x1be   : > { %4887 = vst [vmem:[#allocation4_spill] sm:$0xff] %v3868_v14 }
 0x1bf   : > { %v1785_v32 = vadd.f32 %v1784_v21, %v1783_v26  ;;  %v1798_v21 = vsel %vm1602_vm1, %v3864_v5, 0.0  ;;  %v3872_v26 = vld [vmem:[#allocation2 + $0x190] sm:$0xff] }
 0x1c0   : > { %4888 = vst [vmem:[#allocation5_spill] sm:$0xff] %v3872_v26 }
 0x1c1   : > { %v1787_v39 = vadd.f32 %v1786_v27, %v1785_v32  ;;  %v1800_v32 = vsel %vm1602_vm1, %v3868_v14, 0.0 }
 0x1c3   : > { %v1789_v51 = vadd.f32 %v1788_v35, %v1787_v39  ;;  %v3876_v35 = vld [vmem:[#allocation2 + $0x198] sm:$0xff] }
 0x1c4   : > { %4889 = vst [vmem:[#allocation6_spill] sm:$0xff] %v3876_v35 }
 0x1c5   : > { %v1791_v63 = vadd.f32 %v1790_v45, %v1789_v51  ;;  %v1802_v45 = vsel %vm1602_vm1, %v3872_v26, 0.0  ;;  %v3880_v51 = vld [vmem:[#allocation2 + $0x1a0] sm:$0xff] }
 0x1c6   : > { %4890 = vst [vmem:[#allocation7_spill] sm:$0xff] %v3880_v51 }
 0x1c7   : > { %v1793_v8 = vadd.f32 %v1792_v55, %v1791_v63  ;;  %v1804_v63 = vsel %vm1602_vm1, %v3876_v35, 0.0 }
 0x1c9   : > { %v1795_v18 = vadd.f32 %v1794_v0, %v1793_v8  ;;  %v3884_v0 = vld [vmem:[#allocation2 + $0x1a8] sm:$0xff] }
 0x1ca   : > { %4891 = vst [vmem:[#allocation8_spill] sm:$0xff] %v3884_v0 }
 0x1cb   : > { %v1797_v27 = vadd.f32 %v1796_v12, %v1795_v18  ;;  %v1806_v12 = vsel %vm1602_vm1, %v3880_v51, 0.0  ;;  %v3888_v18 = vld [vmem:[#allocation2 + $0x1b0] sm:$0xff] }
 0x1cc   : > { %4892 = vst [vmem:[#allocation9_spill] sm:$0xff] %v3888_v18 }
 0x1cd   : > { %v1799_v39 = vadd.f32 %v1798_v21, %v1797_v27  ;;  %v1808_v21 = vsel %vm1602_vm1, %v3884_v0, 0.0  ;;  %v3892_v27 = vld [vmem:[#allocation2 + $0x1b8] sm:$0xff] }
 0x1ce   : > { %4893 = vst [vmem:[#allocation10_spill] sm:$0xff] %v3892_v27 }
 0x1cf   : > { %v1801_v55 = vadd.f32 %v1800_v32, %v1799_v39  ;;  %v1810_v32 = vsel %vm1602_vm1, %v3888_v18, 0.0  ;;  %v3896_v39 = vld [vmem:[#allocation2 + $0x1c0] sm:$0xff] }
 0x1d0   : > { %4894 = vst [vmem:[#allocation11_spill] sm:$0xff] %v3896_v39 }
 0x1d1   : > { %v1803_v8 = vadd.f32 %v1802_v45, %v1801_v55  ;;  %v1812_v45 = vsel %vm1602_vm1, %v3892_v27, 0.0  ;;  %v3900_v55 = vld [vmem:[#allocation2 + $0x1c8] sm:$0xff] }
 0x1d2   : > { %4895 = vst [vmem:[#allocation12_spill] sm:$0xff] %v3900_v55 }
 0x1d3   : > { %v1805_v14 = vadd.f32 %v1804_v63, %v1803_v8  ;;  %v1814_v63 = vsel %vm1602_vm1, %v3896_v39, 0.0  ;;  %v3904_v8 = vld [vmem:[#allocation2 + $0x1d0] sm:$0xff] }
 0x1d4   : > { %4896 = vst [vmem:[#allocation13_spill] sm:$0xff] %v3904_v8 }
 0x1d5   : > { %v1807_v26 = vadd.f32 %v1806_v12, %v1805_v14  ;;  %v1816_v14 = vsel %vm1602_vm1, %v3900_v55, 0.0  ;;  %v3908_v12 = vld [vmem:[#allocation2 + $0x1d8] sm:$0xff] }
 0x1d6   : > { %4897 = vst [vmem:[#allocation14_spill] sm:$0xff] %v3908_v12  ;;  %v1820_v27 = vsel %vm1602_vm1, %v3908_v12, 0.0 }
 0x1d7   : > { %v1809_v35 = vadd.f32 %v1808_v21, %v1807_v26  ;;  %v1818_v26 = vsel %vm1602_vm1, %v3904_v8, 0.0 }
 0x1d9   : > { %v1811_v51 = vadd.f32 %v1810_v32, %v1809_v35  ;;  %v3914_v35 = vld [vmem:[#allocation2 + $0x1e0] sm:$0xff] }
 0x1da   : > { %4898 = vst [vmem:[#allocation15_spill] sm:$0xff] %v3914_v35 }
 0x1db   : > { %v1813_v0 = vadd.f32 %v1812_v45, %v1811_v51  ;;  %v1822_v51 = vsel %vm1602_vm1, %v3914_v35, 0.0  ;;  %v3918_v45 = vld [vmem:[#allocation2 + $0x1e8] sm:$0xff] }
 0x1dc   : > { %4899 = vst [vmem:[#allocation16_spill] sm:$0xff] %v3918_v45 }
 0x1dd   : > { %v1815_v18 = vadd.f32 %v1814_v63, %v1813_v0  ;;  %v1824_v0 = vsel %vm1602_vm1, %v3918_v45, 0.0  ;;  %v3922_v63 = vld [vmem:[#allocation2 + $0x1f0] sm:$0xff] }
 0x1df   : > { %v1817_v21 = vadd.f32 %v1816_v14, %v1815_v18  ;;  %v1826_v18 = vsel %vm1602_vm1, %v3922_v63, 0.0  ;;  %v3926_v14 = vld [vmem:[#allocation2 + $0x1f8] sm:$0xff] }
 0x1e1   : > { %v1819_v32 = vadd.f32 %v1818_v26, %v1817_v21 }
 0x1e3   : > { %v1821_v39 = vadd.f32 %v1820_v27, %v1819_v32  ;;  %v1828_v27 = vsel %vm1602_vm1, %v3926_v14, 0.0 }
 0x1e5   : > { %v1823_v55 = vadd.f32 %v1822_v51, %v1821_v39 }
 0x1e7   : > { %v1825_v8 = vadd.f32 %v1824_v0, %v1823_v55 }
 0x1e9   : > { %v1827_v12 = vadd.f32 %v1826_v18, %v1825_v8 }
 0x1eb   : > { %v1829_v26 = vadd.f32 %v1828_v27, %v1827_v12 }
 0x1ed   : > { %v1830_v21 = vrot.slane %v1829_v26, 4 }
 0x1ef   : > { %v1831_v32 = vadd.f32 %v1830_v21, %v1829_v26 }
 0x1f1   : > { %v1832_v35 = vrot.slane %v1831_v32, 2 }
 0x1f3   : > { %v1833_v39 = vadd.f32 %v1832_v35, %v1831_v32 }
 0x1f5   : > { %v1834_v51 = vrot.slane %v1833_v39, 1 }
 0x1f7   : > { %v1835_v5 = vadd.f32 %v1834_v51, %v1833_v39 }
 0x1f9   : > { %v3930_v45 = vmul.f32 0.001953125, %v1835_v5 }
 0x1fb   : > { %v3934_v55 = vsub.f32 %v3674_v40, %v3930_v45  ;;  %v3938_v0 = vsub.f32 %v3676_v41, %v3930_v45  ;;  %v3942_v8 = vsub.f32 %v3678_v42, %v3930_v45  ;;  %v3946_v12 = vsub.f32 %v3680_v43, %v3930_v45 }
 0x1fc   : > { %v3950_v5 = vsub.f32 %v3688_v47, %v3930_v45  ;;  %v3960_v42 = vsub.f32 %v3692_v50, %v3930_v45  ;;  %v3966_v47 = vsub.f32 %v3696_v53, %v3930_v45  ;;  %v3975_v50 = vsub.f32 %v3700_v56, %v3930_v45 }
 0x1fd   : > { %v1901_v40 = vmul.f32 %v3934_v55, %v3934_v55  ;;  %v1902_v35 = vmul.f32 %v3938_v0, %v3938_v0  ;;  %v1903_v41 = vmul.f32 %v3942_v8, %v3942_v8  ;;  %v1904_v43 = vmul.f32 %v3946_v12, %v3946_v12 }
 0x1fe   : > { %4900 = vst [vmem:[#allocation17_spill] sm:$0xff] %v3950_v5  ;;  %v1905_v18 = vmul.f32 %v3950_v5, %v3950_v5  ;;  %v1906_v39 = vmul.f32 %v3960_v42, %v3960_v42  ;;  %v3982_v5 = vsub.f32 %v3704_v59, %v3930_v45  ;;  %v3989_v56 = vsub.f32 %v3708_v62, %v3930_v45 }
 0x1ff   : > { %v1965_v27 = vsel %vm1602_vm1, %v1901_v40, 0.0  ;;  %v1966_v26 = vsel %vm1602_vm1, %v1902_v35, 0.0  ;;  %v1968_v21 = vsel %vm1602_vm1, %v1903_v41, 0.0  ;;  %v1970_v53 = vsel %vm1602_vm1, %v1904_v43, 0.0 }
 0x200   : > { %v1967_v32 = vadd.f32 %v1966_v26, %v1965_v27  ;;  %v1907_v40 = vmul.f32 %v3966_v47, %v3966_v47  ;;  %v1972_v35 = vsel %vm1602_vm1, %v1905_v18, 0.0  ;;  %v1908_v27 = vmul.f32 %v3975_v50, %v3975_v50 }
 0x201   : > { %v1974_v43 = vsel %vm1602_vm1, %v1906_v39, 0.0  ;;  %v3996_v59 = vsub.f32 %v3712_v1, %v3930_v45  ;;  %v4003_v62 = vsub.f32 %v3716_v4, %v3930_v45  ;;  %v4010_v1 = vsub.f32 %v3720_v7, %v3930_v45 }
 0x202   : > { %v1969_v51 = vadd.f32 %v1968_v21, %v1967_v32  ;;  %v1909_v21 = vmul.f32 %v3982_v5, %v3982_v5  ;;  %v1976_v18 = vsel %vm1602_vm1, %v1907_v40, 0.0  ;;  %v1978_v39 = vsel %vm1602_vm1, %v1908_v27, 0.0 }
 0x203   : > { %v4017_v4 = vsub.f32 %v3724_v10, %v3930_v45  ;;  %v4024_v7 = vsub.f32 %v3728_v13, %v3930_v45  ;;  %v4031_v10 = vsub.f32 %v3732_v16, %v3930_v45  ;;  %v4038_v13 = vsub.f32 %v3736_v19, %v3930_v45 }
 0x204   : > { %v1971_v41 = vadd.f32 %v1970_v53, %v1969_v51  ;;  %v1910_v53 = vmul.f32 %v3989_v56, %v3989_v56  ;;  %v1980_v40 = vsel %vm1602_vm1, %v1909_v21, 0.0  ;;  %v4045_v16 = vsub.f32 %v3740_v22, %v3930_v45 }
 0x205   : > { %v4052_v19 = vsub.f32 %v3744_v25, %v3930_v45  ;;  %v4059_v22 = vsub.f32 %v3748_v28, %v3930_v45  ;;  %v4066_v25 = vsub.f32 %v3752_v31, %v3930_v45  ;;  %v4073_v28 = vsub.f32 %v3756_v34, %v3930_v45 }
 0x206   : > { %v1973_v26 = vadd.f32 %v1972_v35, %v1971_v41  ;;  %v1911_v35 = vmul.f32 %v3996_v59, %v3996_v59  ;;  %v1982_v27 = vsel %vm1602_vm1, %v1910_v53, 0.0  ;;  %v4080_v31 = vsub.f32 %v3760_v37, %v3930_v45 }
 0x207   : > { %v4087_v34 = vsub.f32 %v3764_v44, %v3930_v45  ;;  %v4094_v37 = vsub.f32 %v3768_v48, %v3930_v45  ;;  %v4101_v44 = vsub.f32 %v3772_v52, %v3930_v45  ;;  %v4108_v48 = vsub.f32 %v3776_v57, %v3930_v45 }
 0x208   : > { %v1975_v32 = vadd.f32 %v1974_v43, %v1973_v26  ;;  %v1912_v43 = vmul.f32 %v4003_v62, %v4003_v62  ;;  %v1984_v21 = vsel %vm1602_vm1, %v1911_v35, 0.0  ;;  %v4115_v52 = vsub.f32 %v3780_v61, %v3930_v45 }
 0x209   : > { %v4122_v57 = vsub.f32 %v3784_v2, %v3930_v45  ;;  %v4129_v61 = vsub.f32 %v3788_v6, %v3930_v45  ;;  %v4136_v2 = vsub.f32 %v3792_v11, %v3930_v45  ;;  %v4143_v6 = vsub.f32 %v3796_v15, %v3930_v45 }
 0x20a   : > { %v1977_v51 = vadd.f32 %v1976_v18, %v1975_v32  ;;  %v1913_v18 = vmul.f32 %v4010_v1, %v4010_v1  ;;  %v1986_v53 = vsel %vm1602_vm1, %v1912_v43, 0.0  ;;  %v4150_v11 = vsub.f32 %v3800_v20, %v3930_v45 }
 0x20b   : > { %v4157_v15 = vsub.f32 %v3804_v24, %v3930_v45  ;;  %v4164_v20 = vsub.f32 %v3808_v29, %v3930_v45  ;;  %v4171_v24 = vsub.f32 %v3812_v33, %v3930_v45  ;;  %v4178_v29 = vsub.f32 %v3816_v38, %v3930_v45 }
 0x20c   : > { %v1979_v41 = vadd.f32 %v1978_v39, %v1977_v51  ;;  %v1914_v39 = vmul.f32 %v4017_v4, %v4017_v4  ;;  %v1988_v35 = vsel %vm1602_vm1, %v1913_v18, 0.0  ;;  %v4185_v33 = vsub.f32 %v3820_v46, %v3930_v45 }
 0x20d   : > { %v4192_v38 = vsub.f32 %v3824_v54, %v3930_v45  ;;  %v4199_v46 = vsub.f32 %v3828_v60, %v3930_v45  ;;  %v4206_v54 = vsub.f32 %v3832_v3, %v3930_v45  ;;  %v4213_v60 = vsub.f32 %v3836_v9, %v3930_v45 }
 0x20e   : > { %v1981_v26 = vadd.f32 %v1980_v40, %v1979_v41  ;;  %v1915_v40 = vmul.f32 %v4024_v7, %v4024_v7  ;;  %v1990_v43 = vsel %vm1602_vm1, %v1914_v39, 0.0  ;;  %v4220_v3 = vsub.f32 %v3840_v17, %v3930_v45 }
 0x20f   : > { %4901 = vst [vmem:[#allocation18_spill] sm:$0xff] %v4199_v46  ;;  %4902 = vst [vmem:[#allocation19_spill] sm:$0xff] %v4206_v54  ;;  %v4227_v9 = vsub.f32 %v3844_v23, %v3930_v45  ;;  %v4234_v17 = vsub.f32 %v3848_v30, %v3930_v45  ;;  %v4241_v23 = vsub.f32 %v3852_v36, %v3930_v45 }
 0x210   : > { %v1983_v32 = vadd.f32 %v1982_v27, %v1981_v26  ;;  %v1916_v27 = vmul.f32 %v4031_v10, %v4031_v10  ;;  %v1992_v18 = vsel %vm1602_vm1, %v1915_v40, 0.0  ;;  %4903 = vst [vmem:[#allocation20_spill] sm:$0xff] %v4213_v60  ;;  %4904 = vst [vmem:[#allocation21_spill] sm:$0xff] %v4220_v3  ;;  %v4248_v30 = vsub.f32 %v3856_v49, %v3930_v45 }
 0x211   : > { %4905 = vst [vmem:[#allocation22_spill] sm:$0xff] %v4227_v9  ;;  %4906 = vst [vmem:[#allocation23_spill] sm:$0xff] %v4234_v17  ;;  %v4255_v36 = vsub.f32 %v3860_v58, %v3930_v45 }
 0x212   : > { %v1985_v51 = vadd.f32 %v1984_v21, %v1983_v32  ;;  %v1917_v21 = vmul.f32 %v4038_v13, %v4038_v13  ;;  %v1994_v39 = vsel %vm1602_vm1, %v1916_v27, 0.0  ;;  %4907 = vst [vmem:[#allocation24_spill] sm:$0xff] %v4241_v23  ;;  %4908 = vst [vmem:[#allocation25_spill] sm:$0xff] %v4248_v30 }
 0x213   : > { %4909 = vst [vmem:[#allocation26_spill] sm:$0xff] %v4255_v36 }
 0x214   : > { %v1987_v41 = vadd.f32 %v1986_v53, %v1985_v51  ;;  %v1918_v53 = vmul.f32 %v4045_v16, %v4045_v16  ;;  %v1996_v40 = vsel %vm1602_vm1, %v1917_v21, 0.0 }
 0x216   : > { %v1989_v26 = vadd.f32 %v1988_v35, %v1987_v41  ;;  %v1919_v35 = vmul.f32 %v4052_v19, %v4052_v19  ;;  %v1998_v27 = vsel %vm1602_vm1, %v1918_v53, 0.0 }
 0x218   : > { %v1991_v32 = vadd.f32 %v1990_v43, %v1989_v26  ;;  %v1920_v43 = vmul.f32 %v4059_v22, %v4059_v22  ;;  %v2000_v21 = vsel %vm1602_vm1, %v1919_v35, 0.0 }
 0x21a   : > { %v1993_v51 = vadd.f32 %v1992_v18, %v1991_v32  ;;  %v1921_v18 = vmul.f32 %v4066_v25, %v4066_v25  ;;  %v2002_v53 = vsel %vm1602_vm1, %v1920_v43, 0.0 }
 0x21c   : > { %v1995_v41 = vadd.f32 %v1994_v39, %v1993_v51  ;;  %v1922_v39 = vmul.f32 %v4073_v28, %v4073_v28  ;;  %v2004_v35 = vsel %vm1602_vm1, %v1921_v18, 0.0 }
 0x21e   : > { %v1997_v26 = vadd.f32 %v1996_v40, %v1995_v41  ;;  %v1923_v40 = vmul.f32 %v4080_v31, %v4080_v31  ;;  %v2006_v43 = vsel %vm1602_vm1, %v1922_v39, 0.0 }
 0x220   : > { %v1999_v32 = vadd.f32 %v1998_v27, %v1997_v26  ;;  %v1924_v27 = vmul.f32 %v4087_v34, %v4087_v34  ;;  %v2008_v18 = vsel %vm1602_vm1, %v1923_v40, 0.0 }
 0x222   : > { %v2001_v51 = vadd.f32 %v2000_v21, %v1999_v32  ;;  %v1925_v21 = vmul.f32 %v4094_v37, %v4094_v37  ;;  %v2010_v39 = vsel %vm1602_vm1, %v1924_v27, 0.0 }
 0x224   : > { %v2003_v41 = vadd.f32 %v2002_v53, %v2001_v51  ;;  %v1926_v53 = vmul.f32 %v4101_v44, %v4101_v44  ;;  %v2012_v40 = vsel %vm1602_vm1, %v1925_v21, 0.0 }
 0x226   : > { %v2005_v26 = vadd.f32 %v2004_v35, %v2003_v41  ;;  %v1927_v35 = vmul.f32 %v4108_v48, %v4108_v48  ;;  %v2014_v27 = vsel %vm1602_vm1, %v1926_v53, 0.0 }
 0x228   : > { %v2007_v32 = vadd.f32 %v2006_v43, %v2005_v26  ;;  %v1928_v43 = vmul.f32 %v4115_v52, %v4115_v52  ;;  %v2016_v21 = vsel %vm1602_vm1, %v1927_v35, 0.0 }
 0x22a   : > { %v2009_v51 = vadd.f32 %v2008_v18, %v2007_v32  ;;  %v1929_v18 = vmul.f32 %v4122_v57, %v4122_v57  ;;  %v2018_v53 = vsel %vm1602_vm1, %v1928_v43, 0.0 }
 0x22c   : > { %v2011_v41 = vadd.f32 %v2010_v39, %v2009_v51  ;;  %v1930_v39 = vmul.f32 %v4129_v61, %v4129_v61  ;;  %v2020_v35 = vsel %vm1602_vm1, %v1929_v18, 0.0 }
 0x22e   : > { %v2013_v26 = vadd.f32 %v2012_v40, %v2011_v41  ;;  %v1931_v40 = vmul.f32 %v4136_v2, %v4136_v2  ;;  %v2022_v43 = vsel %vm1602_vm1, %v1930_v39, 0.0 }
 0x230   : > { %v2015_v32 = vadd.f32 %v2014_v27, %v2013_v26  ;;  %v1932_v27 = vmul.f32 %v4143_v6, %v4143_v6  ;;  %v2024_v18 = vsel %vm1602_vm1, %v1931_v40, 0.0 }
 0x232   : > { %v2017_v51 = vadd.f32 %v2016_v21, %v2015_v32  ;;  %v1933_v21 = vmul.f32 %v4150_v11, %v4150_v11  ;;  %v2026_v39 = vsel %vm1602_vm1, %v1932_v27, 0.0 }
 0x234   : > { %v2019_v41 = vadd.f32 %v2018_v53, %v2017_v51  ;;  %v1934_v53 = vmul.f32 %v4157_v15, %v4157_v15  ;;  %v2028_v40 = vsel %vm1602_vm1, %v1933_v21, 0.0 }
 0x236   : > { %v2021_v26 = vadd.f32 %v2020_v35, %v2019_v41  ;;  %v1935_v35 = vmul.f32 %v4164_v20, %v4164_v20  ;;  %v2030_v27 = vsel %vm1602_vm1, %v1934_v53, 0.0 }
 0x238   : > { %v2023_v32 = vadd.f32 %v2022_v43, %v2021_v26  ;;  %v1936_v43 = vmul.f32 %v4171_v24, %v4171_v24  ;;  %v2032_v21 = vsel %vm1602_vm1, %v1935_v35, 0.0 }
 0x23a   : > { %v2025_v51 = vadd.f32 %v2024_v18, %v2023_v32  ;;  %v1937_v18 = vmul.f32 %v4178_v29, %v4178_v29  ;;  %v2034_v53 = vsel %vm1602_vm1, %v1936_v43, 0.0 }
 0x23c   : > { %v2027_v41 = vadd.f32 %v2026_v39, %v2025_v51  ;;  %v1938_v39 = vmul.f32 %v4185_v33, %v4185_v33  ;;  %v2036_v35 = vsel %vm1602_vm1, %v1937_v18, 0.0 }
 0x23e   : > { %v2029_v26 = vadd.f32 %v2028_v40, %v2027_v41  ;;  %v1939_v40 = vmul.f32 %v4192_v38, %v4192_v38  ;;  %v2038_v43 = vsel %vm1602_vm1, %v1938_v39, 0.0 }
 0x240   : > { %v2031_v32 = vadd.f32 %v2030_v27, %v2029_v26  ;;  %v1940_v27 = vmul.f32 %v4199_v46, %v4199_v46  ;;  %v2040_v18 = vsel %vm1602_vm1, %v1939_v40, 0.0 }
 0x242   : > { %v2033_v51 = vadd.f32 %v2032_v21, %v2031_v32  ;;  %v1941_v21 = vmul.f32 %v4206_v54, %v4206_v54  ;;  %v2042_v39 = vsel %vm1602_vm1, %v1940_v27, 0.0 }
 0x244   : > { %v2035_v41 = vadd.f32 %v2034_v53, %v2033_v51  ;;  %v1942_v53 = vmul.f32 %v4213_v60, %v4213_v60  ;;  %v2044_v40 = vsel %vm1602_vm1, %v1941_v21, 0.0 }
 0x246   : > { %v2037_v26 = vadd.f32 %v2036_v35, %v2035_v41  ;;  %v1943_v35 = vmul.f32 %v4220_v3, %v4220_v3  ;;  %v2046_v27 = vsel %vm1602_vm1, %v1942_v53, 0.0 }
 0x248   : > { %v2039_v32 = vadd.f32 %v2038_v43, %v2037_v26  ;;  %v1944_v43 = vmul.f32 %v4227_v9, %v4227_v9  ;;  %v2048_v21 = vsel %vm1602_vm1, %v1943_v35, 0.0 }
 0x24a   : > { %v2041_v51 = vadd.f32 %v2040_v18, %v2039_v32  ;;  %v1945_v18 = vmul.f32 %v4234_v17, %v4234_v17  ;;  %v2050_v53 = vsel %vm1602_vm1, %v1944_v43, 0.0 }
 0x24c   : > { %v2043_v41 = vadd.f32 %v2042_v39, %v2041_v51  ;;  %v1946_v39 = vmul.f32 %v4241_v23, %v4241_v23  ;;  %v2052_v35 = vsel %vm1602_vm1, %v1945_v18, 0.0  ;;  %v1948_v23 = vmul.f32 %v4255_v36, %v4255_v36 }
 0x24e   : > { %v2045_v26 = vadd.f32 %v2044_v40, %v2043_v41  ;;  %v4910_v40 = vld [vmem:[#allocation3_spill] sm:$0xff]  ;;  %v1947_v41 = vmul.f32 %v4248_v30, %v4248_v30  ;;  %v2054_v43 = vsel %vm1602_vm1, %v1946_v39, 0.0  ;;  %v2058_v39 = vsel %vm1602_vm1, %v1948_v23, 0.0 }
 0x24f   : > { %v4262_v49 = vsub.f32 %v4910_v40, %v3930_v45 }
 0x250   : > { %v2047_v32 = vadd.f32 %v2046_v27, %v2045_v26  ;;  %v4912_v26 = vld [vmem:[#allocation4_spill] sm:$0xff]  ;;  %v2056_v18 = vsel %vm1602_vm1, %v1947_v41, 0.0 }
 0x251   : > { %4911 = vst [vmem:[#allocation3_spill] sm:$0xff] %v4262_v49  ;;  %v4269_v58 = vsub.f32 %v4912_v26, %v3930_v45  ;;  %v1949_v30 = vmul.f32 %v4262_v49, %v4262_v49 }
 0x252   : > { %v2049_v51 = vadd.f32 %v2048_v21, %v2047_v32  ;;  %v4914_v32 = vld [vmem:[#allocation5_spill] sm:$0xff] }
 0x253   : > { %4913 = vst [vmem:[#allocation4_spill] sm:$0xff] %v4269_v58  ;;  %v4276_v40 = vsub.f32 %v4914_v32, %v3930_v45  ;;  %v1950_v36 = vmul.f32 %v4269_v58, %v4269_v58  ;;  %v2060_v41 = vsel %vm1602_vm1, %v1949_v30, 0.0 }
 0x254   : > { %v2051_v27 = vadd.f32 %v2050_v53, %v2049_v51  ;;  %v4916_v51 = vld [vmem:[#allocation6_spill] sm:$0xff] }
 0x255   : > { %4915 = vst [vmem:[#allocation5_spill] sm:$0xff] %v4276_v40  ;;  %v4283_v26 = vsub.f32 %v4916_v51, %v3930_v45  ;;  %v1951_v49 = vmul.f32 %v4276_v40, %v4276_v40  ;;  %v2062_v23 = vsel %vm1602_vm1, %v1950_v36, 0.0 }
 0x256   : > { %v2053_v21 = vadd.f32 %v2052_v35, %v2051_v27  ;;  %v4918_v27 = vld [vmem:[#allocation7_spill] sm:$0xff] }
 0x257   : > { %4917 = vst [vmem:[#allocation6_spill] sm:$0xff] %v4283_v26  ;;  %v4290_v32 = vsub.f32 %v4918_v27, %v3930_v45  ;;  %v1952_v58 = vmul.f32 %v4283_v26, %v4283_v26  ;;  %v2064_v30 = vsel %vm1602_vm1, %v1951_v49, 0.0 }
 0x258   : > { %v2055_v53 = vadd.f32 %v2054_v43, %v2053_v21  ;;  %v4920_v21 = vld [vmem:[#allocation8_spill] sm:$0xff] }
 0x259   : > { %4919 = vst [vmem:[#allocation7_spill] sm:$0xff] %v4290_v32  ;;  %v4297_v51 = vsub.f32 %v4920_v21, %v3930_v45  ;;  %v1953_v40 = vmul.f32 %v4290_v32, %v4290_v32  ;;  %v2066_v36 = vsel %vm1602_vm1, %v1952_v58, 0.0 }
 0x25a   : > { %v2057_v35 = vadd.f32 %v2056_v18, %v2055_v53  ;;  %v4922_v53 = vld [vmem:[#allocation9_spill] sm:$0xff] }
 0x25b   : > { %4921 = vst [vmem:[#allocation8_spill] sm:$0xff] %v4297_v51  ;;  %v4304_v27 = vsub.f32 %v4922_v53, %v3930_v45  ;;  %v1954_v26 = vmul.f32 %v4297_v51, %v4297_v51  ;;  %v2068_v49 = vsel %vm1602_vm1, %v1953_v40, 0.0 }
 0x25c   : > { %v2059_v43 = vadd.f32 %v2058_v39, %v2057_v35  ;;  %v4924_v35 = vld [vmem:[#allocation10_spill] sm:$0xff] }
 0x25d   : > { %4923 = vst [vmem:[#allocation9_spill] sm:$0xff] %v4304_v27  ;;  %v4311_v21 = vsub.f32 %v4924_v35, %v3930_v45  ;;  %v1955_v32 = vmul.f32 %v4304_v27, %v4304_v27  ;;  %v2070_v58 = vsel %vm1602_vm1, %v1954_v26, 0.0 }
 0x25e   : > { %v2061_v18 = vadd.f32 %v2060_v41, %v2059_v43  ;;  %v4926_v43 = vld [vmem:[#allocation11_spill] sm:$0xff] }
 0x25f   : > { %4925 = vst [vmem:[#allocation10_spill] sm:$0xff] %v4311_v21  ;;  %v4318_v53 = vsub.f32 %v4926_v43, %v3930_v45  ;;  %v1956_v51 = vmul.f32 %v4311_v21, %v4311_v21  ;;  %v2072_v40 = vsel %vm1602_vm1, %v1955_v32, 0.0 }
 0x260   : > { %v2063_v39 = vadd.f32 %v2062_v23, %v2061_v18  ;;  %v4928_v18 = vld [vmem:[#allocation12_spill] sm:$0xff] }
 0x261   : > { %4927 = vst [vmem:[#allocation11_spill] sm:$0xff] %v4318_v53  ;;  %v4325_v35 = vsub.f32 %v4928_v18, %v3930_v45  ;;  %v1957_v27 = vmul.f32 %v4318_v53, %v4318_v53  ;;  %v2074_v26 = vsel %vm1602_vm1, %v1956_v51, 0.0 }
 0x262   : > { %v2065_v41 = vadd.f32 %v2064_v30, %v2063_v39  ;;  %v4930_v39 = vld [vmem:[#allocation13_spill] sm:$0xff] }
 0x263   : > { %4929 = vst [vmem:[#allocation12_spill] sm:$0xff] %v4325_v35  ;;  %v4332_v43 = vsub.f32 %v4930_v39, %v3930_v45  ;;  %v1958_v21 = vmul.f32 %v4325_v35, %v4325_v35  ;;  %v2076_v32 = vsel %vm1602_vm1, %v1957_v27, 0.0 }
 0x264   : > { %v2067_v23 = vadd.f32 %v2066_v36, %v2065_v41  ;;  %v4932_v41 = vld [vmem:[#allocation14_spill] sm:$0xff] }
 0x265   : > { %4931 = vst [vmem:[#allocation13_spill] sm:$0xff] %v4332_v43  ;;  %v4339_v18 = vsub.f32 %v4932_v41, %v3930_v45  ;;  %v1959_v53 = vmul.f32 %v4332_v43, %v4332_v43  ;;  %v2078_v51 = vsel %vm1602_vm1, %v1958_v21, 0.0 }
 0x266   : > { %v2069_v30 = vadd.f32 %v2068_v49, %v2067_v23  ;;  %v4934_v23 = vld [vmem:[#allocation15_spill] sm:$0xff] }
 0x267   : > { %4933 = vst [vmem:[#allocation14_spill] sm:$0xff] %v4339_v18  ;;  %v4346_v39 = vsub.f32 %v4934_v23, %v3930_v45  ;;  %v1960_v35 = vmul.f32 %v4339_v18, %v4339_v18  ;;  %v2080_v27 = vsel %vm1602_vm1, %v1959_v53, 0.0 }
 0x268   : > { %v2071_v36 = vadd.f32 %v2070_v58, %v2069_v30  ;;  %v4936_v30 = vld [vmem:[#allocation16_spill] sm:$0xff] }
 0x269   : > { %4935 = vst [vmem:[#allocation15_spill] sm:$0xff] %v4346_v39  ;;  %v4353_v41 = vsub.f32 %v4936_v30, %v3930_v45  ;;  %v1961_v23 = vmul.f32 %v4346_v39, %v4346_v39  ;;  %v2082_v21 = vsel %vm1602_vm1, %v1960_v35, 0.0 }
 0x26a   : > { %v2073_v49 = vadd.f32 %v2072_v40, %v2071_v36  ;;  %v4360_v36 = vsub.f32 %v3922_v63, %v3930_v45 }
 0x26b   : > { %4937 = vst [vmem:[#allocation16_spill] sm:$0xff] %v4353_v41  ;;  %v1962_v30 = vmul.f32 %v4353_v41, %v4353_v41 }
 0x26c   : > { %v2075_v58 = vadd.f32 %v2074_v26, %v2073_v49  ;;  %4938 = vst [vmem:[#allocation27_spill] sm:$0xff] %v4360_v36  ;;  %v4367_v49 = vsub.f32 %v3926_v14, %v3930_v45  ;;  %v1963_v63 = vmul.f32 %v4360_v36, %v4360_v36 }
 0x26e   : > { %v2077_v40 = vadd.f32 %v2076_v32, %v2075_v58  ;;  %4939 = vst [vmem:[#allocation28_spill] sm:$0xff] %v4367_v49  ;;  %v2084_v58 = vsel %vm1602_vm1, %v1961_v23, 0.0  ;;  %v1964_v53 = vmul.f32 %v4367_v49, %v4367_v49  ;;  %v2088_v45 = vsel %vm1602_vm1, %v1963_v63, 0.0 }
 0x26f   : > { %v2104_v49 = vlaneseq }
 0x270   : > { %v2079_v26 = vadd.f32 %v2078_v51, %v2077_v40  ;;  %v2086_v51 = vsel %vm1602_vm1, %v1962_v30, 0.0  ;;  %v2090_v41 = vsel %vm1602_vm1, %v1964_v53, 0.0 }
 0x271   : > { %v2105_v9 = vshrl.u32 %v2104_v49, 7 }
 0x272   : > { %v2081_v32 = vadd.f32 %v2080_v27, %v2079_v26 }
 0x273   : > { %v2106_v30 = vsub.s32 0, %v2105_v9 }
 0x274   : > { %v2083_v18 = vadd.f32 %v2082_v21, %v2081_v32 }
 0x276   : > { %v2085_v40 = vadd.f32 %v2084_v58, %v2083_v18  ;;  %v2099_v18 = vld [vmem:[%s4843_s2] sm:$0x1] }
 0x278   : > { %v2087_v14 = vadd.f32 %v2086_v51, %v2085_v40 }
 0x27a   : > { %v2089_v39 = vadd.f32 %v2088_v45, %v2087_v14 }
 0x27c   : > { %v2091_v35 = vadd.f32 %v2090_v41, %v2089_v39 }
 0x27e   : > { %v2092_v27 = vrot.slane %v2091_v35, 4 }
 0x280   : > { %v2093_v26 = vadd.f32 %v2092_v27, %v2091_v35 }
 0x282   : > { %v2094_v43 = vrot.slane %v2093_v26, 2 }
 0x284   : > { %v2095_v36 = vadd.f32 %v2094_v43, %v2093_v26  ;;  %v4388_v43 = vld [vmem:[%s4844_s3] ss:$0 sm:$0xff] }
 0x286   : > { %v2096_v17 = vrot.slane %v2095_v36, 1 }
 0x288   : > { %v2097_v23 = vadd.f32 %v2096_v17, %v2095_v36  ;;  %v4940_v36 = vld [vmem:[#allocation17_spill] sm:$0xff] }
 0x28a   : > { %v2098_v21 = vmul.f32 0.001953125, %v2097_v23 }
 0x28c   : > { %v2100_v32 = vadd.f32 1e-05, %v2098_v21 }
 0x28e   : > { %3402 = vrsqrt.f32 %v2100_v32 }
 0x298   : > { %v3403_v63 = vpop.eup %3402 }
 0x299   : > { %v2102_v58 = vmul.f32 %v3403_v63, %v2099_v18 }
 0x29b   : > { %v4383_v53 = vrot.slane %v2102_v58, %v2106_v30 }
 0x29d   : > { %v2109_v17 = vmul.f32 %v4383_v53, %v3934_v55  ;;  %v2110_v39 = vmul.f32 %v4383_v53, %v3938_v0  ;;  %v2111_v41 = vmul.f32 %v4383_v53, %v3942_v8  ;;  %v2112_v9 = vmul.f32 %v4383_v53, %v3946_v12 }
 0x29e   : > { %v2113_v49 = vmul.f32 %v4383_v53, %v4940_v36  ;;  %v2114_v51 = vmul.f32 %v4383_v53, %v3960_v42  ;;  %v2115_v40 = vmul.f32 %v4383_v53, %v3966_v47  ;;  %v2116_v55 = vmul.f32 %v4383_v53, %v3975_v50 }
 0x29f   : > { %v2180_v0 = vadd.f32 %v4388_v43, %v2109_v17  ;;  %v2181_v45 = vadd.f32 %v4388_v43, %v2110_v39  ;;  %v2182_v8 = vadd.f32 %v4388_v43, %v2111_v41  ;;  %v2183_v12 = vadd.f32 %v4388_v43, %v2112_v9 }
 0x2a0   : > { %v2184_v14 = vadd.f32 %v4388_v43, %v2113_v49  ;;  %v2185_v35 = vadd.f32 %v4388_v43, %v2114_v51  ;;  %v2186_v42 = vadd.f32 %v4388_v43, %v2115_v40  ;;  %v2187_v27 = vadd.f32 %v4388_v43, %v2116_v55 }
 0x2a1   : > { %v2244_v47 = vmul.f32 0.2, %v2180_v0  ;;  %v2245_v26 = vmul.f32 0.2, %v2181_v45  ;;  %v2246_v23 = vmul.f32 0.2, %v2182_v8  ;;  %v2117_v50 = vmul.f32 %v4383_v53, %v3982_v5 }
 0x2a2   : > { %v2247_v21 = vmul.f32 0.2, %v2183_v12  ;;  %v2248_v32 = vmul.f32 0.2, %v2184_v14  ;;  %v2249_v18 = vmul.f32 0.2, %v2185_v35  ;;  %v2118_v30 = vmul.f32 %v4383_v53, %v3989_v56 }
 0x2a3   : > { %v2308_v63 = vmax.f32 %v2180_v0, %v2244_v47  ;;  %v2309_v58 = vmax.f32 %v2181_v45, %v2245_v26  ;;  %v2310_v17 = vmax.f32 %v2182_v8, %v2246_v23  ;;  %v2250_v39 = vmul.f32 0.2, %v2186_v42 }
 0x2a4   : > { %v2311_v41 = vmax.f32 %v2183_v12, %v2247_v21  ;;  %v2312_v9 = vmax.f32 %v2184_v14, %v2248_v32  ;;  %v2313_v36 = vmax.f32 %v2185_v35, %v2249_v18  ;;  %v2251_v49 = vmul.f32 0.2, %v2187_v27 }
 0x2a5   : > { %v2945_v51 = vpack.c.bf16 %v2308_v63, %v2308_v63  ;;  %v2946_v40 = vpack.c.bf16 %v2309_v58, %v2309_v58  ;;  %v2947_v55 = vpack.c.bf16 %v2310_v17, %v2310_v17  ;;  %v2314_v3 = vmax.f32 %v2186_v42, %v2250_v39 }
 0x2a6   : > { %v2948_v60 = vpack.c.bf16 %v2311_v41, %v2311_v41  ;;  %v2949_v5 = vpack.c.bf16 %v2312_v9, %v2312_v9  ;;  %v2950_v54 = vpack.c.bf16 %v2313_v36, %v2313_v36  ;;  %v2315_v46 = vmax.f32 %v2187_v27, %v2251_v49 }
 0x2a7   : > { %2629 = vst.msk [vmem:[%s4845_s4] sm:$0xf] %vm2628_vm2, %v2945_v51  ;;  %2630 = vst.msk [vmem:[%s4845_s4 + $0x4] sm:$0xf] %vm2628_vm2, %v2946_v40  ;;  %v2951_v56 = vpack.c.bf16 %v2314_v3, %v2314_v3  ;;  %v2188_v0 = vadd.f32 %v4388_v43, %v2117_v50  ;;  %v2189_v45 = vadd.f32 %v4388_v43, %v2118_v30 }
 0x2a8   : > { %2631 = vst.msk [vmem:[%s4845_s4 + $0x8] sm:$0xf] %vm2628_vm2, %v2947_v55  ;;  %v2119_v8 = vmul.f32 %v4383_v53, %v3996_v59  ;;  %2632 = vst.msk [vmem:[%s4845_s4 + $0xc] sm:$0xf] %vm2628_vm2, %v2948_v60  ;;  %v2952_v3 = vpack.c.bf16 %v2315_v46, %v2315_v46  ;;  %v2120_v12 = vmul.f32 %v4383_v53, %v4003_v62 }
 0x2a9   : > { %2633 = vst.msk [vmem:[%s4845_s4 + $0x10] sm:$0xf] %vm2628_vm2, %v2949_v5  ;;  %2634 = vst.msk [vmem:[%s4845_s4 + $0x14] sm:$0xf] %vm2628_vm2, %v2950_v54  ;;  %v2121_v59 = vmul.f32 %v4383_v53, %v4010_v1  ;;  %v2122_v60 = vmul.f32 %v4383_v53, %v4017_v4  ;;  %v2252_v14 = vmul.f32 0.2, %v2188_v0  ;;  %v2123_v46 = vmul.f32 %v4383_v53, %v4024_v7 }
 0x2aa   : > { %2635 = vst.msk [vmem:[%s4845_s4 + $0x18] sm:$0xf] %vm2628_vm2, %v2951_v56  ;;  %v2253_v35 = vmul.f32 0.2, %v2189_v45  ;;  %v2190_v42 = vadd.f32 %v4388_v43, %v2119_v8  ;;  %2636 = vst.msk [vmem:[%s4845_s4 + $0x1c] sm:$0xf] %vm2628_vm2, %v2952_v3  ;;  %v2191_v62 = vadd.f32 %v4388_v43, %v2120_v12  ;;  %v2124_v54 = vmul.f32 %v4383_v53, %v4031_v10 }
 0x2ab   : > { %v2192_v1 = vadd.f32 %v4388_v43, %v2121_v59  ;;  %v2193_v4 = vadd.f32 %v4388_v43, %v2122_v60  ;;  %v2316_v27 = vmax.f32 %v2188_v0, %v2252_v14  ;;  %v2194_v23 = vadd.f32 %v4388_v43, %v2123_v46 }
 0x2ac   : > { %v2317_v47 = vmax.f32 %v2189_v45, %v2253_v35  ;;  %v2254_v26 = vmul.f32 0.2, %v2190_v42  ;;  %v2255_v7 = vmul.f32 0.2, %v2191_v62  ;;  %v2195_v32 = vadd.f32 %v4388_v43, %v2124_v54 }
 0x2ad   : > { %v2256_v50 = vmul.f32 0.2, %v2192_v1  ;;  %v2257_v21 = vmul.f32 0.2, %v2193_v4  ;;  %v2953_v18 = vpack.c.bf16 %v2316_v27, %v2316_v27  ;;  %v2258_v58 = vmul.f32 0.2, %v2194_v23 }
 0x2ae   : > { %v2954_v30 = vpack.c.bf16 %v2317_v47, %v2317_v47  ;;  %v2318_v63 = vmax.f32 %v2190_v42, %v2254_v26  ;;  %v2319_v17 = vmax.f32 %v2191_v62, %v2255_v7  ;;  %v2259_v9 = vmul.f32 0.2, %v2195_v32 }
 0x2af   : > { %v2320_v39 = vmax.f32 %v2192_v1, %v2256_v50  ;;  %v2321_v41 = vmax.f32 %v2193_v4, %v2257_v21  ;;  %2637 = vst.msk [vmem:[%s4845_s4 + $0x20] sm:$0xf] %vm2628_vm2, %v2953_v18  ;;  %v2322_v36 = vmax.f32 %v2194_v23, %v2258_v58  ;;  %v2125_v49 = vmul.f32 %v4383_v53, %v4038_v13 }
 0x2b0   : > { %2638 = vst.msk [vmem:[%s4845_s4 + $0x24] sm:$0xf] %vm2628_vm2, %v2954_v30  ;;  %v2955_v10 = vpack.c.bf16 %v2318_v63, %v2318_v63  ;;  %v2126_v51 = vmul.f32 %v4383_v53, %v4045_v16  ;;  %v2956_v40 = vpack.c.bf16 %v2319_v17, %v2319_v17  ;;  %v2323_v56 = vmax.f32 %v2195_v32, %v2259_v9 }
 0x2b1   : > { %v2957_v55 = vpack.c.bf16 %v2320_v39, %v2320_v39  ;;  %v2958_v5 = vpack.c.bf16 %v2321_v41, %v2321_v41  ;;  %v2959_v0 = vpack.c.bf16 %v2322_v36, %v2322_v36  ;;  %v2196_v45 = vadd.f32 %v4388_v43, %v2125_v49 }
 0x2b2   : > { %2639 = vst.msk [vmem:[%s4845_s4 + $0x28] sm:$0xf] %vm2628_vm2, %v2955_v10  ;;  %v2197_v8 = vadd.f32 %v4388_v43, %v2126_v51  ;;  %v2127_v13 = vmul.f32 %v4383_v53, %v4052_v19  ;;  %2640 = vst.msk [vmem:[%s4845_s4 + $0x2c] sm:$0xf] %vm2628_vm2, %v2956_v40  ;;  %v2960_v16 = vpack.c.bf16 %v2323_v56, %v2323_v56 }
 0x2b3   : > { %2641 = vst.msk [vmem:[%s4845_s4 + $0x30] sm:$0xf] %vm2628_vm2, %v2957_v55  ;;  %2642 = vst.msk [vmem:[%s4845_s4 + $0x34] sm:$0xf] %vm2628_vm2, %v2958_v5  ;;  %v2128_v3 = vmul.f32 %v4383_v53, %v4059_v22  ;;  %v2129_v19 = vmul.f32 %v4383_v53, %v4066_v25  ;;  %v2130_v12 = vmul.f32 %v4383_v53, %v4073_v28  ;;  %v2260_v59 = vmul.f32 0.2, %v2196_v45 }
 0x2b4   : > { %2643 = vst.msk [vmem:[%s4845_s4 + $0x38] sm:$0xf] %vm2628_vm2, %v2959_v0  ;;  %v2261_v60 = vmul.f32 0.2, %v2197_v8  ;;  %v2198_v14 = vadd.f32 %v4388_v43, %v2127_v13  ;;  %v2131_v35 = vmul.f32 %v4383_v53, %v4080_v31  ;;  %2644 = vst.msk [vmem:[%s4845_s4 + $0x3c] sm:$0xf] %vm2628_vm2, %v2960_v16  ;;  %v2132_v42 = vmul.f32 %v4383_v53, %v4087_v34 }
 0x2b5   : > { %v2199_v22 = vadd.f32 %v4388_v43, %v2128_v3  ;;  %v2200_v25 = vadd.f32 %v4388_v43, %v2129_v19  ;;  %v2201_v28 = vadd.f32 %v4388_v43, %v2130_v12  ;;  %v2324_v46 = vmax.f32 %v2196_v45, %v2260_v59 }
 0x2b6   : > { %v2325_v62 = vmax.f32 %v2197_v8, %v2261_v60  ;;  %v2262_v1 = vmul.f32 0.2, %v2198_v14  ;;  %v2202_v4 = vadd.f32 %v4388_v43, %v2131_v35  ;;  %v2203_v47 = vadd.f32 %v4388_v43, %v2132_v42 }
 0x2b7   : > { %v2263_v31 = vmul.f32 0.2, %v2199_v22  ;;  %v2264_v54 = vmul.f32 0.2, %v2200_v25  ;;  %v2265_v27 = vmul.f32 0.2, %v2201_v28  ;;  %v2961_v26 = vpack.c.bf16 %v2324_v46, %v2324_v46 }
 0x2b8   : > { %v2962_v23 = vpack.c.bf16 %v2325_v62, %v2325_v62  ;;  %v2326_v7 = vmax.f32 %v2198_v14, %v2262_v1  ;;  %v2266_v50 = vmul.f32 0.2, %v2202_v4  ;;  %v2267_v30 = vmul.f32 0.2, %v2203_v47 }
 0x2b9   : > { %v2327_v21 = vmax.f32 %v2199_v22, %v2263_v31  ;;  %v2328_v32 = vmax.f32 %v2200_v25, %v2264_v54  ;;  %v2329_v18 = vmax.f32 %v2201_v28, %v2265_v27  ;;  %2645 = vst.msk [vmem:[%s4845_s4 + $0x40] sm:$0xf] %vm2628_vm2, %v2961_v26  ;;  %v2133_v58 = vmul.f32 %v4383_v53, %v4094_v37 }
 0x2ba   : > { %2646 = vst.msk [vmem:[%s4845_s4 + $0x44] sm:$0xf] %vm2628_vm2, %v2962_v23  ;;  %v2963_v34 = vpack.c.bf16 %v2326_v7, %v2326_v7  ;;  %v2330_v63 = vmax.f32 %v2202_v4, %v2266_v50  ;;  %v2134_v17 = vmul.f32 %v4383_v53, %v4101_v44  ;;  %v2331_v10 = vmax.f32 %v2203_v47, %v2267_v30 }
 0x2bb   : > { %v2964_v39 = vpack.c.bf16 %v2327_v21, %v2327_v21  ;;  %v2965_v41 = vpack.c.bf16 %v2328_v32, %v2328_v32  ;;  %v2966_v9 = vpack.c.bf16 %v2329_v18, %v2329_v18  ;;  %v2204_v49 = vadd.f32 %v4388_v43, %v2133_v58  ;;  %v4941_v58 = vld [vmem:[#allocation18_spill] sm:$0xff] }
 0x2bc   : > { %2647 = vst.msk [vmem:[%s4845_s4 + $0x48] sm:$0xf] %vm2628_vm2, %v2963_v34  ;;  %v2967_v36 = vpack.c.bf16 %v2330_v63, %v2330_v63  ;;  %v2205_v51 = vadd.f32 %v4388_v43, %v2134_v17  ;;  %v2135_v37 = vmul.f32 %v4383_v53, %v4108_v48  ;;  %v2968_v44 = vpack.c.bf16 %v2331_v10, %v2331_v10 }
 0x2bd   : > { %2648 = vst.msk [vmem:[%s4845_s4 + $0x4c] sm:$0xf] %vm2628_vm2, %v2964_v39  ;;  %2649 = vst.msk [vmem:[%s4845_s4 + $0x50] sm:$0xf] %vm2628_vm2, %v2965_v41  ;;  %v2136_v40 = vmul.f32 %v4383_v53, %v4115_v52  ;;  %v2137_v48 = vmul.f32 %v4383_v53, %v4122_v57  ;;  %v2138_v55 = vmul.f32 %v4383_v53, %v4129_v61  ;;  %v2268_v5 = vmul.f32 0.2, %v2204_v49 }
 0x2be   : > { %2650 = vst.msk [vmem:[%s4845_s4 + $0x54] sm:$0xf] %vm2628_vm2, %v2966_v9  ;;  %2651 = vst.msk [vmem:[%s4845_s4 + $0x58] sm:$0xf] %vm2628_vm2, %v2967_v36  ;;  %v2269_v56 = vmul.f32 0.2, %v2205_v51  ;;  %v2206_v0 = vadd.f32 %v4388_v43, %v2135_v37  ;;  %v2139_v45 = vmul.f32 %v4383_v53, %v4136_v2  ;;  %v2140_v8 = vmul.f32 %v4383_v53, %v4143_v6 }
 0x2bf   : > { %2652 = vst.msk [vmem:[%s4845_s4 + $0x5c] sm:$0xf] %vm2628_vm2, %v2968_v44  ;;  %v2207_v52 = vadd.f32 %v4388_v43, %v2136_v40  ;;  %v2208_v57 = vadd.f32 %v4388_v43, %v2137_v48  ;;  %v2209_v61 = vadd.f32 %v4388_v43, %v2138_v55  ;;  %v2332_v13 = vmax.f32 %v2204_v49, %v2268_v5 }
 0x2c0   : > { %v2333_v16 = vmax.f32 %v2205_v51, %v2269_v56  ;;  %v2270_v3 = vmul.f32 0.2, %v2206_v0  ;;  %v2210_v19 = vadd.f32 %v4388_v43, %v2139_v45  ;;  %v2211_v60 = vadd.f32 %v4388_v43, %v2140_v8  ;;  %v4943_v8 = vld [vmem:[#allocation20_spill] sm:$0xff] }
 0x2c1   : > { %v2271_v2 = vmul.f32 0.2, %v2207_v52  ;;  %v2272_v12 = vmul.f32 0.2, %v2208_v57  ;;  %v2273_v59 = vmul.f32 0.2, %v2209_v61  ;;  %v2969_v14 = vpack.c.bf16 %v2332_v13, %v2332_v13 }
 0x2c2   : > { %v2970_v35 = vpack.c.bf16 %v2333_v16, %v2333_v16  ;;  %v2334_v22 = vmax.f32 %v2206_v0, %v2270_v3  ;;  %v2274_v25 = vmul.f32 0.2, %v2210_v19  ;;  %v2275_v62 = vmul.f32 0.2, %v2211_v60 }
 0x2c3   : > { %v2335_v28 = vmax.f32 %v2207_v52, %v2271_v2  ;;  %v2336_v42 = vmax.f32 %v2208_v57, %v2272_v12  ;;  %v2337_v46 = vmax.f32 %v2209_v61, %v2273_v59  ;;  %2653 = vst.msk [vmem:[%s4845_s4 + $0x60] sm:$0xf] %vm2628_vm2, %v2969_v14  ;;  %v2141_v4 = vmul.f32 %v4383_v53, %v4150_v11  ;;  %v4942_v57 = vld [vmem:[#allocation19_spill] sm:$0xff]  ;;  %v4944_v14 = vld [vmem:[#allocation21_spill] sm:$0xff] }
 0x2c4   : > { %2654 = vst.msk [vmem:[%s4845_s4 + $0x64] sm:$0xf] %vm2628_vm2, %v2970_v35  ;;  %v2971_v6 = vpack.c.bf16 %v2334_v22, %v2334_v22  ;;  %v2338_v1 = vmax.f32 %v2210_v19, %v2274_v25  ;;  %v2142_v31 = vmul.f32 %v4383_v53, %v4157_v15  ;;  %v2339_v26 = vmax.f32 %v2211_v60, %v2275_v62  ;;  %v4945_v25 = vld [vmem:[#allocation22_spill] sm:$0xff]  ;;  %v4947_v62 = vld [vmem:[#allocation24_spill] sm:$0xff] }
 0x2c5   : > { %v2972_v54 = vpack.c.bf16 %v2335_v28, %v2335_v28  ;;  %v2973_v27 = vpack.c.bf16 %v2336_v42, %v2336_v42  ;;  %v2974_v47 = vpack.c.bf16 %v2337_v46, %v2337_v46  ;;  %v2212_v7 = vadd.f32 %v4388_v43, %v2141_v4  ;;  %v4946_v42 = vld [vmem:[#allocation23_spill] sm:$0xff] }
 0x2c6   : > { %2655 = vst.msk [vmem:[%s4845_s4 + $0x68] sm:$0xf] %vm2628_vm2, %v2971_v6  ;;  %v2975_v23 = vpack.c.bf16 %v2338_v1, %v2338_v1  ;;  %v2213_v50 = vadd.f32 %v4388_v43, %v2142_v31  ;;  %v2143_v11 = vmul.f32 %v4383_v53, %v4164_v20  ;;  %v2976_v15 = vpack.c.bf16 %v2339_v26, %v2339_v26 }
 0x2c7   : > { %2656 = vst.msk [vmem:[%s4845_s4 + $0x6c] sm:$0xf] %vm2628_vm2, %v2972_v54  ;;  %2657 = vst.msk [vmem:[%s4845_s4 + $0x70] sm:$0xf] %vm2628_vm2, %v2973_v27  ;;  %v2144_v21 = vmul.f32 %v4383_v53, %v4171_v24  ;;  %v2145_v20 = vmul.f32 %v4383_v53, %v4178_v29  ;;  %v2146_v32 = vmul.f32 %v4383_v53, %v4185_v33  ;;  %v2276_v18 = vmul.f32 0.2, %v2212_v7 }
 0x2c8   : > { %2658 = vst.msk [vmem:[%s4845_s4 + $0x74] sm:$0xf] %vm2628_vm2, %v2974_v47  ;;  %2659 = vst.msk [vmem:[%s4845_s4 + $0x78] sm:$0xf] %vm2628_vm2, %v2975_v23  ;;  %v2277_v30 = vmul.f32 0.2, %v2213_v50  ;;  %v2214_v34 = vadd.f32 %v4388_v43, %v2143_v11  ;;  %v2147_v63 = vmul.f32 %v4383_v53, %v4192_v38  ;;  %v2148_v17 = vmul.f32 %v4383_v53, %v4941_v58 }
 0x2c9   : > { %2660 = vst.msk [vmem:[%s4845_s4 + $0x7c] sm:$0xf] %vm2628_vm2, %v2976_v15  ;;  %v2215_v24 = vadd.f32 %v4388_v43, %v2144_v21  ;;  %v2216_v29 = vadd.f32 %v4388_v43, %v2145_v20  ;;  %v2217_v33 = vadd.f32 %v4388_v43, %v2146_v32  ;;  %v2340_v39 = vmax.f32 %v2212_v7, %v2276_v18  ;;  %v4948_v54 = vld [vmem:[#allocation25_spill] sm:$0xff]  ;;  %v4949_v7 = vld [vmem:[#allocation26_spill] sm:$0xff] }
 0x2ca   : > { %v2341_v41 = vmax.f32 %v2213_v50, %v2277_v30  ;;  %v2278_v9 = vmul.f32 0.2, %v2214_v34  ;;  %v2218_v10 = vadd.f32 %v4388_v43, %v2147_v63  ;;  %v2219_v51 = vadd.f32 %v4388_v43, %v2148_v17 }
 0x2cb   : > { %v2279_v38 = vmul.f32 0.2, %v2215_v24  ;;  %v2280_v36 = vmul.f32 0.2, %v2216_v29  ;;  %v2281_v49 = vmul.f32 0.2, %v2217_v33  ;;  %v2977_v37 = vpack.c.bf16 %v2340_v39, %v2340_v39 }
 0x2cc   : > { %v2978_v44 = vpack.c.bf16 %v2341_v41, %v2341_v41  ;;  %v2342_v40 = vmax.f32 %v2214_v34, %v2278_v9  ;;  %v2282_v48 = vmul.f32 0.2, %v2218_v10  ;;  %v2283_v0 = vmul.f32 0.2, %v2219_v51 }
 0x2cd   : > { %v2343_v55 = vmax.f32 %v2215_v24, %v2279_v38  ;;  %v2344_v5 = vmax.f32 %v2216_v29, %v2280_v36  ;;  %v2345_v56 = vmax.f32 %v2217_v33, %v2281_v49  ;;  %2661 = vst.msk [vmem:[%s4845_s4 + $0x80] sm:$0xf] %vm2628_vm2, %v2977_v37  ;;  %v2149_v61 = vmul.f32 %v4383_v53, %v4942_v57  ;;  %v4950_v38 = vld [vmem:[#allocation3_spill] sm:$0xff]  ;;  %v4951_v49 = vld [vmem:[#allocation4_spill] sm:$0xff]  ;;  %v4953_v57 = vld [vmem:[#allocation6_spill] sm:$0xff] }
 0x2ce   : > { %2662 = vst.msk [vmem:[%s4845_s4 + $0x84] sm:$0xf] %vm2628_vm2, %v2978_v44  ;;  %v2979_v45 = vpack.c.bf16 %v2342_v40, %v2342_v40  ;;  %v2346_v52 = vmax.f32 %v2218_v10, %v2282_v48  ;;  %v2150_v13 = vmul.f32 %v4383_v53, %v4943_v8  ;;  %v2347_v2 = vmax.f32 %v2219_v51, %v2283_v0  ;;  %v4952_v0 = vld [vmem:[#allocation5_spill] sm:$0xff]  ;;  %v4954_v8 = vld [vmem:[#allocation7_spill] sm:$0xff] }
 0x2cf   : > { %v2980_v16 = vpack.c.bf16 %v2343_v55, %v2343_v55  ;;  %v2981_v3 = vpack.c.bf16 %v2344_v5, %v2344_v5  ;;  %v2982_v19 = vpack.c.bf16 %v2345_v56, %v2345_v56  ;;  %v2220_v59 = vadd.f32 %v4388_v43, %v2149_v61 }
 0x2d0   : > { %2663 = vst.msk [vmem:[%s4845_s4 + $0x88] sm:$0xf] %vm2628_vm2, %v2979_v45  ;;  %v2983_v12 = vpack.c.bf16 %v2346_v52, %v2346_v52  ;;  %v2221_v60 = vadd.f32 %v4388_v43, %v2150_v13  ;;  %v2151_v35 = vmul.f32 %v4383_v53, %v4944_v14  ;;  %v2984_v22 = vpack.c.bf16 %v2347_v2, %v2347_v2 }
 0x2d1   : > { %2664 = vst.msk [vmem:[%s4845_s4 + $0x8c] sm:$0xf] %vm2628_vm2, %v2980_v16  ;;  %2665 = vst.msk [vmem:[%s4845_s4 + $0x90] sm:$0xf] %vm2628_vm2, %v2981_v3  ;;  %v2152_v28 = vmul.f32 %v4383_v53, %v4945_v25  ;;  %v2153_v46 = vmul.f32 %v4383_v53, %v4946_v42  ;;  %v2154_v6 = vmul.f32 %v4383_v53, %v4947_v62  ;;  %v2284_v1 = vmul.f32 0.2, %v2220_v59 }
 0x2d2   : > { %2666 = vst.msk [vmem:[%s4845_s4 + $0x94] sm:$0xf] %vm2628_vm2, %v2982_v19  ;;  %2667 = vst.msk [vmem:[%s4845_s4 + $0x98] sm:$0xf] %vm2628_vm2, %v2983_v12  ;;  %v2285_v4 = vmul.f32 0.2, %v2221_v60  ;;  %v2222_v31 = vadd.f32 %v4388_v43, %v2151_v35  ;;  %v2155_v27 = vmul.f32 %v4383_v53, %v4948_v54  ;;  %v2156_v50 = vmul.f32 %v4383_v53, %v4949_v7 }
 0x2d3   : > { %2668 = vst.msk [vmem:[%s4845_s4 + $0x9c] sm:$0xf] %vm2628_vm2, %v2984_v22  ;;  %v2223_v47 = vadd.f32 %v4388_v43, %v2152_v28  ;;  %v2224_v26 = vadd.f32 %v4388_v43, %v2153_v46  ;;  %v2225_v23 = vadd.f32 %v4388_v43, %v2154_v6  ;;  %v2348_v11 = vmax.f32 %v2220_v59, %v2284_v1  ;;  %v4955_v16 = vld [vmem:[#allocation8_spill] sm:$0xff]  ;;  %v4956_v59 = vld [vmem:[#allocation9_spill] sm:$0xff]  ;;  %v4957_v25 = vld [vmem:[#allocation10_spill] sm:$0xff] }
 0x2d4   : > { %v2349_v15 = vmax.f32 %v2221_v60, %v2285_v4  ;;  %v2286_v21 = vmul.f32 0.2, %v2222_v31  ;;  %v2226_v20 = vadd.f32 %v4388_v43, %v2155_v27  ;;  %v2227_v34 = vadd.f32 %v4388_v43, %v2156_v50 }
 0x2d5   : > { %v2287_v32 = vmul.f32 0.2, %v2223_v47  ;;  %v2288_v18 = vmul.f32 0.2, %v2224_v26  ;;  %v2289_v30 = vmul.f32 0.2, %v2225_v23  ;;  %v2985_v63 = vpack.c.bf16 %v2348_v11, %v2348_v11 }
 0x2d6   : > { %v2986_v24 = vpack.c.bf16 %v2349_v15, %v2349_v15  ;;  %v2350_v29 = vmax.f32 %v2222_v31, %v2286_v21  ;;  %v2290_v33 = vmul.f32 0.2, %v2226_v20  ;;  %v2291_v41 = vmul.f32 0.2, %v2227_v34 }
 0x2d7   : > { %v2351_v58 = vmax.f32 %v2223_v47, %v2287_v32  ;;  %v2352_v17 = vmax.f32 %v2224_v26, %v2288_v18  ;;  %v2353_v39 = vmax.f32 %v2225_v23, %v2289_v30  ;;  %2669 = vst.msk [vmem:[%s4845_s4 + $0xa0] sm:$0xf] %vm2628_vm2, %v2985_v63  ;;  %v2157_v36 = vmul.f32 %v4383_v53, %v4950_v38  ;;  %v4958_v32 = vld [vmem:[#allocation11_spill] sm:$0xff]  ;;  %v4959_v30 = vld [vmem:[#allocation12_spill] sm:$0xff]  ;;  %v4961_v38 = vld [vmem:[#allocation14_spill] sm:$0xff] }
 0x2d8   : > { %2670 = vst.msk [vmem:[%s4845_s4 + $0xa4] sm:$0xf] %vm2628_vm2, %v2986_v24  ;;  %v2987_v9 = vpack.c.bf16 %v2350_v29, %v2350_v29  ;;  %v2354_v10 = vmax.f32 %v2226_v20, %v2290_v33  ;;  %v2158_v51 = vmul.f32 %v4383_v53, %v4951_v49  ;;  %v2355_v48 = vmax.f32 %v2227_v34, %v2291_v41  ;;  %v4960_v41 = vld [vmem:[#allocation13_spill] sm:$0xff]  ;;  %v4962_v49 = vld [vmem:[#allocation15_spill] sm:$0xff] }
 0x2d9   : > { %v2988_v37 = vpack.c.bf16 %v2351_v58, %v2351_v58  ;;  %v2989_v44 = vpack.c.bf16 %v2352_v17, %v2352_v17  ;;  %v2990_v40 = vpack.c.bf16 %v2353_v39, %v2353_v39  ;;  %v2228_v5 = vadd.f32 %v4388_v43, %v2157_v36 }
 0x2da   : > { %2671 = vst.msk [vmem:[%s4845_s4 + $0xa8] sm:$0xf] %vm2628_vm2, %v2987_v9  ;;  %v2991_v55 = vpack.c.bf16 %v2354_v10, %v2354_v10  ;;  %v2229_v56 = vadd.f32 %v4388_v43, %v2158_v51  ;;  %v2159_v45 = vmul.f32 %v4383_v53, %v4952_v0  ;;  %v2992_v52 = vpack.c.bf16 %v2355_v48, %v2355_v48 }
 0x2db   : > { %2672 = vst.msk [vmem:[%s4845_s4 + $0xac] sm:$0xf] %vm2628_vm2, %v2988_v37  ;;  %2673 = vst.msk [vmem:[%s4845_s4 + $0xb0] sm:$0xf] %vm2628_vm2, %v2989_v44  ;;  %v2160_v61 = vmul.f32 %v4383_v53, %v4953_v57  ;;  %v2161_v13 = vmul.f32 %v4383_v53, %v4954_v8  ;;  %v2162_v3 = vmul.f32 %v4383_v53, %v4955_v16  ;;  %v2292_v19 = vmul.f32 0.2, %v2228_v5 }
 0x2dc   : > { %2674 = vst.msk [vmem:[%s4845_s4 + $0xb4] sm:$0xf] %vm2628_vm2, %v2990_v40  ;;  %2675 = vst.msk [vmem:[%s4845_s4 + $0xb8] sm:$0xf] %vm2628_vm2, %v2991_v55  ;;  %v2293_v2 = vmul.f32 0.2, %v2229_v56  ;;  %v2230_v12 = vadd.f32 %v4388_v43, %v2159_v45  ;;  %v2163_v60 = vmul.f32 %v4383_v53, %v4956_v59  ;;  %v2164_v28 = vmul.f32 %v4383_v53, %v4957_v25 }
 0x2dd   : > { %2676 = vst.msk [vmem:[%s4845_s4 + $0xbc] sm:$0xf] %vm2628_vm2, %v2992_v52  ;;  %v2231_v14 = vadd.f32 %v4388_v43, %v2160_v61  ;;  %v2232_v35 = vadd.f32 %v4388_v43, %v2161_v13  ;;  %v2233_v22 = vadd.f32 %v4388_v43, %v2162_v3  ;;  %v2356_v42 = vmax.f32 %v2228_v5, %v2292_v19  ;;  %v4963_v37 = vld [vmem:[#allocation16_spill] sm:$0xff]  ;;  %v4964_v5 = vld [vmem:[#allocation27_spill] sm:$0xff] }
 0x2de   : > { %v2357_v46 = vmax.f32 %v2229_v56, %v2293_v2  ;;  %v2294_v62 = vmul.f32 0.2, %v2230_v12  ;;  %v2234_v6 = vadd.f32 %v4388_v43, %v2163_v60  ;;  %v2235_v54 = vadd.f32 %v4388_v43, %v2164_v28  ;;  %v4965_v57 = vld [vmem:[#allocation28_spill] sm:$0xff] }
 0x2df   : > { %v2295_v1 = vmul.f32 0.2, %v2231_v14  ;;  %v2296_v4 = vmul.f32 0.2, %v2232_v35  ;;  %v2297_v31 = vmul.f32 0.2, %v2233_v22  ;;  %v2993_v27 = vpack.c.bf16 %v2356_v42, %v2356_v42 }
 0x2e0   : > { %v2994_v47 = vpack.c.bf16 %v2357_v46, %v2357_v46  ;;  %v2358_v26 = vmax.f32 %v2230_v12, %v2294_v62  ;;  %v2298_v23 = vmul.f32 0.2, %v2234_v6  ;;  %v2299_v15 = vmul.f32 0.2, %v2235_v54 }
 0x2e1   : > { %v2359_v7 = vmax.f32 %v2231_v14, %v2295_v1  ;;  %v2360_v50 = vmax.f32 %v2232_v35, %v2296_v4  ;;  %v2361_v11 = vmax.f32 %v2233_v22, %v2297_v31  ;;  %2677 = vst.msk [vmem:[%s4845_s4 + $0xc0] sm:$0xf] %vm2628_vm2, %v2993_v27  ;;  %v2165_v18 = vmul.f32 %v4383_v53, %v4958_v32 }
 0x2e2   : > { %2678 = vst.msk [vmem:[%s4845_s4 + $0xc4] sm:$0xf] %vm2628_vm2, %v2994_v47  ;;  %v2995_v21 = vpack.c.bf16 %v2358_v26, %v2358_v26  ;;  %v2362_v20 = vmax.f32 %v2234_v6, %v2298_v23  ;;  %v2166_v34 = vmul.f32 %v4383_v53, %v4959_v30  ;;  %v2363_v33 = vmax.f32 %v2235_v54, %v2299_v15 }
 0x2e3   : > { %v2996_v63 = vpack.c.bf16 %v2359_v7, %v2359_v7  ;;  %v2997_v24 = vpack.c.bf16 %v2360_v50, %v2360_v50  ;;  %v2998_v29 = vpack.c.bf16 %v2361_v11, %v2361_v11  ;;  %v2236_v17 = vadd.f32 %v4388_v43, %v2165_v18 }
 0x2e4   : > { %2679 = vst.msk [vmem:[%s4845_s4 + $0xc8] sm:$0xf] %vm2628_vm2, %v2995_v21  ;;  %v2999_v58 = vpack.c.bf16 %v2362_v20, %v2362_v20  ;;  %v2237_v39 = vadd.f32 %v4388_v43, %v2166_v34  ;;  %v2167_v9 = vmul.f32 %v4383_v53, %v4960_v41  ;;  %v3000_v10 = vpack.c.bf16 %v2363_v33, %v2363_v33 }
 0x2e5   : > { %2680 = vst.msk [vmem:[%s4845_s4 + $0xcc] sm:$0xf] %vm2628_vm2, %v2996_v63  ;;  %2681 = vst.msk [vmem:[%s4845_s4 + $0xd0] sm:$0xf] %vm2628_vm2, %v2997_v24  ;;  %v2168_v36 = vmul.f32 %v4383_v53, %v4961_v38  ;;  %v2169_v51 = vmul.f32 %v4383_v53, %v4962_v49  ;;  %v2170_v44 = vmul.f32 %v4383_v53, %v4963_v37  ;;  %v2300_v40 = vmul.f32 0.2, %v2236_v17 }
 0x2e6   : > { %2682 = vst.msk [vmem:[%s4845_s4 + $0xd4] sm:$0xf] %vm2628_vm2, %v2998_v29  ;;  %2683 = vst.msk [vmem:[%s4845_s4 + $0xd8] sm:$0xf] %vm2628_vm2, %v2999_v58  ;;  %v2301_v48 = vmul.f32 0.2, %v2237_v39  ;;  %v2238_v55 = vadd.f32 %v4388_v43, %v2167_v9  ;;  %v2171_v56 = vmul.f32 %v4383_v53, %v4964_v5  ;;  %v2172_v61 = vmul.f32 %v4383_v53, %v4965_v57 }
 0x2e7   : > { %2684 = vst.msk [vmem:[%s4845_s4 + $0xdc] sm:$0xf] %vm2628_vm2, %v3000_v10  ;;  %v2239_v0 = vadd.f32 %v4388_v43, %v2168_v36  ;;  %v2240_v45 = vadd.f32 %v4388_v43, %v2169_v51  ;;  %v2241_v52 = vadd.f32 %v4388_v43, %v2170_v44  ;;  %v2364_v8 = vmax.f32 %v2236_v17, %v2300_v40 }
 0x2e8   : > { %v2365_v13 = vmax.f32 %v2237_v39, %v2301_v48  ;;  %v2302_v16 = vmul.f32 0.2, %v2238_v55  ;;  %v2242_v3 = vadd.f32 %v4388_v43, %v2171_v56  ;;  %v2243_v59 = vadd.f32 %v4388_v43, %v2172_v61 }
 0x2e9   : > { %v2303_v19 = vmul.f32 0.2, %v2239_v0  ;;  %v2304_v2 = vmul.f32 0.2, %v2240_v45  ;;  %v2305_v12 = vmul.f32 0.2, %v2241_v52  ;;  %v3001_v60 = vpack.c.bf16 %v2364_v8, %v2364_v8 }
 0x2ea   : > { %v3002_v14 = vpack.c.bf16 %v2365_v13, %v2365_v13  ;;  %v2366_v35 = vmax.f32 %v2238_v55, %v2302_v16  ;;  %v2306_v22 = vmul.f32 0.2, %v2242_v3  ;;  %v2307_v46 = vmul.f32 0.2, %v2243_v59 }
 0x2eb   : > { %v2367_v25 = vmax.f32 %v2239_v0, %v2303_v19  ;;  %v2368_v28 = vmax.f32 %v2240_v45, %v2304_v2  ;;  %v2369_v42 = vmax.f32 %v2241_v52, %v2305_v12  ;;  %2685 = vst.msk [vmem:[%s4845_s4 + $0xe0] sm:$0xf] %vm2628_vm2, %v3001_v60 }
 0x2ec   : > { %2686 = vst.msk [vmem:[%s4845_s4 + $0xe4] sm:$0xf] %vm2628_vm2, %v3002_v14  ;;  %v3003_v53 = vpack.c.bf16 %v2366_v35, %v2366_v35  ;;  %v2370_v43 = vmax.f32 %v2242_v3, %v2306_v22  ;;  %v2371_v4 = vmax.f32 %v2243_v59, %v2307_v46 }
 0x2ed   : > { %v3004_v62 = vpack.c.bf16 %v2367_v25, %v2367_v25  ;;  %v3005_v6 = vpack.c.bf16 %v2368_v28, %v2368_v28  ;;  %v3006_v1 = vpack.c.bf16 %v2369_v42, %v2369_v42 }
 0x2ee   : > { %2687 = vst.msk [vmem:[%s4845_s4 + $0xe8] sm:$0xf] %vm2628_vm2, %v3003_v53  ;;  %v3007_v31 = vpack.c.bf16 %v2370_v43, %v2370_v43  ;;  %v3008_v54 = vpack.c.bf16 %v2371_v4, %v2371_v4 }
 0x2ef   : > { %2688 = vst.msk [vmem:[%s4845_s4 + $0xec] sm:$0xf] %vm2628_vm2, %v3004_v62  ;;  %2689 = vst.msk [vmem:[%s4845_s4 + $0xf0] sm:$0xf] %vm2628_vm2, %v3005_v6 }
 0x2f0   : > { %2690 = vst.msk [vmem:[%s4845_s4 + $0xf4] sm:$0xf] %vm2628_vm2, %v3006_v1  ;;  %2691 = vst.msk [vmem:[%s4845_s4 + $0xf8] sm:$0xf] %vm2628_vm2, %v3007_v31 }
 0x2f1   : > { %2692 = vst.msk [vmem:[%s4845_s4 + $0xfc] sm:$0xf] %vm2628_vm2, %v3008_v54 }
 0x2f2 PF: > { %s14_s15 = sadd.s32 1, %s3410_s15  }
 0x2f3   : > { %p11_p5 = scmp.ge.s32.totalorder %s14_s15, 4  }
 0x2f5   :  { %13 = sbr.rel (!%p11_p5) target bundleno = 1 (0x1), region = 70 }

// kernel: discriminator_forward.7
= control target key start
LH: loop header
LB: loop body
LE: loop exit
PB: predicated region body
PF: predicated region fallthrough
CT: control target
= control target key end

     0   :  { %s1393_s15 = smov 0   ;;  %s1721_s0 = inlined_call_operand.vmem [shape: bf16[2,144,64], index: 0, kind: input, shape index: {}]   ;;  %s1722_s1 = inlined_call_operand.vmem [shape: bf16[4,64,32], index: 1, kind: input, shape index: {}]   ;;  %s1723_s2 = inlined_call_operand.vmem [shape: f32[1,32], index: 2, kind: input, shape index: {}]   ;;  %s1724_s3 = inlined_call_operand.vmem [shape: f32[1,32], index: 3, kind: input, shape index: {}]   ;;  %s1725_s4 = inlined_call_operand.vmem [shape: bf16[128,32], index: 4, kind: output, shape index: {}]  }
   0x1 LB: > { %s1399_s16 = sadd.s32 4294967295, %s1366_s15   ;;  %p1086_p0 = scmp.ge.s32.totalorder %s1366_s15, 1  ;;  %s1366_s15 = sphi %s1393_s15, %s14_s15  }
   0x2   : > { %p157_p1 = scmp.lt.s32.totalorder %s1366_s15, 3 }
   0x4   : > { %p158_p2 = pnand %p1086_p0, %p157_p1 }
   0x5   : > { %v1326_v0 = vld [vmem:[%s1722_s1 + $0x20] sm:$0xff] (!%p158_p2)   ;;  %p178_p3 = scmp.lt.s32.totalorder (!%p158_p2), %s1399_s16, 1  ;;  %v1328_v2 = vld [vmem:[%s1722_s1 + $0x28] sm:$0xff] (!%p158_p2)   ;;  %v1330_v4 = vld [vmem:[%s1722_s1 + $0x30] sm:$0xff] (!%p158_p2)   ;;  %vm261_vm0 = vcmask (!%p158_p2), 523264   ;;  %s1160_s30 = sshll.u32 (!%p158_p2), %s1399_s16, 6 }
   0x6   : > { %161 = sbr.rel (%p158_p2) target bundleno = 407 (0x197), region = 36  ;;  %v1327_v1 = vld [vmem:[%s1722_s1 + $0x40] sm:$0xff] (!%p158_p2)   ;;  %1229 = vmatprep.subr.bf16.mxu1 (!%p158_p2), %v1326_v0  ;;  %v1329_v3 = vld [vmem:[%s1722_s1 + $0x48] sm:$0xff] (!%p158_p2)   ;;  %v1331_v5 = vld [vmem:[%s1722_s1 + $0x50] sm:$0xff] (!%p158_p2)   ;;  %vm754_vm1 = vcmask (!%p158_p2), 261120   ;;  %s753_s5 = scalar_lea.vmem (!%p158_p2), [#allocation2], %s1160_s30 }
   0x7   : > { %1261 = vmatprep.subr.bf16.mxu0 (!%p158_p2), %v1327_v1  ;;  %1230 = vmatpush3.bf16.msra.mxu1 (!%p158_p2), %v1326_v0  ;;  %v1332_v6 = vld [vmem:[%s1722_s1 + $0x38] sm:$0xff] (!%p158_p2)   ;;  %v1337_v11 = vld [vmem:[%s1722_s1] sm:$0xff] (!%p158_p2)   ;;  %v1340_v14 = vld [vmem:[%s1722_s1 + $0x8] sm:$0xff] (!%p158_p2)   ;;  %p1161_p4 = scmp.ne.s32.totalorder (!%p158_p2), %s1399_s16, 1 }
   0x8   : > { %1262 = vmatpush3.bf16.msra.mxu0 (!%p158_p2), %v1327_v1  ;;  %1231 = vmatprep.subr.bf16.mxu1 (!%p158_p2), %v1328_v2  ;;  %v1333_v7 = vld [vmem:[%s1722_s1 + $0x58] sm:$0xff] (!%p158_p2)   ;;  %v1339_v12 = vld [vmem:[%s1722_s1 + $0x60] sm:$0xff] (!%p158_p2)   ;;  %v1341_v15 = vld [vmem:[%s1722_s1 + $0x68] sm:$0xff] (!%p158_p2)  }
   0x9   : > { %1263 = vmatprep.subr.bf16.mxu0 (!%p158_p2), %v1329_v3  ;;  %v1345_v19 = vld [vmem:[%s1722_s1 + $0x10] sm:$0xff] (!%p158_p2)   ;;  %v1348_v22 = vld [vmem:[%s1722_s1 + $0x18] sm:$0xff] (!%p158_p2)  }
   0xa   : > { %v1347_v20 = vld [vmem:[%s1722_s1 + $0x70] sm:$0xff] (!%p158_p2)   ;;  %v1349_v23 = vld [vmem:[%s1722_s1 + $0x78] sm:$0xff] (!%p158_p2)  }
   0xb   : > { %1232 = vmatpush3.bf16.msra.mxu1 (!%p158_p2), %v1328_v2 }
   0xc   : > { %1264 = vmatpush3.bf16.msra.mxu0 (!%p158_p2), %v1329_v3  ;;  %1233 = vmatprep.subr.bf16.mxu1 (!%p158_p2), %v1330_v4 }
   0xd   : > { %s179_s23 = scalar_select %p178_p3, %s1399_s16, 1  ;;  %1265 = vmatprep.subr.bf16.mxu0 %v1331_v5 }
   0xe   : > { %vm1036_vm2 = vcmask (!%p1161_p4), 257024  }
   0xf   : > { %s1317_s28 = smul.u32 72, %s179_s23  ;;  %1234 = vmatpush3.bf16.msra.mxu1 %v1330_v4 }
  0x10   : > { %1266 = vmatpush3.bf16.msra.mxu0 %v1331_v5  ;;  %1235 = vmatprep.subr.bf16.mxu1 %v1332_v6 }
  0x11   : > { %s1429_s9 = scalar_lea.vmem %s1721_s0, %s1317_s28  ;;  %1267 = vmatprep.subr.bf16.mxu0 %v1333_v7 }
  0x12   : > { %v1334_v8 = vld [vmem:[%s1429_s9 + $0x24] sm:$0xff]   ;;  %v1336_v10 = vld [vmem:[%s1429_s9 + $0x2c] sm:$0xff]   ;;  %v1342_v16 = vld [vmem:[%s1429_s9 + $0x34] sm:$0xff]  }
  0x13   : > { %v1335_v9 = vld [vmem:[%s1429_s9 + $0x4] sm:$0xff]   ;;  %1237 = vmatprep.mubr.msk.bf16.mxu1 %vm261_vm0, %v1334_v8  ;;  %v1338_v13 = vld [vmem:[%s1429_s9 + $0xc] sm:$0xff]   ;;  %1236 = vmatpush3.bf16.msra.mxu1 %v1332_v6  ;;  %v1343_v17 = vld [vmem:[%s1429_s9 + $0x14] sm:$0xff]  }
  0x14   : > { %1269 = vmatprep.mubr.msk.bf16.mxu0 %vm261_vm0, %v1335_v9  ;;  %1268 = vmatpush3.bf16.msra.mxu0 %v1333_v7  ;;  %v1344_v18 = vld [vmem:[%s1429_s9 + $0x3c] sm:$0xff]   ;;  %v1351_v25 = vld [vmem:[%s1429_s9 + $0x28] sm:$0xff]   ;;  %v1353_v27 = vld [vmem:[%s1429_s9 + $0x30] sm:$0xff]  }
  0x15   : > { %1245 = vmatprep.subr.bf16.mxu1 %v1337_v11  ;;  %1277 = vmatprep.subr.bf16.mxu0 %v1339_v12  ;;  %v1346_v21 = vld [vmem:[%s1429_s9 + $0x1c] sm:$0xff]   ;;  %v1352_v26 = vld [vmem:[%s1429_s9 + $0x8] sm:$0xff]   ;;  %v1354_v28 = vld [vmem:[%s1429_s9 + $0x10] sm:$0xff]  }
  0x16   : > { %1238 = vmatmul.mubr.msk.bf16.vlgmr.msra.gmra.mrb[0].mxu1 %vm261_vm0, %v1336_v10  ;;  %v1350_v24 = vld [vmem:[%s1429_s9] sm:$0xff]   ;;  %v1355_v29 = vld [vmem:[%s1429_s9 + $0x38] sm:$0xff]  }
  0x17   : > { %1270 = vmatmul.mubr.msk.bf16.vlgmr.msra.gmra.mrb[0].mxu0 %vm261_vm0, %v1338_v13  ;;  %1246 = vmatpush3.bf16.msra.mxu1 %v1337_v11  ;;  %v1356_v30 = vld [vmem:[%s1429_s9 + $0x18] sm:$0xff]   ;;  %v1357_v31 = vld [vmem:[%s1429_s9 + $0x40] sm:$0xff]  }
  0x18   : > { %1278 = vmatpush3.bf16.msra.mxu0 %v1339_v12  ;;  %1247 = vmatprep.subr.bf16.mxu1 %v1340_v14 }
  0x19   : > { %1279 = vmatprep.subr.bf16.mxu0 %v1341_v15  ;;  %1241 = vmatprep.mubr.msk.bf16.mxu1 %vm261_vm0, %v1342_v16 }
  0x1a   : > { %1273 = vmatprep.mubr.msk.bf16.mxu0 %vm261_vm0, %v1343_v17 }
  0x1b   : > { %1248 = vmatpush3.bf16.msra.mxu1 %v1340_v14 }
  0x1c   : > { %1280 = vmatpush3.bf16.msra.mxu0 %v1341_v15  ;;  %1249 = vmatprep.subr.bf16.mxu1 %v1345_v19 }
  0x1d   : > { %1281 = vmatprep.subr.bf16.mxu0 %v1347_v20 }
  0x1e   : > { %1242 = vmatmul.mubr.msk.bf16.gmra.mrb[4].mxu1 %vm261_vm0, %v1344_v18 }
  0x1f   : > { %1274 = vmatmul.mubr.msk.bf16.gmra.mrb[4].mxu0 %vm261_vm0, %v1346_v21  ;;  %1250 = vmatpush3.bf16.msra.mxu1 %v1345_v19 }
  0x20   : > { %1282 = vmatpush3.bf16.msra.mxu0 %v1347_v20  ;;  %1251 = vmatprep.subr.bf16.mxu1 %v1348_v22 }
  0x21   : > { %1283 = vmatprep.subr.bf16.mxu0 %v1349_v23  ;;  %1253 = vmatprep.mubr.msk.bf16.mxu1 %vm261_vm0, %v1350_v24 }
  0x22   : > { %1285 = vmatprep.mubr.msk.bf16.mxu0 %vm261_vm0, %v1351_v25 }
  0x23   : > { %1252 = vmatpush3.bf16.msra.mxu1 %v1348_v22 }
  0x24   : > { %1284 = vmatpush3.bf16.msra.mxu0 %v1349_v23 }
  0x26   : > { %1254 = vmatmul.mubr.msk.bf16.vlgmr.msra.gmra.mrb[0].mxu1 %vm261_vm0, %v1352_v26 }
  0x27   : > { %1286 = vmatmul.mubr.msk.bf16.vlgmr.msra.gmra.mrb[0].mxu0 %vm261_vm0, %v1353_v27  ;;  %1257 = vmatprep.mubr.msk.bf16.mxu1 %vm261_vm0, %v1354_v28 }
  0x28   : > { %1289 = vmatprep.mubr.msk.bf16.mxu0 %vm261_vm0, %v1355_v29 }
  0x2e   : > { %1258 = vmatmul.mubr.msk.bf16.gmra.mrb[4].mxu1 %vm261_vm0, %v1356_v30 }
  0x2f   : > { %1290 = vmatmul.mubr.msk.bf16.gmra.mrb[4].mxu0 %vm261_vm0, %v1357_v31 }
  0xf9   : > { %v1255_v32 = vpop.f32.mrb[0].mxu1 }
  0xfa   : > { %v1287_v33 = vpop.f32.mrb[0].mxu0  ;;  %v429_v34 = vpop.f32.mrb[1].mxu1 }
  0xfb   : > { %v1293_v35 = vadd.f32 %v1287_v33, %v1255_v32  ;;  %v713_v36 = vpop.f32.mrb[1].mxu0  ;;  %v1256_v37 = vpop.f32.mrb[2].mxu1 }
  0xfc   : > { %v1294_v38 = vadd.f32 %v713_v36, %v429_v34  ;;  %v1288_v39 = vpop.f32.mrb[2].mxu0  ;;  %v432_v40 = vpop.f32.mrb[3].mxu1 }
  0xfd   : > { %757 = vst.msk [vmem:[%s753_s5 + $0x10] sm:$0xff] %vm754_vm1, %v1293_v35  ;;  %v1295_v41 = vadd.f32 %v1288_v39, %v1256_v37  ;;  %v716_v42 = vpop.f32.mrb[3].mxu0 }
  0xfe   : > { %755 = vst.msk [vmem:[%s753_s5] sm:$0xff] %vm754_vm1, %v1294_v38  ;;  %v1296_v43 = vadd.f32 %v716_v42, %v432_v40 }
  0xff   : > { %758 = vst.msk [vmem:[%s753_s5 + $0x18] sm:$0xff] %vm754_vm1, %v1295_v41 }
 0x100   : > { %756 = vst.msk [vmem:[%s753_s5 + $0x8] sm:$0xff] %vm754_vm1, %v1296_v43 }
 0x101   : > { %v1259_v44 = vpop.f32.mrb[4].mxu1 }
 0x102   : > { %v1291_v45 = vpop.f32.mrb[4].mxu0  ;;  %v445_v46 = vpop.f32.mrb[5].mxu1  ;;  %766 = sbr.rel (%p1161_p4) target bundleno = 407 (0x197), region = 40 }
 0x103   : > { %v1297_v47 = vadd.f32 %v1291_v45, %v1259_v44  ;;  %v729_v48 = vpop.f32.mrb[5].mxu0  ;;  %v1260_v49 = vpop.f32.mrb[6].mxu1 }
 0x104   : > { %v1298_v50 = vadd.f32 %v729_v48, %v445_v46  ;;  %v1292_v51 = vpop.f32.mrb[6].mxu0  ;;  %v448_v52 = vpop.f32.mrb[7].mxu1 }
 0x105   : > { %761 = vst.msk [vmem:[%s753_s5 + $0x30] sm:$0xff] %vm754_vm1, %v1297_v47  ;;  %v1299_v53 = vadd.f32 %v1292_v51, %v1260_v49  ;;  %v732_v54 = vpop.f32.mrb[7].mxu0 }
 0x106   : > { %759 = vst.msk [vmem:[%s753_s5 + $0x20] sm:$0xff] %vm754_vm1, %v1298_v50  ;;  %v1300_v55 = vadd.f32 %v732_v54, %v448_v52 }
 0x107   : > { %762 = vst.msk [vmem:[%s753_s5 + $0x38] sm:$0xff] %vm754_vm1, %v1299_v53 }
 0x108   : > { %760 = vst.msk [vmem:[%s753_s5 + $0x28] sm:$0xff] %vm754_vm1, %v1300_v55 }
 0x10f   : > { %v767_v56 = vld [vmem:[#allocation2] sm:$0xff]  ;;  %v768_v57 = vld [vmem:[#allocation2 + $0x8] sm:$0xff]  ;;  %v769_v58 = vld [vmem:[#allocation2 + $0x10] sm:$0xff] }
 0x110   : > { %v770_v59 = vld [vmem:[#allocation2 + $0x18] sm:$0xff]  ;;  %v783_v60 = vsel %vm754_vm1, %v767_v56, 0.0  ;;  %v784_v61 = vsel %vm754_vm1, %v768_v57, 0.0  ;;  %v786_v62 = vsel %vm754_vm1, %v769_v58, 0.0  ;;  %v771_v63 = vld [vmem:[#allocation2 + $0x20] sm:$0xff]  ;;  %v772_v2 = vld [vmem:[#allocation2 + $0x28] sm:$0xff] }
 0x111   : > { %v785_v0 = vadd.f32 %v784_v61, %v783_v60  ;;  %v788_v1 = vsel %vm754_vm1, %v770_v59, 0.0  ;;  %v790_v4 = vsel %vm754_vm1, %v771_v63, 0.0  ;;  %v773_v5 = vld [vmem:[#allocation2 + $0x30] sm:$0xff]  ;;  %v792_v7 = vsel %vm754_vm1, %v772_v2, 0.0  ;;  %v774_v8 = vld [vmem:[#allocation2 + $0x38] sm:$0xff]  ;;  %v775_v11 = vld [vmem:[#allocation2 + $0x40] sm:$0xff] }
 0x112   : > { %v794_v10 = vsel %vm754_vm1, %v773_v5, 0.0  ;;  %v796_v13 = vsel %vm754_vm1, %v774_v8, 0.0  ;;  %v776_v14 = vld [vmem:[#allocation2 + $0x48] sm:$0xff]  ;;  %v798_v16 = vsel %vm754_vm1, %v775_v11, 0.0  ;;  %v777_v17 = vld [vmem:[#allocation2 + $0x50] sm:$0xff]  ;;  %v778_v20 = vld [vmem:[#allocation2 + $0x58] sm:$0xff] }
 0x113   : > { %v787_v3 = vadd.f32 %v786_v62, %v785_v0  ;;  %v800_v19 = vsel %vm754_vm1, %v776_v14, 0.0  ;;  %v802_v22 = vsel %vm754_vm1, %v777_v17, 0.0  ;;  %v779_v23 = vld [vmem:[#allocation2 + $0x60] sm:$0xff]  ;;  %v804_v25 = vsel %vm754_vm1, %v778_v20, 0.0  ;;  %v780_v26 = vld [vmem:[#allocation2 + $0x68] sm:$0xff]  ;;  %v781_v29 = vld [vmem:[#allocation2 + $0x70] sm:$0xff] }
 0x114   : > { %v806_v28 = vsel %vm754_vm1, %v779_v23, 0.0  ;;  %v808_v31 = vsel %vm754_vm1, %v780_v26, 0.0  ;;  %v782_v32 = vld [vmem:[#allocation2 + $0x78] sm:$0xff]  ;;  %v810_v34 = vsel %vm754_vm1, %v781_v29, 0.0 }
 0x115   : > { %v789_v6 = vadd.f32 %v788_v1, %v787_v3  ;;  %v812_v36 = vsel %vm754_vm1, %v782_v32, 0.0 }
 0x117   : > { %v791_v9 = vadd.f32 %v790_v4, %v789_v6 }
 0x119   : > { %v793_v12 = vadd.f32 %v792_v7, %v791_v9 }
 0x11b   : > { %v795_v15 = vadd.f32 %v794_v10, %v793_v12 }
 0x11d   : > { %v797_v18 = vadd.f32 %v796_v13, %v795_v15 }
 0x11f   : > { %v799_v21 = vadd.f32 %v798_v16, %v797_v18 }
 0x121   : > { %v801_v24 = vadd.f32 %v800_v19, %v799_v21 }
 0x123   : > { %v803_v27 = vadd.f32 %v802_v22, %v801_v24 }
 0x125   : > { %v805_v30 = vadd.f32 %v804_v25, %v803_v27 }
 0x127   : > { %v807_v33 = vadd.f32 %v806_v28, %v805_v30 }
 0x129   : > { %v809_v35 = vadd.f32 %v808_v31, %v807_v33 }
 0x12b   : > { %v811_v37 = vadd.f32 %v810_v34, %v809_v35 }
 0x12d   : > { %v813_v38 = vadd.f32 %v812_v36, %v811_v37 }
 0x12f   : > { %v814_v39 = vrot.slane %v813_v38, 4 }
 0x131   : > { %v815_v40 = vadd.f32 %v814_v39, %v813_v38 }
 0x133   : > { %v816_v41 = vrot.slane %v815_v40, 2 }
 0x135   : > { %v817_v42 = vadd.f32 %v816_v41, %v815_v40 }
 0x137   : > { %v818_v43 = vrot.slane %v817_v42, 1 }
 0x139   : > { %v819_v44 = vadd.f32 %v818_v43, %v817_v42 }
 0x13b   : > { %v820_v45 = vmul.f32 0.0078125, %v819_v44 }
 0x13d   : > { %v1516_v46 = vsub.f32 %v767_v56, %v820_v45  ;;  %v1518_v47 = vsub.f32 %v768_v57, %v820_v45  ;;  %v1520_v48 = vsub.f32 %v769_v58, %v820_v45  ;;  %v1522_v49 = vsub.f32 %v770_v59, %v820_v45 }
 0x13e   : > { %v1524_v50 = vsub.f32 %v771_v63, %v820_v45  ;;  %v1532_v54 = vsub.f32 %v772_v2, %v820_v45  ;;  %v1536_v56 = vsub.f32 %v773_v5, %v820_v45  ;;  %v1543_v62 = vsub.f32 %v774_v8, %v820_v45 }
 0x13f   : > { %v837_v51 = vmul.f32 %v1516_v46, %v1516_v46  ;;  %v838_v52 = vmul.f32 %v1518_v47, %v1518_v47  ;;  %v839_v53 = vmul.f32 %v1520_v48, %v1520_v48  ;;  %v840_v55 = vmul.f32 %v1522_v49, %v1522_v49 }
 0x140   : > { %v841_v57 = vmul.f32 %v1524_v50, %v1524_v50  ;;  %v842_v63 = vmul.f32 %v1532_v54, %v1532_v54  ;;  %v1548_v2 = vsub.f32 %v775_v11, %v820_v45  ;;  %v843_v3 = vmul.f32 %v1536_v56, %v1536_v56 }
 0x141   : > { %v853_v58 = vsel %vm754_vm1, %v837_v51, 0.0  ;;  %v854_v59 = vsel %vm754_vm1, %v838_v52, 0.0  ;;  %v856_v60 = vsel %vm754_vm1, %v839_v53, 0.0  ;;  %v858_v0 = vsel %vm754_vm1, %v840_v55, 0.0 }
 0x142   : > { %v855_v61 = vadd.f32 %v854_v59, %v853_v58  ;;  %v860_v4 = vsel %vm754_vm1, %v841_v57, 0.0  ;;  %v1553_v6 = vsub.f32 %v776_v14, %v820_v45  ;;  %v844_v7 = vmul.f32 %v1543_v62, %v1543_v62 }
 0x143   : > { %v862_v8 = vsel %vm754_vm1, %v842_v63, 0.0  ;;  %v1558_v10 = vsub.f32 %v777_v17, %v820_v45  ;;  %v845_v11 = vmul.f32 %v1548_v2, %v1548_v2  ;;  %v864_v12 = vsel %vm754_vm1, %v843_v3, 0.0  ;;  %v891_v63 = vld [vmem:[%s1723_s2] sm:$0x1] }
 0x144   : > { %v857_v1 = vadd.f32 %v856_v60, %v855_v61  ;;  %v1563_v15 = vsub.f32 %v778_v20, %v820_v45  ;;  %v846_v14 = vmul.f32 %v1553_v6, %v1553_v6  ;;  %v866_v16 = vsel %vm754_vm1, %v844_v7, 0.0 }
 0x145   : > { %v1568_v19 = vsub.f32 %v779_v23, %v820_v45  ;;  %v847_v17 = vmul.f32 %v1558_v10, %v1558_v10  ;;  %v868_v21 = vsel %vm754_vm1, %v845_v11, 0.0  ;;  %v1573_v24 = vsub.f32 %v780_v26, %v820_v45 }
 0x146   : > { %v859_v5 = vadd.f32 %v858_v0, %v857_v1  ;;  %v848_v20 = vmul.f32 %v1563_v15, %v1563_v15  ;;  %v870_v25 = vsel %vm754_vm1, %v846_v14, 0.0  ;;  %v1578_v28 = vsub.f32 %v781_v29, %v820_v45 }
 0x147   : > { %v849_v23 = vmul.f32 %v1568_v19, %v1568_v19  ;;  %v872_v30 = vsel %vm754_vm1, %v847_v17, 0.0  ;;  %v1583_v33 = vsub.f32 %v782_v32, %v820_v45  ;;  %v850_v26 = vmul.f32 %v1573_v24, %v1573_v24 }
 0x148   : > { %v861_v9 = vadd.f32 %v860_v4, %v859_v5  ;;  %v874_v34 = vsel %vm754_vm1, %v848_v20, 0.0  ;;  %v851_v36 = vmul.f32 %v1578_v28, %v1578_v28  ;;  %v896_v60 = vlaneseq  ;;  %v1604_v5 = vld [vmem:[%s1724_s3] ss:$0 sm:$0xff] }
 0x149   : > { %v876_v29 = vsel %vm754_vm1, %v849_v23, 0.0  ;;  %v852_v38 = vmul.f32 %v1583_v33, %v1583_v33  ;;  %v878_v39 = vsel %vm754_vm1, %v850_v26, 0.0 }
 0x14a   : > { %v863_v13 = vadd.f32 %v862_v8, %v861_v9  ;;  %v880_v32 = vsel %vm754_vm1, %v851_v36, 0.0  ;;  %v897_v61 = vshrl.u32 %v896_v60, 7 }
 0x14b   : > { %v882_v42 = vsel %vm754_vm1, %v852_v38, 0.0 }
 0x14c   : > { %v865_v18 = vadd.f32 %v864_v12, %v863_v13  ;;  %v898_v0 = vsub.s32 0, %v897_v61 }
 0x14e   : > { %v867_v22 = vadd.f32 %v866_v16, %v865_v18 }
 0x150   : > { %v869_v27 = vadd.f32 %v868_v21, %v867_v22 }
 0x152   : > { %v871_v31 = vadd.f32 %v870_v25, %v869_v27 }
 0x154   : > { %v873_v35 = vadd.f32 %v872_v30, %v871_v31 }
 0x156   : > { %v875_v37 = vadd.f32 %v874_v34, %v873_v35 }
 0x158   : > { %v877_v40 = vadd.f32 %v876_v29, %v875_v37 }
 0x15a   : > { %v879_v41 = vadd.f32 %v878_v39, %v877_v40 }
 0x15c   : > { %v881_v43 = vadd.f32 %v880_v32, %v879_v41 }
 0x15e   : > { %v883_v44 = vadd.f32 %v882_v42, %v881_v43 }
 0x160   : > { %v884_v45 = vrot.slane %v883_v44, 4 }
 0x162   : > { %v885_v51 = vadd.f32 %v884_v45, %v883_v44 }
 0x164   : > { %v886_v52 = vrot.slane %v885_v51, 2 }
 0x166   : > { %v887_v53 = vadd.f32 %v886_v52, %v885_v51 }
 0x168   : > { %v888_v55 = vrot.slane %v887_v53, 1 }
 0x16a   : > { %v889_v57 = vadd.f32 %v888_v55, %v887_v53 }
 0x16c   : > { %v890_v58 = vmul.f32 0.0078125, %v889_v57 }
 0x16e   : > { %v892_v59 = vadd.f32 1e-05, %v890_v58 }
 0x170   : > { %1358 = vrsqrt.f32 %v892_v59 }
 0x17a   : > { %v1359_v1 = vpop.eup %1358 }
 0x17b   : > { %v894_v3 = vmul.f32 %v1359_v1, %v891_v63 }
 0x17d   : > { %v1599_v4 = vrot.slane %v894_v3, %v898_v0 }
 0x17f   : > { %v901_v7 = vmul.f32 %v1599_v4, %v1516_v46  ;;  %v902_v8 = vmul.f32 %v1599_v4, %v1518_v47  ;;  %v903_v9 = vmul.f32 %v1599_v4, %v1520_v48  ;;  %v904_v11 = vmul.f32 %v1599_v4, %v1522_v49 }
 0x180   : > { %v905_v12 = vmul.f32 %v1599_v4, %v1524_v50  ;;  %v906_v13 = vmul.f32 %v1599_v4, %v1532_v54  ;;  %v907_v14 = vmul.f32 %v1599_v4, %v1536_v56  ;;  %v908_v46 = vmul.f32 %v1599_v4, %v1543_v62 }
 0x181   : > { %v924_v47 = vadd.f32 %v1604_v5, %v901_v7  ;;  %v925_v16 = vadd.f32 %v1604_v5, %v902_v8  ;;  %v926_v48 = vadd.f32 %v1604_v5, %v903_v9  ;;  %v927_v49 = vadd.f32 %v1604_v5, %v904_v11 }
 0x182   : > { %v928_v18 = vadd.f32 %v1604_v5, %v905_v12  ;;  %v929_v50 = vadd.f32 %v1604_v5, %v906_v13  ;;  %v930_v54 = vadd.f32 %v1604_v5, %v907_v14  ;;  %v931_v17 = vadd.f32 %v1604_v5, %v908_v46 }
 0x183   : > { %v940_v56 = vmul.f32 0.2, %v924_v47  ;;  %v941_v21 = vmul.f32 0.2, %v925_v16  ;;  %v942_v22 = vmul.f32 0.2, %v926_v48  ;;  %v909_v62 = vmul.f32 %v1599_v4, %v1548_v2 }
 0x184   : > { %v943_v20 = vmul.f32 0.2, %v927_v49  ;;  %v944_v25 = vmul.f32 0.2, %v928_v18  ;;  %v945_v27 = vmul.f32 0.2, %v929_v50  ;;  %v910_v23 = vmul.f32 %v1599_v4, %v1553_v6 }
 0x185   : > { %v956_v30 = vmax.f32 %v924_v47, %v940_v56  ;;  %v957_v31 = vmax.f32 %v925_v16, %v941_v21  ;;  %v958_v26 = vmax.f32 %v926_v48, %v942_v22  ;;  %v946_v34 = vmul.f32 0.2, %v930_v54 }
 0x186   : > { %v959_v35 = vmax.f32 %v927_v49, %v943_v20  ;;  %v960_v36 = vmax.f32 %v928_v18, %v944_v25  ;;  %v961_v29 = vmax.f32 %v929_v50, %v945_v27  ;;  %v947_v37 = vmul.f32 0.2, %v931_v17 }
 0x187   : > { %v1181_v38 = vpack.c.bf16 %v956_v30, %v956_v30  ;;  %v1182_v39 = vpack.c.bf16 %v957_v31, %v957_v31  ;;  %v1183_v40 = vpack.c.bf16 %v958_v26, %v958_v26  ;;  %v962_v32 = vmax.f32 %v930_v54, %v946_v34 }
 0x188   : > { %v1184_v41 = vpack.c.bf16 %v959_v35, %v959_v35  ;;  %v1185_v2 = vpack.c.bf16 %v960_v36, %v960_v36  ;;  %v1186_v42 = vpack.c.bf16 %v961_v29, %v961_v29  ;;  %v963_v43 = vmax.f32 %v931_v17, %v947_v37 }
 0x189   : > { %1037 = vst.msk [vmem:[%s1725_s4] sm:$0xf] %vm1036_vm2, %v1181_v38  ;;  %1038 = vst.msk [vmem:[%s1725_s4 + $0x4] sm:$0xf] %vm1036_vm2, %v1182_v39  ;;  %v1187_v6 = vpack.c.bf16 %v962_v32, %v962_v32  ;;  %v932_v44 = vadd.f32 %v1604_v5, %v909_v62  ;;  %v933_v45 = vadd.f32 %v1604_v5, %v910_v23 }
 0x18a   : > { %1039 = vst.msk [vmem:[%s1725_s4 + $0x8] sm:$0xf] %vm1036_vm2, %v1183_v40  ;;  %v911_v51 = vmul.f32 %v1599_v4, %v1558_v10  ;;  %1040 = vst.msk [vmem:[%s1725_s4 + $0xc] sm:$0xf] %vm1036_vm2, %v1184_v41  ;;  %v1188_v52 = vpack.c.bf16 %v963_v43, %v963_v43  ;;  %v912_v53 = vmul.f32 %v1599_v4, %v1563_v15 }
 0x18b   : > { %1041 = vst.msk [vmem:[%s1725_s4 + $0x10] sm:$0xf] %vm1036_vm2, %v1185_v2  ;;  %1042 = vst.msk [vmem:[%s1725_s4 + $0x14] sm:$0xf] %vm1036_vm2, %v1186_v42  ;;  %v913_v10 = vmul.f32 %v1599_v4, %v1568_v19  ;;  %v914_v55 = vmul.f32 %v1599_v4, %v1573_v24  ;;  %v948_v57 = vmul.f32 0.2, %v932_v44  ;;  %v915_v60 = vmul.f32 %v1599_v4, %v1578_v28 }
 0x18c   : > { %1043 = vst.msk [vmem:[%s1725_s4 + $0x18] sm:$0xf] %vm1036_vm2, %v1187_v6  ;;  %v949_v58 = vmul.f32 0.2, %v933_v45  ;;  %v934_v59 = vadd.f32 %v1604_v5, %v911_v51  ;;  %1044 = vst.msk [vmem:[%s1725_s4 + $0x1c] sm:$0xf] %vm1036_vm2, %v1188_v52  ;;  %v935_v15 = vadd.f32 %v1604_v5, %v912_v53  ;;  %v916_v61 = vmul.f32 %v1599_v4, %v1583_v33 }
 0x18d   : > { %v936_v19 = vadd.f32 %v1604_v5, %v913_v10  ;;  %v937_v24 = vadd.f32 %v1604_v5, %v914_v55  ;;  %v964_v63 = vmax.f32 %v932_v44, %v948_v57  ;;  %v938_v3 = vadd.f32 %v1604_v5, %v915_v60 }
 0x18e   : > { %v965_v0 = vmax.f32 %v933_v45, %v949_v58  ;;  %v950_v1 = vmul.f32 0.2, %v934_v59  ;;  %v951_v28 = vmul.f32 0.2, %v935_v15  ;;  %v939_v9 = vadd.f32 %v1604_v5, %v916_v61 }
 0x18f   : > { %v952_v7 = vmul.f32 0.2, %v936_v19  ;;  %v953_v8 = vmul.f32 0.2, %v937_v24  ;;  %v1189_v11 = vpack.c.bf16 %v964_v63, %v964_v63  ;;  %v954_v14 = vmul.f32 0.2, %v938_v3 }
 0x190   : > { %v1190_v12 = vpack.c.bf16 %v965_v0, %v965_v0  ;;  %v966_v13 = vmax.f32 %v934_v59, %v950_v1  ;;  %v967_v46 = vmax.f32 %v935_v15, %v951_v28  ;;  %v955_v48 = vmul.f32 0.2, %v939_v9 }
 0x191   : > { %v968_v47 = vmax.f32 %v936_v19, %v952_v7  ;;  %v969_v16 = vmax.f32 %v937_v24, %v953_v8  ;;  %1045 = vst.msk [vmem:[%s1725_s4 + $0x20] sm:$0xf] %vm1036_vm2, %v1189_v11  ;;  %v970_v4 = vmax.f32 %v938_v3, %v954_v14 }
 0x192   : > { %1046 = vst.msk [vmem:[%s1725_s4 + $0x24] sm:$0xf] %vm1036_vm2, %v1190_v12  ;;  %v1191_v33 = vpack.c.bf16 %v966_v13, %v966_v13  ;;  %v1192_v5 = vpack.c.bf16 %v967_v46, %v967_v46  ;;  %v971_v50 = vmax.f32 %v939_v9, %v955_v48 }
 0x193   : > { %v1193_v49 = vpack.c.bf16 %v968_v47, %v968_v47  ;;  %v1194_v18 = vpack.c.bf16 %v969_v16, %v969_v16  ;;  %v1195_v54 = vpack.c.bf16 %v970_v4, %v970_v4 }
 0x194   : > { %1047 = vst.msk [vmem:[%s1725_s4 + $0x28] sm:$0xf] %vm1036_vm2, %v1191_v33  ;;  %1048 = vst.msk [vmem:[%s1725_s4 + $0x2c] sm:$0xf] %vm1036_vm2, %v1192_v5  ;;  %v1196_v17 = vpack.c.bf16 %v971_v50, %v971_v50 }
 0x195   : > { %1049 = vst.msk [vmem:[%s1725_s4 + $0x30] sm:$0xf] %vm1036_vm2, %v1193_v49  ;;  %1050 = vst.msk [vmem:[%s1725_s4 + $0x34] sm:$0xf] %vm1036_vm2, %v1194_v18 }
 0x196   : > { %1051 = vst.msk [vmem:[%s1725_s4 + $0x38] sm:$0xf] %vm1036_vm2, %v1195_v54  ;;  %1052 = vst.msk [vmem:[%s1725_s4 + $0x3c] sm:$0xf] %vm1036_vm2, %v1196_v17 }
 0x197 PF: > { %s14_s15 = sadd.s32 1, %s1366_s15  }
 0x198   : > { %p11_p5 = scmp.ge.s32.totalorder %s14_s15, 4  }
 0x19a   :  { %13 = sbr.rel (!%p11_p5) target bundleno = 1 (0x1), region = 70 }

// kernel: discriminator_forward.8
= control target key start
LH: loop header
LB: loop body
LE: loop exit
PB: predicated region body
PF: predicated region fallthrough
CT: control target
= control target key end

     0   :  { %s1104_s15 = smov 0   ;;  %s1301_s0 = inlined_call_operand.vmem [shape: bf16[2,40,128], index: 0, kind: input, shape index: {}]   ;;  %s1302_s1 = inlined_call_operand.vmem [shape: bf16[4,128,64], index: 1, kind: input, shape index: {}]   ;;  %s1303_s2 = inlined_call_operand.vmem [shape: f32[1,64], index: 2, kind: input, shape index: {}]   ;;  %s1304_s3 = inlined_call_operand.vmem [shape: f32[1,64], index: 3, kind: input, shape index: {}]   ;;  %s1305_s4 = inlined_call_operand.vmem [shape: bf16[32,64], index: 4, kind: output, shape index: {}]  }
   0x1 LB: > { %s1110_s16 = sadd.s32 4294967295, %s1075_s15   ;;  %p791_p0 = scmp.ge.s32.totalorder %s1075_s15, 1  ;;  %s1075_s15 = sphi %s1104_s15, %s14_s15  }
   0x2   : > { %p157_p1 = scmp.lt.s32.totalorder %s1075_s15, 3 }
   0x4   : > { %p158_p2 = pnand %p791_p0, %p157_p1 }
   0x5   : > { %v1029_v0 = vld [vmem:[%s1302_s1 + $0x40] sm:$0xff] (!%p158_p2)   ;;  %v1077_v1 = vmov (!%p158_p2), 0.0   ;;  %v1031_v3 = vld [vmem:[%s1302_s1 + $0x48] sm:$0xff] (!%p158_p2)   ;;  %vm1078_vm0 = vmmov (!%p158_p2), 0   ;;  %p178_p3 = scmp.lt.s32.totalorder (!%p158_p2), %s1110_s16, 1  ;;  %v1033_v5 = vld [vmem:[%s1302_s1 + $0x50] sm:$0xff] (!%p158_p2)  }
   0x6   : > { %161 = sbr.rel (%p158_p2) target bundleno = 370 (0x172), region = 36  ;;  %928 = vmatprep.subr.bf16.mxu1 (!%p158_p2), %v1077_v1  ;;  %968 = vmatprep.subr.bf16.mxu0 (!%p158_p2), %v1077_v1  ;;  %v1030_v2 = vld [vmem:[%s1302_s1 + $0x80] sm:$0xff] (!%p158_p2)   ;;  %v1032_v4 = vld [vmem:[%s1302_s1 + $0x88] sm:$0xff] (!%p158_p2)   ;;  %v1034_v6 = vld [vmem:[%s1302_s1 + $0x90] sm:$0xff] (!%p158_p2)   ;;  %vm230_vm1 = vcmask (!%p158_p2), 1045504   ;;  %s879_s13 = sshll.u32 (!%p158_p2), %s1110_s16, 4 }
   0x7   : > { %929 = vmatpush3.bf16.msra.mxu1 (!%p158_p2), %v1029_v0  ;;  %944 = vmatprep.mubr.msk.bf16.mxu1 (!%p158_p2), %vm1078_vm0, %v1077_v1  ;;  %v1035_v7 = vld [vmem:[%s1302_s1 + $0x58] sm:$0xff] (!%p158_p2)   ;;  %v1037_v9 = vld [vmem:[%s1302_s1 + $0x60] sm:$0xff] (!%p158_p2)   ;;  %v1039_v11 = vld [vmem:[%s1302_s1 + $0x68] sm:$0xff] (!%p158_p2)   ;;  %vm657_vm2 = vcmask (!%p158_p2), 523264   ;;  %s656_s14 = scalar_lea.vmem (!%p158_p2), [#allocation2], %s879_s13  ;;  %p880_p4 = scmp.ne.s32.totalorder (!%p158_p2), %s1110_s16, 1 }
   0x8   : > { %969 = vmatpush3.bf16.msra.mxu0 (!%p158_p2), %v1030_v2  ;;  %930 = vmatprep.subr.bf16.mxu1 (!%p158_p2), %v1077_v1  ;;  %v1036_v8 = vld [vmem:[%s1302_s1 + $0x98] sm:$0xff] (!%p158_p2)   ;;  %v1038_v10 = vld [vmem:[%s1302_s1 + $0xa0] sm:$0xff] (!%p158_p2)   ;;  %v1040_v12 = vld [vmem:[%s1302_s1 + $0xa8] sm:$0xff] (!%p158_p2)  }
   0x9   : > { %970 = vmatprep.subr.bf16.mxu0 (!%p158_p2), %v1077_v1  ;;  %984 = vmatprep.mubr.msk.bf16.mxu0 (!%p158_p2), %vm1078_vm0, %v1077_v1  ;;  %v1041_v15 = vld [vmem:[%s1302_s1 + $0x70] sm:$0xff] (!%p158_p2)   ;;  %v1043_v21 = vld [vmem:[%s1302_s1 + $0x78] sm:$0xff] (!%p158_p2)   ;;  %v1047_v28 = vld [vmem:[%s1302_s1] sm:$0xff] (!%p158_p2)  }
   0xa   : > { %v1042_v17 = vld [vmem:[%s1302_s1 + $0xb0] sm:$0xff] (!%p158_p2)   ;;  %v1044_v22 = vld [vmem:[%s1302_s1 + $0xb8] sm:$0xff] (!%p158_p2)   ;;  %v1050_v30 = vld [vmem:[%s1302_s1 + $0xc0] sm:$0xff] (!%p158_p2)  }
   0xb   : > { %931 = vmatpush3.bf16.msra.mxu1 (!%p158_p2), %v1031_v3  ;;  %v1051_v31 = vld [vmem:[%s1302_s1 + $0x8] sm:$0xff] (!%p158_p2)   ;;  %v1053_v33 = vld [vmem:[%s1302_s1 + $0x10] sm:$0xff] (!%p158_p2)   ;;  %v1055_v35 = vld [vmem:[%s1302_s1 + $0x18] sm:$0xff] (!%p158_p2)  }
   0xc   : > { %971 = vmatpush3.bf16.msra.mxu0 (!%p158_p2), %v1032_v4  ;;  %932 = vmatprep.subr.bf16.mxu1 (!%p158_p2), %v1077_v1  ;;  %v1052_v32 = vld [vmem:[%s1302_s1 + $0xc8] sm:$0xff] (!%p158_p2)   ;;  %v1054_v34 = vld [vmem:[%s1302_s1 + $0xd0] sm:$0xff] (!%p158_p2)   ;;  %v1056_v36 = vld [vmem:[%s1302_s1 + $0xd8] sm:$0xff] (!%p158_p2)  }
   0xd   : > { %s179_s29 = scalar_select %p178_p3, %s1110_s16, 1  ;;  %972 = vmatprep.subr.bf16.mxu0 %v1077_v1  ;;  %v1057_v37 = vld [vmem:[%s1302_s1 + $0x20] sm:$0xff]   ;;  %v1059_v39 = vld [vmem:[%s1302_s1 + $0x28] sm:$0xff]   ;;  %v1061_v41 = vld [vmem:[%s1302_s1 + $0x30] sm:$0xff]  }
   0xe   : > { %v1058_v38 = vld [vmem:[%s1302_s1 + $0xe0] sm:$0xff]   ;;  %v1060_v40 = vld [vmem:[%s1302_s1 + $0xe8] sm:$0xff]   ;;  %v1062_v42 = vld [vmem:[%s1302_s1 + $0xf0] sm:$0xff]   ;;  %vm753_vm3 = vcmask (!%p880_p4), 519168  }
   0xf   : > { %933 = vmatpush3.bf16.msra.mxu1 %v1033_v5  ;;  %s1018_s8 = smul.u32 20, %s179_s29  ;;  %v1063_v43 = vld [vmem:[%s1302_s1 + $0x38] sm:$0xff]  }
  0x10   : > { %973 = vmatpush3.bf16.msra.mxu0 %v1034_v6  ;;  %934 = vmatprep.subr.bf16.mxu1 %v1077_v1  ;;  %v1064_v44 = vld [vmem:[%s1302_s1 + $0xf8] sm:$0xff]  }
  0x11   : > { %974 = vmatprep.subr.bf16.mxu0 %v1077_v1  ;;  %s1162_s17 = scalar_lea.vmem %s1301_s0, %s1018_s8 }
  0x12   : > { %v202_v13 = vld [vmem:[%s1162_s17 + $0x8] sm:$0xc]  ;;  %v1174_v14 = vld [vmem:[%s1162_s17 + $0xc] sm:$0xf]  ;;  %v1048_v20 = vld [vmem:[%s1162_s17] sm:$0xfc]  }
  0x13   : > { %935 = vmatpush3.bf16.msra.mxu1 %v1035_v7  ;;  %v1046_v16 = vld [vmem:[%s1162_s17 + $0x10] ss:$0 sps:$4 sm:$0x33]   ;;  %v1049_v18 = vld [vmem:[%s1162_s17 + $0x8] ss:$0 sps:$4 sm:$0x33]   ;;  %v809_v19 = vcombine.low %v202_v13, %v1174_v14 }
  0x14   : > { %975 = vmatpush3.bf16.msra.mxu0 %v1036_v8  ;;  %936 = vmatprep.subr.bf16.mxu1 %v1077_v1  ;;  %v232_v24 = vrot.slane %v1046_v16, 2  ;;  %v447_v25 = vrot.slane %v1048_v20, 2  ;;  %v448_v26 = vrot.slane %v1049_v18, 2  ;;  %v542_v45 = vld [vmem:[%s1162_s17 + $0x10] sm:$0xf]  ;;  %v1065_v46 = vld [vmem:[%s1162_s17] sm:$0xff]  }
  0x15   : > { %976 = vmatprep.subr.bf16.mxu0 %v1077_v1  ;;  %v231_v23 = vrot.slane %v809_v19, 2  ;;  %v870_v47 = vcombine.low %v1174_v14, %v542_v45 }
  0x16   : > { %v449_v29 = vsel %vm230_vm1, %v447_v25, %v448_v26 }
  0x17   : > { %937 = vmatpush3.bf16.msra.mxu1 %v1037_v9  ;;  %v233_v27 = vsel %vm230_vm1, %v231_v23, %v232_v24 }
  0x18   : > { %977 = vmatpush3.bf16.msra.mxu0 %v1038_v10  ;;  %938 = vmatprep.subr.bf16.mxu1 %v1077_v1 }
  0x19   : > { %978 = vmatprep.subr.bf16.mxu0 %v1077_v1 }
  0x1b   : > { %939 = vmatpush3.bf16.msra.mxu1 %v1039_v11 }
  0x1c   : > { %979 = vmatpush3.bf16.msra.mxu0 %v1040_v12  ;;  %940 = vmatprep.subr.bf16.mxu1 %v1077_v1 }
  0x1d   : > { %980 = vmatprep.subr.bf16.mxu0 %v1077_v1 }
  0x1f   : > { %941 = vmatpush3.bf16.msra.mxu1 %v1041_v15 }
  0x20   : > { %981 = vmatpush3.bf16.msra.mxu0 %v1042_v17  ;;  %942 = vmatprep.subr.bf16.mxu1 %v1077_v1 }
  0x21   : > { %982 = vmatprep.subr.bf16.mxu0 %v1077_v1 }
  0x23   : > { %943 = vmatpush3.bf16.msra.mxu1 %v1043_v21 }
  0x24   : > { %983 = vmatpush3.bf16.msra.mxu0 %v1044_v22  ;;  %948 = vmatprep.subr.bf16.mxu1 %v1077_v1 }
  0x25   : > { %988 = vmatprep.subr.bf16.mxu0 %v1077_v1 }
  0x26   : > { %945 = vmatmul.mubr.bf16.vlgmr.msra.gmra.mrb[0].mxu1 %v233_v27 }
  0x27   : > { %949 = vmatpush3.bf16.msra.mxu1 %v1047_v28  ;;  %985 = vmatmul.mubr.bf16.vlgmr.msra.gmra.mrb[0].mxu0 %v449_v29 }
  0x28   : > { %989 = vmatpush3.bf16.msra.mxu0 %v1050_v30  ;;  %950 = vmatprep.subr.bf16.mxu1 %v1077_v1 }
  0x29   : > { %990 = vmatprep.subr.bf16.mxu0 %v1077_v1  ;;  %964 = vmatprep.mubr.msk.bf16.mxu1 %vm1078_vm0, %v1077_v1 }
  0x2a   : > { %1004 = vmatprep.mubr.msk.bf16.mxu0 %vm1078_vm0, %v1077_v1 }
  0x2b   : > { %951 = vmatpush3.bf16.msra.mxu1 %v1051_v31 }
  0x2c   : > { %991 = vmatpush3.bf16.msra.mxu0 %v1052_v32  ;;  %952 = vmatprep.subr.bf16.mxu1 %v1077_v1 }
  0x2d   : > { %992 = vmatprep.subr.bf16.mxu0 %v1077_v1 }
  0x2f   : > { %953 = vmatpush3.bf16.msra.mxu1 %v1053_v33 }
  0x30   : > { %993 = vmatpush3.bf16.msra.mxu0 %v1054_v34  ;;  %954 = vmatprep.subr.bf16.mxu1 %v1077_v1 }
  0x31   : > { %994 = vmatprep.subr.bf16.mxu0 %v1077_v1 }
  0x33   : > { %955 = vmatpush3.bf16.msra.mxu1 %v1055_v35  ;;  %v709_v35 = vlaneseq (!%p880_p4) }
  0x34   : > { %995 = vmatpush3.bf16.msra.mxu0 %v1056_v36  ;;  %956 = vmatprep.subr.bf16.mxu1 %v1077_v1 }
  0x35   : > { %996 = vmatprep.subr.bf16.mxu0 %v1077_v1  ;;  %v710_v36 = vshrl.u32 (!%p880_p4), %v709_v35, 7 }
  0x37   : > { %957 = vmatpush3.bf16.msra.mxu1 %v1057_v37  ;;  %v704_v37 = vld [vmem:[%s1303_s2] sm:$0x1] (!%p880_p4) }
  0x38   : > { %997 = vmatpush3.bf16.msra.mxu0 %v1058_v38  ;;  %958 = vmatprep.subr.bf16.mxu1 %v1077_v1  ;;  %v711_v38 = vsub.s32 (!%p880_p4), 0, %v710_v36 }
  0x39   : > { %998 = vmatprep.subr.bf16.mxu0 %v1077_v1 }
  0x3b   : > { %959 = vmatpush3.bf16.msra.mxu1 %v1059_v39 }
  0x3c   : > { %999 = vmatpush3.bf16.msra.mxu0 %v1060_v40  ;;  %960 = vmatprep.subr.bf16.mxu1 %v1077_v1 }
  0x3d   : > { %1000 = vmatprep.subr.bf16.mxu0 %v1077_v1 }
  0x3f   : > { %961 = vmatpush3.bf16.msra.mxu1 %v1061_v41 }
  0x40   : > { %1001 = vmatpush3.bf16.msra.mxu0 %v1062_v42  ;;  %962 = vmatprep.subr.bf16.mxu1 %v1077_v1  ;;  %v881_v42 = vld [vmem:[%s1304_s3] ss:$0 sm:$0xff] (!%p880_p4) }
  0x41   : > { %1002 = vmatprep.subr.bf16.mxu0 %v1077_v1 }
  0x43   : > { %963 = vmatpush3.bf16.msra.mxu1 %v1063_v43 }
  0x44   : > { %1003 = vmatpush3.bf16.msra.mxu0 %v1064_v44 }
  0x46   : > { %965 = vmatmul.mubr.bf16.vlgmr.msra.gmra.mrb[0].mxu1 %v1065_v46 }
  0x47   : > { %1005 = vmatmul.mubr.bf16.vlgmr.msra.gmra.mrb[0].mxu0 %v870_v47 }
 0x119   : > { %v412_v48 = vpop.f32.mrb[0].mxu1  ;;  %663 = sbr.rel (%p880_p4) target bundleno = 370 (0x172), region = 40 }
 0x11a   : > { %v646_v49 = vpop.f32.mrb[0].mxu0  ;;  %v966_v50 = vpop.f32.mrb[1].mxu1 }
 0x11b   : > { %v1008_v51 = vadd.f32 %v646_v49, %v412_v48  ;;  %v1006_v52 = vpop.f32.mrb[1].mxu0  ;;  %v415_v53 = vpop.f32.mrb[2].mxu1 }
 0x11c   : > { %v649_v54 = vpop.f32.mrb[2].mxu0  ;;  %v967_v55 = vpop.f32.mrb[3].mxu1 }
 0x11d   : > { %658 = vst.msk [vmem:[%s656_s14] sm:$0xff] %vm657_vm2, %v1008_v51  ;;  %v1009_v56 = vadd.f32 %v649_v54, %v415_v53  ;;  %v1007_v57 = vpop.f32.mrb[3].mxu0 }
 0x11f   : > { %659 = vst.msk [vmem:[%s656_s14 + $0x8] sm:$0xff] %vm657_vm2, %v1009_v56 }
 0x126   : > { %v664_v58 = vld [vmem:[#allocation2] sm:$0xff]  ;;  %v665_v59 = vld [vmem:[#allocation2 + $0x8] sm:$0xff]  ;;  %v666_v60 = vld [vmem:[#allocation2 + $0x10] sm:$0xff] }
 0x127   : > { %v667_v61 = vld [vmem:[#allocation2 + $0x18] sm:$0xff]  ;;  %v668_v62 = vsel %vm657_vm2, %v664_v58, 0.0  ;;  %v669_v63 = vsel %vm657_vm2, %v665_v59, 0.0  ;;  %v671_v0 = vsel %vm657_vm2, %v666_v60, 0.0 }
 0x128   : > { %v670_v1 = vadd.f32 %v669_v63, %v668_v62  ;;  %v673_v2 = vsel %vm657_vm2, %v667_v61, 0.0 }
 0x12a   : > { %v672_v3 = vadd.f32 %v671_v0, %v670_v1 }
 0x12c   : > { %v674_v4 = vadd.f32 %v673_v2, %v672_v3 }
 0x12e   : > { %v675_v5 = vrot.slane %v674_v4, 4 }
 0x130   : > { %v676_v6 = vadd.f32 %v675_v5, %v674_v4 }
 0x132   : > { %v677_v7 = vrot.slane %v676_v6, 2 }
 0x134   : > { %v678_v8 = vadd.f32 %v677_v7, %v676_v6 }
 0x136   : > { %v679_v9 = vrot.slane %v678_v8, 1 }
 0x138   : > { %v680_v10 = vadd.f32 %v679_v9, %v678_v8 }
 0x13a   : > { %v681_v11 = vmul.f32 0.03125, %v680_v10 }
 0x13c   : > { %v682_v12 = vsub.f32 %v664_v58, %v681_v11  ;;  %v683_v13 = vsub.f32 %v665_v59, %v681_v11  ;;  %v684_v14 = vsub.f32 %v666_v60, %v681_v11  ;;  %v685_v15 = vsub.f32 %v667_v61, %v681_v11 }
 0x13e   : > { %v686_v16 = vmul.f32 %v682_v12, %v682_v12  ;;  %v687_v17 = vmul.f32 %v683_v13, %v683_v13  ;;  %v688_v18 = vmul.f32 %v684_v14, %v684_v14  ;;  %v689_v19 = vmul.f32 %v685_v15, %v685_v15 }
 0x140   : > { %v690_v20 = vsel %vm657_vm2, %v686_v16, 0.0  ;;  %v691_v21 = vsel %vm657_vm2, %v687_v17, 0.0  ;;  %v693_v22 = vsel %vm657_vm2, %v688_v18, 0.0  ;;  %v695_v24 = vsel %vm657_vm2, %v689_v19, 0.0 }
 0x141   : > { %v692_v23 = vadd.f32 %v691_v21, %v690_v20 }
 0x143   : > { %v694_v25 = vadd.f32 %v693_v22, %v692_v23 }
 0x145   : > { %v696_v26 = vadd.f32 %v695_v24, %v694_v25 }
 0x147   : > { %v697_v27 = vrot.slane %v696_v26, 4 }
 0x149   : > { %v698_v28 = vadd.f32 %v697_v27, %v696_v26 }
 0x14b   : > { %v699_v29 = vrot.slane %v698_v28, 2 }
 0x14d   : > { %v700_v30 = vadd.f32 %v699_v29, %v698_v28 }
 0x14f   : > { %v701_v31 = vrot.slane %v700_v30, 1 }
 0x151   : > { %v702_v32 = vadd.f32 %v701_v31, %v700_v30 }
 0x153   : > { %v703_v33 = vmul.f32 0.03125, %v702_v32 }
 0x155   : > { %v705_v34 = vadd.f32 1e-05, %v703_v33 }
 0x157   : > { %1067 = vrsqrt.f32 %v705_v34 }
 0x161   : > { %v1068_v39 = vpop.eup %1067 }
 0x162   : > { %v707_v40 = vmul.f32 %v1068_v39, %v704_v37 }
 0x164   : > { %v712_v41 = vrot.slane %v707_v40, %v711_v38 }
 0x166   : > { %v714_v43 = vmul.f32 %v712_v41, %v682_v12  ;;  %v715_v44 = vmul.f32 %v712_v41, %v683_v13  ;;  %v716_v45 = vmul.f32 %v712_v41, %v684_v14  ;;  %v717_v46 = vmul.f32 %v712_v41, %v685_v15 }
 0x168   : > { %v725_v47 = vadd.f32 %v881_v42, %v714_v43  ;;  %v726_v48 = vadd.f32 %v881_v42, %v715_v44  ;;  %v727_v49 = vadd.f32 %v881_v42, %v716_v45  ;;  %v728_v50 = vadd.f32 %v881_v42, %v717_v46 }
 0x16a   : > { %v729_v51 = vmul.f32 0.2, %v725_v47  ;;  %v730_v52 = vmul.f32 0.2, %v726_v48  ;;  %v731_v53 = vmul.f32 0.2, %v727_v49 }
 0x16b   : > { %v732_v54 = vmul.f32 0.2, %v728_v50 }
 0x16c   : > { %v733_v55 = vmax.f32 %v725_v47, %v729_v51  ;;  %v734_v56 = vmax.f32 %v726_v48, %v730_v52  ;;  %v735_v57 = vmax.f32 %v727_v49, %v731_v53 }
 0x16d   : > { %v736_v58 = vmax.f32 %v728_v50, %v732_v54 }
 0x16e   : > { %v888_v59 = vpack.c.bf16 %v733_v55, %v733_v55  ;;  %v889_v60 = vpack.c.bf16 %v734_v56, %v734_v56  ;;  %v890_v61 = vpack.c.bf16 %v735_v57, %v735_v57 }
 0x16f   : > { %v891_v62 = vpack.c.bf16 %v736_v58, %v736_v58 }
 0x170   : > { %754 = vst.msk [vmem:[%s1305_s4] sm:$0xf] %vm753_vm3, %v888_v59  ;;  %755 = vst.msk [vmem:[%s1305_s4 + $0x4] sm:$0xf] %vm753_vm3, %v889_v60 }
 0x171   : > { %756 = vst.msk [vmem:[%s1305_s4 + $0x8] sm:$0xf] %vm753_vm3, %v890_v61  ;;  %757 = vst.msk [vmem:[%s1305_s4 + $0xc] sm:$0xf] %vm753_vm3, %v891_v62 }
 0x172 PF: > { %s14_s15 = sadd.s32 1, %s1075_s15  }
 0x173   : > { %p11_p5 = scmp.ge.s32.totalorder %s14_s15, 4  }
 0x175   :  { %13 = sbr.rel (!%p11_p5) target bundleno = 1 (0x1), region = 70 }

// kernel: discriminator_forward.9
= control target key start
LH: loop header
LB: loop body
LE: loop exit
PB: predicated region body
PF: predicated region fallthrough
CT: control target
= control target key end

     0   :  { %v978_v22 = vmov 1966171168   ;;  %v146_v24 = vlaneseq  ;;  %vm750_vm0 = vcmask 1024   ;;  %s1205_s1 = inlined_call_operand.vmem [shape: bf16[1024,1], index: 1, kind: input, shape index: {}]   ;;  %s1206_s0 = inlined_call_operand.vmem [shape: bf16[2,1024], index: 0, kind: input, shape index: {}]   ;;  %s1207_s2 = inlined_call_operand.vmem [shape: f32[2,1], index: 2, kind: output, shape index: {}]  }
   0x1   :  { %v909_v0 = vld [vmem:[%s1205_s1 + $0x40] sm:$0xff]   ;;  %v913_v4 = vld [vmem:[%s1205_s1 + $0x48] sm:$0xff]   ;;  %v917_v8 = vld [vmem:[%s1205_s1 + $0x50] sm:$0xff]   ;;  %v144_v23 = vunpack.c.l.s4 %v978_v22 }
   0x2   :  { %v910_v1 = vld [vmem:[%s1205_s1 + $0xc0] sm:$0xff]   ;;  %820 = vmatprep.subr.bf16.mxu0 %v909_v0  ;;  %v914_v5 = vld [vmem:[%s1205_s1 + $0xc8] sm:$0xff]   ;;  %v918_v9 = vld [vmem:[%s1205_s1 + $0xd0] sm:$0xff]   ;;  %v147_v30 = vshrl.u32 %v146_v24, 7 }
   0x3   :  { %v911_v2 = vld [vmem:[%s1205_s1] sm:$0xff]   ;;  %842 = vmatprep.subr.bf16.mxu1 %v910_v1  ;;  %v915_v6 = vld [vmem:[%s1205_s1 + $0x8] sm:$0xff]   ;;  %v919_v10 = vld [vmem:[%s1205_s1 + $0x10] sm:$0xff]   ;;  %v145_v29 = vunpack.c.0.s8 %v144_v23 }
   0x4   :  { %v912_v3 = vld [vmem:[%s1205_s1 + $0x80] sm:$0xff]   ;;  %821 = vmatpush3.bf16.msra.mxu0 %v911_v2  ;;  %v916_v7 = vld [vmem:[%s1205_s1 + $0x88] sm:$0xff]   ;;  %v920_v11 = vld [vmem:[%s1205_s1 + $0x90] sm:$0xff]  }
   0x5   :  { %843 = vmatpush3.bf16.msra.mxu1 %v912_v3  ;;  %822 = vmatprep.subr.bf16.mxu0 %v913_v4  ;;  %v921_v12 = vld [vmem:[%s1205_s1 + $0x58] sm:$0xff]   ;;  %v925_v16 = vld [vmem:[%s1205_s1 + $0x60] sm:$0xff]   ;;  %v929_v20 = vld [vmem:[%s1205_s1 + $0x68] sm:$0xff]   ;;  %v1084_v35 = vsub.s32 %v145_v29, %v147_v30 }
   0x6   :  { %844 = vmatprep.subr.bf16.mxu1 %v914_v5  ;;  %v922_v13 = vld [vmem:[%s1205_s1 + $0xd8] sm:$0xff]   ;;  %v926_v17 = vld [vmem:[%s1205_s1 + $0xe0] sm:$0xff]   ;;  %v930_v21 = vld [vmem:[%s1205_s1 + $0xe8] sm:$0xff]  }
   0x7   :  { %v923_v14 = vld [vmem:[%s1205_s1 + $0x18] sm:$0xff]   ;;  %v927_v18 = vld [vmem:[%s1205_s1 + $0x20] sm:$0xff]   ;;  %v931_v25 = vld [vmem:[%s1205_s1 + $0x28] sm:$0xff]  }
   0x8   :  { %823 = vmatpush3.bf16.msra.mxu0 %v915_v6  ;;  %v924_v15 = vld [vmem:[%s1205_s1 + $0x98] sm:$0xff]   ;;  %v928_v19 = vld [vmem:[%s1205_s1 + $0xa0] sm:$0xff]   ;;  %v932_v26 = vld [vmem:[%s1205_s1 + $0xa8] sm:$0xff]  }
   0x9   :  { %845 = vmatpush3.bf16.msra.mxu1 %v916_v7  ;;  %824 = vmatprep.subr.bf16.mxu0 %v917_v8  ;;  %v933_v27 = vld [vmem:[%s1205_s1 + $0x70] sm:$0xff]   ;;  %v937_v33 = vld [vmem:[%s1205_s1 + $0x78] sm:$0xff]   ;;  %v12_v38 = vld [vmem:[%s1206_s0] sm:$0xff] }
   0xa   :  { %846 = vmatprep.subr.bf16.mxu1 %v918_v9  ;;  %v934_v28 = vld [vmem:[%s1205_s1 + $0xf0] sm:$0xff]   ;;  %v938_v34 = vld [vmem:[%s1205_s1 + $0xf8] sm:$0xff]   ;;  %v142_v39 = vcombine.high %v12_v38, %v12_v38  ;;  %v149_v40 = vrot.slane %v12_v38, %v1084_v35  ;;  %v942_v41 = vld [vmem:[%s1205_s1 + $0x140] sm:$0xff]  }
   0xb   :  { %v935_v31 = vld [vmem:[%s1205_s1 + $0x30] sm:$0xff]   ;;  %v939_v36 = vld [vmem:[%s1205_s1 + $0x38] sm:$0xff]   ;;  %v943_v42 = vld [vmem:[%s1205_s1 + $0x1c0] sm:$0xff]  }
   0xc   :  { %825 = vmatpush3.bf16.msra.mxu0 %v919_v10  ;;  %v936_v32 = vld [vmem:[%s1205_s1 + $0xb0] sm:$0xff]   ;;  %v940_v37 = vld [vmem:[%s1205_s1 + $0xb8] sm:$0xff]   ;;  %v157_v43 = vcombine.high %v149_v40, %v149_v40  ;;  %v165_v44 = vrot.slane %v149_v40, %v1084_v35  ;;  %v1104_v45 = vrot.slane %v142_v39, %v1084_v35  ;;  %v944_v47 = vld [vmem:[%s1205_s1 + $0x100] sm:$0xff]  }
   0xd   :  { %847 = vmatpush3.bf16.msra.mxu1 %v920_v11  ;;  %826 = vmatprep.subr.bf16.mxu0 %v921_v12  ;;  %v946_v50 = vld [vmem:[%s1205_s1 + $0x148] sm:$0xff]   ;;  %v945_v52 = vld [vmem:[%s1205_s1 + $0x180] sm:$0xff]   ;;  %v950_v57 = vld [vmem:[%s1205_s1 + $0x150] sm:$0xff]  }
   0xe   :  { %848 = vmatprep.subr.bf16.mxu1 %v922_v13  ;;  %v179_v46 = vrot.slane %v157_v43, %v1084_v35  ;;  %v158_v48 = vcombine.high %v1104_v45, %v1104_v45  ;;  %v187_v49 = vcombine.high %v165_v44, %v165_v44  ;;  %v947_v54 = vld [vmem:[%s1205_s1 + $0x1c8] sm:$0xff]   ;;  %v951_v59 = vld [vmem:[%s1205_s1 + $0x1d0] sm:$0xff]   ;;  %v954_v61 = vld [vmem:[%s1205_s1 + $0x158] sm:$0xff]  }
   0xf   :  { %v948_v55 = vld [vmem:[%s1205_s1 + $0x108] sm:$0xff]   ;;  %v952_v60 = vld [vmem:[%s1205_s1 + $0x110] sm:$0xff]   ;;  %v955_v63 = vld [vmem:[%s1205_s1 + $0x1d8] sm:$0xff]  }
  0x10   :  { %827 = vmatpush3.bf16.msra.mxu0 %v923_v14  ;;  %615 = vmatprep.mubr.bf16.mxu0 %v179_v46  ;;  %v189_v51 = vcombine.high %v179_v46, %v179_v46  ;;  %v186_v53 = vrot.slane %v158_v48, %v1084_v35  ;;  %v949_v58 = vld [vmem:[%s1205_s1 + $0x188] sm:$0xff]   ;;  %v953_v62 = vld [vmem:[%s1205_s1 + $0x190] sm:$0xff]   ;;  %v956_v0 = vld [vmem:[%s1205_s1 + $0x118] sm:$0xff]  }
  0x11   :  { %849 = vmatpush3.bf16.msra.mxu1 %v924_v15  ;;  %828 = vmatprep.subr.bf16.mxu0 %v925_v16  ;;  %v958_v1 = vld [vmem:[%s1205_s1 + $0x160] sm:$0xff]   ;;  %v957_v2 = vld [vmem:[%s1205_s1 + $0x198] sm:$0xff]   ;;  %v962_v5 = vld [vmem:[%s1205_s1 + $0x168] sm:$0xff]  }
  0x12   :  { %850 = vmatprep.subr.bf16.mxu1 %v926_v17  ;;  %655 = vmatprep.mubr.bf16.mxu1 %v189_v51  ;;  %v190_v56 = vcombine.high %v186_v53, %v186_v53  ;;  %v959_v3 = vld [vmem:[%s1205_s1 + $0x1e0] sm:$0xff]   ;;  %v963_v7 = vld [vmem:[%s1205_s1 + $0x1e8] sm:$0xff]   ;;  %v966_v9 = vld [vmem:[%s1205_s1 + $0x170] sm:$0xff]   ;;  %v172_v17 = vrot.slane %v1104_v45, %v1084_v35 }
  0x13   :  { %v960_v4 = vld [vmem:[%s1205_s1 + $0x120] sm:$0xff]   ;;  %v964_v8 = vld [vmem:[%s1205_s1 + $0x128] sm:$0xff]   ;;  %v967_v11 = vld [vmem:[%s1205_s1 + $0x1f0] sm:$0xff]  }
  0x14   :  { %829 = vmatpush3.bf16.msra.mxu0 %v927_v18  ;;  %v961_v6 = vld [vmem:[%s1205_s1 + $0x1a0] sm:$0xff]   ;;  %v965_v10 = vld [vmem:[%s1205_s1 + $0x1a8] sm:$0xff]   ;;  %v968_v12 = vld [vmem:[%s1205_s1 + $0x130] sm:$0xff]  }
  0x15   :  { %851 = vmatpush3.bf16.msra.mxu1 %v928_v19  ;;  %830 = vmatprep.subr.bf16.mxu0 %v929_v20  ;;  %v970_v13 = vld [vmem:[%s1205_s1 + $0x178] sm:$0xff]   ;;  %v969_v14 = vld [vmem:[%s1205_s1 + $0x1b0] sm:$0xff]   ;;  %v188_v19 = vcombine.high %v172_v17, %v172_v17 }
  0x16   :  { %852 = vmatprep.subr.bf16.mxu1 %v930_v21  ;;  %v971_v15 = vld [vmem:[%s1205_s1 + $0x1f8] sm:$0xff]  }
  0x17   :  { %v972_v16 = vld [vmem:[%s1205_s1 + $0x138] sm:$0xff]  }
  0x18   :  { %831 = vmatpush3.bf16.msra.mxu0 %v931_v25  ;;  %v973_v18 = vld [vmem:[%s1205_s1 + $0x1b8] sm:$0xff]  }
  0x19   :  { %853 = vmatpush3.bf16.msra.mxu1 %v932_v26  ;;  %832 = vmatprep.subr.bf16.mxu0 %v933_v27 }
  0x1a   :  { %854 = vmatprep.subr.bf16.mxu1 %v934_v28 }
  0x1c   :  { %833 = vmatpush3.bf16.msra.mxu0 %v935_v31 }
  0x1d   :  { %855 = vmatpush3.bf16.msra.mxu1 %v936_v32  ;;  %834 = vmatprep.subr.bf16.mxu0 %v937_v33 }
  0x1e   :  { %856 = vmatprep.subr.bf16.mxu1 %v938_v34 }
  0x20   :  { %835 = vmatpush3.bf16.msra.mxu0 %v939_v36 }
  0x21   :  { %857 = vmatpush3.bf16.msra.mxu1 %v940_v37  ;;  %864 = vmatprep.subr.bf16.mxu0 %v942_v41 }
  0x22   :  { %886 = vmatprep.subr.bf16.mxu1 %v943_v42 }
  0x23   :  { %616 = vmatmul.mubr.bf16.vlgmr.msra.gmra.mrb[0].mxu0 %v165_v44 }
  0x24   :  { %865 = vmatpush3.bf16.msra.mxu0 %v944_v47  ;;  %656 = vmatmul.mubr.bf16.vlgmr.msra.gmra.mrb[0].mxu1 %v187_v49 }
  0x25   :  { %866 = vmatprep.subr.bf16.mxu0 %v946_v50  ;;  %887 = vmatpush3.bf16.msra.mxu1 %v945_v52 }
  0x26   :  { %695 = vmatprep.mubr.bf16.mxu0 %v186_v53  ;;  %888 = vmatprep.subr.bf16.mxu1 %v947_v54 }
  0x27   :  { %735 = vmatprep.mubr.bf16.mxu1 %v190_v56 }
  0x28   :  { %867 = vmatpush3.bf16.msra.mxu0 %v948_v55 }
  0x29   :  { %868 = vmatprep.subr.bf16.mxu0 %v950_v57  ;;  %889 = vmatpush3.bf16.msra.mxu1 %v949_v58 }
  0x2a   :  { %890 = vmatprep.subr.bf16.mxu1 %v951_v59 }
  0x2c   :  { %869 = vmatpush3.bf16.msra.mxu0 %v952_v60 }
  0x2d   :  { %870 = vmatprep.subr.bf16.mxu0 %v954_v61  ;;  %891 = vmatpush3.bf16.msra.mxu1 %v953_v62 }
  0x2e   :  { %892 = vmatprep.subr.bf16.mxu1 %v955_v63 }
  0x30   :  { %871 = vmatpush3.bf16.msra.mxu0 %v956_v0 }
  0x31   :  { %872 = vmatprep.subr.bf16.mxu0 %v958_v1  ;;  %893 = vmatpush3.bf16.msra.mxu1 %v957_v2 }
  0x32   :  { %894 = vmatprep.subr.bf16.mxu1 %v959_v3 }
  0x34   :  { %873 = vmatpush3.bf16.msra.mxu0 %v960_v4 }
  0x35   :  { %874 = vmatprep.subr.bf16.mxu0 %v962_v5  ;;  %895 = vmatpush3.bf16.msra.mxu1 %v961_v6 }
  0x36   :  { %896 = vmatprep.subr.bf16.mxu1 %v963_v7 }
  0x38   :  { %875 = vmatpush3.bf16.msra.mxu0 %v964_v8 }
  0x39   :  { %876 = vmatprep.subr.bf16.mxu0 %v966_v9  ;;  %897 = vmatpush3.bf16.msra.mxu1 %v965_v10 }
  0x3a   :  { %898 = vmatprep.subr.bf16.mxu1 %v967_v11 }
  0x3c   :  { %877 = vmatpush3.bf16.msra.mxu0 %v968_v12 }
  0x3d   :  { %878 = vmatprep.subr.bf16.mxu0 %v970_v13  ;;  %899 = vmatpush3.bf16.msra.mxu1 %v969_v14 }
  0x3e   :  { %900 = vmatprep.subr.bf16.mxu1 %v971_v15 }
  0x40   :  { %879 = vmatpush3.bf16.msra.mxu0 %v972_v16 }
  0x41   :  { %901 = vmatpush3.bf16.msra.mxu1 %v973_v18 }
  0x43   :  { %696 = vmatmul.mubr.bf16.vlgmr.msra.gmra.mrb[4].mxu0 %v172_v17 }
  0x44   :  { %736 = vmatmul.mubr.bf16.vlgmr.msra.gmra.mrb[4].mxu1 %v188_v19 }
  0xf6   :  { %v836_v20 = vpop.f32.mrb[0].mxu0 }
  0xf7   :  { %v837_v21 = vpop.f32.mrb[1].mxu0  ;;  %v858_v22 = vpop.f32.mrb[0].mxu1 }
  0xf8   :  { %v838_v23 = vadd.f32 %v837_v21, %v836_v20  ;;  %v839_v24 = vpop.f32.mrb[2].mxu0  ;;  %v859_v25 = vpop.f32.mrb[1].mxu1 }
  0xf9   :  { %v840_v26 = vpop.f32.mrb[3].mxu0  ;;  %v860_v27 = vadd.f32 %v859_v25, %v858_v22  ;;  %v861_v28 = vpop.f32.mrb[2].mxu1 }
  0xfa   :  { %v862_v29 = vpop.f32.mrb[3].mxu1 }
  0xfb   :  { %v658_v30 = vadd.f32 %v860_v27, %v838_v23 }
 0x116   :  { %v880_v31 = vpop.f32.mrb[4].mxu0 }
 0x117   :  { %v881_v32 = vpop.f32.mrb[5].mxu0  ;;  %v902_v33 = vpop.f32.mrb[4].mxu1 }
 0x118   :  { %v882_v34 = vadd.f32 %v881_v32, %v880_v31  ;;  %v883_v35 = vpop.f32.mrb[6].mxu0  ;;  %v903_v36 = vpop.f32.mrb[5].mxu1 }
 0x119   :  { %v884_v37 = vpop.f32.mrb[7].mxu0  ;;  %v904_v39 = vadd.f32 %v903_v36, %v902_v33  ;;  %v905_v40 = vpop.f32.mrb[6].mxu1 }
 0x11a   :  { %v698_v38 = vadd.f32 %v882_v34, %v658_v30  ;;  %v906_v41 = vpop.f32.mrb[7].mxu1 }
 0x11c   :  { %v738_v42 = vadd.f32 %v904_v39, %v698_v38 }
 0x11e   :  { %v743_v43 = vsub.f32 0.0, %v738_v42 }
 0x120   :  { %v744_v44 = vmul.f32 1.442695, %v743_v43 }
 0x122   :  { %974 = vpow2.f32 %v744_v44 }
 0x12c   :  { %v975_v45 = vpop.eup %974 }
 0x12d   :  { %v746_v46 = vadd.f32 1.0, %v975_v45 }
 0x12f   :  { %976 = vrcp.f32 %v746_v46 }
 0x139   :  { %v977_v47 = vpop.eup %976 }
 0x13a   :  { %v748_v48 = vmax.f32 %v977_v47, 0.0 }
 0x13c   :  { %v749_v49 = vmin.f32 %v748_v48, 1.0 }
 0x13e   :  { %751 = vst.msk [vmem:[%s1207_s2] sm:$0x3] %vm750_vm0, %v749_v49 }

</bundles_post_ra>
